<compile_context>
chip_gen: v7x
topology: tpu7x:2x2x1
jax: 0.10.0
libtpu: 0.0.40
codegen_flags: <defaults>
</compile_context>

<pallas_src>
import math

import jax
import jax.numpy as jnp
from jax import lax
from jax.experimental import pallas as pl
from jax.experimental.pallas import tpu as pltpu

# ------------------------- model hyper-parameters ---------------------------
BS = 2            # batch size
C = 16            # in_channel
RED = 2           # lanet_channel_reduction_rate
CR = C // RED     # reduced channels inside each LANet
L = 4             # local_attention_num
LCR = L * CR      # packed LANet hidden width
D = 64            # vit_embed_dim
H = 4             # msa_heads_num
DH = D // H       # per-head dim
FF = 128          # dim_feedforward
NUM_LAYERS = 2    # num_layers
HWH = 7           # spatial (seq_num = 7*7 in the module)
HW = HWH * HWH    # 49 tokens from the feature map
S = HW + 1        # +1 cls token
SP = 64           # per-sample sequence padded to 64 rows (full MXU M pass)
PAD = SP - S
BSP = BS * SP     # batch folded into the GEMM M dimension (= 128)
EPS = 1e-5
NEG_INF = -1e30


# --------------------------- layer-norm helper ------------------------------
def _layer_norm(x, gamma, beta, eps=EPS):
    mu = jnp.mean(x, axis=-1, keepdims=True)
    var = jnp.mean((x - mu) * (x - mu), axis=-1, keepdims=True)
    return (x - mu) * lax.rsqrt(var + eps) * gamma + beta


# ------------------------------ fused kernel --------------------------------
def _transfer_neck_kernel(
        tok_ref,                                  # (BS, HW, C) token-major x
        mask_ref,                                 # (BSP, BSP) additive mask
        w1p_ref, b1p_ref, w2p_ref, b2p_ref,       # packed LocalCNN
        cw_ref, cb_ref,                           # 1x1 embed conv C -> D
        clspos_ref, poshw_ref,                    # cls_token+pos[0], pos[1:]
        wqkv_ref, bqkv_ref, wo_ref, bo_ref,       # stacked (NL, ...) MHA
        g1_ref, be1_ref,                          # norm1
        wf1_ref, bf1_ref, wf2_ref, bf2_ref,       # FFN
        g2_ref, be2_ref,                          # norm2
        o_ref,                                    # (BS, D) cls embeddings
        x_sc):                                    # VMEM scratch (BSP, D) f32
    f32 = jnp.float32
    bf16 = jnp.bfloat16

    # ---- stage 1: LocalCNN attention map + attention-weighted embed conv ----
    # Layout per sample block of SP=64 rows: rows 0..48 tokens, row 49 cls,
    # rows 50..63 zero padding (masked out of attention as keys).
    x_sc[...] = jnp.zeros((BSP, D), f32)          # zero pads (and everything)
    w1p = w1p_ref[...]; b1p = b1p_ref[...]
    w2p = w2p_ref[...]; b2p = b2p_ref[...]
    cw = cw_ref[...]; cb = cb_ref[...]
    clspos = clspos_ref[...]                      # (1, D)   cls_token + pos[0]
    poshw = poshw_ref[...]                        # (HW, D)  pos[1:]

    for b in range(BS):                           # static unroll, bs is tiny
        tok = tok_ref[b]                          # (HW, C)
        h1 = jnp.dot(tok, w1p, preferred_element_type=f32) + b1p    # (HW,L*CR)
        a = jnp.dot(h1, w2p, preferred_element_type=f32) + b2p      # (HW, L)
        a = jax.nn.sigmoid(a)
        m = jnp.max(a, axis=-1, keepdims=True)                      # (HW, 1)
        e0 = jnp.dot(tok, cw, preferred_element_type=f32)           # (HW, D)
        emb = m * e0 + cb + poshw                 # conv(m*x) = m*(x@W) + b
        x_sc[pl.ds(b * SP, HW), :] = emb          # aligned 49-row block store
        x_sc[pl.ds(b * SP + HW, 1), :] = clspos   # cls row (row 49)

    # ---- stage 2: post-norm transformer encoder layers ----
    for layer in range(NUM_LAYERS):               # weights stay VMEM-resident
        wqkv_l = wqkv_ref[layer]                  # (D, 3D)  bf16, scale folded
        bqkv_l = bqkv_ref[layer]                  # (1, 3D)  f32, scale folded
        wo_l = wo_ref[layer]                      # (D, D)   bf16

        xb = x_sc[...].astype(bf16)               # (BSP, D) bf16
        qkv = (jnp.dot(xb, wqkv_l, preferred_element_type=f32)
               + bqkv_l).astype(bf16)             # (BSP, 3D) bf16

        attn = None                               # f32 accumulator (BSP, D)
        for h in range(H):                        # per-head, cross-batch
            q = qkv[:, h * DH:(h + 1) * DH]                   # (BSP, DH)
            k = qkv[:, D + h * DH:D + (h + 1) * DH]
            v = qkv[:, 2 * D + h * DH:2 * D + (h + 1) * DH]
            # Q @ K^T without an explicit transpose (contract dim 1 of both).
            s = lax.dot_general(q, k, (((1,), (1,)), ((), ())),
                                preferred_element_type=f32)   # (BSP, BSP)
            s = s + mask_ref[...]                 # block + padded-key mask
            s = s - jnp.max(s, axis=-1, keepdims=True)
            e = jnp.exp(s)
            p = e * pl.reciprocal(jnp.sum(e, axis=-1, keepdims=True),
                                  approx=True)
            oh = jnp.dot(p.astype(bf16), v,
                         preferred_element_type=f32)          # (BSP, DH)
            # Fold head into the output projection via its Wo row-slice
            # (sublane-aligned, DH=16) -> no head-concat / lane-slice stores.
            wo_h = wo_l[h * DH:(h + 1) * DH, :]               # (DH, D) bf16
            ha = jnp.dot(oh.astype(bf16), wo_h,
                         preferred_element_type=f32)          # (BSP, D)
            attn = ha if attn is None else attn + ha

        x1 = _layer_norm(x_sc[...] + attn + bo_ref[layer],
                         g1_ref[layer], be1_ref[layer])
        ff = jnp.dot(x1.astype(bf16), wf1_ref[layer],
                     preferred_element_type=f32) + bf1_ref[layer]
        ff = jnp.maximum(ff, 0.0)                 # ReLU
        y = jnp.dot(ff.astype(bf16), wf2_ref[layer],
                    preferred_element_type=f32) + bf2_ref[layer]
        x_sc[...] = _layer_norm(x1 + y, g2_ref[layer], be2_ref[layer])

    # ---- stage 3: cls-token embedding of every sample (row 49 per block) ----
    for b in range(BS):
        o_ref[pl.ds(b, 1), :] = x_sc[pl.ds(b * SP + HW, 1), :]


# ------------------------------- full forward --------------------------------
@jax.jit
def transfer_neck_forward(x, params):
    """x: (bs, C, 7, 7) NCHW -> (bs, D) cls embedding."""
    bs = x.shape[0]
    assert bs == BS, "kernel is specialized for the packed batch size"
    # NCHW -> token-major (bs, HW, C); one tiny XLA transpose of a 6 KB array.
    tokens = x.reshape(bs, C, HW).transpose(0, 2, 1).astype(jnp.float32)

    # Additive attention mask over the folded (BSP, BSP) score slab:
    # 0 where query & key are in the same sample AND the key is a real row
    # (token or cls), NEG_INF otherwise.  Built once, outside the kernel.
    ridx = jnp.arange(BSP, dtype=jnp.int32)[:, None]
    cidx = jnp.arange(BSP, dtype=jnp.int32)[None, :]
    mask = jnp.where((ridx // SP == cidx // SP) & ((cidx % SP) < S),
                     0.0, NEG_INF).astype(jnp.float32)

    args = (tokens, mask,
            params["lanet_w1p"], params["lanet_b1p"],
            params["lanet_w2p"], params["lanet_b2p"],
            params["conv_w"], params["conv_b"],
            params["cls_pos0"], params["pos_hw"],
            params["wqkv"], params["bqkv"], params["wo"], params["bo"],
            params["g1"], params["be1"],
            params["wf1"], params["bf1"], params["wf2"], params["bf2"],
            params["g2"], params["be2"])
    return pl.pallas_call(
        _transfer_neck_kernel,
        out_shape=jax.ShapeDtypeStruct((bs, D), jnp.float32),
        in_specs=[pl.BlockSpec(memory_space=pltpu.MemorySpace.VMEM)
                  for _ in args],
        out_specs=pl.BlockSpec(memory_space=pltpu.MemorySpace.VMEM),
        scratch_shapes=[pltpu.VMEM((BSP, D), jnp.float32)],
    )(*args)


# ------------------------------ parameter init --------------------------------
def init_params(key):
    keys = iter(jax.random.split(key, 64))
    bf16 = jnp.bfloat16

    def nrm(shape, scale=0.02):
        return scale * jax.random.normal(next(keys), shape, jnp.float32)

    # Per-LANet 1x1 convs (C->CR, CR->1), stored as token-major matmul weights
    # and packed so LocalCNN is just two matmuls (block-diagonal 2nd stage).
    w1 = nrm((L, C, CR))                                  # W1_l as (C, CR)
    b1 = nrm((L, CR))
    w2 = nrm((L, CR))                                     # W2_l as (CR,)
    b2 = nrm((L,))
    w1p = jnp.transpose(w1, (1, 0, 2)).reshape(C, LCR)    # (C, L*CR)
    b1p = b1.reshape(1, LCR)
    w2p = jnp.zeros((LCR, L), jnp.float32)
    for l in range(L):
        w2p = w2p.at[l * CR:(l + 1) * CR, l].set(w2[l])   # block-diagonal
    b2p = b2.reshape(1, L)

    # cls token / positional embedding (PyTorch zero-inits; random here),
    # pre-folded: cls row needs cls+pos[0], token rows need pos[1:].
    cls_token = nrm((1, D))
    pos_embed = nrm((S, D))

    # Encoder layers stacked along a leading layer axis.  wqkv columns are
    # [Wq | Wk | Wv] (in_proj^T); head h lives in cols h*DH:(h+1)*DH.
    # One-time host-side transform: fold the 1/sqrt(DH) attention scale into
    # the Q columns (weights AND bias), and pre-cast matmul weights to bf16.
    scale = 1.0 / math.sqrt(DH)
    wqkv = nrm((NUM_LAYERS, D, 3 * D))
    bqkv = nrm((NUM_LAYERS, 1, 3 * D))
    wqkv = wqkv.at[:, :, :D].multiply(scale)
    bqkv = bqkv.at[:, :, :D].multiply(scale)

    p = {
        "lanet_w1p": w1p, "lanet_b1p": b1p,
        "lanet_w2p": w2p, "lanet_b2p": b2p,
        "conv_w": nrm((C, D)), "conv_b": nrm((1, D)),
        "cls_pos0": cls_token + pos_embed[0:1, :],
        "pos_hw": pos_embed[1:, :],
        "wqkv": wqkv.astype(bf16),
        "bqkv": bqkv,
        "wo": nrm((NUM_LAYERS, D, D)).astype(bf16),
        "bo": nrm((NUM_LAYERS, 1, D)),
        "g1": jnp.ones((NUM_LAYERS, 1, D), jnp.float32),
        "be1": jnp.zeros((NUM_LAYERS, 1, D), jnp.float32),
        "wf1": nrm((NUM_LAYERS, D, FF)).astype(bf16),
        "bf1": nrm((NUM_LAYERS, 1, FF)),
        "wf2": nrm((NUM_LAYERS, FF, D)).astype(bf16),
        "bf2": nrm((NUM_LAYERS, 1, D)),
        "g2": jnp.ones((NUM_LAYERS, 1, D), jnp.float32),
        "be2": jnp.zeros((NUM_LAYERS, 1, D), jnp.float32),
    }
    return p


if __name__ == "__main__":
    x = jax.random.normal(jax.random.PRNGKey(0), (BS, C, HWH, HWH), jnp.float32)
    params = init_params(jax.random.PRNGKey(1))
    out = transfer_neck_forward(x, params)
    out = jax.block_until_ready(out)
    assert out.shape == (BS, D), out.shape
    assert bool(jnp.all(jnp.isfinite(out)))
    print("KERNEL_OK")
</pallas_src>

<mosaic_0001>
module attributes {stable_mosaic.version = 11 : i64} {
  func.func @_transfer_neck_kernel(%arg0: memref<2x49x16xf32, #tpu.memory_space<vmem>>, %arg1: memref<128x128xf32, #tpu.memory_space<vmem>>, %arg2: memref<16x32xf32, #tpu.memory_space<vmem>>, %arg3: memref<1x32xf32, #tpu.memory_space<vmem>>, %arg4: memref<32x4xf32, #tpu.memory_space<vmem>>, %arg5: memref<1x4xf32, #tpu.memory_space<vmem>>, %arg6: memref<16x64xf32, #tpu.memory_space<vmem>>, %arg7: memref<1x64xf32, #tpu.memory_space<vmem>>, %arg8: memref<1x64xf32, #tpu.memory_space<vmem>>, %arg9: memref<49x64xf32, #tpu.memory_space<vmem>>, %arg10: memref<2x64x192xbf16, #tpu.memory_space<vmem>>, %arg11: memref<2x1x192xf32, #tpu.memory_space<vmem>>, %arg12: memref<2x64x64xbf16, #tpu.memory_space<vmem>>, %arg13: memref<2x1x64xf32, #tpu.memory_space<vmem>>, %arg14: memref<2x1x64xf32, #tpu.memory_space<vmem>>, %arg15: memref<2x1x64xf32, #tpu.memory_space<vmem>>, %arg16: memref<2x64x128xbf16, #tpu.memory_space<vmem>>, %arg17: memref<2x1x128xf32, #tpu.memory_space<vmem>>, %arg18: memref<2x128x64xbf16, #tpu.memory_space<vmem>>, %arg19: memref<2x1x64xf32, #tpu.memory_space<vmem>>, %arg20: memref<2x1x64xf32, #tpu.memory_space<vmem>>, %arg21: memref<2x1x64xf32, #tpu.memory_space<vmem>>, %arg22: memref<2x64xf32, #tpu.memory_space<vmem>>, %arg23: memref<128x64xf32, #tpu.memory_space<vmem>>) attributes {dimension_semantics = [], scalar_prefetch = 0 : i64, scratch_operands = 1 : i64, tpu.core_type = #tpu.core_type<tc>} {
    %cst = arith.constant 0.000000e+00 : f32
    %0 = vector.broadcast %cst : f32 to vector<128x64xf32>
    %c0 = arith.constant 0 : index
    %c0_0 = arith.constant 0 : index
    %1 = vector.load %arg23[%c0, %c0_0] : memref<128x64xf32, #tpu.memory_space<vmem>>, vector<128x64xf32>
    tpu.vector_store %arg23[%c0, %c0_0], %0 {strides = array<i32>} : memref<128x64xf32, #tpu.memory_space<vmem>>, vector<128x64xf32>,
    %c0_1 = arith.constant 0 : index
    %c0_2 = arith.constant 0 : index
    %2 = vector.load %arg2[%c0_1, %c0_2] : memref<16x32xf32, #tpu.memory_space<vmem>>, vector<16x32xf32>
    %c0_3 = arith.constant 0 : index
    %c0_4 = arith.constant 0 : index
    %3 = vector.load %arg3[%c0_3, %c0_4] : memref<1x32xf32, #tpu.memory_space<vmem>>, vector<1x32xf32>
    %c0_5 = arith.constant 0 : index
    %c0_6 = arith.constant 0 : index
    %4 = vector.load %arg4[%c0_5, %c0_6] : memref<32x4xf32, #tpu.memory_space<vmem>>, vector<32x4xf32>
    %c0_7 = arith.constant 0 : index
    %c0_8 = arith.constant 0 : index
    %5 = vector.load %arg5[%c0_7, %c0_8] : memref<1x4xf32, #tpu.memory_space<vmem>>, vector<1x4xf32>
    %c0_9 = arith.constant 0 : index
    %c0_10 = arith.constant 0 : index
    %6 = vector.load %arg6[%c0_9, %c0_10] : memref<16x64xf32, #tpu.memory_space<vmem>>, vector<16x64xf32>
    %c0_11 = arith.constant 0 : index
    %c0_12 = arith.constant 0 : index
    %7 = vector.load %arg7[%c0_11, %c0_12] : memref<1x64xf32, #tpu.memory_space<vmem>>, vector<1x64xf32>
    %c0_13 = arith.constant 0 : index
    %c0_14 = arith.constant 0 : index
    %8 = vector.load %arg8[%c0_13, %c0_14] : memref<1x64xf32, #tpu.memory_space<vmem>>, vector<1x64xf32>
    %c0_15 = arith.constant 0 : index
    %c0_16 = arith.constant 0 : index
    %9 = vector.load %arg9[%c0_15, %c0_16] : memref<49x64xf32, #tpu.memory_space<vmem>>, vector<49x64xf32>
    %c0_17 = arith.constant 0 : index
    %c0_18 = arith.constant 0 : index
    %c0_19 = arith.constant 0 : index
    %10 = vector.load %arg0[%c0_17, %c0_18, %c0_19] : memref<2x49x16xf32, #tpu.memory_space<vmem>>, vector<1x49x16xf32>
    %11 = vector.shape_cast %10 : vector<1x49x16xf32> to vector<49x16xf32>
    %cst_20 = arith.constant dense<0.000000e+00> : vector<49x32xf32>
    %12 = tpu.matmul %11, %2, %cst_20 {dimension_numbers = #tpu.dot_dimension_numbers<[1], [0], [0], [1], [0, 0, 1, 1], [], []>} : vector<49x16xf32>, vector<16x32xf32>, vector<49x32xf32> -> vector<49x32xf32>
    %13 = vector.broadcast %3 : vector<1x32xf32> to vector<49x32xf32>
    %14 = arith.addf %12, %13 : vector<49x32xf32>
    %cst_21 = arith.constant dense<0.000000e+00> : vector<49x4xf32>
    %15 = tpu.matmul %14, %4, %cst_21 {dimension_numbers = #tpu.dot_dimension_numbers<[1], [0], [0], [1], [0, 0, 1, 1], [], []>} : vector<49x32xf32>, vector<32x4xf32>, vector<49x4xf32> -> vector<49x4xf32>
    %16 = vector.broadcast %5 : vector<1x4xf32> to vector<49x4xf32>
    %17 = arith.addf %15, %16 : vector<49x4xf32>
    %18 = arith.negf %17 : vector<49x4xf32>
    %19 = math.exp %18 : vector<49x4xf32>
    %cst_22 = arith.constant 1.000000e+00 : f32
    %20 = vector.broadcast %cst_22 : f32 to vector<49x4xf32>
    %21 = arith.addf %20, %19 : vector<49x4xf32>
    %22 = arith.divf %20, %21 : vector<49x4xf32>
    %cst_23 = arith.constant dense<0xFF800000> : vector<49xf32>
    %23 = vector.multi_reduction <maximumf>, %22, %cst_23 [1] : vector<49x4xf32> to vector<49xf32>
    %24 = vector.shape_cast %23 : vector<49xf32> to vector<49x1xf32>
    %cst_24 = arith.constant dense<0.000000e+00> : vector<49x64xf32>
    %25 = tpu.matmul %11, %6, %cst_24 {dimension_numbers = #tpu.dot_dimension_numbers<[1], [0], [0], [1], [0, 0, 1, 1], [], []>} : vector<49x16xf32>, vector<16x64xf32>, vector<49x64xf32> -> vector<49x64xf32>
    %26 = vector.broadcast %24 : vector<49x1xf32> to vector<49x64xf32>
    %27 = arith.mulf %26, %25 : vector<49x64xf32>
    %28 = vector.broadcast %7 : vector<1x64xf32> to vector<49x64xf32>
    %29 = arith.addf %27, %28 : vector<49x64xf32>
    %30 = arith.addf %29, %9 : vector<49x64xf32>
    %c0_25 = arith.constant 0 : index
    %c0_26 = arith.constant 0 : index
    %31 = vector.load %arg23[%c0_25, %c0_26] : memref<128x64xf32, #tpu.memory_space<vmem>>, vector<49x64xf32>
    tpu.vector_store %arg23[%c0_25, %c0_26], %30 {strides = array<i32>} : memref<128x64xf32, #tpu.memory_space<vmem>>, vector<49x64xf32>,
    %c49 = arith.constant 49 : index
    %c0_27 = arith.constant 0 : index
    %32 = vector.load %arg23[%c49, %c0_27] : memref<128x64xf32, #tpu.memory_space<vmem>>, vector<1x64xf32>
    tpu.vector_store %arg23[%c49, %c0_27], %8 {strides = array<i32>} : memref<128x64xf32, #tpu.memory_space<vmem>>, vector<1x64xf32>,
    %c1 = arith.constant 1 : index
    %c0_28 = arith.constant 0 : index
    %c0_29 = arith.constant 0 : index
    %33 = vector.load %arg0[%c1, %c0_28, %c0_29] : memref<2x49x16xf32, #tpu.memory_space<vmem>>, vector<1x49x16xf32>
    %34 = vector.shape_cast %33 : vector<1x49x16xf32> to vector<49x16xf32>
    %cst_30 = arith.constant dense<0.000000e+00> : vector<49x32xf32>
    %35 = tpu.matmul %34, %2, %cst_30 {dimension_numbers = #tpu.dot_dimension_numbers<[1], [0], [0], [1], [0, 0, 1, 1], [], []>} : vector<49x16xf32>, vector<16x32xf32>, vector<49x32xf32> -> vector<49x32xf32>
    %36 = vector.broadcast %3 : vector<1x32xf32> to vector<49x32xf32>
    %37 = arith.addf %35, %36 : vector<49x32xf32>
    %cst_31 = arith.constant dense<0.000000e+00> : vector<49x4xf32>
    %38 = tpu.matmul %37, %4, %cst_31 {dimension_numbers = #tpu.dot_dimension_numbers<[1], [0], [0], [1], [0, 0, 1, 1], [], []>} : vector<49x32xf32>, vector<32x4xf32>, vector<49x4xf32> -> vector<49x4xf32>
    %39 = vector.broadcast %5 : vector<1x4xf32> to vector<49x4xf32>
    %40 = arith.addf %38, %39 : vector<49x4xf32>
    %41 = arith.negf %40 : vector<49x4xf32>
    %42 = math.exp %41 : vector<49x4xf32>
    %cst_32 = arith.constant 1.000000e+00 : f32
    %43 = vector.broadcast %cst_32 : f32 to vector<49x4xf32>
    %44 = arith.addf %43, %42 : vector<49x4xf32>
    %45 = arith.divf %43, %44 : vector<49x4xf32>
    %cst_33 = arith.constant dense<0xFF800000> : vector<49xf32>
    %46 = vector.multi_reduction <maximumf>, %45, %cst_33 [1] : vector<49x4xf32> to vector<49xf32>
    %47 = vector.shape_cast %46 : vector<49xf32> to vector<49x1xf32>
    %cst_34 = arith.constant dense<0.000000e+00> : vector<49x64xf32>
    %48 = tpu.matmul %34, %6, %cst_34 {dimension_numbers = #tpu.dot_dimension_numbers<[1], [0], [0], [1], [0, 0, 1, 1], [], []>} : vector<49x16xf32>, vector<16x64xf32>, vector<49x64xf32> -> vector<49x64xf32>
    %49 = vector.broadcast %47 : vector<49x1xf32> to vector<49x64xf32>
    %50 = arith.mulf %49, %48 : vector<49x64xf32>
    %51 = vector.broadcast %7 : vector<1x64xf32> to vector<49x64xf32>
    %52 = arith.addf %50, %51 : vector<49x64xf32>
    %53 = arith.addf %52, %9 : vector<49x64xf32>
    %c64 = arith.constant 64 : index
    %c0_35 = arith.constant 0 : index
    %54 = vector.load %arg23[%c64, %c0_35] : memref<128x64xf32, #tpu.memory_space<vmem>>, vector<49x64xf32>
    tpu.vector_store %arg23[%c64, %c0_35], %53 {strides = array<i32>} : memref<128x64xf32, #tpu.memory_space<vmem>>, vector<49x64xf32>,
    %c113 = arith.constant 113 : index
    %c0_36 = arith.constant 0 : index
    %55 = vector.load %arg23[%c113, %c0_36] : memref<128x64xf32, #tpu.memory_space<vmem>>, vector<1x64xf32>
    tpu.vector_store %arg23[%c113, %c0_36], %8 {strides = array<i32>} : memref<128x64xf32, #tpu.memory_space<vmem>>, vector<1x64xf32>,
    %c0_37 = arith.constant 0 : index
    %c0_38 = arith.constant 0 : index
    %c0_39 = arith.constant 0 : index
    %56 = vector.load %arg10[%c0_37, %c0_38, %c0_39] : memref<2x64x192xbf16, #tpu.memory_space<vmem>>, vector<1x64x192xbf16>
    %57 = vector.shape_cast %56 : vector<1x64x192xbf16> to vector<64x192xbf16>
    %c0_40 = arith.constant 0 : index
    %c0_41 = arith.constant 0 : index
    %c0_42 = arith.constant 0 : index
    %58 = vector.load %arg11[%c0_40, %c0_41, %c0_42] : memref<2x1x192xf32, #tpu.memory_space<vmem>>, vector<1x1x192xf32>
    %59 = vector.shape_cast %58 : vector<1x1x192xf32> to vector<1x192xf32>
    %c0_43 = arith.constant 0 : index
    %c0_44 = arith.constant 0 : index
    %c0_45 = arith.constant 0 : index
    %60 = vector.load %arg12[%c0_43, %c0_44, %c0_45] : memref<2x64x64xbf16, #tpu.memory_space<vmem>>, vector<1x64x64xbf16>
    %61 = vector.shape_cast %60 : vector<1x64x64xbf16> to vector<64x64xbf16>
    %c0_46 = arith.constant 0 : index
    %c0_47 = arith.constant 0 : index
    %62 = vector.load %arg23[%c0_46, %c0_47] : memref<128x64xf32, #tpu.memory_space<vmem>>, vector<128x64xf32>
    %63 = arith.truncf %62 : vector<128x64xf32> to vector<128x64xbf16>
    %cst_48 = arith.constant dense<0.000000e+00> : vector<128x192xf32>
    %64 = tpu.matmul %63, %57, %cst_48 {dimension_numbers = #tpu.dot_dimension_numbers<[1], [0], [0], [1], [0, 0, 1, 1], [], []>} : vector<128x64xbf16>, vector<64x192xbf16>, vector<128x192xf32> -> vector<128x192xf32>
    %65 = vector.broadcast %59 : vector<1x192xf32> to vector<128x192xf32>
    %66 = arith.addf %64, %65 : vector<128x192xf32>
    %67 = arith.truncf %66 : vector<128x192xf32> to vector<128x192xbf16>
    %68 = vector.extract_strided_slice %67 {offsets = [0, 0], sizes = [128, 16], strides = [1, 1]} : vector<128x192xbf16> to vector<128x16xbf16>
    %69 = vector.extract_strided_slice %67 {offsets = [0, 64], sizes = [128, 16], strides = [1, 1]} : vector<128x192xbf16> to vector<128x16xbf16>
    %70 = vector.extract_strided_slice %67 {offsets = [0, 128], sizes = [128, 16], strides = [1, 1]} : vector<128x192xbf16> to vector<128x16xbf16>
    %cst_49 = arith.constant dense<0.000000e+00> : vector<128x128xf32>
    %71 = tpu.matmul %68, %69, %cst_49 {dimension_numbers = #tpu.dot_dimension_numbers<[1], [1], [0], [0], [0, 0, 1, 0], [], []>} : vector<128x16xbf16>, vector<128x16xbf16>, vector<128x128xf32> -> vector<128x128xf32>
    %c0_50 = arith.constant 0 : index
    %c0_51 = arith.constant 0 : index
    %72 = vector.load %arg1[%c0_50, %c0_51] : memref<128x128xf32, #tpu.memory_space<vmem>>, vector<128x128xf32>
    %73 = arith.addf %71, %72 : vector<128x128xf32>
    %cst_52 = arith.constant dense<0xFF800000> : vector<128xf32>
    %74 = vector.multi_reduction <maximumf>, %73, %cst_52 [1] : vector<128x128xf32> to vector<128xf32>
    %75 = vector.shape_cast %74 : vector<128xf32> to vector<128x1xf32>
    %76 = vector.broadcast %75 : vector<128x1xf32> to vector<128x128xf32>
    %77 = arith.subf %73, %76 : vector<128x128xf32>
    %78 = math.exp %77 : vector<128x128xf32>
    %cst_53 = arith.constant dense<0.000000e+00> : vector<128xf32>
    %79 = vector.multi_reduction <add>, %78, %cst_53 [1] : vector<128x128xf32> to vector<128xf32>
    %80 = vector.shape_cast %79 : vector<128xf32> to vector<128x1xf32>
    %81 = tpu.reciprocal %80 {approx = true} : vector<128x1xf32> -> vector<128x1xf32>
    %82 = vector.broadcast %81 : vector<128x1xf32> to vector<128x128xf32>
    %83 = arith.mulf %78, %82 : vector<128x128xf32>
    %84 = arith.truncf %83 : vector<128x128xf32> to vector<128x128xbf16>
    %cst_54 = arith.constant dense<0.000000e+00> : vector<128x16xf32>
    %85 = tpu.matmul %84, %70, %cst_54 {dimension_numbers = #tpu.dot_dimension_numbers<[1], [0], [0], [1], [0, 0, 1, 1], [], []>} : vector<128x128xbf16>, vector<128x16xbf16>, vector<128x16xf32> -> vector<128x16xf32>
    %86 = vector.extract_strided_slice %61 {offsets = [0, 0], sizes = [16, 64], strides = [1, 1]} : vector<64x64xbf16> to vector<16x64xbf16>
    %87 = arith.truncf %85 : vector<128x16xf32> to vector<128x16xbf16>
    %cst_55 = arith.constant dense<0.000000e+00> : vector<128x64xf32>
    %88 = tpu.matmul %87, %86, %cst_55 {dimension_numbers = #tpu.dot_dimension_numbers<[1], [0], [0], [1], [0, 0, 1, 1], [], []>} : vector<128x16xbf16>, vector<16x64xbf16>, vector<128x64xf32> -> vector<128x64xf32>
    %89 = vector.extract_strided_slice %67 {offsets = [0, 16], sizes = [128, 16], strides = [1, 1]} : vector<128x192xbf16> to vector<128x16xbf16>
    %90 = vector.extract_strided_slice %67 {offsets = [0, 80], sizes = [128, 16], strides = [1, 1]} : vector<128x192xbf16> to vector<128x16xbf16>
    %91 = vector.extract_strided_slice %67 {offsets = [0, 144], sizes = [128, 16], strides = [1, 1]} : vector<128x192xbf16> to vector<128x16xbf16>
    %cst_56 = arith.constant dense<0.000000e+00> : vector<128x128xf32>
    %92 = tpu.matmul %89, %90, %cst_56 {dimension_numbers = #tpu.dot_dimension_numbers<[1], [1], [0], [0], [0, 0, 1, 0], [], []>} : vector<128x16xbf16>, vector<128x16xbf16>, vector<128x128xf32> -> vector<128x128xf32>
    %c0_57 = arith.constant 0 : index
    %c0_58 = arith.constant 0 : index
    %93 = vector.load %arg1[%c0_57, %c0_58] : memref<128x128xf32, #tpu.memory_space<vmem>>, vector<128x128xf32>
    %94 = arith.addf %92, %93 : vector<128x128xf32>
    %cst_59 = arith.constant dense<0xFF800000> : vector<128xf32>
    %95 = vector.multi_reduction <maximumf>, %94, %cst_59 [1] : vector<128x128xf32> to vector<128xf32>
    %96 = vector.shape_cast %95 : vector<128xf32> to vector<128x1xf32>
    %97 = vector.broadcast %96 : vector<128x1xf32> to vector<128x128xf32>
    %98 = arith.subf %94, %97 : vector<128x128xf32>
    %99 = math.exp %98 : vector<128x128xf32>
    %cst_60 = arith.constant dense<0.000000e+00> : vector<128xf32>
    %100 = vector.multi_reduction <add>, %99, %cst_60 [1] : vector<128x128xf32> to vector<128xf32>
    %101 = vector.shape_cast %100 : vector<128xf32> to vector<128x1xf32>
    %102 = tpu.reciprocal %101 {approx = true} : vector<128x1xf32> -> vector<128x1xf32>
    %103 = vector.broadcast %102 : vector<128x1xf32> to vector<128x128xf32>
    %104 = arith.mulf %99, %103 : vector<128x128xf32>
    %105 = arith.truncf %104 : vector<128x128xf32> to vector<128x128xbf16>
    %cst_61 = arith.constant dense<0.000000e+00> : vector<128x16xf32>
    %106 = tpu.matmul %105, %91, %cst_61 {dimension_numbers = #tpu.dot_dimension_numbers<[1], [0], [0], [1], [0, 0, 1, 1], [], []>} : vector<128x128xbf16>, vector<128x16xbf16>, vector<128x16xf32> -> vector<128x16xf32>
    %107 = vector.extract_strided_slice %61 {offsets = [16, 0], sizes = [16, 64], strides = [1, 1]} : vector<64x64xbf16> to vector<16x64xbf16>
    %108 = arith.truncf %106 : vector<128x16xf32> to vector<128x16xbf16>
    %cst_62 = arith.constant dense<0.000000e+00> : vector<128x64xf32>
    %109 = tpu.matmul %108, %107, %cst_62 {dimension_numbers = #tpu.dot_dimension_numbers<[1], [0], [0], [1], [0, 0, 1, 1], [], []>} : vector<128x16xbf16>, vector<16x64xbf16>, vector<128x64xf32> -> vector<128x64xf32>
    %110 = arith.addf %88, %109 : vector<128x64xf32>
    %111 = vector.extract_strided_slice %67 {offsets = [0, 32], sizes = [128, 16], strides = [1, 1]} : vector<128x192xbf16> to vector<128x16xbf16>
    %112 = vector.extract_strided_slice %67 {offsets = [0, 96], sizes = [128, 16], strides = [1, 1]} : vector<128x192xbf16> to vector<128x16xbf16>
    %113 = vector.extract_strided_slice %67 {offsets = [0, 160], sizes = [128, 16], strides = [1, 1]} : vector<128x192xbf16> to vector<128x16xbf16>
    %cst_63 = arith.constant dense<0.000000e+00> : vector<128x128xf32>
    %114 = tpu.matmul %111, %112, %cst_63 {dimension_numbers = #tpu.dot_dimension_numbers<[1], [1], [0], [0], [0, 0, 1, 0], [], []>} : vector<128x16xbf16>, vector<128x16xbf16>, vector<128x128xf32> -> vector<128x128xf32>
    %c0_64 = arith.constant 0 : index
    %c0_65 = arith.constant 0 : index
    %115 = vector.load %arg1[%c0_64, %c0_65] : memref<128x128xf32, #tpu.memory_space<vmem>>, vector<128x128xf32>
    %116 = arith.addf %114, %115 : vector<128x128xf32>
    %cst_66 = arith.constant dense<0xFF800000> : vector<128xf32>
    %117 = vector.multi_reduction <maximumf>, %116, %cst_66 [1] : vector<128x128xf32> to vector<128xf32>
    %118 = vector.shape_cast %117 : vector<128xf32> to vector<128x1xf32>
    %119 = vector.broadcast %118 : vector<128x1xf32> to vector<128x128xf32>
    %120 = arith.subf %116, %119 : vector<128x128xf32>
    %121 = math.exp %120 : vector<128x128xf32>
    %cst_67 = arith.constant dense<0.000000e+00> : vector<128xf32>
    %122 = vector.multi_reduction <add>, %121, %cst_67 [1] : vector<128x128xf32> to vector<128xf32>
    %123 = vector.shape_cast %122 : vector<128xf32> to vector<128x1xf32>
    %124 = tpu.reciprocal %123 {approx = true} : vector<128x1xf32> -> vector<128x1xf32>
    %125 = vector.broadcast %124 : vector<128x1xf32> to vector<128x128xf32>
    %126 = arith.mulf %121, %125 : vector<128x128xf32>
    %127 = arith.truncf %126 : vector<128x128xf32> to vector<128x128xbf16>
    %cst_68 = arith.constant dense<0.000000e+00> : vector<128x16xf32>
    %128 = tpu.matmul %127, %113, %cst_68 {dimension_numbers = #tpu.dot_dimension_numbers<[1], [0], [0], [1], [0, 0, 1, 1], [], []>} : vector<128x128xbf16>, vector<128x16xbf16>, vector<128x16xf32> -> vector<128x16xf32>
    %129 = vector.extract_strided_slice %61 {offsets = [32, 0], sizes = [16, 64], strides = [1, 1]} : vector<64x64xbf16> to vector<16x64xbf16>
    %130 = arith.truncf %128 : vector<128x16xf32> to vector<128x16xbf16>
    %cst_69 = arith.constant dense<0.000000e+00> : vector<128x64xf32>
    %131 = tpu.matmul %130, %129, %cst_69 {dimension_numbers = #tpu.dot_dimension_numbers<[1], [0], [0], [1], [0, 0, 1, 1], [], []>} : vector<128x16xbf16>, vector<16x64xbf16>, vector<128x64xf32> -> vector<128x64xf32>
    %132 = arith.addf %110, %131 : vector<128x64xf32>
    %133 = vector.extract_strided_slice %67 {offsets = [0, 48], sizes = [128, 16], strides = [1, 1]} : vector<128x192xbf16> to vector<128x16xbf16>
    %134 = vector.extract_strided_slice %67 {offsets = [0, 112], sizes = [128, 16], strides = [1, 1]} : vector<128x192xbf16> to vector<128x16xbf16>
    %135 = vector.extract_strided_slice %67 {offsets = [0, 176], sizes = [128, 16], strides = [1, 1]} : vector<128x192xbf16> to vector<128x16xbf16>
    %cst_70 = arith.constant dense<0.000000e+00> : vector<128x128xf32>
    %136 = tpu.matmul %133, %134, %cst_70 {dimension_numbers = #tpu.dot_dimension_numbers<[1], [1], [0], [0], [0, 0, 1, 0], [], []>} : vector<128x16xbf16>, vector<128x16xbf16>, vector<128x128xf32> -> vector<128x128xf32>
    %c0_71 = arith.constant 0 : index
    %c0_72 = arith.constant 0 : index
    %137 = vector.load %arg1[%c0_71, %c0_72] : memref<128x128xf32, #tpu.memory_space<vmem>>, vector<128x128xf32>
    %138 = arith.addf %136, %137 : vector<128x128xf32>
    %cst_73 = arith.constant dense<0xFF800000> : vector<128xf32>
    %139 = vector.multi_reduction <maximumf>, %138, %cst_73 [1] : vector<128x128xf32> to vector<128xf32>
    %140 = vector.shape_cast %139 : vector<128xf32> to vector<128x1xf32>
    %141 = vector.broadcast %140 : vector<128x1xf32> to vector<128x128xf32>
    %142 = arith.subf %138, %141 : vector<128x128xf32>
    %143 = math.exp %142 : vector<128x128xf32>
    %cst_74 = arith.constant dense<0.000000e+00> : vector<128xf32>
    %144 = vector.multi_reduction <add>, %143, %cst_74 [1] : vector<128x128xf32> to vector<128xf32>
    %145 = vector.shape_cast %144 : vector<128xf32> to vector<128x1xf32>
    %146 = tpu.reciprocal %145 {approx = true} : vector<128x1xf32> -> vector<128x1xf32>
    %147 = vector.broadcast %146 : vector<128x1xf32> to vector<128x128xf32>
    %148 = arith.mulf %143, %147 : vector<128x128xf32>
    %149 = arith.truncf %148 : vector<128x128xf32> to vector<128x128xbf16>
    %cst_75 = arith.constant dense<0.000000e+00> : vector<128x16xf32>
    %150 = tpu.matmul %149, %135, %cst_75 {dimension_numbers = #tpu.dot_dimension_numbers<[1], [0], [0], [1], [0, 0, 1, 1], [], []>} : vector<128x128xbf16>, vector<128x16xbf16>, vector<128x16xf32> -> vector<128x16xf32>
    %151 = vector.extract_strided_slice %61 {offsets = [48, 0], sizes = [16, 64], strides = [1, 1]} : vector<64x64xbf16> to vector<16x64xbf16>
    %152 = arith.truncf %150 : vector<128x16xf32> to vector<128x16xbf16>
    %cst_76 = arith.constant dense<0.000000e+00> : vector<128x64xf32>
    %153 = tpu.matmul %152, %151, %cst_76 {dimension_numbers = #tpu.dot_dimension_numbers<[1], [0], [0], [1], [0, 0, 1, 1], [], []>} : vector<128x16xbf16>, vector<16x64xbf16>, vector<128x64xf32> -> vector<128x64xf32>
    %154 = arith.addf %132, %153 : vector<128x64xf32>
    %c0_77 = arith.constant 0 : index
    %c0_78 = arith.constant 0 : index
    %155 = vector.load %arg23[%c0_77, %c0_78] : memref<128x64xf32, #tpu.memory_space<vmem>>, vector<128x64xf32>
    %156 = arith.addf %155, %154 : vector<128x64xf32>
    %c0_79 = arith.constant 0 : index
    %c0_80 = arith.constant 0 : index
    %c0_81 = arith.constant 0 : index
    %157 = vector.load %arg13[%c0_79, %c0_80, %c0_81] : memref<2x1x64xf32, #tpu.memory_space<vmem>>, vector<1x1x64xf32>
    %158 = vector.shape_cast %157 : vector<1x1x64xf32> to vector<1x64xf32>
    %159 = vector.broadcast %158 : vector<1x64xf32> to vector<128x64xf32>
    %160 = arith.addf %156, %159 : vector<128x64xf32>
    %c0_82 = arith.constant 0 : index
    %c0_83 = arith.constant 0 : index
    %c0_84 = arith.constant 0 : index
    %161 = vector.load %arg14[%c0_82, %c0_83, %c0_84] : memref<2x1x64xf32, #tpu.memory_space<vmem>>, vector<1x1x64xf32>
    %162 = vector.shape_cast %161 : vector<1x1x64xf32> to vector<1x64xf32>
    %c0_85 = arith.constant 0 : index
    %c0_86 = arith.constant 0 : index
    %c0_87 = arith.constant 0 : index
    %163 = vector.load %arg15[%c0_85, %c0_86, %c0_87] : memref<2x1x64xf32, #tpu.memory_space<vmem>>, vector<1x1x64xf32>
    %164 = vector.shape_cast %163 : vector<1x1x64xf32> to vector<1x64xf32>
    %cst_88 = arith.constant dense<0.000000e+00> : vector<128xf32>
    %165 = vector.multi_reduction <add>, %160, %cst_88 [1] : vector<128x64xf32> to vector<128xf32>
    %166 = vector.shape_cast %165 : vector<128xf32> to vector<128x1xf32>
    %cst_89 = arith.constant 6.400000e+01 : f32
    %167 = vector.broadcast %cst_89 : f32 to vector<128x1xf32>
    %168 = arith.divf %166, %167 : vector<128x1xf32>
    %169 = vector.broadcast %168 : vector<128x1xf32> to vector<128x64xf32>
    %170 = arith.subf %160, %169 : vector<128x64xf32>
    %171 = vector.broadcast %168 : vector<128x1xf32> to vector<128x64xf32>
    %172 = arith.subf %160, %171 : vector<128x64xf32>
    %173 = arith.mulf %170, %172 : vector<128x64xf32>
    %cst_90 = arith.constant dense<0.000000e+00> : vector<128xf32>
    %174 = vector.multi_reduction <add>, %173, %cst_90 [1] : vector<128x64xf32> to vector<128xf32>
    %175 = vector.shape_cast %174 : vector<128xf32> to vector<128x1xf32>
    %cst_91 = arith.constant 6.400000e+01 : f32
    %176 = vector.broadcast %cst_91 : f32 to vector<128x1xf32>
    %177 = arith.divf %175, %176 : vector<128x1xf32>
    %178 = vector.broadcast %168 : vector<128x1xf32> to vector<128x64xf32>
    %179 = arith.subf %160, %178 : vector<128x64xf32>
    %cst_92 = arith.constant 9.99999974E-6 : f32
    %180 = vector.broadcast %cst_92 : f32 to vector<128x1xf32>
    %181 = arith.addf %177, %180 : vector<128x1xf32>
    %182 = math.rsqrt %181 : vector<128x1xf32>
    %183 = vector.broadcast %182 : vector<128x1xf32> to vector<128x64xf32>
    %184 = arith.mulf %179, %183 : vector<128x64xf32>
    %185 = vector.broadcast %162 : vector<1x64xf32> to vector<128x64xf32>
    %186 = arith.mulf %184, %185 : vector<128x64xf32>
    %187 = vector.broadcast %164 : vector<1x64xf32> to vector<128x64xf32>
    %188 = arith.addf %186, %187 : vector<128x64xf32>
    %189 = arith.truncf %188 : vector<128x64xf32> to vector<128x64xbf16>
    %c0_93 = arith.constant 0 : index
    %c0_94 = arith.constant 0 : index
    %c0_95 = arith.constant 0 : index
    %190 = vector.load %arg16[%c0_93, %c0_94, %c0_95] : memref<2x64x128xbf16, #tpu.memory_space<vmem>>, vector<1x64x128xbf16>
    %191 = vector.shape_cast %190 : vector<1x64x128xbf16> to vector<64x128xbf16>
    %cst_96 = arith.constant dense<0.000000e+00> : vector<128x128xf32>
    %192 = tpu.matmul %189, %191, %cst_96 {dimension_numbers = #tpu.dot_dimension_numbers<[1], [0], [0], [1], [0, 0, 1, 1], [], []>} : vector<128x64xbf16>, vector<64x128xbf16>, vector<128x128xf32> -> vector<128x128xf32>
    %c0_97 = arith.constant 0 : index
    %c0_98 = arith.constant 0 : index
    %c0_99 = arith.constant 0 : index
    %193 = vector.load %arg17[%c0_97, %c0_98, %c0_99] : memref<2x1x128xf32, #tpu.memory_space<vmem>>, vector<1x1x128xf32>
    %194 = vector.shape_cast %193 : vector<1x1x128xf32> to vector<1x128xf32>
    %195 = vector.broadcast %194 : vector<1x128xf32> to vector<128x128xf32>
    %196 = arith.addf %192, %195 : vector<128x128xf32>
    %cst_100 = arith.constant 0.000000e+00 : f32
    %197 = vector.broadcast %cst_100 : f32 to vector<128x128xf32>
    %198 = arith.maximumf %196, %197 : vector<128x128xf32>
    %199 = arith.truncf %198 : vector<128x128xf32> to vector<128x128xbf16>
    %c0_101 = arith.constant 0 : index
    %c0_102 = arith.constant 0 : index
    %c0_103 = arith.constant 0 : index
    %200 = vector.load %arg18[%c0_101, %c0_102, %c0_103] : memref<2x128x64xbf16, #tpu.memory_space<vmem>>, vector<1x128x64xbf16>
    %201 = vector.shape_cast %200 : vector<1x128x64xbf16> to vector<128x64xbf16>
    %cst_104 = arith.constant dense<0.000000e+00> : vector<128x64xf32>
    %202 = tpu.matmul %199, %201, %cst_104 {dimension_numbers = #tpu.dot_dimension_numbers<[1], [0], [0], [1], [0, 0, 1, 1], [], []>} : vector<128x128xbf16>, vector<128x64xbf16>, vector<128x64xf32> -> vector<128x64xf32>
    %c0_105 = arith.constant 0 : index
    %c0_106 = arith.constant 0 : index
    %c0_107 = arith.constant 0 : index
    %203 = vector.load %arg19[%c0_105, %c0_106, %c0_107] : memref<2x1x64xf32, #tpu.memory_space<vmem>>, vector<1x1x64xf32>
    %204 = vector.shape_cast %203 : vector<1x1x64xf32> to vector<1x64xf32>
    %205 = vector.broadcast %204 : vector<1x64xf32> to vector<128x64xf32>
    %206 = arith.addf %202, %205 : vector<128x64xf32>
    %207 = arith.addf %188, %206 : vector<128x64xf32>
    %c0_108 = arith.constant 0 : index
    %c0_109 = arith.constant 0 : index
    %c0_110 = arith.constant 0 : index
    %208 = vector.load %arg20[%c0_108, %c0_109, %c0_110] : memref<2x1x64xf32, #tpu.memory_space<vmem>>, vector<1x1x64xf32>
    %209 = vector.shape_cast %208 : vector<1x1x64xf32> to vector<1x64xf32>
    %c0_111 = arith.constant 0 : index
    %c0_112 = arith.constant 0 : index
    %c0_113 = arith.constant 0 : index
    %210 = vector.load %arg21[%c0_111, %c0_112, %c0_113] : memref<2x1x64xf32, #tpu.memory_space<vmem>>, vector<1x1x64xf32>
    %211 = vector.shape_cast %210 : vector<1x1x64xf32> to vector<1x64xf32>
    %cst_114 = arith.constant dense<0.000000e+00> : vector<128xf32>
    %212 = vector.multi_reduction <add>, %207, %cst_114 [1] : vector<128x64xf32> to vector<128xf32>
    %213 = vector.shape_cast %212 : vector<128xf32> to vector<128x1xf32>
    %cst_115 = arith.constant 6.400000e+01 : f32
    %214 = vector.broadcast %cst_115 : f32 to vector<128x1xf32>
    %215 = arith.divf %213, %214 : vector<128x1xf32>
    %216 = vector.broadcast %215 : vector<128x1xf32> to vector<128x64xf32>
    %217 = arith.subf %207, %216 : vector<128x64xf32>
    %218 = vector.broadcast %215 : vector<128x1xf32> to vector<128x64xf32>
    %219 = arith.subf %207, %218 : vector<128x64xf32>
    %220 = arith.mulf %217, %219 : vector<128x64xf32>
    %cst_116 = arith.constant dense<0.000000e+00> : vector<128xf32>
    %221 = vector.multi_reduction <add>, %220, %cst_116 [1] : vector<128x64xf32> to vector<128xf32>
    %222 = vector.shape_cast %221 : vector<128xf32> to vector<128x1xf32>
    %cst_117 = arith.constant 6.400000e+01 : f32
    %223 = vector.broadcast %cst_117 : f32 to vector<128x1xf32>
    %224 = arith.divf %222, %223 : vector<128x1xf32>
    %225 = vector.broadcast %215 : vector<128x1xf32> to vector<128x64xf32>
    %226 = arith.subf %207, %225 : vector<128x64xf32>
    %cst_118 = arith.constant 9.99999974E-6 : f32
    %227 = vector.broadcast %cst_118 : f32 to vector<128x1xf32>
    %228 = arith.addf %224, %227 : vector<128x1xf32>
    %229 = math.rsqrt %228 : vector<128x1xf32>
    %230 = vector.broadcast %229 : vector<128x1xf32> to vector<128x64xf32>
    %231 = arith.mulf %226, %230 : vector<128x64xf32>
    %232 = vector.broadcast %209 : vector<1x64xf32> to vector<128x64xf32>
    %233 = arith.mulf %231, %232 : vector<128x64xf32>
    %234 = vector.broadcast %211 : vector<1x64xf32> to vector<128x64xf32>
    %235 = arith.addf %233, %234 : vector<128x64xf32>
    %c0_119 = arith.constant 0 : index
    %c0_120 = arith.constant 0 : index
    %236 = vector.load %arg23[%c0_119, %c0_120] : memref<128x64xf32, #tpu.memory_space<vmem>>, vector<128x64xf32>
    tpu.vector_store %arg23[%c0_119, %c0_120], %235 {strides = array<i32>} : memref<128x64xf32, #tpu.memory_space<vmem>>, vector<128x64xf32>,
    %c1_121 = arith.constant 1 : index
    %c0_122 = arith.constant 0 : index
    %c0_123 = arith.constant 0 : index
    %237 = vector.load %arg10[%c1_121, %c0_122, %c0_123] : memref<2x64x192xbf16, #tpu.memory_space<vmem>>, vector<1x64x192xbf16>
    %238 = vector.shape_cast %237 : vector<1x64x192xbf16> to vector<64x192xbf16>
    %c1_124 = arith.constant 1 : index
    %c0_125 = arith.constant 0 : index
    %c0_126 = arith.constant 0 : index
    %239 = vector.load %arg11[%c1_124, %c0_125, %c0_126] : memref<2x1x192xf32, #tpu.memory_space<vmem>>, vector<1x1x192xf32>
    %240 = vector.shape_cast %239 : vector<1x1x192xf32> to vector<1x192xf32>
    %c1_127 = arith.constant 1 : index
    %c0_128 = arith.constant 0 : index
    %c0_129 = arith.constant 0 : index
    %241 = vector.load %arg12[%c1_127, %c0_128, %c0_129] : memref<2x64x64xbf16, #tpu.memory_space<vmem>>, vector<1x64x64xbf16>
    %242 = vector.shape_cast %241 : vector<1x64x64xbf16> to vector<64x64xbf16>
    %c0_130 = arith.constant 0 : index
    %c0_131 = arith.constant 0 : index
    %243 = vector.load %arg23[%c0_130, %c0_131] : memref<128x64xf32, #tpu.memory_space<vmem>>, vector<128x64xf32>
    %244 = arith.truncf %243 : vector<128x64xf32> to vector<128x64xbf16>
    %cst_132 = arith.constant dense<0.000000e+00> : vector<128x192xf32>
    %245 = tpu.matmul %244, %238, %cst_132 {dimension_numbers = #tpu.dot_dimension_numbers<[1], [0], [0], [1], [0, 0, 1, 1], [], []>} : vector<128x64xbf16>, vector<64x192xbf16>, vector<128x192xf32> -> vector<128x192xf32>
    %246 = vector.broadcast %240 : vector<1x192xf32> to vector<128x192xf32>
    %247 = arith.addf %245, %246 : vector<128x192xf32>
    %248 = arith.truncf %247 : vector<128x192xf32> to vector<128x192xbf16>
    %249 = vector.extract_strided_slice %248 {offsets = [0, 0], sizes = [128, 16], strides = [1, 1]} : vector<128x192xbf16> to vector<128x16xbf16>
    %250 = vector.extract_strided_slice %248 {offsets = [0, 64], sizes = [128, 16], strides = [1, 1]} : vector<128x192xbf16> to vector<128x16xbf16>
    %251 = vector.extract_strided_slice %248 {offsets = [0, 128], sizes = [128, 16], strides = [1, 1]} : vector<128x192xbf16> to vector<128x16xbf16>
    %cst_133 = arith.constant dense<0.000000e+00> : vector<128x128xf32>
    %252 = tpu.matmul %249, %250, %cst_133 {dimension_numbers = #tpu.dot_dimension_numbers<[1], [1], [0], [0], [0, 0, 1, 0], [], []>} : vector<128x16xbf16>, vector<128x16xbf16>, vector<128x128xf32> -> vector<128x128xf32>
    %c0_134 = arith.constant 0 : index
    %c0_135 = arith.constant 0 : index
    %253 = vector.load %arg1[%c0_134, %c0_135] : memref<128x128xf32, #tpu.memory_space<vmem>>, vector<128x128xf32>
    %254 = arith.addf %252, %253 : vector<128x128xf32>
    %cst_136 = arith.constant dense<0xFF800000> : vector<128xf32>
    %255 = vector.multi_reduction <maximumf>, %254, %cst_136 [1] : vector<128x128xf32> to vector<128xf32>
    %256 = vector.shape_cast %255 : vector<128xf32> to vector<128x1xf32>
    %257 = vector.broadcast %256 : vector<128x1xf32> to vector<128x128xf32>
    %258 = arith.subf %254, %257 : vector<128x128xf32>
    %259 = math.exp %258 : vector<128x128xf32>
    %cst_137 = arith.constant dense<0.000000e+00> : vector<128xf32>
    %260 = vector.multi_reduction <add>, %259, %cst_137 [1] : vector<128x128xf32> to vector<128xf32>
    %261 = vector.shape_cast %260 : vector<128xf32> to vector<128x1xf32>
    %262 = tpu.reciprocal %261 {approx = true} : vector<128x1xf32> -> vector<128x1xf32>
    %263 = vector.broadcast %262 : vector<128x1xf32> to vector<128x128xf32>
    %264 = arith.mulf %259, %263 : vector<128x128xf32>
    %265 = arith.truncf %264 : vector<128x128xf32> to vector<128x128xbf16>
    %cst_138 = arith.constant dense<0.000000e+00> : vector<128x16xf32>
    %266 = tpu.matmul %265, %251, %cst_138 {dimension_numbers = #tpu.dot_dimension_numbers<[1], [0], [0], [1], [0, 0, 1, 1], [], []>} : vector<128x128xbf16>, vector<128x16xbf16>, vector<128x16xf32> -> vector<128x16xf32>
    %267 = vector.extract_strided_slice %242 {offsets = [0, 0], sizes = [16, 64], strides = [1, 1]} : vector<64x64xbf16> to vector<16x64xbf16>
    %268 = arith.truncf %266 : vector<128x16xf32> to vector<128x16xbf16>
    %cst_139 = arith.constant dense<0.000000e+00> : vector<128x64xf32>
    %269 = tpu.matmul %268, %267, %cst_139 {dimension_numbers = #tpu.dot_dimension_numbers<[1], [0], [0], [1], [0, 0, 1, 1], [], []>} : vector<128x16xbf16>, vector<16x64xbf16>, vector<128x64xf32> -> vector<128x64xf32>
    %270 = vector.extract_strided_slice %248 {offsets = [0, 16], sizes = [128, 16], strides = [1, 1]} : vector<128x192xbf16> to vector<128x16xbf16>
    %271 = vector.extract_strided_slice %248 {offsets = [0, 80], sizes = [128, 16], strides = [1, 1]} : vector<128x192xbf16> to vector<128x16xbf16>
    %272 = vector.extract_strided_slice %248 {offsets = [0, 144], sizes = [128, 16], strides = [1, 1]} : vector<128x192xbf16> to vector<128x16xbf16>
    %cst_140 = arith.constant dense<0.000000e+00> : vector<128x128xf32>
    %273 = tpu.matmul %270, %271, %cst_140 {dimension_numbers = #tpu.dot_dimension_numbers<[1], [1], [0], [0], [0, 0, 1, 0], [], []>} : vector<128x16xbf16>, vector<128x16xbf16>, vector<128x128xf32> -> vector<128x128xf32>
    %c0_141 = arith.constant 0 : index
    %c0_142 = arith.constant 0 : index
    %274 = vector.load %arg1[%c0_141, %c0_142] : memref<128x128xf32, #tpu.memory_space<vmem>>, vector<128x128xf32>
    %275 = arith.addf %273, %274 : vector<128x128xf32>
    %cst_143 = arith.constant dense<0xFF800000> : vector<128xf32>
    %276 = vector.multi_reduction <maximumf>, %275, %cst_143 [1] : vector<128x128xf32> to vector<128xf32>
    %277 = vector.shape_cast %276 : vector<128xf32> to vector<128x1xf32>
    %278 = vector.broadcast %277 : vector<128x1xf32> to vector<128x128xf32>
    %279 = arith.subf %275, %278 : vector<128x128xf32>
    %280 = math.exp %279 : vector<128x128xf32>
    %cst_144 = arith.constant dense<0.000000e+00> : vector<128xf32>
    %281 = vector.multi_reduction <add>, %280, %cst_144 [1] : vector<128x128xf32> to vector<128xf32>
    %282 = vector.shape_cast %281 : vector<128xf32> to vector<128x1xf32>
    %283 = tpu.reciprocal %282 {approx = true} : vector<128x1xf32> -> vector<128x1xf32>
    %284 = vector.broadcast %283 : vector<128x1xf32> to vector<128x128xf32>
    %285 = arith.mulf %280, %284 : vector<128x128xf32>
    %286 = arith.truncf %285 : vector<128x128xf32> to vector<128x128xbf16>
    %cst_145 = arith.constant dense<0.000000e+00> : vector<128x16xf32>
    %287 = tpu.matmul %286, %272, %cst_145 {dimension_numbers = #tpu.dot_dimension_numbers<[1], [0], [0], [1], [0, 0, 1, 1], [], []>} : vector<128x128xbf16>, vector<128x16xbf16>, vector<128x16xf32> -> vector<128x16xf32>
    %288 = vector.extract_strided_slice %242 {offsets = [16, 0], sizes = [16, 64], strides = [1, 1]} : vector<64x64xbf16> to vector<16x64xbf16>
    %289 = arith.truncf %287 : vector<128x16xf32> to vector<128x16xbf16>
    %cst_146 = arith.constant dense<0.000000e+00> : vector<128x64xf32>
    %290 = tpu.matmul %289, %288, %cst_146 {dimension_numbers = #tpu.dot_dimension_numbers<[1], [0], [0], [1], [0, 0, 1, 1], [], []>} : vector<128x16xbf16>, vector<16x64xbf16>, vector<128x64xf32> -> vector<128x64xf32>
    %291 = arith.addf %269, %290 : vector<128x64xf32>
    %292 = vector.extract_strided_slice %248 {offsets = [0, 32], sizes = [128, 16], strides = [1, 1]} : vector<128x192xbf16> to vector<128x16xbf16>
    %293 = vector.extract_strided_slice %248 {offsets = [0, 96], sizes = [128, 16], strides = [1, 1]} : vector<128x192xbf16> to vector<128x16xbf16>
    %294 = vector.extract_strided_slice %248 {offsets = [0, 160], sizes = [128, 16], strides = [1, 1]} : vector<128x192xbf16> to vector<128x16xbf16>
    %cst_147 = arith.constant dense<0.000000e+00> : vector<128x128xf32>
    %295 = tpu.matmul %292, %293, %cst_147 {dimension_numbers = #tpu.dot_dimension_numbers<[1], [1], [0], [0], [0, 0, 1, 0], [], []>} : vector<128x16xbf16>, vector<128x16xbf16>, vector<128x128xf32> -> vector<128x128xf32>
    %c0_148 = arith.constant 0 : index
    %c0_149 = arith.constant 0 : index
    %296 = vector.load %arg1[%c0_148, %c0_149] : memref<128x128xf32, #tpu.memory_space<vmem>>, vector<128x128xf32>
    %297 = arith.addf %295, %296 : vector<128x128xf32>
    %cst_150 = arith.constant dense<0xFF800000> : vector<128xf32>
    %298 = vector.multi_reduction <maximumf>, %297, %cst_150 [1] : vector<128x128xf32> to vector<128xf32>
    %299 = vector.shape_cast %298 : vector<128xf32> to vector<128x1xf32>
    %300 = vector.broadcast %299 : vector<128x1xf32> to vector<128x128xf32>
    %301 = arith.subf %297, %300 : vector<128x128xf32>
    %302 = math.exp %301 : vector<128x128xf32>
    %cst_151 = arith.constant dense<0.000000e+00> : vector<128xf32>
    %303 = vector.multi_reduction <add>, %302, %cst_151 [1] : vector<128x128xf32> to vector<128xf32>
    %304 = vector.shape_cast %303 : vector<128xf32> to vector<128x1xf32>
    %305 = tpu.reciprocal %304 {approx = true} : vector<128x1xf32> -> vector<128x1xf32>
    %306 = vector.broadcast %305 : vector<128x1xf32> to vector<128x128xf32>
    %307 = arith.mulf %302, %306 : vector<128x128xf32>
    %308 = arith.truncf %307 : vector<128x128xf32> to vector<128x128xbf16>
    %cst_152 = arith.constant dense<0.000000e+00> : vector<128x16xf32>
    %309 = tpu.matmul %308, %294, %cst_152 {dimension_numbers = #tpu.dot_dimension_numbers<[1], [0], [0], [1], [0, 0, 1, 1], [], []>} : vector<128x128xbf16>, vector<128x16xbf16>, vector<128x16xf32> -> vector<128x16xf32>
    %310 = vector.extract_strided_slice %242 {offsets = [32, 0], sizes = [16, 64], strides = [1, 1]} : vector<64x64xbf16> to vector<16x64xbf16>
    %311 = arith.truncf %309 : vector<128x16xf32> to vector<128x16xbf16>
    %cst_153 = arith.constant dense<0.000000e+00> : vector<128x64xf32>
    %312 = tpu.matmul %311, %310, %cst_153 {dimension_numbers = #tpu.dot_dimension_numbers<[1], [0], [0], [1], [0, 0, 1, 1], [], []>} : vector<128x16xbf16>, vector<16x64xbf16>, vector<128x64xf32> -> vector<128x64xf32>
    %313 = arith.addf %291, %312 : vector<128x64xf32>
    %314 = vector.extract_strided_slice %248 {offsets = [0, 48], sizes = [128, 16], strides = [1, 1]} : vector<128x192xbf16> to vector<128x16xbf16>
    %315 = vector.extract_strided_slice %248 {offsets = [0, 112], sizes = [128, 16], strides = [1, 1]} : vector<128x192xbf16> to vector<128x16xbf16>
    %316 = vector.extract_strided_slice %248 {offsets = [0, 176], sizes = [128, 16], strides = [1, 1]} : vector<128x192xbf16> to vector<128x16xbf16>
    %cst_154 = arith.constant dense<0.000000e+00> : vector<128x128xf32>
    %317 = tpu.matmul %314, %315, %cst_154 {dimension_numbers = #tpu.dot_dimension_numbers<[1], [1], [0], [0], [0, 0, 1, 0], [], []>} : vector<128x16xbf16>, vector<128x16xbf16>, vector<128x128xf32> -> vector<128x128xf32>
    %c0_155 = arith.constant 0 : index
    %c0_156 = arith.constant 0 : index
    %318 = vector.load %arg1[%c0_155, %c0_156] : memref<128x128xf32, #tpu.memory_space<vmem>>, vector<128x128xf32>
    %319 = arith.addf %317, %318 : vector<128x128xf32>
    %cst_157 = arith.constant dense<0xFF800000> : vector<128xf32>
    %320 = vector.multi_reduction <maximumf>, %319, %cst_157 [1] : vector<128x128xf32> to vector<128xf32>
    %321 = vector.shape_cast %320 : vector<128xf32> to vector<128x1xf32>
    %322 = vector.broadcast %321 : vector<128x1xf32> to vector<128x128xf32>
    %323 = arith.subf %319, %322 : vector<128x128xf32>
    %324 = math.exp %323 : vector<128x128xf32>
    %cst_158 = arith.constant dense<0.000000e+00> : vector<128xf32>
    %325 = vector.multi_reduction <add>, %324, %cst_158 [1] : vector<128x128xf32> to vector<128xf32>
    %326 = vector.shape_cast %325 : vector<128xf32> to vector<128x1xf32>
    %327 = tpu.reciprocal %326 {approx = true} : vector<128x1xf32> -> vector<128x1xf32>
    %328 = vector.broadcast %327 : vector<128x1xf32> to vector<128x128xf32>
    %329 = arith.mulf %324, %328 : vector<128x128xf32>
    %330 = arith.truncf %329 : vector<128x128xf32> to vector<128x128xbf16>
    %cst_159 = arith.constant dense<0.000000e+00> : vector<128x16xf32>
    %331 = tpu.matmul %330, %316, %cst_159 {dimension_numbers = #tpu.dot_dimension_numbers<[1], [0], [0], [1], [0, 0, 1, 1], [], []>} : vector<128x128xbf16>, vector<128x16xbf16>, vector<128x16xf32> -> vector<128x16xf32>
    %332 = vector.extract_strided_slice %242 {offsets = [48, 0], sizes = [16, 64], strides = [1, 1]} : vector<64x64xbf16> to vector<16x64xbf16>
    %333 = arith.truncf %331 : vector<128x16xf32> to vector<128x16xbf16>
    %cst_160 = arith.constant dense<0.000000e+00> : vector<128x64xf32>
    %334 = tpu.matmul %333, %332, %cst_160 {dimension_numbers = #tpu.dot_dimension_numbers<[1], [0], [0], [1], [0, 0, 1, 1], [], []>} : vector<128x16xbf16>, vector<16x64xbf16>, vector<128x64xf32> -> vector<128x64xf32>
    %335 = arith.addf %313, %334 : vector<128x64xf32>
    %c0_161 = arith.constant 0 : index
    %c0_162 = arith.constant 0 : index
    %336 = vector.load %arg23[%c0_161, %c0_162] : memref<128x64xf32, #tpu.memory_space<vmem>>, vector<128x64xf32>
    %337 = arith.addf %336, %335 : vector<128x64xf32>
    %c1_163 = arith.constant 1 : index
    %c0_164 = arith.constant 0 : index
    %c0_165 = arith.constant 0 : index
    %338 = vector.load %arg13[%c1_163, %c0_164, %c0_165] : memref<2x1x64xf32, #tpu.memory_space<vmem>>, vector<1x1x64xf32>
    %339 = vector.shape_cast %338 : vector<1x1x64xf32> to vector<1x64xf32>
    %340 = vector.broadcast %339 : vector<1x64xf32> to vector<128x64xf32>
    %341 = arith.addf %337, %340 : vector<128x64xf32>
    %c1_166 = arith.constant 1 : index
    %c0_167 = arith.constant 0 : index
    %c0_168 = arith.constant 0 : index
    %342 = vector.load %arg14[%c1_166, %c0_167, %c0_168] : memref<2x1x64xf32, #tpu.memory_space<vmem>>, vector<1x1x64xf32>
    %343 = vector.shape_cast %342 : vector<1x1x64xf32> to vector<1x64xf32>
    %c1_169 = arith.constant 1 : index
    %c0_170 = arith.constant 0 : index
    %c0_171 = arith.constant 0 : index
    %344 = vector.load %arg15[%c1_169, %c0_170, %c0_171] : memref<2x1x64xf32, #tpu.memory_space<vmem>>, vector<1x1x64xf32>
    %345 = vector.shape_cast %344 : vector<1x1x64xf32> to vector<1x64xf32>
    %cst_172 = arith.constant dense<0.000000e+00> : vector<128xf32>
    %346 = vector.multi_reduction <add>, %341, %cst_172 [1] : vector<128x64xf32> to vector<128xf32>
    %347 = vector.shape_cast %346 : vector<128xf32> to vector<128x1xf32>
    %cst_173 = arith.constant 6.400000e+01 : f32
    %348 = vector.broadcast %cst_173 : f32 to vector<128x1xf32>
    %349 = arith.divf %347, %348 : vector<128x1xf32>
    %350 = vector.broadcast %349 : vector<128x1xf32> to vector<128x64xf32>
    %351 = arith.subf %341, %350 : vector<128x64xf32>
    %352 = vector.broadcast %349 : vector<128x1xf32> to vector<128x64xf32>
    %353 = arith.subf %341, %352 : vector<128x64xf32>
    %354 = arith.mulf %351, %353 : vector<128x64xf32>
    %cst_174 = arith.constant dense<0.000000e+00> : vector<128xf32>
    %355 = vector.multi_reduction <add>, %354, %cst_174 [1] : vector<128x64xf32> to vector<128xf32>
    %356 = vector.shape_cast %355 : vector<128xf32> to vector<128x1xf32>
    %cst_175 = arith.constant 6.400000e+01 : f32
    %357 = vector.broadcast %cst_175 : f32 to vector<128x1xf32>
    %358 = arith.divf %356, %357 : vector<128x1xf32>
    %359 = vector.broadcast %349 : vector<128x1xf32> to vector<128x64xf32>
    %360 = arith.subf %341, %359 : vector<128x64xf32>
    %cst_176 = arith.constant 9.99999974E-6 : f32
    %361 = vector.broadcast %cst_176 : f32 to vector<128x1xf32>
    %362 = arith.addf %358, %361 : vector<128x1xf32>
    %363 = math.rsqrt %362 : vector<128x1xf32>
    %364 = vector.broadcast %363 : vector<128x1xf32> to vector<128x64xf32>
    %365 = arith.mulf %360, %364 : vector<128x64xf32>
    %366 = vector.broadcast %343 : vector<1x64xf32> to vector<128x64xf32>
    %367 = arith.mulf %365, %366 : vector<128x64xf32>
    %368 = vector.broadcast %345 : vector<1x64xf32> to vector<128x64xf32>
    %369 = arith.addf %367, %368 : vector<128x64xf32>
    %370 = arith.truncf %369 : vector<128x64xf32> to vector<128x64xbf16>
    %c1_177 = arith.constant 1 : index
    %c0_178 = arith.constant 0 : index
    %c0_179 = arith.constant 0 : index
    %371 = vector.load %arg16[%c1_177, %c0_178, %c0_179] : memref<2x64x128xbf16, #tpu.memory_space<vmem>>, vector<1x64x128xbf16>
    %372 = vector.shape_cast %371 : vector<1x64x128xbf16> to vector<64x128xbf16>
    %cst_180 = arith.constant dense<0.000000e+00> : vector<128x128xf32>
    %373 = tpu.matmul %370, %372, %cst_180 {dimension_numbers = #tpu.dot_dimension_numbers<[1], [0], [0], [1], [0, 0, 1, 1], [], []>} : vector<128x64xbf16>, vector<64x128xbf16>, vector<128x128xf32> -> vector<128x128xf32>
    %c1_181 = arith.constant 1 : index
    %c0_182 = arith.constant 0 : index
    %c0_183 = arith.constant 0 : index
    %374 = vector.load %arg17[%c1_181, %c0_182, %c0_183] : memref<2x1x128xf32, #tpu.memory_space<vmem>>, vector<1x1x128xf32>
    %375 = vector.shape_cast %374 : vector<1x1x128xf32> to vector<1x128xf32>
    %376 = vector.broadcast %375 : vector<1x128xf32> to vector<128x128xf32>
    %377 = arith.addf %373, %376 : vector<128x128xf32>
    %cst_184 = arith.constant 0.000000e+00 : f32
    %378 = vector.broadcast %cst_184 : f32 to vector<128x128xf32>
    %379 = arith.maximumf %377, %378 : vector<128x128xf32>
    %380 = arith.truncf %379 : vector<128x128xf32> to vector<128x128xbf16>
    %c1_185 = arith.constant 1 : index
    %c0_186 = arith.constant 0 : index
    %c0_187 = arith.constant 0 : index
    %381 = vector.load %arg18[%c1_185, %c0_186, %c0_187] : memref<2x128x64xbf16, #tpu.memory_space<vmem>>, vector<1x128x64xbf16>
    %382 = vector.shape_cast %381 : vector<1x128x64xbf16> to vector<128x64xbf16>
    %cst_188 = arith.constant dense<0.000000e+00> : vector<128x64xf32>
    %383 = tpu.matmul %380, %382, %cst_188 {dimension_numbers = #tpu.dot_dimension_numbers<[1], [0], [0], [1], [0, 0, 1, 1], [], []>} : vector<128x128xbf16>, vector<128x64xbf16>, vector<128x64xf32> -> vector<128x64xf32>
    %c1_189 = arith.constant 1 : index
    %c0_190 = arith.constant 0 : index
    %c0_191 = arith.constant 0 : index
    %384 = vector.load %arg19[%c1_189, %c0_190, %c0_191] : memref<2x1x64xf32, #tpu.memory_space<vmem>>, vector<1x1x64xf32>
    %385 = vector.shape_cast %384 : vector<1x1x64xf32> to vector<1x64xf32>
    %386 = vector.broadcast %385 : vector<1x64xf32> to vector<128x64xf32>
    %387 = arith.addf %383, %386 : vector<128x64xf32>
    %388 = arith.addf %369, %387 : vector<128x64xf32>
    %c1_192 = arith.constant 1 : index
    %c0_193 = arith.constant 0 : index
    %c0_194 = arith.constant 0 : index
    %389 = vector.load %arg20[%c1_192, %c0_193, %c0_194] : memref<2x1x64xf32, #tpu.memory_space<vmem>>, vector<1x1x64xf32>
    %390 = vector.shape_cast %389 : vector<1x1x64xf32> to vector<1x64xf32>
    %c1_195 = arith.constant 1 : index
    %c0_196 = arith.constant 0 : index
    %c0_197 = arith.constant 0 : index
    %391 = vector.load %arg21[%c1_195, %c0_196, %c0_197] : memref<2x1x64xf32, #tpu.memory_space<vmem>>, vector<1x1x64xf32>
    %392 = vector.shape_cast %391 : vector<1x1x64xf32> to vector<1x64xf32>
    %cst_198 = arith.constant dense<0.000000e+00> : vector<128xf32>
    %393 = vector.multi_reduction <add>, %388, %cst_198 [1] : vector<128x64xf32> to vector<128xf32>
    %394 = vector.shape_cast %393 : vector<128xf32> to vector<128x1xf32>
    %cst_199 = arith.constant 6.400000e+01 : f32
    %395 = vector.broadcast %cst_199 : f32 to vector<128x1xf32>
    %396 = arith.divf %394, %395 : vector<128x1xf32>
    %397 = vector.broadcast %396 : vector<128x1xf32> to vector<128x64xf32>
    %398 = arith.subf %388, %397 : vector<128x64xf32>
    %399 = vector.broadcast %396 : vector<128x1xf32> to vector<128x64xf32>
    %400 = arith.subf %388, %399 : vector<128x64xf32>
    %401 = arith.mulf %398, %400 : vector<128x64xf32>
    %cst_200 = arith.constant dense<0.000000e+00> : vector<128xf32>
    %402 = vector.multi_reduction <add>, %401, %cst_200 [1] : vector<128x64xf32> to vector<128xf32>
    %403 = vector.shape_cast %402 : vector<128xf32> to vector<128x1xf32>
    %cst_201 = arith.constant 6.400000e+01 : f32
    %404 = vector.broadcast %cst_201 : f32 to vector<128x1xf32>
    %405 = arith.divf %403, %404 : vector<128x1xf32>
    %406 = vector.broadcast %396 : vector<128x1xf32> to vector<128x64xf32>
    %407 = arith.subf %388, %406 : vector<128x64xf32>
    %cst_202 = arith.constant 9.99999974E-6 : f32
    %408 = vector.broadcast %cst_202 : f32 to vector<128x1xf32>
    %409 = arith.addf %405, %408 : vector<128x1xf32>
    %410 = math.rsqrt %409 : vector<128x1xf32>
    %411 = vector.broadcast %410 : vector<128x1xf32> to vector<128x64xf32>
    %412 = arith.mulf %407, %411 : vector<128x64xf32>
    %413 = vector.broadcast %390 : vector<1x64xf32> to vector<128x64xf32>
    %414 = arith.mulf %412, %413 : vector<128x64xf32>
    %415 = vector.broadcast %392 : vector<1x64xf32> to vector<128x64xf32>
    %416 = arith.addf %414, %415 : vector<128x64xf32>
    %c0_203 = arith.constant 0 : index
    %c0_204 = arith.constant 0 : index
    %417 = vector.load %arg23[%c0_203, %c0_204] : memref<128x64xf32, #tpu.memory_space<vmem>>, vector<128x64xf32>
    tpu.vector_store %arg23[%c0_203, %c0_204], %416 {strides = array<i32>} : memref<128x64xf32, #tpu.memory_space<vmem>>, vector<128x64xf32>,
    %c49_205 = arith.constant 49 : index
    %c0_206 = arith.constant 0 : index
    %418 = vector.load %arg23[%c49_205, %c0_206] : memref<128x64xf32, #tpu.memory_space<vmem>>, vector<1x64xf32>
    %c0_207 = arith.constant 0 : index
    %c0_208 = arith.constant 0 : index
    %419 = vector.load %arg22[%c0_207, %c0_208] : memref<2x64xf32, #tpu.memory_space<vmem>>, vector<1x64xf32>
    tpu.vector_store %arg22[%c0_207, %c0_208], %418 {strides = array<i32>} : memref<2x64xf32, #tpu.memory_space<vmem>>, vector<1x64xf32>,
    %c113_209 = arith.constant 113 : index
    %c0_210 = arith.constant 0 : index
    %420 = vector.load %arg23[%c113_209, %c0_210] : memref<128x64xf32, #tpu.memory_space<vmem>>, vector<1x64xf32>
    %c1_211 = arith.constant 1 : index
    %c0_212 = arith.constant 0 : index
    %421 = vector.load %arg22[%c1_211, %c0_212] : memref<2x64xf32, #tpu.memory_space<vmem>>, vector<1x64xf32>
    tpu.vector_store %arg22[%c1_211, %c0_212], %420 {strides = array<i32>} : memref<2x64xf32, #tpu.memory_space<vmem>>, vector<1x64xf32>,
    return
  }
}

</mosaic_0001>

<bundles_post_ra>
// kernel: transfer_neck_forward.1
= control target key start
LH: loop header
LB: loop body
LE: loop exit
PB: predicated region body
PF: predicated region fallthrough
CT: control target
= control target key end

     0   :  { %s15297_s0 = inlined_call_operand.vmem [shape: f32[2,49,16], index: 0, kind: input, shape index: {}]   ;;  %s15298_s1 = inlined_call_operand.vmem [shape: f32[128,128], index: 1, kind: input, shape index: {}]   ;;  %s15299_s2 = inlined_call_operand.vmem [shape: f32[16,32], index: 2, kind: input, shape index: {}]   ;;  %s15300_s3 = inlined_call_operand.vmem [shape: f32[1,32], index: 3, kind: input, shape index: {}]   ;;  %s15301_s4 = inlined_call_operand.vmem [shape: f32[32,4], index: 4, kind: input, shape index: {}]   ;;  %s15302_s5 = inlined_call_operand.vmem [shape: f32[1,4], index: 5, kind: input, shape index: {}]   ;;  %s15303_s6 = inlined_call_operand.vmem [shape: f32[16,64], index: 6, kind: input, shape index: {}]   ;;  %s15304_s7 = inlined_call_operand.vmem [shape: f32[1,64], index: 7, kind: input, shape index: {}]   ;;  %s15305_s8 = inlined_call_operand.vmem [shape: f32[1,64], index: 8, kind: input, shape index: {}]   ;;  %s15306_s9 = inlined_call_operand.vmem [shape: f32[49,64], index: 9, kind: input, shape index: {}]   ;;  %s15307_s10 = inlined_call_operand.vmem [shape: bf16[2,64,192], index: 10, kind: input, shape index: {}]   ;;  %s15308_s11 = inlined_call_operand.vmem [shape: f32[2,1,192], index: 11, kind: input, shape index: {}]   ;;  %s15309_s12 = inlined_call_operand.vmem [shape: bf16[2,64,64], index: 12, kind: input, shape index: {}]   ;;  %s15310_s13 = inlined_call_operand.vmem [shape: f32[2,1,64], index: 13, kind: input, shape index: {}]   ;;  %s15311_s14 = inlined_call_operand.vmem [shape: f32[2,1,64], index: 14, kind: input, shape index: {}]   ;;  %s15312_s15 = inlined_call_operand.vmem [shape: f32[2,1,64], index: 15, kind: input, shape index: {}]   ;;  %s15313_s16 = inlined_call_operand.vmem [shape: bf16[2,64,128], index: 16, kind: input, shape index: {}]   ;;  %s15314_s17 = inlined_call_operand.vmem [shape: f32[2,1,128], index: 17, kind: input, shape index: {}]   ;;  %s15315_s18 = inlined_call_operand.vmem [shape: bf16[2,128,64], index: 18, kind: input, shape index: {}]   ;;  %s15316_s19 = inlined_call_operand.vmem [shape: f32[2,1,64], index: 19, kind: input, shape index: {}]   ;;  %s15317_s20 = inlined_call_operand.vmem [shape: f32[2,1,64], index: 20, kind: input, shape index: {}]   ;;  %s15318_s21 = inlined_call_operand.vmem [shape: f32[2,1,64], index: 21, kind: input, shape index: {}]   ;;  %s15319_s22 = inlined_call_operand.hbm [shape: f32[2,64], index: 22, kind: output, shape index: {}]  }
   0x1   :  { %15394 = sst [smem:[#allocation49_spill]] %s15297_s0 }
   0x2   :  { %15395 = sst [smem:[#allocation50_spill]] %s15298_s1 }
   0x3   :  { %15396 = sst [smem:[#allocation51_spill]] %s15299_s2 }
   0x4   :  { %15397 = sst [smem:[#allocation52_spill]] %s15300_s3 }
   0x5   :  { %15398 = sst [smem:[#allocation53_spill]] %s15301_s4 }
   0x6   :  { %15399 = sst [smem:[#allocation54_spill]] %s15302_s5 }
   0x7   :  { %15400 = sst [smem:[#allocation55_spill]] %s15303_s6 }
   0x8   :  { %s15401_s29 = sld [smem:[#allocation51_spill]]  ;;  %v10886_v2 = vmov 0.0|0.0   ;;  %vm10887_vm0 = vmmov 0   ;;  %v10888_v4 = vmov 0.0   ;;  %s15402_s1 = sld [smem:[#allocation49_spill]]  ;;  %vm122_vm1 = vcmask 130048  }
   0x9   :  { %9846 = vmatprep.subr.bf16.mxu0 %v10886_v2  ;;  %8924 = vmatprep.mubr.msk.f32.mxu0 %vm10887_vm0, %v10888_v4  ;;  %s15403_s6 = sld [smem:[#allocation53_spill]] }
   0xa   :  { %9870 = vmatprep.subr.bf16.mxu1 %v10886_v2  ;;  %8956 = vmatprep.mubr.msk.f32.mxu1 %vm10887_vm0, %v10888_v4 }
   0xe   :  { %v90_v0 = vld [vmem:[%s15401_s29] sm:$0xff]  ;;  %v91_v1 = vld [vmem:[%s15401_s29 + $0x8] sm:$0xff]  ;;  %v111_v10 = vld [vmem:[%s15402_s1 + $0x10] sm:$0xff] }
   0xf   :  { %v9847_v3 = vpack.c.bf16 %v91_v1, %v90_v0  ;;  %v109_v5 = vld [vmem:[%s15402_s1] sm:$0xff]  ;;  %v94_v7 = vld [vmem:[%s15403_s6 + $0x8] sm:$0xff]  ;;  %v11052_v11 = vld [vmem:[%s15402_s1 + $0x18] sm:$0xff] }
  0x10   :  { %v93_v6 = vld [vmem:[%s15403_s6] sm:$0xff]  ;;  %v110_v9 = vld [vmem:[%s15402_s1 + $0x8] sm:$0xff]  ;;  %v11078_v14 = vld [vmem:[%s15402_s1 + $0x30] sm:$0x1] }
  0x11   :  { %9848 = vmatpush3.bf16.msra.mxu0 %v9847_v3  ;;  %v9850_v8 = vpack.c.bf16 %v94_v7, %v93_v6  ;;  %v11060_v12 = vld [vmem:[%s15402_s1 + $0x20] sm:$0xff]  ;;  %v11069_v13 = vld [vmem:[%s15402_s1 + $0x28] sm:$0xff] }
  0x12   :  { %9849 = vmatprep.subr.bf16.mxu0 %v10886_v2 }
  0x13   :  { %9872 = vmatpush3.bf16.msra.mxu1 %v9850_v8 }
  0x14   :  { %8925 = vmatmul.mubr.msk.f32.vlgmr.msra.gmra.mrb[0].mxu0 %vm122_vm1, %v109_v5  ;;  %9871 = vmatprep.subr.bf16.mxu1 %v10886_v2 }
  0x15   :  { %8927 = vmatprep.mubr.msk.f32.mxu0 %vm10887_vm0, %v10888_v4  ;;  %9851 = vmatpush3.bf16.msra.mxu0 %v9850_v8 }
  0x16   :  { %9852 = vmatprep.subr.bf16.mxu0 %v10886_v2 }
  0x18   :  { %8928 = vmatmul.mubr.msk.f32.gmra.mrb[2].mxu0 %vm122_vm1, %v110_v9 }
  0x19   :  { %8930 = vmatprep.mubr.msk.f32.mxu0 %vm10887_vm0, %v10888_v4 }
  0x1c   :  { %8931 = vmatmul.mubr.msk.f32.gmra.mrb[4].mxu0 %vm122_vm1, %v111_v10 }
  0x1d   :  { %8933 = vmatprep.mubr.msk.f32.mxu0 %vm10887_vm0, %v10888_v4 }
  0x20   :  { %8934 = vmatmul.mubr.msk.f32.gmra.mrb[6].mxu0 %vm122_vm1, %v11052_v11 }
  0x21   :  { %8936 = vmatprep.mubr.msk.f32.mxu0 %vm10887_vm0, %v10888_v4 }
  0x24   :  { %8937 = vmatmul.mubr.msk.f32.gmra.mrb[8].mxu0 %vm122_vm1, %v11060_v12 }
  0x25   :  { %8939 = vmatprep.mubr.msk.f32.mxu0 %vm10887_vm0, %v10888_v4 }
  0x28   :  { %8940 = vmatmul.mubr.msk.f32.gmra.mrb[10].mxu0 %vm122_vm1, %v11069_v13 }
  0x29   :  { %8942 = vmatprep.mubr.msk.f32.mxu0 %vm10887_vm0, %v10888_v4 }
  0x2c   :  { %8943 = vmatmul.mubr.msk.f32.gmra.mrb[12].mxu0 %vm122_vm1, %v11078_v14 }
  0x2d   :  { %27 = vsyncpa [#allocation4], 0  ;;  %8953 = vmatprep.mubr.msk.f32.mxu0 %vm10887_vm0, %v10888_v4  ;;  %v95_v15 = vld [vmem:[%s15403_s6 + $0x10] sm:$0xff]  ;;  %v96_v16 = vld [vmem:[%s15403_s6 + $0x18] sm:$0xff]  ;;  %s15404_s30 = sld [smem:[#allocation55_spill]]  ;;  %s15405_s24 = sld [smem:[#allocation52_spill]] }
  0x2e   :  { %v9853_v17 = vpack.c.bf16 %v96_v16, %v95_v15  ;;  %vm250_vm2 = vcmask 261120   ;;  %v8173_v43 = vld [vmem:[%s15402_s1 + $0x38] sm:$0xff]  ;;  %v8174_v44 = vld [vmem:[%s15402_s1 + $0x40] sm:$0xff]  ;;  %v8175_v45 = vld [vmem:[%s15402_s1 + $0x48] sm:$0xff]  ;;  %s15406_s25 = sld [smem:[#allocation54_spill]]  ;;  %vm414_vm3 = vcmask 31744  }
  0x2f   :  { %v8176_v46 = vld [vmem:[%s15402_s1 + $0x50] sm:$0xff]  ;;  %v8177_v47 = vld [vmem:[%s15402_s1 + $0x58] sm:$0xff]  ;;  %v8178_v48 = vld [vmem:[%s15402_s1 + $0x60] sm:$0xff]  ;;  %vm73_vm4 = vcmask 523264   ;;  %vm433_vm5 = vcmask 24576   ;;  %vm570_vm6 = vcmask 516096  }
  0x30   :  { %9854 = vmatpush3.bf16.msra.mxu0 %v9853_v17  ;;  %9873 = vmatpush3.bf16.msra.mxu1 %v9853_v17  ;;  %v8179_v49 = vld [vmem:[%s15402_s1 + $0x68] sm:$0x1]  ;;  %74 = vst.msk [vmem:[#allocation2] sm:$0xff] %vm73_vm4, %v10888_v4  ;;  %75 = vst.msk [vmem:[#allocation2 + $0x8] sm:$0xff] %vm73_vm4, %v10888_v4  ;;  %s10890_s3 = smov 64   ;;  %s10891_s28 = smov 48  }
  0x31   :  { %9858 = vmatprep.subr.bf16.mxu1 %v10886_v2  ;;  %9855 = vmatprep.subr.bf16.mxu0 %v10886_v2  ;;  %76 = vst.msk [vmem:[#allocation2 + $0x10] sm:$0xff] %vm73_vm4, %v10888_v4  ;;  %77 = vst.msk [vmem:[#allocation2 + $0x18] sm:$0xff] %vm73_vm4, %v10888_v4  ;;  %s10892_s29 = smov 112   ;;  %s10895_s4 = smov 16  }
  0x32   :  { %78 = vst.msk [vmem:[#allocation2 + $0x20] sm:$0xff] %vm73_vm4, %v10888_v4  ;;  %79 = vst.msk [vmem:[#allocation2 + $0x28] sm:$0xff] %vm73_vm4, %v10888_v4  ;;  %s15423_s23 = sld [smem:[#allocation50_spill]]  ;;  %s10896_s27 = smov 80  }
  0x33   :  { %v98_v18 = vld [vmem:[%s15404_s30] sm:$0xff]  ;;  %v99_v19 = vld [vmem:[%s15404_s30 + $0x8] sm:$0xff]  ;;  %80 = vst.msk [vmem:[#allocation2 + $0x30] sm:$0xff] %vm73_vm4, %v10888_v4  ;;  %81 = vst.msk [vmem:[#allocation2 + $0x38] sm:$0xff] %vm73_vm4, %v10888_v4  ;;  %s10893_s30 = smov 32  }
  0x34   :  { %v11105_v20 = vld [vmem:[%s15405_s24] ss:$0 sm:$0xff]  ;;  %v9856_v22 = vpack.c.bf16 %v99_v19, %v98_v18  ;;  %82 = vst.msk [vmem:[#allocation2 + $0x40] sm:$0xff] %vm73_vm4, %v10888_v4  ;;  %83 = vst.msk [vmem:[#allocation2 + $0x48] sm:$0xff] %vm73_vm4, %v10888_v4 }
  0x35   :  { %v11227_v50 = vld [vmem:[%s15406_s25] ss:$0 sm:$0xff]  ;;  %84 = vst.msk [vmem:[#allocation2 + $0x50] sm:$0xff] %vm73_vm4, %v10888_v4  ;;  %85 = vst.msk [vmem:[#allocation2 + $0x58] sm:$0xff] %vm73_vm4, %v10888_v4 }
  0x36   :  { %86 = vst.msk [vmem:[#allocation2 + $0x60] sm:$0xff] %vm73_vm4, %v10888_v4  ;;  %87 = vst.msk [vmem:[#allocation2 + $0x68] sm:$0xff] %vm73_vm4, %v10888_v4 }
  0x37   :  { %88 = vst.msk [vmem:[#allocation2 + $0x70] sm:$0xff] %vm73_vm4, %v10888_v4  ;;  %89 = vst.msk [vmem:[#allocation2 + $0x78] sm:$0xff] %vm73_vm4, %v10888_v4 }
  0xe7   :  { %v210_v21 = vpop.f32.mrb[0].mxu0 }
  0xe8   :  { %v211_v23 = vadd.f32 %v11105_v20, %v210_v21  ;;  %v8926_v24 = vpop.f32.mrb[1].mxu0 }
  0xea   :  { %8954 = vmatmul.mubr.msk.f32.vlgmr.msra.gmra.mrb[14].mxu0 %vm250_vm2, %v211_v23 }
  0xeb   :  { %v215_v25 = vpop.f32.mrb[2].mxu0  ;;  %9857 = vmatpush3.bf16.msra.mxu0 %v9856_v22  ;;  %8978 = vmatprep.mubr.msk.f32.mxu0 %vm10887_vm0, %v10888_v4 }
  0xec   :  { %v216_v26 = vadd.f32 %v11105_v20, %v215_v25  ;;  %v8929_v27 = vpop.f32.mrb[3].mxu0  ;;  %9861 = vmatprep.subr.bf16.mxu0 %v10886_v2 }
  0xee   :  { %8957 = vmatmul.mubr.msk.f32.vlgmr.msra.gmra.mrb[0].mxu1 %vm250_vm2, %v216_v26  ;;  %8979 = vmatmul.mubr.msk.f32.vlgmr.msra.gmra.mrb[16].mxu0 %vm122_vm1, %v109_v5 }
  0xef   :  { %9860 = vmatpush3.bf16.msra.mxu1 %v9847_v3  ;;  %v220_v28 = vpop.f32.mrb[4].mxu0  ;;  %8959 = vmatprep.mubr.msk.f32.mxu1 %vm10887_vm0, %v10888_v4 }
  0xf0   :  { %v221_v29 = vadd.f32 %v11105_v20, %v220_v28  ;;  %v8932_v30 = vpop.f32.mrb[5].mxu0  ;;  %8981 = vmatprep.mubr.msk.f32.mxu0 %vm10887_vm0, %v10888_v4  ;;  %9863 = vmatpush3.bf16.msra.mxu0 %v9850_v8 }
  0xf1   :  { %9864 = vmatprep.subr.bf16.mxu0 %v10886_v2  ;;  %9867 = vmatprep.subr.bf16.mxu1 %v10886_v2 }
  0xf2   :  { %8960 = vmatmul.mubr.msk.f32.gmra.mrb[2].mxu1 %vm250_vm2, %v221_v29  ;;  %8982 = vmatmul.mubr.msk.f32.gmra.mrb[18].mxu0 %vm122_vm1, %v110_v9 }
  0xf3   :  { %v225_v31 = vpop.f32.mrb[6].mxu0  ;;  %8962 = vmatprep.mubr.msk.f32.mxu1 %vm10887_vm0, %v10888_v4  ;;  %8984 = vmatprep.mubr.msk.f32.mxu0 %vm10887_vm0, %v10888_v4 }
  0xf4   :  { %v226_v32 = vadd.f32 %v11105_v20, %v225_v31  ;;  %v8935_v33 = vpop.f32.mrb[7].mxu0  ;;  %9866 = vmatpush3.bf16.msra.mxu0 %v9853_v17 }
  0xf6   :  { %8963 = vmatmul.mubr.msk.f32.gmra.mrb[4].mxu1 %vm250_vm2, %v226_v32  ;;  %8985 = vmatmul.mubr.msk.f32.gmra.mrb[20].mxu0 %vm122_vm1, %v111_v10 }
  0xf7   :  { %v230_v34 = vpop.f32.mrb[8].mxu0  ;;  %8965 = vmatprep.mubr.msk.f32.mxu1 %vm10887_vm0, %v10888_v4  ;;  %8987 = vmatprep.mubr.msk.f32.mxu0 %vm10887_vm0, %v10888_v4 }
  0xf8   :  { %v231_v35 = vadd.f32 %v11105_v20, %v230_v34  ;;  %v8938_v36 = vpop.f32.mrb[9].mxu0 }
  0xfa   :  { %8966 = vmatmul.mubr.msk.f32.gmra.mrb[6].mxu1 %vm250_vm2, %v231_v35  ;;  %8988 = vmatmul.mubr.msk.f32.gmra.mrb[22].mxu0 %vm122_vm1, %v11052_v11 }
  0xfb   :  { %v235_v37 = vpop.f32.mrb[10].mxu0  ;;  %8968 = vmatprep.mubr.msk.f32.mxu1 %vm10887_vm0, %v10888_v4  ;;  %8990 = vmatprep.mubr.msk.f32.mxu0 %vm10887_vm0, %v10888_v4 }
  0xfc   :  { %v236_v38 = vadd.f32 %v11105_v20, %v235_v37  ;;  %v8941_v39 = vpop.f32.mrb[11].mxu0 }
  0xfe   :  { %8969 = vmatmul.mubr.msk.f32.gmra.mrb[8].mxu1 %vm250_vm2, %v236_v38  ;;  %8991 = vmatmul.mubr.msk.f32.gmra.mrb[24].mxu0 %vm122_vm1, %v11060_v12 }
  0xff   :  { %v240_v40 = vpop.f32.mrb[12].mxu0  ;;  %8971 = vmatprep.mubr.msk.f32.mxu1 %vm10887_vm0, %v10888_v4  ;;  %8993 = vmatprep.mubr.msk.f32.mxu0 %vm10887_vm0, %v10888_v4 }
 0x100   :  { %v241_v41 = vadd.f32 %v11105_v20, %v240_v40  ;;  %v8944_v42 = vpop.f32.mrb[13].mxu0 }
 0x102   :  { %8972 = vmatmul.mubr.msk.f32.gmra.mrb[10].mxu1 %vm250_vm2, %v241_v41  ;;  %8994 = vmatmul.mubr.msk.f32.gmra.mrb[26].mxu0 %vm122_vm1, %v11069_v13 }
 0x103   :  { %9003 = vmatprep.mubr.msk.f32.mxu1 %vm10887_vm0, %v10888_v4  ;;  %8996 = vmatprep.mubr.msk.f32.mxu0 %vm10887_vm0, %v10888_v4 }
 0x106   :  { %9004 = vmatmul.mubr.msk.f32.vlgmr.msra.gmra.mrb[12].mxu1 %vm122_vm1, %v8173_v43  ;;  %8997 = vmatmul.mubr.msk.f32.gmra.mrb[28].mxu0 %vm122_vm1, %v11078_v14 }
 0x107   :  { %9006 = vmatprep.mubr.msk.f32.mxu1 %vm10887_vm0, %v10888_v4  ;;  %9032 = vmatprep.mubr.msk.f32.mxu0 %vm10887_vm0, %v10888_v4 }
 0x108   :  { %9869 = vmatpush3.bf16.msra.mxu1 %v9856_v22 }
 0x10a   :  { %9007 = vmatmul.mubr.msk.f32.gmra.mrb[14].mxu1 %vm122_vm1, %v8174_v44 }
 0x10b   :  { %9009 = vmatprep.mubr.msk.f32.mxu1 %vm10887_vm0, %v10888_v4 }
 0x10e   :  { %9010 = vmatmul.mubr.msk.f32.gmra.mrb[16].mxu1 %vm122_vm1, %v8175_v45 }
 0x10f   :  { %9012 = vmatprep.mubr.msk.f32.mxu1 %vm10887_vm0, %v10888_v4 }
 0x112   :  { %9013 = vmatmul.mubr.msk.f32.gmra.mrb[18].mxu1 %vm122_vm1, %v8176_v46 }
 0x113   :  { %9015 = vmatprep.mubr.msk.f32.mxu1 %vm10887_vm0, %v10888_v4 }
 0x116   :  { %9016 = vmatmul.mubr.msk.f32.gmra.mrb[20].mxu1 %vm122_vm1, %v8177_v47 }
 0x117   :  { %9018 = vmatprep.mubr.msk.f32.mxu1 %vm10887_vm0, %v10888_v4 }
 0x11a   :  { %9019 = vmatmul.mubr.msk.f32.gmra.mrb[22].mxu1 %vm122_vm1, %v8178_v48 }
 0x11b   :  { %9021 = vmatprep.mubr.msk.f32.mxu1 %vm10887_vm0, %v10888_v4 }
 0x11e   :  { %9022 = vmatmul.mubr.msk.f32.gmra.mrb[24].mxu1 %vm122_vm1, %v8179_v49 }
 0x11f   :  { %9057 = vmatprep.mubr.msk.f32.mxu1 %vm10887_vm0, %v10888_v4 }
 0x122   :  { %9058 = vmatmul.mubr.msk.f32.vlgmr.msra.gmra.mrb[26].mxu1 %vm122_vm1, %v8173_v43 }
 0x123   :  { %9060 = vmatprep.mubr.msk.f32.mxu1 %vm10887_vm0, %v10888_v4 }
 0x126   :  { %9061 = vmatmul.mubr.msk.f32.gmra.mrb[28].mxu1 %vm122_vm1, %v8174_v44 }
 0x127   :  { %9063 = vmatprep.mubr.msk.f32.mxu1 %vm10887_vm0, %v10888_v4 }
 0x12a   :  { %9064 = vmatmul.mubr.msk.f32.gmra.mrb[30].mxu1 %vm122_vm1, %v8175_v45 }
 0x12b   :  { %9066 = vmatprep.mubr.msk.f32.mxu1 %vm10887_vm0, %v10888_v4 }
 0x12e   :  { %9067 = vmatmul.mubr.msk.f32.gmra.mrb[32].mxu1 %vm122_vm1, %v8176_v46 }
 0x12f   :  { %9069 = vmatprep.mubr.msk.f32.mxu1 %vm10887_vm0, %v10888_v4 }
 0x132   :  { %9070 = vmatmul.mubr.msk.f32.gmra.mrb[34].mxu1 %vm122_vm1, %v8177_v47 }
 0x133   :  { %9072 = vmatprep.mubr.msk.f32.mxu1 %vm10887_vm0, %v10888_v4 }
 0x136   :  { %9073 = vmatmul.mubr.msk.f32.gmra.mrb[36].mxu1 %vm122_vm1, %v8178_v48 }
 0x137   :  { %9075 = vmatprep.mubr.msk.f32.mxu1 %vm10887_vm0, %v10888_v4 }
 0x13a   :  { %9076 = vmatmul.mubr.msk.f32.gmra.mrb[38].mxu1 %vm122_vm1, %v8179_v49 }
 0x1bd   :  { %v338_v51 = vpop.f32.mrb[14].mxu0 }
 0x1be   :  { %v339_v52 = vadd.f32 %v11227_v50, %v338_v51  ;;  %v8955_v53 = vpop.f32.mrb[15].mxu0 }
 0x1c0   :  { %v8158_v54 = vmul.f32 -1.442695, %v339_v52 }
 0x1c1   :  { %v343_v55 = vpop.f32.mrb[0].mxu1  ;;  %v11254_v52 = vpop.f32.mrb[16].mxu0 }
 0x1c2   :  { %10102 = vpow2.f32 %v8158_v54  ;;  %v344_v56 = vadd.f32 %v11227_v50, %v343_v55  ;;  %v8958_v57 = vpop.f32.mrb[1].mxu1  ;;  %v8980_v55 = vpop.f32.mrb[17].mxu0 }
 0x1c4   :  { %v8159_v58 = vmul.f32 -1.442695, %v344_v56 }
 0x1c5   :  { %v348_v59 = vpop.f32.mrb[2].mxu1 }
 0x1c6   :  { %10104 = vpow2.f32 %v8159_v58  ;;  %v349_v60 = vadd.f32 %v11227_v50, %v348_v59  ;;  %v8961_v61 = vpop.f32.mrb[3].mxu1  ;;  %v10048_v59 = vld [vmem:[%s15307_s10 + $0x4] ss:$8 sps:$4 sm:$0xff]  }
 0x1c7   :  { %v10046_v61 = vld [vmem:[%s15307_s10] ss:$8 sps:$4 sm:$0xff]   ;;  %1131 = vmatprep.subr.bf16.mxu0 %v10048_v59 }
 0x1c8   :  { %v8160_v62 = vmul.f32 -1.442695, %v349_v60  ;;  %v508_v60 = vpop.f32.mrb[18].mxu0  ;;  %v11382_v59 = vld [vmem:[%s15306_s9 + $0x28] sm:$0xff] }
 0x1c9   :  { %v353_v63 = vpop.f32.mrb[4].mxu1 }
 0x1ca   :  { %10106 = vpow2.f32 %v8160_v62  ;;  %v354_v0 = vadd.f32 %v11227_v50, %v353_v63  ;;  %v8964_v1 = vpop.f32.mrb[5].mxu1 }
 0x1cc   :  { %v10103_v2 = vpop.eup %10102  ;;  %v8161_v3 = vmul.f32 -1.442695, %v354_v0  ;;  %v8983_v0 = vpop.f32.mrb[19].mxu0 }
 0x1cd   :  { %v393_v5 = vadd.f32 1.0, %v10103_v2  ;;  %v358_v6 = vpop.f32.mrb[6].mxu1  ;;  %v11391_v0 = vld [vmem:[%s15306_s9 + $0x30] sm:$0x1] }
 0x1ce   :  { %10108 = vpow2.f32 %v8161_v3  ;;  %v359_v7 = vadd.f32 %v11227_v50, %v358_v6  ;;  %v8967_v8 = vpop.f32.mrb[7].mxu1  ;;  %v513_v6 = vpop.f32.mrb[20].mxu0 }
 0x1cf   :  { %10110 = vrcp.f32 %v393_v5  ;;  %v10051_v5 = vld [vmem:[%s15307_s10 + $0x14] ss:$8 sps:$4 sm:$0xff]  }
 0x1d0   :  { %v10105_v9 = vpop.eup %10104  ;;  %v8162_v10 = vmul.f32 -1.442695, %v359_v7  ;;  %v10049_v7 = vld [vmem:[%s15307_s10 + $0x10] ss:$8 sps:$4 sm:$0xff]  }
 0x1d1   :  { %v394_v11 = vadd.f32 1.0, %v10105_v9  ;;  %v363_v12 = vpop.f32.mrb[8].mxu1 }
 0x1d2   :  { %10112 = vpow2.f32 %v8162_v10  ;;  %v364_v13 = vadd.f32 %v11227_v50, %v363_v12  ;;  %v8970_v14 = vpop.f32.mrb[9].mxu1  ;;  %v8986_v10 = vpop.f32.mrb[21].mxu0 }
 0x1d3   :  { %10114 = vrcp.f32 %v394_v11  ;;  %v10054_v14 = vld [vmem:[%s15307_s10 + $0x24] ss:$8 sps:$4 sm:$0xff]  }
 0x1d4   :  { %v10107_v15 = vpop.eup %10106  ;;  %v8163_v16 = vmul.f32 -1.442695, %v364_v13 }
 0x1d5   :  { %v395_v17 = vadd.f32 1.0, %v10107_v15  ;;  %v368_v18 = vpop.f32.mrb[10].mxu1  ;;  %v518_v15 = vpop.f32.mrb[22].mxu0 }
 0x1d6   :  { %10116 = vpow2.f32 %v8163_v16  ;;  %v369_v19 = vadd.f32 %v11227_v50, %v368_v18  ;;  %v8973_v21 = vpop.f32.mrb[11].mxu1  ;;  %v8989_v16 = vpop.f32.mrb[23].mxu0  ;;  %v10055_v18 = vld [vmem:[%s15307_s10 + $0x30] ss:$8 sps:$4 sm:$0xff]  }
 0x1d7   :  { %10118 = vrcp.f32 %v395_v17  ;;  %v523_v17 = vpop.f32.mrb[24].mxu0 }
 0x1d8   :  { %v10109_v22 = vpop.eup %10108  ;;  %v8164_v23 = vmul.f32 -1.442695, %v369_v19  ;;  %v8992_v19 = vpop.f32.mrb[25].mxu0 }
 0x1d9   :  { %v10111_v24 = vpop.eup %10110  ;;  %v396_v25 = vadd.f32 1.0, %v10109_v22  ;;  %v668_v26 = vpop.f32.mrb[12].mxu1  ;;  %v15327_v22 = vmov 0  }
 0x1da   :  { %10120 = vpow2.f32 %v8164_v23  ;;  %v669_v27 = vadd.f32 %v11105_v20, %v668_v26  ;;  %v9005_v28 = vpop.f32.mrb[13].mxu1  ;;  %v415_v29 = vsel %vm414_vm3, %v10111_v24, -inf  ;;  %v528_v21 = vpop.f32.mrb[26].mxu0  ;;  %v101_v26 = vld [vmem:[%s15305_s8] sm:$0x1]  ;;  %s10894_s8 = smov 96  }
 0x1db   :  { %10122 = vrcp.f32 %v396_v25  ;;  %416 = vmax.xlane.f32.xlu0 %v415_v29  ;;  %v8995_v23 = vpop.f32.mrb[27].mxu0  ;;  %572 = vst.msk [vmem:[#allocation2 + $0x31] sm:$0x1] %vm570_vm6, %v101_v26  ;;  %1014 = vst.msk [vmem:[#allocation2 + $0x71] sm:$0x1] %vm570_vm6, %v101_v26 }
 0x1dc   :  { %v10113_v30 = vpop.eup %10112  ;;  %9033 = vmatmul.mubr.msk.f32.vlgmr.msra.gmra.mrb[30].mxu0 %vm250_vm2, %v669_v27  ;;  %v533_v24 = vpop.f32.mrb[28].mxu0  ;;  %v11336_v28 = vld [vmem:[%s15304_s7] ss:$0 sm:$0xff] }
 0x1dd   :  { %v10115_v31 = vpop.eup %10114  ;;  %v397_v32 = vadd.f32 1.0, %v10113_v30  ;;  %v673_v33 = vpop.f32.mrb[14].mxu1  ;;  %9035 = vmatprep.mubr.msk.f32.mxu0 %vm10887_vm0, %v10888_v4  ;;  %1132 = vmatpush1.bf16.msra.mxu0 %v10046_v61  ;;  %v11342_v30 = vld [vmem:[%s15306_s9] sm:$0xff] }
 0x1de   :  { %v674_v34 = vadd.f32 %v11105_v20, %v673_v33  ;;  %v9008_v35 = vpop.f32.mrb[15].mxu1  ;;  %v418_v36 = vsel %vm414_vm3, %v10115_v31, -inf  ;;  %1133 = vmatprep.subr.bf16.mxu0 %v10051_v5  ;;  %v8998_v25 = vpop.f32.mrb[29].mxu0 }
 0x1df   :  { %10124 = vrcp.f32 %v397_v32  ;;  %419 = vmax.xlane.f32.xlu0 %v418_v36  ;;  %v11349_v35 = vld [vmem:[%s15306_s9 + $0x8] sm:$0xff] }
 0x1e0   :  { %v10117_v37 = vpop.eup %10116  ;;  %9036 = vmatmul.mubr.msk.f32.gmra.mrb[32].mxu0 %vm250_vm2, %v674_v34 }
 0x1e1   :  { %v10119_v38 = vpop.eup %10118  ;;  %v398_v39 = vadd.f32 1.0, %v10117_v37  ;;  %v678_v40 = vpop.f32.mrb[16].mxu1  ;;  %9038 = vmatprep.mubr.msk.f32.mxu0 %vm10887_vm0, %v10888_v4  ;;  %1134 = vmatpush1.bf16.msra.mxu0 %v10049_v7 }
 0x1e2   :  { %v679_v41 = vadd.f32 %v11105_v20, %v678_v40  ;;  %v9011_v42 = vpop.f32.mrb[17].mxu1  ;;  %v421_v43 = vsel %vm414_vm3, %v10119_v38, -inf  ;;  %1135 = vmatprep.subr.bf16.mxu0 %v10054_v14  ;;  %v11357_v40 = vld [vmem:[%s15306_s9 + $0x10] sm:$0xff] }
 0x1e3   :  { %10126 = vrcp.f32 %v398_v39  ;;  %422 = vmax.xlane.f32.xlu1 %v421_v43 }
 0x1e4   :  { %v10121_v44 = vpop.eup %10120  ;;  %9039 = vmatmul.mubr.msk.f32.gmra.mrb[34].mxu0 %vm250_vm2, %v679_v41 }
 0x1e5   :  { %v10123_v45 = vpop.eup %10122  ;;  %v399_v46 = vadd.f32 1.0, %v10121_v44  ;;  %v683_v47 = vpop.f32.mrb[18].mxu1  ;;  %9041 = vmatprep.mubr.msk.f32.mxu0 %vm10887_vm0, %v10888_v4 }
 0x1e6   :  { %v684_v48 = vadd.f32 %v11105_v20, %v683_v47  ;;  %v9014_v49 = vpop.f32.mrb[19].mxu1  ;;  %v424_v51 = vsel %vm414_vm3, %v10123_v45, -inf  ;;  %v11365_v45 = vld [vmem:[%s15306_s9 + $0x18] sm:$0xff] }
 0x1e7   :  { %10128 = vrcp.f32 %v399_v46  ;;  %425 = vmax.xlane.f32.xlu1 %v424_v51  ;;  %v11373_v51 = vld [vmem:[%s15306_s9 + $0x20] sm:$0xff] }
 0x1e8   :  { %9042 = vmatmul.mubr.msk.f32.gmra.mrb[36].mxu0 %vm250_vm2, %v684_v48 }
 0x1e9   :  { %v10125_v53 = vpop.eup %10124  ;;  %v688_v54 = vpop.f32.mrb[20].mxu1  ;;  %9044 = vmatprep.mubr.msk.f32.mxu0 %vm10887_vm0, %v10888_v4 }
 0x1ea   :  { %v689_v56 = vadd.f32 %v11105_v20, %v688_v54  ;;  %v9017_v57 = vpop.f32.mrb[21].mxu1  ;;  %v427_v58 = vsel %vm414_vm3, %v10125_v53, -inf }
 0x1eb   :  { %428 = vmax.xlane.f32.xlu0 %v427_v58 }
 0x1ec   :  { %9045 = vmatmul.mubr.msk.f32.gmra.mrb[38].mxu0 %vm250_vm2, %v689_v56 }
 0x1ed   :  { %v10127_v62 = vpop.eup %10126  ;;  %v693_v63 = vpop.f32.mrb[22].mxu1  ;;  %9047 = vmatprep.mubr.msk.f32.mxu0 %vm10887_vm0, %v10888_v4 }
 0x1ee   :  { %v694_v1 = vadd.f32 %v11105_v20, %v693_v63  ;;  %v9020_v2 = vpop.f32.mrb[23].mxu1  ;;  %v430_v3 = vsel %vm414_vm3, %v10127_v62, -inf }
 0x1ef   :  { %431 = vmax.xlane.f32.xlu1 %v430_v3 }
 0x1f0   :  { %9048 = vmatmul.mubr.msk.f32.gmra.mrb[40].mxu0 %vm250_vm2, %v694_v1 }
 0x1f1   :  { %v10129_v8 = vpop.eup %10128  ;;  %v698_v9 = vpop.f32.mrb[24].mxu1  ;;  %9050 = vmatprep.mubr.msk.f32.mxu0 %vm10887_vm0, %v10888_v4  ;;  %v10052_v4 = vld [vmem:[%s15307_s10 + $0x20] ss:$8 sps:$4 sm:$0xff]  }
 0x1f2   :  { %v434_v11 = vsel %vm433_vm5, %v10129_v8, -inf  ;;  %v699_v12 = vadd.f32 %v11105_v20, %v698_v9  ;;  %v9023_v13 = vpop.f32.mrb[25].mxu1  ;;  %1136 = vmatpush1.bf16.msra.mxu0 %v10052_v4  ;;  %v10057_v20 = vld [vmem:[%s15307_s10 + $0x34] ss:$8 sps:$4 sm:$0xff]  }
 0x1f3   :  { %435 = vmax.xlane.f32.xlu0 %v434_v11  ;;  %1137 = vmatprep.subr.bf16.mxu0 %v10057_v20  ;;  %v1039_v11 = vld [vmem:[#allocation2 + $0x38] sm:$0xff] }
 0x1f4   :  { %9051 = vmatmul.mubr.msk.f32.gmra.mrb[42].mxu0 %vm250_vm2, %v699_v12 }
 0x1f5   :  { %1163 = vmatprep.mubr.bf16.mxu0 %v15327_v22 }
 0x1f6   :  { %1138 = vmatpush1.bf16.msra.mxu0 %v10055_v18 }
 0x268   :  { %v417_v27 = vpop.xlane.xlu0 %416 }
 0x269   :  { %v537_v29 = vmul.f32 %v11254_v52, %v417_v27 }
 0x26b   :  { %v550_v31 = vadd.f32 %v11336_v28, %v537_v29 }
 0x26c   :  { %v420_v32 = vpop.xlane.xlu0 %419 }
 0x26d   :  { %v557_v33 = vadd.f32 %v550_v31, %v11342_v30  ;;  %v538_v34 = vmul.f32 %v508_v60, %v420_v32 }
 0x26f   :  { %564 = vst.msk [vmem:[#allocation2] sm:$0xff] %vm73_vm4, %v557_v33  ;;  %v551_v36 = vadd.f32 %v11336_v28, %v538_v34 }
 0x270   :  { %v423_v37 = vpop.xlane.xlu1 %422 }
 0x271   :  { %v558_v38 = vadd.f32 %v551_v36, %v11349_v35  ;;  %v539_v39 = vmul.f32 %v513_v6, %v423_v37 }
 0x273   :  { %565 = vst.msk [vmem:[#allocation2 + $0x8] sm:$0xff] %vm73_vm4, %v558_v38  ;;  %v552_v41 = vadd.f32 %v11336_v28, %v539_v39 }
 0x274   :  { %v426_v42 = vpop.xlane.xlu1 %425 }
 0x275   :  { %v559_v43 = vadd.f32 %v552_v41, %v11357_v40  ;;  %v540_v44 = vmul.f32 %v518_v15, %v426_v42 }
 0x276   :  { %v1032_v52 = vld [vmem:[#allocation2] sm:$0xff] }
 0x277   :  { %566 = vst.msk [vmem:[#allocation2 + $0x10] sm:$0xff] %vm73_vm4, %v559_v43  ;;  %v553_v46 = vadd.f32 %v11336_v28, %v540_v44 }
 0x278   :  { %v429_v47 = vpop.xlane.xlu0 %428 }
 0x279   :  { %v560_v48 = vadd.f32 %v553_v46, %v11365_v45  ;;  %v541_v49 = vmul.f32 %v523_v17, %v429_v47 }
 0x27a   :  { %v1033_v53 = vld [vmem:[#allocation2 + $0x8] sm:$0xff] }
 0x27b   :  { %567 = vst.msk [vmem:[#allocation2 + $0x18] sm:$0xff] %vm73_vm4, %v560_v48  ;;  %v554_v54 = vadd.f32 %v11336_v28, %v541_v49  ;;  %v1048_v55 = vpack.c.bf16 %v1033_v53, %v1032_v52 }
 0x27c   :  { %v432_v56 = vpop.xlane.xlu1 %431 }
 0x27d   :  { %v561_v57 = vadd.f32 %v554_v54, %v11373_v51  ;;  %v542_v58 = vmul.f32 %v528_v21, %v432_v56  ;;  %8216 = vmatmul.mubr.msk.bf16.vlgmr.msra.gmra.mrb[44].mxu0 %vm73_vm4, %v1048_v55 }
 0x27e   :  { %1173 = vmatprep.mubr.bf16.mxu0 %v15327_v22  ;;  %v1034_v1 = vld [vmem:[#allocation2 + $0x10] sm:$0xff] }
 0x27f   :  { %568 = vst.msk [vmem:[#allocation2 + $0x20] sm:$0xff] %vm73_vm4, %v561_v57  ;;  %v555_v60 = vadd.f32 %v11336_v28, %v542_v58 }
 0x280   :  { %v436_v61 = vpop.xlane.xlu0 %435 }
 0x281   :  { %v562_v62 = vadd.f32 %v555_v60, %v11382_v59  ;;  %v543_v63 = vmul.f32 %v533_v24, %v436_v61 }
 0x282   :  { %v1035_v2 = vld [vmem:[#allocation2 + $0x18] sm:$0xff] }
 0x283   :  { %569 = vst.msk [vmem:[#allocation2 + $0x28] sm:$0xff] %vm73_vm4, %v562_v62  ;;  %v556_v3 = vadd.f32 %v11336_v28, %v543_v63  ;;  %v1049_v5 = vpack.c.bf16 %v1035_v2, %v1034_v1 }
 0x285   :  { %v563_v6 = vadd.f32 %v556_v3, %v11391_v0  ;;  %8217 = vmatmul.mubr.msk.bf16.gmra.mrb[48].mxu0 %vm73_vm4, %v1049_v5 }
 0x286   :  { %1183 = vmatprep.mubr.bf16.mxu0 %v15327_v22  ;;  %v1036_v7 = vld [vmem:[#allocation2 + $0x20] sm:$0xff] }
 0x287   :  { %571 = vst.msk [vmem:[#allocation2 + $0x30] sm:$0x1] %vm570_vm6, %v563_v6 }
 0x28a   :  { %v1037_v8 = vld [vmem:[#allocation2 + $0x28] sm:$0xff] }
 0x28b   :  { %v1050_v9 = vpack.c.bf16 %v1037_v8, %v1036_v7  ;;  %v952_v8 = vpop.f32.mrb[26].mxu1 }
 0x28d   :  { %8218 = vmatmul.mubr.msk.bf16.gmra.mrb[52].mxu0 %vm73_vm4, %v1050_v9  ;;  %v9059_v9 = vpop.f32.mrb[27].mxu1 }
 0x28e   :  { %1193 = vmatprep.mubr.bf16.mxu0 %v15327_v22  ;;  %v1038_v10 = vld [vmem:[#allocation2 + $0x30] sm:$0xff] }
 0x28f   :  { %v1051_v12 = vpack.c.bf16 %v1039_v11, %v1038_v10 }
 0x295   :  { %8219 = vmatmul.mubr.msk.bf16.gmra.mrb[56].mxu0 %vm73_vm4, %v1051_v12  ;;  %v957_v12 = vpop.f32.mrb[28].mxu1 }
 0x296   :  { %1203 = vmatprep.mubr.bf16.mxu0 %v15327_v22 }
 0x2af   :  { %v789_v13 = vpop.f32.mrb[30].mxu0 }
 0x2b0   :  { %v790_v14 = vadd.f32 %v11227_v50, %v789_v13  ;;  %v9034_v15 = vpop.f32.mrb[31].mxu0  ;;  %v9062_v13 = vpop.f32.mrb[29].mxu1 }
 0x2b2   :  { %v8194_v4 = vmul.f32 -1.442695, %v790_v14 }
 0x2b3   :  { %v794_v16 = vpop.f32.mrb[32].mxu0 }
 0x2b4   :  { %10130 = vpow2.f32 %v8194_v4  ;;  %v795_v20 = vadd.f32 %v11227_v50, %v794_v16  ;;  %v9037_v17 = vpop.f32.mrb[33].mxu0  ;;  %v962_v4 = vpop.f32.mrb[30].mxu1 }
 0x2b5   :  { %v9065_v16 = vpop.f32.mrb[31].mxu1 }
 0x2b6   :  { %v8195_v18 = vmul.f32 -1.442695, %v795_v20 }
 0x2b7   :  { %v799_v19 = vpop.f32.mrb[34].mxu0 }
 0x2b8   :  { %10132 = vpow2.f32 %v8195_v18  ;;  %v800_v21 = vadd.f32 %v11227_v50, %v799_v19  ;;  %v9040_v23 = vpop.f32.mrb[35].mxu0  ;;  %v11417_v18 = vpop.f32.mrb[32].mxu1 }
 0x2b9   :  { %v9068_v19 = vpop.f32.mrb[33].mxu1 }
 0x2ba   :  { %v8196_v24 = vmul.f32 -1.442695, %v800_v21  ;;  %v11419_v21 = vpop.f32.mrb[34].mxu1 }
 0x2bb   :  { %v804_v25 = vpop.f32.mrb[36].mxu0  ;;  %v9071_v23 = vpop.f32.mrb[35].mxu1 }
 0x2bc   :  { %10134 = vpow2.f32 %v8196_v24  ;;  %v805_v26 = vadd.f32 %v11227_v50, %v804_v25  ;;  %v9043_v27 = vpop.f32.mrb[37].mxu0  ;;  %v11421_v24 = vpop.f32.mrb[36].mxu1 }
 0x2bd   :  { %v9074_v25 = vpop.f32.mrb[37].mxu1 }
 0x2be   :  { %v10131_v29 = vpop.eup %10130  ;;  %v8197_v31 = vmul.f32 -1.442695, %v805_v26  ;;  %v11423_v26 = vpop.f32.mrb[38].mxu1 }
 0x2bf   :  { %v844_v32 = vadd.f32 1.0, %v10131_v29  ;;  %v809_v33 = vpop.f32.mrb[38].mxu0  ;;  %v9077_v27 = vpop.f32.mrb[39].mxu1  ;;  %v1057_v29 = vlaneseq }
 0x2c0   :  { %10136 = vpow2.f32 %v8197_v31  ;;  %v810_v34 = vadd.f32 %v11227_v50, %v809_v33  ;;  %v9046_v36 = vpop.f32.mrb[39].mxu0  ;;  %v1023_v33 = vld [vmem:[%s15308_s11] sm:$0x3] }
 0x2c1   :  { %10138 = vrcp.f32 %v844_v32  ;;  %v11425_v31 = vshrl.u32 %v1057_v29, 7 }
 0x2c2   :  { %v10133_v37 = vpop.eup %10132  ;;  %v8198_v38 = vmul.f32 -1.442695, %v810_v34 }
 0x2c3   :  { %v845_v39 = vadd.f32 1.0, %v10133_v37  ;;  %v814_v41 = vpop.f32.mrb[40].mxu0  ;;  %15407 = vst [vmem:[#allocation6_spill] sm:$0xff] %v11425_v31  ;;  %v15326_v32 = vsub.s32 0, %v11425_v31  ;;  %v15325_v34 = vsub.s32 1, %v11425_v31 }
 0x2c4   :  { %10140 = vpow2.f32 %v8198_v38  ;;  %v815_v42 = vadd.f32 %v11227_v50, %v814_v41  ;;  %v9049_v43 = vpop.f32.mrb[41].mxu0 }
 0x2c5   :  { %10142 = vrcp.f32 %v845_v39  ;;  %v11434_v36 = vrot.slane %v1023_v33, %v15326_v32  ;;  %v11438_v38 = vrot.slane %v1023_v33, %v15325_v34 }
 0x2c6   :  { %v10135_v44 = vpop.eup %10134  ;;  %v8199_v46 = vmul.f32 -1.442695, %v815_v42 }
 0x2c7   :  { %v846_v47 = vadd.f32 1.0, %v10135_v44  ;;  %v819_v48 = vpop.f32.mrb[42].mxu0 }
 0x2c8   :  { %10144 = vpow2.f32 %v8199_v46  ;;  %v820_v49 = vadd.f32 %v11227_v50, %v819_v48  ;;  %v9052_v52 = vpop.f32.mrb[43].mxu0 }
 0x2c9   :  { %10146 = vrcp.f32 %v846_v47 }
 0x2ca   :  { %v10137_v53 = vpop.eup %10136  ;;  %v8200_v54 = vmul.f32 -1.442695, %v820_v49 }
 0x2cb   :  { %v10139_v55 = vpop.eup %10138  ;;  %v847_v56 = vadd.f32 1.0, %v10137_v53 }
 0x2cc   :  { %10148 = vpow2.f32 %v8200_v54  ;;  %v865_v57 = vsel %vm414_vm3, %v10139_v55, -inf }
 0x2cd   :  { %10150 = vrcp.f32 %v847_v56  ;;  %866 = vmax.xlane.f32.xlu1 %v865_v57 }
 0x2ce   :  { %v10141_v58 = vpop.eup %10140 }
 0x2cf   :  { %v10143_v60 = vpop.eup %10142  ;;  %v848_v61 = vadd.f32 1.0, %v10141_v58 }
 0x2d0   :  { %v868_v62 = vsel %vm414_vm3, %v10143_v60, -inf }
 0x2d1   :  { %10152 = vrcp.f32 %v848_v61  ;;  %869 = vmax.xlane.f32.xlu0 %v868_v62 }
 0x2d2   :  { %v10145_v63 = vpop.eup %10144 }
 0x2d3   :  { %v10147_v50 = vpop.eup %10146  ;;  %v849_v1 = vadd.f32 1.0, %v10145_v63 }
 0x2d4   :  { %v871_v2 = vsel %vm414_vm3, %v10147_v50, -inf }
 0x2d5   :  { %10154 = vrcp.f32 %v849_v1  ;;  %872 = vmax.xlane.f32.xlu1 %v871_v2 }
 0x2d6   :  { %v10149_v3 = vpop.eup %10148 }
 0x2d7   :  { %v10151_v5 = vpop.eup %10150  ;;  %v850_v6 = vadd.f32 1.0, %v10149_v3 }
 0x2d8   :  { %v874_v7 = vsel %vm414_vm3, %v10151_v5, -inf }
 0x2d9   :  { %10156 = vrcp.f32 %v850_v6  ;;  %875 = vmax.xlane.f32.xlu0 %v874_v7 }
 0x2db   :  { %v10153_v10 = vpop.eup %10152 }
 0x2dc   :  { %v877_v11 = vsel %vm414_vm3, %v10153_v10, -inf }
 0x2dd   :  { %878 = vmax.xlane.f32.xlu1 %v877_v11 }
 0x2df   :  { %v10155_v14 = vpop.eup %10154 }
 0x2e0   :  { %v880_v15 = vsel %vm414_vm3, %v10155_v14, -inf }
 0x2e1   :  { %881 = vmax.xlane.f32.xlu0 %v880_v15 }
 0x2e3   :  { %v10157_v20 = vpop.eup %10156 }
 0x2e4   :  { %v883_v17 = vsel %vm433_vm5, %v10157_v20, -inf }
 0x2e5   :  { %884 = vmax.xlane.f32.xlu1 %v883_v17 }
 0x350   :  { %v1165_v37 = vpop.f32.mrb[44].mxu0 }
 0x351   :  { %v1167_v39 = vpop.f32.mrb[45].mxu0  ;;  %v1166_v42 = vadd.f32 %v1165_v37, %v11434_v36 }
 0x352   :  { %v1169_v41 = vpop.f32.mrb[46].mxu0  ;;  %v1168_v46 = vadd.f32 %v1167_v39, %v11438_v38 }
 0x353   :  { %v1170_v43 = vadd.f32 %v1169_v41, %v11434_v36  ;;  %v1171_v44 = vpop.f32.mrb[47].mxu0 }
 0x354   :  { %v1172_v47 = vadd.f32 %v1171_v44, %v11438_v38 }
 0x355   :  { %v11444_v48 = vpack.c.bf16 %v1170_v43, %v1166_v42 }
 0x356   :  { %v11446_v49 = vpack.c.bf16 %v1172_v47, %v1168_v46 }
 0x357   :  { %1284 = vrot.lane.b32.xlu0 %v11444_v48, %s10890_s3  ;;  %9094 = vmatprep.mubr.msk.bf16.mxu1 %vm122_vm1, %v11444_v48 }
 0x358   :  { %15408 = vst [vmem:[#allocation7_spill] sm:$0xff] %v11446_v49  ;;  %v1175_v52 = vpop.f32.mrb[48].mxu0  ;;  %9110 = vmatprep.subr.bf16.mxu0 %v11446_v49 }
 0x359   :  { %v1177_v53 = vpop.f32.mrb[49].mxu0  ;;  %9111 = vmatpush3.bf16.msra.mxu0 %v11446_v49  ;;  %v1176_v56 = vadd.f32 %v1175_v52, %v11434_v36 }
 0x35a   :  { %v867_v54 = vpop.xlane.xlu1 %866  ;;  %v1179_v55 = vpop.f32.mrb[50].mxu0  ;;  %v1178_v61 = vadd.f32 %v1177_v53, %v11438_v38 }
 0x35b   :  { %v986_v57 = vmul.f32 %v952_v8, %v867_v54  ;;  %v1180_v58 = vadd.f32 %v1179_v55, %v11434_v36  ;;  %v1181_v60 = vpop.f32.mrb[51].mxu0 }
 0x35c   :  { %v1182_v62 = vadd.f32 %v1181_v60, %v11438_v38 }
 0x35d   :  { %v993_v63 = vadd.f32 %v11336_v28, %v986_v57  ;;  %v11459_v50 = vpack.c.bf16 %v1180_v58, %v1176_v56 }
 0x35e   :  { %v11461_v1 = vpack.c.bf16 %v1182_v62, %v1178_v61  ;;  %v870_v2 = vpop.xlane.xlu0 %869 }
 0x35f   :  { %v1000_v3 = vadd.f32 %v993_v63, %v11342_v30  ;;  %v987_v5 = vmul.f32 %v957_v12, %v870_v2  ;;  %1286 = vrot.lane.b32.xlu1 %v11459_v50, %s10890_s3 }
 0x360   :  { %15409 = vst [vmem:[#allocation8_spill] sm:$0xff] %v11461_v1  ;;  %v1185_v6 = vpop.f32.mrb[52].mxu0  ;;  %9112 = vmatprep.subr.bf16.mxu0 %v11461_v1 }
 0x361   :  { %1007 = vst.msk [vmem:[#allocation2 + $0x40] sm:$0xff] %vm73_vm4, %v1000_v3  ;;  %v994_v7 = vadd.f32 %v11336_v28, %v987_v5  ;;  %v1187_v8 = vpop.f32.mrb[53].mxu0  ;;  %9113 = vmatpush3.bf16.msra.mxu0 %v11461_v1  ;;  %v1186_v30 = vadd.f32 %v1185_v6, %v11434_v36  ;;  %v1047_v6 = vld [vmem:[#allocation2 + $0x78] sm:$0xff] }
 0x362   :  { %v873_v9 = vpop.xlane.xlu1 %872  ;;  %v1189_v10 = vpop.f32.mrb[54].mxu0  ;;  %v1188_v15 = vadd.f32 %v1187_v8, %v11438_v38 }
 0x363   :  { %v1001_v11 = vadd.f32 %v994_v7, %v11349_v35  ;;  %v988_v12 = vmul.f32 %v962_v4, %v873_v9  ;;  %v1190_v13 = vadd.f32 %v1189_v10, %v11434_v36  ;;  %v1191_v14 = vpop.f32.mrb[55].mxu0 }
 0x364   :  { %v1192_v16 = vadd.f32 %v1191_v14, %v11438_v38 }
 0x365   :  { %1008 = vst.msk [vmem:[#allocation2 + $0x48] sm:$0xff] %vm73_vm4, %v1001_v11  ;;  %v995_v20 = vadd.f32 %v11336_v28, %v988_v12  ;;  %v11477_v17 = vpack.c.bf16 %v1190_v13, %v1186_v30 }
 0x366   :  { %v11479_v19 = vpack.c.bf16 %v1192_v16, %v1188_v15  ;;  %v876_v23 = vpop.xlane.xlu0 %875 }
 0x367   :  { %v1002_v35 = vadd.f32 %v995_v20, %v11357_v40  ;;  %v989_v4 = vmul.f32 %v11417_v18, %v876_v23  ;;  %1288 = vrot.lane.b32.xlu1 %v11477_v17, %s10890_s3 }
 0x368   :  { %15410 = vst [vmem:[#allocation9_spill] sm:$0xff] %v11479_v19  ;;  %v1195_v25 = vpop.f32.mrb[56].mxu0  ;;  %9114 = vmatprep.subr.bf16.mxu0 %v11479_v19  ;;  %v1040_v46 = vld [vmem:[#allocation2 + $0x40] sm:$0xff] }
 0x369   :  { %1009 = vst.msk [vmem:[#allocation2 + $0x50] sm:$0xff] %vm73_vm4, %v1002_v35  ;;  %v996_v27 = vadd.f32 %v11336_v28, %v989_v4  ;;  %v1197_v29 = vpop.f32.mrb[57].mxu0  ;;  %9115 = vmatpush3.bf16.msra.mxu0 %v11479_v19  ;;  %v1196_v40 = vadd.f32 %v1195_v25, %v11434_v36 }
 0x36a   :  { %v879_v33 = vpop.xlane.xlu1 %878  ;;  %v1199_v37 = vpop.f32.mrb[58].mxu0  ;;  %v1198_v43 = vadd.f32 %v1197_v29, %v11438_v38 }
 0x36b   :  { %v1003_v39 = vadd.f32 %v996_v27, %v11365_v45  ;;  %v990_v18 = vmul.f32 %v11419_v21, %v879_v33  ;;  %v1200_v41 = vadd.f32 %v1199_v37, %v11434_v36  ;;  %v1201_v42 = vpop.f32.mrb[59].mxu0 }
 0x36c   :  { %v1202_v44 = vadd.f32 %v1201_v42, %v11438_v38  ;;  %v1041_v47 = vld [vmem:[#allocation2 + $0x48] sm:$0xff] }
 0x36d   :  { %1010 = vst.msk [vmem:[#allocation2 + $0x58] sm:$0xff] %vm73_vm4, %v1003_v39  ;;  %v997_v52 = vadd.f32 %v11336_v28, %v990_v18  ;;  %v11497_v53 = vpack.c.bf16 %v1200_v41, %v1196_v40  ;;  %v1052_v45 = vpack.c.bf16 %v1041_v47, %v1040_v46 }
 0x36e   :  { %v11499_v54 = vpack.c.bf16 %v1202_v44, %v1198_v43  ;;  %v882_v55 = vpop.xlane.xlu0 %881 }
 0x36f   :  { %v1004_v21 = vadd.f32 %v997_v52, %v11373_v51  ;;  %v991_v56 = vmul.f32 %v11421_v24, %v882_v55  ;;  %8220 = vmatmul.mubr.msk.bf16.gmra.mrb[60].mxu0 %vm73_vm4, %v1052_v45  ;;  %1290 = vrot.lane.b32.xlu1 %v11497_v53, %s10890_s3 }
 0x370   :  { %15411 = vst [vmem:[#allocation10_spill] sm:$0xff] %v11499_v54  ;;  %9116 = vmatprep.subr.bf16.mxu0 %v11499_v54  ;;  %1213 = vmatprep.mubr.bf16.mxu0 %v15327_v22  ;;  %v1042_v60 = vld [vmem:[#allocation2 + $0x50] sm:$0xff] }
 0x371   :  { %1011 = vst.msk [vmem:[#allocation2 + $0x60] sm:$0xff] %vm73_vm4, %v1004_v21  ;;  %v998_v57 = vadd.f32 %v11336_v28, %v991_v56  ;;  %9117 = vmatpush3.bf16.msra.mxu0 %v11499_v54 }
 0x372   :  { %v885_v58 = vpop.xlane.xlu1 %884 }
 0x373   :  { %v1005_v51 = vadd.f32 %v998_v57, %v11382_v59  ;;  %v992_v24 = vmul.f32 %v11423_v26, %v885_v58 }
 0x374   :  { %v1043_v61 = vld [vmem:[#allocation2 + $0x58] sm:$0xff] }
 0x375   :  { %1012 = vst.msk [vmem:[#allocation2 + $0x68] sm:$0xff] %vm73_vm4, %v1005_v51  ;;  %v999_v62 = vadd.f32 %v11336_v28, %v992_v24  ;;  %v1053_v63 = vpack.c.bf16 %v1043_v61, %v1042_v60 }
 0x377   :  { %v1006_v2 = vadd.f32 %v999_v62, %v11391_v0  ;;  %8221 = vmatmul.mubr.msk.bf16.gmra.mrb[64].mxu0 %vm73_vm4, %v1053_v63 }
 0x378   :  { %1223 = vmatprep.mubr.bf16.mxu0 %v15327_v22  ;;  %v1044_v3 = vld [vmem:[#allocation2 + $0x60] sm:$0xff] }
 0x379   :  { %1013 = vst.msk [vmem:[#allocation2 + $0x70] sm:$0x1] %vm570_vm6, %v1006_v2 }
 0x37c   :  { %v1045_v5 = vld [vmem:[#allocation2 + $0x68] sm:$0xff] }
 0x37d   :  { %v1054_v59 = vpack.c.bf16 %v1045_v5, %v1044_v3 }
 0x37f   :  { %8222 = vmatmul.mubr.msk.bf16.gmra.mrb[68].mxu0 %vm73_vm4, %v1054_v59 }
 0x380   :  { %1233 = vmatprep.mubr.bf16.mxu0 %v15327_v22  ;;  %v1046_v26 = vld [vmem:[#allocation2 + $0x70] sm:$0xff] }
 0x381   :  { %v1055_v7 = vpack.c.bf16 %v1047_v6, %v1046_v26 }
 0x387   :  { %8223 = vmatmul.mubr.msk.bf16.gmra.mrb[72].mxu0 %vm73_vm4, %v1055_v7 }
 0x3c9   :  { %v1285_v28 = vpop.permute.xlu0 %1284 }
 0x3ca   :  { %9970 = vmatprep.subr.msk.bf16.mxu1 %vm122_vm1, %v1285_v28  ;;  %v1325_v0 = vsel %vm122_vm1, %v1285_v28, 0 }
 0x3cb   :  { %9079 = vmatpush3.bf16.xpose.msra.mxu1 %v1325_v0 }
 0x3d1   :  { %v1287_v8 = vpop.permute.xlu1 %1286 }
 0x3d2   :  { %9971 = vmatprep.subr.msk.bf16.mxu1 %vm122_vm1, %v1287_v8  ;;  %v1328_v9 = vsel %vm122_vm1, %v1287_v8, 0 }
 0x3d3   :  { %9081 = vmatpush3.bf16.xpose.msra.mxu1 %v1328_v9 }
 0x3d9   :  { %v1289_v10 = vpop.permute.xlu1 %1288 }
 0x3da   :  { %9972 = vmatprep.subr.msk.bf16.mxu1 %vm122_vm1, %v1289_v10  ;;  %v1331_v11 = vsel %vm122_vm1, %v1289_v10, 0 }
 0x3db   :  { %9083 = vmatpush3.bf16.xpose.msra.mxu1 %v1331_v11 }
 0x3e1   :  { %v1291_v30 = vpop.permute.xlu1 %1290 }
 0x3e2   :  { %9973 = vmatprep.subr.msk.bf16.mxu1 %vm122_vm1, %v1291_v30  ;;  %v1334_v12 = vsel %vm122_vm1, %v1291_v30, 0 }
 0x3e3   :  { %9085 = vmatpush3.bf16.xpose.msra.mxu1 %v1334_v12 }
 0x442   :  { %v1205_v13 = vpop.f32.mrb[60].mxu0 }
 0x443   :  { %v1207_v14 = vpop.f32.mrb[61].mxu0  ;;  %v1206_v16 = vadd.f32 %v1205_v13, %v11434_v36 }
 0x444   :  { %v1209_v15 = vpop.f32.mrb[62].mxu0  ;;  %v1208_v35 = vadd.f32 %v1207_v14, %v11438_v38 }
 0x445   :  { %v1210_v20 = vadd.f32 %v1209_v15, %v11434_v36  ;;  %v1211_v23 = vpop.f32.mrb[63].mxu0 }
 0x446   :  { %v1212_v4 = vadd.f32 %v1211_v23, %v11438_v38 }
 0x447   :  { %v11534_v25 = vpack.c.bf16 %v1210_v20, %v1206_v16 }
 0x448   :  { %v11536_v27 = vpack.c.bf16 %v1212_v4, %v1208_v35 }
 0x449   :  { %15412 = vst [vmem:[#allocation11_spill] sm:$0xff] %v11534_v25  ;;  %1292 = vrot.lane.b32.xlu0 %v11534_v25, %s10890_s3 }
 0x44a   :  { %15413 = vst [vmem:[#allocation12_spill] sm:$0xff] %v11536_v27  ;;  %v1215_v29 = vpop.f32.mrb[64].mxu0  ;;  %9118 = vmatprep.subr.bf16.mxu0 %v11536_v27 }
 0x44b   :  { %v1217_v33 = vpop.f32.mrb[65].mxu0  ;;  %9119 = vmatpush3.bf16.msra.mxu0 %v11536_v27  ;;  %v1216_v39 = vadd.f32 %v1215_v29, %v11434_v36 }
 0x44c   :  { %v1219_v37 = vpop.f32.mrb[66].mxu0  ;;  %v1218_v41 = vadd.f32 %v1217_v33, %v11438_v38 }
 0x44d   :  { %v1220_v40 = vadd.f32 %v1219_v37, %v11434_v36  ;;  %v1221_v18 = vpop.f32.mrb[67].mxu0 }
 0x44e   :  { %v1222_v42 = vadd.f32 %v1221_v18, %v11438_v38 }
 0x44f   :  { %v11546_v43 = vpack.c.bf16 %v1220_v40, %v1216_v39 }
 0x450   :  { %v11548_v44 = vpack.c.bf16 %v1222_v42, %v1218_v41 }
 0x451   :  { %1294 = vrot.lane.b32.xlu1 %v11546_v43, %s10890_s3 }
 0x452   :  { %15414 = vst [vmem:[#allocation13_spill] sm:$0xff] %v11548_v44  ;;  %v1225_v46 = vpop.f32.mrb[68].mxu0  ;;  %9120 = vmatprep.subr.bf16.mxu0 %v11548_v44 }
 0x453   :  { %v1227_v47 = vpop.f32.mrb[69].mxu0  ;;  %9121 = vmatpush3.bf16.msra.mxu0 %v11548_v44  ;;  %v1226_v45 = vadd.f32 %v1225_v46, %v11434_v36 }
 0x454   :  { %v1229_v52 = vpop.f32.mrb[70].mxu0  ;;  %v1228_v56 = vadd.f32 %v1227_v47, %v11438_v38 }
 0x455   :  { %v1230_v55 = vadd.f32 %v1229_v52, %v11434_v36  ;;  %v1231_v21 = vpop.f32.mrb[71].mxu0 }
 0x456   :  { %v1232_v57 = vadd.f32 %v1231_v21, %v11438_v38 }
 0x457   :  { %v11558_v58 = vpack.c.bf16 %v1230_v55, %v1226_v45 }
 0x458   :  { %v11560_v51 = vpack.c.bf16 %v1232_v57, %v1228_v56 }
 0x459   :  { %1296 = vrot.lane.b32.xlu0 %v11558_v58, %s10890_s3 }
 0x45a   :  { %15415 = vst [vmem:[#allocation14_spill] sm:$0xff] %v11560_v51  ;;  %v1235_v24 = vpop.f32.mrb[72].mxu0  ;;  %9122 = vmatprep.subr.bf16.mxu0 %v11560_v51 }
 0x45b   :  { %v1237_v60 = vpop.f32.mrb[73].mxu0  ;;  %9123 = vmatpush3.bf16.msra.mxu0 %v11560_v51  ;;  %v1236_v62 = vadd.f32 %v1235_v24, %v11434_v36 }
 0x45c   :  { %v1239_v61 = vpop.f32.mrb[74].mxu0  ;;  %v1238_v3 = vadd.f32 %v1237_v60, %v11438_v38 }
 0x45d   :  { %v1240_v63 = vadd.f32 %v1239_v61, %v11434_v36  ;;  %v1241_v2 = vpop.f32.mrb[75].mxu0  ;;  %1718 = vrot.lane.b32.xlu0 %v11444_v48, %s10891_s28 }
 0x45e   :  { %v1242_v5 = vadd.f32 %v1241_v2, %v11438_v38 }
 0x45f   :  { %v11572_v59 = vpack.c.bf16 %v1240_v63, %v1236_v62 }
 0x460   :  { %v11574_v26 = vpack.c.bf16 %v1242_v5, %v1238_v3 }
 0x461   :  { %1298 = vrot.lane.b32.xlu1 %v11572_v59, %s10890_s3  ;;  %1722 = vrot.lane.b32.xlu0 %v11477_v17, %s10891_s28 }
 0x462   :  { %15416 = vst [vmem:[#allocation15_spill] sm:$0xff] %v11574_v26  ;;  %9124 = vmatprep.subr.bf16.mxu0 %v11574_v26 }
 0x463   :  { %9125 = vmatpush3.bf16.msra.mxu0 %v11574_v26 }
 0x465   :  { %1720 = vrot.lane.b32.xlu1 %v11459_v50, %s10891_s28  ;;  %1726 = vrot.lane.b32.xlu0 %v11534_v25, %s10891_s28 }
 0x469   :  { %1724 = vrot.lane.b32.xlu1 %v11497_v53, %s10891_s28  ;;  %1730 = vrot.lane.b32.xlu0 %v11558_v58, %s10891_s28 }
 0x46d   :  { %1728 = vrot.lane.b32.xlu1 %v11546_v43, %s10891_s28  ;;  %1702 = vrot.lane.b32.xlu0 %v11444_v48, %s10892_s29 }
 0x471   :  { %1732 = vrot.lane.b32.xlu1 %v11572_v59, %s10891_s28  ;;  %1706 = vrot.lane.b32.xlu0 %v11477_v17, %s10892_s29 }
 0x475   :  { %1704 = vrot.lane.b32.xlu1 %v11459_v50, %s10892_s29  ;;  %1710 = vrot.lane.b32.xlu0 %v11534_v25, %s10892_s29 }
 0x479   :  { %1708 = vrot.lane.b32.xlu1 %v11497_v53, %s10892_s29  ;;  %1714 = vrot.lane.b32.xlu0 %v11558_v58, %s10892_s29 }
 0x47d   :  { %1712 = vrot.lane.b32.xlu1 %v11546_v43, %s10892_s29  ;;  %2438 = vrot.lane.b32.xlu0 %v11444_v48, %s10893_s30 }
 0x481   :  { %1716 = vrot.lane.b32.xlu1 %v11572_v59, %s10892_s29  ;;  %2442 = vrot.lane.b32.xlu0 %v11477_v17, %s10893_s30 }
 0x485   :  { %2440 = vrot.lane.b32.xlu1 %v11459_v50, %s10893_s30  ;;  %2446 = vrot.lane.b32.xlu0 %v11534_v25, %s10893_s30 }
 0x489   :  { %2444 = vrot.lane.b32.xlu1 %v11497_v53, %s10893_s30  ;;  %2450 = vrot.lane.b32.xlu0 %v11558_v58, %s10893_s30 }
 0x48d   :  { %2448 = vrot.lane.b32.xlu1 %v11546_v43, %s10893_s30  ;;  %2426 = vrot.lane.b32.xlu0 %v11477_v17, %s10894_s8 }
 0x491   :  { %2422 = vrot.lane.b32.xlu1 %v11444_v48, %s10894_s8  ;;  %2428 = vrot.lane.b32.xlu0 %v11497_v53, %s10894_s8 }
 0x495   :  { %2424 = vrot.lane.b32.xlu1 %v11459_v50, %s10894_s8  ;;  %2434 = vrot.lane.b32.xlu0 %v11558_v58, %s10894_s8 }
 0x499   :  { %2430 = vrot.lane.b32.xlu1 %v11534_v25, %s10894_s8  ;;  %2039 = vrot.lane.b32.xlu0 %v11446_v49, %s10892_s29 }
 0x49d   :  { %2432 = vrot.lane.b32.xlu1 %v11546_v43, %s10894_s8  ;;  %2043 = vrot.lane.b32.xlu0 %v11479_v19, %s10892_s29 }
 0x4a1   :  { %2041 = vrot.lane.b32.xlu1 %v11461_v1, %s10892_s29  ;;  %2045 = vrot.lane.b32.xlu0 %v11499_v54, %s10892_s29 }
 0x4a5   :  { %2047 = vrot.lane.b32.xlu1 %v11536_v27, %s10892_s29  ;;  %2051 = vrot.lane.b32.xlu0 %v11560_v51, %s10892_s29 }
 0x4a9   :  { %2049 = vrot.lane.b32.xlu1 %v11548_v44, %s10892_s29  ;;  %3039 = vrot.lane.b32.xlu0 %v11444_v48, %s10895_s4 }
 0x4ad   :  { %3041 = vrot.lane.b32.xlu1 %v11459_v50, %s10895_s4  ;;  %2452 = vrot.lane.b32.xlu0 %v11572_v59, %s10893_s30 }
 0x4b1   :  { %3043 = vrot.lane.b32.xlu1 %v11477_v17, %s10895_s4  ;;  %2436 = vrot.lane.b32.xlu0 %v11572_v59, %s10894_s8 }
 0x4b5   :  { %2053 = vrot.lane.b32.xlu1 %v11574_v26, %s10892_s29 }
 0x4bb   :  { %v1293_v36 = vpop.permute.xlu0 %1292 }
 0x4bc   :  { %9974 = vmatprep.subr.msk.bf16.mxu1 %vm122_vm1, %v1293_v36  ;;  %v1337_v38 = vsel %vm122_vm1, %v1293_v36, 0 }
 0x4bd   :  { %9087 = vmatpush3.bf16.xpose.msra.mxu1 %v1337_v38 }
 0x4c3   :  { %v1295_v6 = vpop.permute.xlu1 %1294 }
 0x4c4   :  { %9975 = vmatprep.subr.msk.bf16.mxu1 %vm122_vm1, %v1295_v6  ;;  %v1340_v7 = vsel %vm122_vm1, %v1295_v6, 0 }
 0x4c5   :  { %9089 = vmatpush3.bf16.xpose.msra.mxu1 %v1340_v7 }
 0x4cb   :  { %v1297_v28 = vpop.permute.xlu0 %1296 }
 0x4cc   :  { %9976 = vmatprep.subr.msk.bf16.mxu1 %vm122_vm1, %v1297_v28  ;;  %v1343_v0 = vsel %vm122_vm1, %v1297_v28, 0 }
 0x4cd   :  { %9091 = vmatpush3.bf16.xpose.msra.mxu1 %v1343_v0 }
 0x4cf   :  { %v1719_v8 = vpop.permute.xlu0 %1718 }
 0x4d0   :  { %v1759_v13 = vsel %vm122_vm1, %v1719_v8, 0 }
 0x4d3   :  { %v1299_v9 = vpop.permute.xlu1 %1298  ;;  %v1723_v10 = vpop.permute.xlu0 %1722 }
 0x4d4   :  { %9977 = vmatprep.subr.msk.bf16.mxu1 %vm122_vm1, %v1299_v9  ;;  %v1346_v11 = vsel %vm122_vm1, %v1299_v9, 0  ;;  %v1765_v4 = vsel %vm122_vm1, %v1723_v10, 0 }
 0x4d5   :  { %9093 = vmatpush3.bf16.xpose.msra.mxu1 %v1346_v11 }
 0x4d6   :  { %9978 = vmatprep.subr.msk.bf16.mxu1 %vm122_vm1, %v1719_v8 }
 0x4d7   :  { %v1727_v30 = vpop.permute.xlu0 %1726  ;;  %v1721_v14 = vpop.permute.xlu1 %1720 }
 0x4d8   :  { %v1762_v20 = vsel %vm122_vm1, %v1721_v14, 0  ;;  %v1771_v42 = vsel %vm122_vm1, %v1727_v30, 0 }
 0x4db   :  { %v1731_v12 = vpop.permute.xlu0 %1730  ;;  %v1725_v29 = vpop.permute.xlu1 %1724 }
 0x4dc   :  { %9095 = vmatmul.mubr.msk.bf16.vlgmr.msra.gmra.mrb[40].mxu1 %vm122_vm1, %v11459_v50  ;;  %v1768_v39 = vsel %vm122_vm1, %v1725_v29, 0  ;;  %v1777_v24 = vsel %vm122_vm1, %v1731_v12, 0 }
 0x4dd   :  { %9098 = vmatprep.mubr.msk.bf16.mxu1 %vm122_vm1, %v11477_v17  ;;  %9143 = vmatpush3.bf16.xpose.msra.mxu1 %v1759_v13 }
 0x4de   :  { %9979 = vmatprep.subr.msk.bf16.mxu1 %vm122_vm1, %v1721_v14 }
 0x4df   :  { %v1703_v15 = vpop.permute.xlu0 %1702  ;;  %v1729_v18 = vpop.permute.xlu1 %1728 }
 0x4e0   :  { %v1774_v45 = vsel %vm122_vm1, %v1729_v18, 0 }
 0x4e3   :  { %v1707_v16 = vpop.permute.xlu0 %1706  ;;  %v1733_v46 = vpop.permute.xlu1 %1732 }
 0x4e4   :  { %9099 = vmatmul.mubr.msk.bf16.gmra.mrb[44].mxu1 %vm122_vm1, %v11497_v53  ;;  %v1780_v61 = vsel %vm122_vm1, %v1733_v46, 0 }
 0x4e5   :  { %9102 = vmatprep.mubr.msk.bf16.mxu1 %vm122_vm1, %v11534_v25  ;;  %9145 = vmatpush3.bf16.xpose.msra.mxu1 %v1762_v20 }
 0x4e6   :  { %9980 = vmatprep.subr.msk.bf16.mxu1 %vm122_vm1, %v1723_v10 }
 0x4e7   :  { %v1711_v23 = vpop.permute.xlu0 %1710  ;;  %v1705_v55 = vpop.permute.xlu1 %1704 }
 0x4eb   :  { %v1715_v35 = vpop.permute.xlu0 %1714  ;;  %v1709_v56 = vpop.permute.xlu1 %1708 }
 0x4ec   :  { %9103 = vmatmul.mubr.msk.bf16.gmra.mrb[48].mxu1 %vm122_vm1, %v11546_v43 }
 0x4ed   :  { %9106 = vmatprep.mubr.msk.bf16.mxu1 %vm122_vm1, %v11558_v58  ;;  %9147 = vmatpush3.bf16.xpose.msra.mxu1 %v1765_v4 }
 0x4ee   :  { %9981 = vmatprep.subr.msk.bf16.mxu1 %vm122_vm1, %v1725_v29 }
 0x4ef   :  { %v2439_v33 = vpop.permute.xlu0 %2438  ;;  %v1713_v60 = vpop.permute.xlu1 %1712 }
 0x4f0   :  { %v2479_v63 = vsel %vm122_vm1, %v2439_v33, 0 }
 0x4f3   :  { %v2443_v37 = vpop.permute.xlu0 %2442  ;;  %v1717_v62 = vpop.permute.xlu1 %1716 }
 0x4f4   :  { %9107 = vmatmul.mubr.msk.bf16.gmra.mrb[52].mxu1 %vm122_vm1, %v11572_v59  ;;  %v2485_v36 = vsel %vm122_vm1, %v2443_v37, 0 }
 0x4f5   :  { %9149 = vmatpush3.bf16.xpose.msra.mxu1 %v1768_v39  ;;  %9158 = vmatprep.mubr.msk.bf16.mxu1 %vm122_vm1, %v1703_v15 }
 0x4f6   :  { %9982 = vmatprep.subr.msk.bf16.mxu1 %vm122_vm1, %v1727_v30 }
 0x4f7   :  { %v2447_v40 = vpop.permute.xlu0 %2446  ;;  %v2441_v2 = vpop.permute.xlu1 %2440 }
 0x4f8   :  { %v2482_v3 = vsel %vm122_vm1, %v2441_v2, 0  ;;  %v2491_v9 = vsel %vm122_vm1, %v2447_v40, 0 }
 0x4fb   :  { %v2451_v41 = vpop.permute.xlu0 %2450  ;;  %v2445_v5 = vpop.permute.xlu1 %2444 }
 0x4fc   :  { %v2488_v7 = vsel %vm122_vm1, %v2445_v5, 0  ;;  %v2497_v15 = vsel %vm122_vm1, %v2451_v41, 0 }
 0x4fd   :  { %9151 = vmatpush3.bf16.xpose.msra.mxu1 %v1771_v42 }
 0x4fe   :  { %9983 = vmatprep.subr.msk.bf16.mxu1 %vm122_vm1, %v1729_v18  ;;  %v11767_v18 = vld [vmem:[%s15423_s23 + $0x10] sm:$0xff] }
 0x4ff   :  { %v11698_v47 = vpop.permute.xlu0 %2426  ;;  %v2449_v38 = vpop.permute.xlu1 %2448 }
 0x500   :  { %v2494_v30 = vsel %vm122_vm1, %v2449_v38, 0 }
 0x503   :  { %v11700_v52 = vpop.permute.xlu0 %2428  ;;  %v2423_v6 = vpop.permute.xlu1 %2422 }
 0x505   :  { %9153 = vmatpush3.bf16.xpose.msra.mxu1 %v1774_v45 }
 0x506   :  { %9984 = vmatprep.subr.msk.bf16.mxu1 %vm122_vm1, %v1731_v12 }
 0x507   :  { %v11704_v21 = vpop.permute.xlu0 %2434  ;;  %v2425_v0 = vpop.permute.xlu1 %2424 }
 0x50b   :  { %v11706_v57 = vpop.permute.xlu0 %2039  ;;  %v2431_v10 = vpop.permute.xlu1 %2430 }
 0x50c   :  { %9174 = vmatprep.subr.bf16.mxu0 %v11706_v57 }
 0x50d   :  { %9155 = vmatpush3.bf16.xpose.msra.mxu1 %v1777_v24  ;;  %v11792_v24 = vld [vmem:[%s15423_s23 + $0x18] sm:$0xff] }
 0x50e   :  { %9985 = vmatprep.subr.msk.bf16.mxu1 %vm122_vm1, %v1733_v46  ;;  %15425 = vst [vmem:[#allocation23_spill] sm:$0xff] %v11792_v24 }
 0x50f   :  { %v11727_v28 = vpop.permute.xlu0 %2043  ;;  %v2433_v12 = vpop.permute.xlu1 %2432 }
 0x510   :  { %15417 = vst [vmem:[#allocation16_spill] sm:$0xff] %v11727_v28 }
 0x513   :  { %v11731_v8 = vpop.permute.xlu0 %2045  ;;  %v11739_v14 = vpop.permute.xlu1 %2041 }
 0x514   :  { %15418 = vst [vmem:[#allocation17_spill] sm:$0xff] %v11731_v8  ;;  %15420 = vst [vmem:[#allocation19_spill] sm:$0xff] %v11739_v14 }
 0x515   :  { %9157 = vmatpush3.bf16.xpose.msra.mxu1 %v1780_v61 }
 0x516   :  { %9986 = vmatprep.subr.msk.bf16.mxu1 %vm122_vm1, %v2439_v33 }
 0x517   :  { %v11735_v11 = vpop.permute.xlu0 %2051  ;;  %v11743_v20 = vpop.permute.xlu1 %2047 }
 0x518   :  { %15419 = vst [vmem:[#allocation18_spill] sm:$0xff] %v11735_v11  ;;  %15421 = vst [vmem:[#allocation20_spill] sm:$0xff] %v11743_v20 }
 0x51b   :  { %v3040_v13 = vpop.permute.xlu0 %3039 }
 0x51c   :  { %9159 = vmatmul.mubr.msk.bf16.vlgmr.msra.gmra.mrb[56].mxu1 %vm122_vm1, %v1705_v55  ;;  %v3080_v4 = vsel %vm122_vm1, %v3040_v13, 0 }
 0x51d   :  { %9162 = vmatprep.mubr.msk.bf16.mxu1 %vm122_vm1, %v1707_v16  ;;  %9243 = vmatpush3.bf16.xpose.msra.mxu1 %v2479_v63 }
 0x51e   :  { %9987 = vmatprep.subr.msk.bf16.mxu1 %vm122_vm1, %v2441_v2 }
 0x51f   :  { %v2453_v16 = vpop.permute.xlu0 %2452 }
 0x524   :  { %9163 = vmatmul.mubr.msk.bf16.gmra.mrb[60].mxu1 %vm122_vm1, %v1709_v56 }
 0x525   :  { %9166 = vmatprep.mubr.msk.bf16.mxu1 %vm122_vm1, %v1711_v23  ;;  %9245 = vmatpush3.bf16.xpose.msra.mxu1 %v2482_v3  ;;  %v2500_v23 = vsel %vm122_vm1, %v2453_v16, 0  ;;  %v11810_v3 = vld [vmem:[%s15423_s23 + $0x20] sm:$0xff] }
 0x526   :  { %9988 = vmatprep.subr.msk.bf16.mxu1 %vm122_vm1, %v2443_v37  ;;  %15427 = vst [vmem:[#allocation25_spill] sm:$0xff] %v11810_v3 }
 0x52c   :  { %9167 = vmatmul.mubr.msk.bf16.gmra.mrb[64].mxu1 %vm122_vm1, %v1713_v60  ;;  %v11798_v60 = vld [vmem:[%s15423_s23 + $0x30] sm:$0xff] }
 0x52d   :  { %9170 = vmatprep.mubr.msk.bf16.mxu1 %vm122_vm1, %v1715_v35  ;;  %9247 = vmatpush3.bf16.xpose.msra.mxu1 %v2485_v36  ;;  %v11747_v35 = vpop.permute.xlu1 %2049  ;;  %15426 = vst [vmem:[#allocation24_spill] sm:$0xff] %v11798_v60 }
 0x52e   :  { %9989 = vmatprep.subr.msk.bf16.mxu1 %vm122_vm1, %v2445_v5  ;;  %15422 = vst [vmem:[#allocation21_spill] sm:$0xff] %v11747_v35 }
 0x531   :  { %v3042_v29 = vpop.permute.xlu1 %3041 }
 0x532   :  { %v3083_v33 = vsel %vm122_vm1, %v3042_v29, 0 }
 0x534   :  { %9171 = vmatmul.mubr.msk.bf16.gmra.mrb[68].mxu1 %vm122_vm1, %v1717_v62 }
 0x535   :  { %9249 = vmatpush3.bf16.xpose.msra.mxu1 %v2488_v7  ;;  %9258 = vmatprep.mubr.msk.bf16.mxu1 %vm122_vm1, %v2423_v6  ;;  %v3044_v37 = vpop.permute.xlu1 %3043  ;;  %v11820_v6 = vld [vmem:[%s15423_s23 + $0x38] sm:$0xff]  ;;  %v11825_v7 = vld [vmem:[%s15423_s23 + $0x50] sm:$0xff] }
 0x536   :  { %9990 = vmatprep.subr.msk.bf16.mxu1 %vm122_vm1, %v2447_v40  ;;  %v3086_v39 = vsel %vm122_vm1, %v3044_v37, 0  ;;  %v2437_v40 = vpop.permute.xlu0 %2436  ;;  %15428 = vst [vmem:[#allocation26_spill] sm:$0xff] %v11820_v6  ;;  %15429 = vst [vmem:[#allocation27_spill] sm:$0xff] %v11825_v7 }
 0x53d   :  { %9251 = vmatpush3.bf16.xpose.msra.mxu1 %v2491_v9 }
 0x53e   :  { %9991 = vmatprep.subr.msk.bf16.mxu1 %vm122_vm1, %v2449_v38 }
 0x545   :  { %9253 = vmatpush3.bf16.xpose.msra.mxu1 %v2494_v30 }
 0x546   :  { %9992 = vmatprep.subr.msk.bf16.mxu1 %vm122_vm1, %v2451_v41 }
 0x54d   :  { %9255 = vmatpush3.bf16.xpose.msra.mxu1 %v2497_v15 }
 0x54e   :  { %9993 = vmatprep.subr.msk.bf16.mxu1 %vm122_vm1, %v2453_v16 }
 0x555   :  { %9257 = vmatpush3.bf16.xpose.msra.mxu1 %v2500_v23 }
 0x556   :  { %9994 = vmatprep.subr.msk.bf16.mxu1 %vm122_vm1, %v3040_v13  ;;  %v11842_v13 = vld [vmem:[%s15423_s23 + $0x40] sm:$0xff] }
 0x557   :  { %15431 = vst [vmem:[#allocation29_spill] sm:$0xff] %v11842_v13 }
 0x55c   :  { %9259 = vmatmul.mubr.msk.bf16.vlgmr.msra.gmra.mrb[72].mxu1 %vm122_vm1, %v2425_v0 }
 0x55d   :  { %9262 = vmatprep.mubr.msk.bf16.mxu1 %vm122_vm1, %v11698_v47  ;;  %9325 = vmatpush3.bf16.xpose.msra.mxu1 %v3080_v4  ;;  %v11775_v47 = vld [vmem:[%s15423_s23 + $0x8] sm:$0xff] }
 0x55e   :  { %9995 = vmatprep.subr.msk.bf16.mxu1 %vm122_vm1, %v3042_v29  ;;  %v11855_v29 = vld [vmem:[%s15423_s23 + $0x58] sm:$0xff] }
 0x55f   :  { %15432 = vst [vmem:[#allocation30_spill] sm:$0xff] %v11855_v29 }
 0x564   :  { %9263 = vmatmul.mubr.msk.bf16.gmra.mrb[76].mxu1 %vm122_vm1, %v11700_v52  ;;  %v11780_v52 = vld [vmem:[%s15423_s23] sm:$0xff] }
 0x565   :  { %9266 = vmatprep.mubr.msk.bf16.mxu1 %vm122_vm1, %v2431_v10  ;;  %9327 = vmatpush3.bf16.xpose.msra.mxu1 %v3083_v33  ;;  %15424 = vst [vmem:[#allocation22_spill] sm:$0xff] %v11780_v52  ;;  %v11860_v33 = vld [vmem:[%s15423_s23 + $0x48] sm:$0xff] }
 0x566   :  { %9996 = vmatprep.subr.msk.bf16.mxu1 %vm122_vm1, %v3044_v37  ;;  %15433 = vst [vmem:[#allocation31_spill] sm:$0xff] %v11860_v33 }
 0x56c   :  { %9267 = vmatmul.mubr.msk.bf16.gmra.mrb[80].mxu1 %vm122_vm1, %v2433_v12  ;;  %v11837_v12 = vld [vmem:[%s15423_s23 + $0x28] sm:$0xff] }
 0x56d   :  { %9270 = vmatprep.mubr.msk.bf16.mxu1 %vm122_vm1, %v11704_v21  ;;  %9329 = vmatpush3.bf16.xpose.msra.mxu1 %v3086_v39  ;;  %15430 = vst [vmem:[#allocation28_spill] sm:$0xff] %v11837_v12 }
 0x574   :  { %9271 = vmatmul.mubr.msk.bf16.gmra.mrb[84].mxu1 %vm122_vm1, %v2437_v40 }
 0x5af   :  { %v9096_v41 = vpop.f32.mrb[40].mxu1 }
 0x5b0   :  { %v11770_v42 = vadd.f32 %v9096_v41, %v11767_v18  ;;  %v1382_v46 = vpop.f32.mrb[41].mxu1 }
 0x5b1   :  { %v9097_v45 = vpop.f32.mrb[42].mxu1  ;;  %v11787_v56 = vadd.f32 %v1382_v46, %v11780_v52  ;;  %v1274_v46 = vld [vmem:[%s15423_s23 + $0x70] sm:$0xff] }
 0x5b2   :  { %1449 = vmax.xlane.f32.xlu0 %v11770_v42  ;;  %v1385_v55 = vpop.f32.mrb[43].mxu1  ;;  %v11802_v62 = vadd.f32 %v9097_v45, %v11792_v24 }
 0x5b3   :  { %v11784_v21 = vadd.f32 %v1385_v55, %v11775_v47 }
 0x5b5   :  { %1447 = vmax.xlane.f32.xlu1 %v11784_v21 }
 0x5b6   :  { %1445 = vmax.xlane.f32.xlu0 %v11787_v56 }
 0x5b7   :  { %v9100_v61 = vpop.f32.mrb[44].mxu1 }
 0x5b8   :  { %v11805_v63 = vadd.f32 %v9100_v61, %v11798_v60  ;;  %v1398_v2 = vpop.f32.mrb[45].mxu1 }
 0x5b9   :  { %v9101_v5 = vpop.f32.mrb[46].mxu1  ;;  %v11815_v38 = vadd.f32 %v1398_v2, %v11810_v3  ;;  %v1272_v2 = vld [vmem:[%s15423_s23 + $0x60] sm:$0xff] }
 0x5ba   :  { %v1401_v36 = vpop.f32.mrb[47].mxu1  ;;  %1457 = vmax.xlane.f32.xlu1 %v11805_v63  ;;  %1451 = vmax.xlane.f32.xlu0 %v11802_v62  ;;  %v11829_v9 = vadd.f32 %v9101_v5, %v11820_v6 }
 0x5bb   :  { %v11847_v23 = vadd.f32 %v1401_v36, %v11837_v12  ;;  %v1275_v36 = vld [vmem:[%s15423_s23 + $0x78] sm:$0xff] }
 0x5be   :  { %1453 = vmax.xlane.f32.xlu1 %v11815_v38 }
 0x5bf   :  { %v9104_v0 = vpop.f32.mrb[48].mxu1 }
 0x5c0   :  { %v11832_v10 = vadd.f32 %v9104_v0, %v11825_v7  ;;  %v1414_v30 = vpop.f32.mrb[49].mxu1 }
 0x5c1   :  { %v9105_v15 = vpop.f32.mrb[50].mxu1  ;;  %v11850_v4 = vadd.f32 %v1414_v30, %v11842_v13  ;;  %v11892_v30 = vld [vmem:[%s15423_s23 + $0x68] sm:$0xff] }
 0x5c2   :  { %v1417_v16 = vpop.f32.mrb[51].mxu1  ;;  %1459 = vmax.xlane.f32.xlu1 %v11829_v9  ;;  %1465 = vmax.xlane.f32.xlu0 %v11832_v10  ;;  %v11865_v39 = vadd.f32 %v9105_v15, %v11855_v29  ;;  %15434 = vst [vmem:[#allocation32_spill] sm:$0xff] %v11892_v30 }
 0x5c3   :  { %v11868_v40 = vadd.f32 %v1417_v16, %v11860_v33 }
 0x5c6   :  { %1455 = vmax.xlane.f32.xlu1 %v11847_v23  ;;  %1461 = vmax.xlane.f32.xlu0 %v11850_v4 }
 0x5c7   :  { %v9108_v37 = vpop.f32.mrb[52].mxu1 }
 0x5c8   :  { %v1430_v41 = vpop.f32.mrb[53].mxu1  ;;  %v11875_v61 = vadd.f32 %v9108_v37, %v1274_v46 }
 0x5c9   :  { %v9109_v45 = vpop.f32.mrb[54].mxu1  ;;  %v11881_v5 = vadd.f32 %v1430_v41, %v1272_v2 }
 0x5ca   :  { %v1433_v55 = vpop.f32.mrb[55].mxu1  ;;  %1463 = vmax.xlane.f32.xlu1 %v11868_v40  ;;  %1467 = vmax.xlane.f32.xlu0 %v11865_v39  ;;  %v11887_v0 = vadd.f32 %v9109_v45, %v1275_v36 }
 0x5cb   :  { %v11896_v15 = vadd.f32 %v1433_v55, %v11892_v30 }
 0x5ce   :  { %1473 = vmax.xlane.f32.xlu1 %v11875_v61 }
 0x5d2   :  { %1469 = vmax.xlane.f32.xlu1 %v11881_v5 }
 0x5d6   :  { %1475 = vmax.xlane.f32.xlu1 %v11887_v0 }
 0x5da   :  { %1471 = vmax.xlane.f32.xlu1 %v11896_v15 }
 0x5ef   :  { %v9160_v16 = vpop.f32.mrb[56].mxu1 }
 0x5f0   :  { %v11900_v37 = vadd.f32 %v9160_v16, %v11767_v18  ;;  %v1816_v41 = vpop.f32.mrb[57].mxu1 }
 0x5f1   :  { %v9161_v34 = vpop.f32.mrb[58].mxu1  ;;  %v11907_v22 = vadd.f32 %v1816_v41, %v11780_v52 }
 0x5f2   :  { %v1819_v45 = vpop.f32.mrb[59].mxu1  ;;  %1883 = vmax.xlane.f32.xlu1 %v11900_v37  ;;  %v11912_v31 = vadd.f32 %v9161_v34, %v11792_v24 }
 0x5f3   :  { %v11904_v32 = vadd.f32 %v1819_v45, %v11775_v47 }
 0x5f5   :  { %1881 = vmax.xlane.f32.xlu0 %v11904_v32 }
 0x5f6   :  { %1879 = vmax.xlane.f32.xlu1 %v11907_v22 }
 0x5f7   :  { %v9164_v55 = vpop.f32.mrb[60].mxu1 }
 0x5f8   :  { %v11915_v16 = vadd.f32 %v9164_v55, %v11798_v60  ;;  %v1832_v26 = vpop.f32.mrb[61].mxu1 }
 0x5f9   :  { %v9165_v44 = vpop.f32.mrb[62].mxu1  ;;  %v11923_v45 = vadd.f32 %v1832_v26, %v11810_v3 }
 0x5fa   :  { %v1835_v27 = vpop.f32.mrb[63].mxu1  ;;  %1885 = vmax.xlane.f32.xlu1 %v11912_v31  ;;  %1891 = vmax.xlane.f32.xlu0 %v11915_v16  ;;  %v11928_v55 = vadd.f32 %v9165_v44, %v11820_v6 }
 0x5fb   :  { %v11920_v41 = vadd.f32 %v1835_v27, %v11837_v12 }
 0x5fe   :  { %1889 = vmax.xlane.f32.xlu1 %v11920_v41  ;;  %1887 = vmax.xlane.f32.xlu0 %v11923_v45 }
 0x5ff   :  { %v9168_v34 = vpop.f32.mrb[64].mxu1 }
 0x600   :  { %v11931_v1 = vadd.f32 %v9168_v34, %v11825_v7  ;;  %v1848_v51 = vpop.f32.mrb[65].mxu1 }
 0x601   :  { %v9169_v54 = vpop.f32.mrb[66].mxu1  ;;  %v11939_v26 = vadd.f32 %v1848_v51, %v11842_v13 }
 0x602   :  { %v1851_v19 = vpop.f32.mrb[67].mxu1  ;;  %1899 = vmax.xlane.f32.xlu1 %v11931_v1  ;;  %1893 = vmax.xlane.f32.xlu0 %v11928_v55  ;;  %v11944_v34 = vadd.f32 %v9169_v54, %v11855_v29 }
 0x603   :  { %v11936_v27 = vadd.f32 %v1851_v19, %v11860_v33 }
 0x606   :  { %1895 = vmax.xlane.f32.xlu1 %v11939_v26  ;;  %1897 = vmax.xlane.f32.xlu0 %v11936_v27 }
 0x607   :  { %v9172_v44 = vpop.f32.mrb[68].mxu1 }
 0x608   :  { %v11946_v49 = vadd.f32 %v9172_v44, %v1274_v46  ;;  %v1864_v6 = vpop.f32.mrb[69].mxu1 }
 0x609   :  { %v9173_v3 = vpop.f32.mrb[70].mxu1  ;;  %v11953_v51 = vadd.f32 %v1864_v6, %v1272_v2 }
 0x60a   :  { %v1867_v7 = vpop.f32.mrb[71].mxu1  ;;  %1901 = vmax.xlane.f32.xlu1 %v11944_v34  ;;  %1907 = vmax.xlane.f32.xlu0 %v11946_v49  ;;  %v11957_v54 = vadd.f32 %v9173_v3, %v1275_v36  ;;  %v11976_v3 = vpop.permute.xlu1 %2053 }
 0x60b   :  { %v11951_v19 = vadd.f32 %v1867_v7, %v11892_v30  ;;  %15442 = vst [vmem:[#allocation40_spill] sm:$0xff] %v11976_v3 }
 0x60e   :  { %1905 = vmax.xlane.f32.xlu1 %v11951_v19  ;;  %1903 = vmax.xlane.f32.xlu0 %v11953_v51 }
 0x612   :  { %1909 = vmax.xlane.f32.xlu0 %v11957_v54 }
 0x62f   :  { %v11960_v46 = vpop.f32.mrb[72].mxu1 }
 0x630   :  { %15435 = vst [vmem:[#allocation33_spill] sm:$0xff] %v11960_v46  ;;  %v11962_v44 = vpop.f32.mrb[73].mxu1 }
 0x631   :  { %15436 = vst [vmem:[#allocation34_spill] sm:$0xff] %v11962_v44  ;;  %v11964_v29 = vpop.f32.mrb[74].mxu1 }
 0x632   :  { %15437 = vst [vmem:[#allocation35_spill] sm:$0xff] %v11964_v29  ;;  %v11966_v33 = vpop.f32.mrb[75].mxu1 }
 0x637   :  { %v11968_v7 = vpop.f32.mrb[76].mxu1 }
 0x638   :  { %15438 = vst [vmem:[#allocation36_spill] sm:$0xff] %v11968_v7  ;;  %v11970_v6 = vpop.f32.mrb[77].mxu1 }
 0x639   :  { %15439 = vst [vmem:[#allocation37_spill] sm:$0xff] %v11970_v6  ;;  %v11972_v2 = vpop.f32.mrb[78].mxu1 }
 0x63a   :  { %15440 = vst [vmem:[#allocation38_spill] sm:$0xff] %v11972_v2  ;;  %v11974_v30 = vpop.f32.mrb[79].mxu1 }
 0x63b   :  { %15441 = vst [vmem:[#allocation39_spill] sm:$0xff] %v11974_v30 }
 0x63f   :  { %v1450_v36 = vpop.xlane.xlu0 %1449  ;;  %v11978_v13 = vpop.f32.mrb[80].mxu1 }
 0x640   :  { %15443 = vst [vmem:[#allocation41_spill] sm:$0xff] %v11978_v13  ;;  %v1479_v60 = vsub.f32 %v11770_v42, %v1450_v36  ;;  %v11981_v12 = vpop.f32.mrb[81].mxu1 }
 0x641   :  { %15444 = vst [vmem:[#allocation42_spill] sm:$0xff] %v11981_v12  ;;  %v11983_v29 = vpop.f32.mrb[82].mxu1 }
 0x642   :  { %15445 = vst [vmem:[#allocation43_spill] sm:$0xff] %v11983_v29  ;;  %v1497_v24 = vmul.f32 1.442695, %v1479_v60  ;;  %v11985_v11 = vpop.f32.mrb[83].mxu1  ;;  %v1448_v7 = vpop.xlane.xlu1 %1447 }
 0x643   :  { %15446 = vst [vmem:[#allocation44_spill] sm:$0xff] %v11985_v11  ;;  %v1478_v6 = vsub.f32 %v11784_v21, %v1448_v7  ;;  %v1446_v2 = vpop.xlane.xlu0 %1445 }
 0x644   :  { %10158 = vpow2.f32 %v1497_v24  ;;  %v1477_v30 = vsub.f32 %v11787_v56, %v1446_v2 }
 0x645   :  { %v1495_v3 = vmul.f32 1.442695, %v1478_v6 }
 0x646   :  { %v1493_v44 = vmul.f32 1.442695, %v1477_v30 }
 0x647   :  { %10160 = vpow2.f32 %v1495_v3  ;;  %v11989_v13 = vpop.f32.mrb[84].mxu1  ;;  %v1452_v42 = vpop.xlane.xlu0 %1451 }
 0x648   :  { %15447 = vst [vmem:[#allocation45_spill] sm:$0xff] %v11989_v13  ;;  %10162 = vpow2.f32 %v1493_v44  ;;  %v11991_v36 = vpop.f32.mrb[85].mxu1  ;;  %v1480_v60 = vsub.f32 %v11802_v62, %v1452_v42  ;;  %v1458_v21 = vpop.xlane.xlu1 %1457 }
 0x649   :  { %15448 = vst [vmem:[#allocation46_spill] sm:$0xff] %v11991_v36  ;;  %v11994_v29 = vpop.f32.mrb[86].mxu1  ;;  %v1483_v52 = vsub.f32 %v11805_v63, %v1458_v21 }
 0x64a   :  { %15449 = vst [vmem:[#allocation47_spill] sm:$0xff] %v11994_v29  ;;  %v11996_v11 = vpop.f32.mrb[87].mxu1  ;;  %v1499_v7 = vmul.f32 1.442695, %v1480_v60 }
 0x64b   :  { %15450 = vst [vmem:[#allocation48_spill] sm:$0xff] %v11996_v11  ;;  %v1505_v28 = vmul.f32 1.442695, %v1483_v52 }
 0x64c   :  { %10164 = vpow2.f32 %v1499_v7  ;;  %v1454_v30 = vpop.xlane.xlu1 %1453 }
 0x64e   :  { %v11998_v24 = vpop.eup %10158 }
 0x64f   :  { %1529 = vadd.xlane.f32.xlu1 %v11998_v24  ;;  %v1466_v7 = vpop.xlane.xlu0 %1465 }
 0x650   :  { %v1460_v6 = vpop.xlane.xlu1 %1459  ;;  %v1487_v29 = vsub.f32 %v11832_v10, %v1466_v7 }
 0x651   :  { %v12001_v56 = vpop.eup %10160 }
 0x652   :  { %v12003_v44 = vpop.eup %10162  ;;  %1527 = vadd.xlane.f32.xlu0 %v12001_v56  ;;  %v1513_v13 = vmul.f32 1.442695, %v1487_v29 }
 0x653   :  { %1525 = vadd.xlane.f32.xlu1 %v12003_v44  ;;  %v1462_v11 = vpop.xlane.xlu0 %1461 }
 0x654   :  { %v1456_v2 = vpop.xlane.xlu1 %1455  ;;  %10166 = vpow2.f32 %v1513_v13 }
 0x656   :  { %v12007_v62 = vpop.eup %10164 }
 0x657   :  { %1531 = vadd.xlane.f32.xlu1 %v12007_v62  ;;  %v1468_v14 = vpop.xlane.xlu0 %1467 }
 0x658   :  { %v12010_v3 = vpop.xlane.xlu1 %1463 }
 0x65c   :  { %v1474_v42 = vpop.xlane.xlu1 %1473 }
 0x65d   :  { %v1491_v12 = vsub.f32 %v11875_v61, %v1474_v42  ;;  %v1484_v61 = vsub.f32 %v11829_v9, %v1460_v6  ;;  %v1485_v9 = vsub.f32 %v11850_v4, %v1462_v11 }
 0x65f   :  { %v1521_v20 = vmul.f32 1.442695, %v1491_v12  ;;  %v12032_v12 = vpop.eup %10166  ;;  %v1507_v52 = vmul.f32 1.442695, %v1484_v61  ;;  %v1486_v61 = vsub.f32 %v11868_v40, %v12010_v3 }
 0x660   :  { %v1470_v60 = vpop.xlane.xlu1 %1469 }
 0x661   :  { %v1489_v8 = vsub.f32 %v11881_v5, %v1470_v60  ;;  %10168 = vpow2.f32 %v1521_v20  ;;  %v1488_v60 = vsub.f32 %v11865_v39, %v1468_v14 }
 0x662   :  { %10170 = vpow2.f32 %v1505_v28 }
 0x663   :  { %v1517_v10 = vmul.f32 1.442695, %v1489_v8 }
 0x664   :  { %v12017_v36 = vpop.xlane.xlu1 %1475 }
 0x665   :  { %10172 = vpow2.f32 %v1517_v10 }
 0x668   :  { %3045 = vrot.lane.b32.xlu0 %v11497_v53, %s10895_s4  ;;  %3047 = vrot.lane.b32.xlu1 %v11534_v25, %s10895_s4  ;;  %v12021_v35 = vpop.xlane.xlu1 %1471  ;;  %v1481_v25 = vsub.f32 %v11815_v38, %v1454_v30  ;;  %v1482_v38 = vsub.f32 %v11847_v23, %v1456_v2  ;;  %v1509_v2 = vmul.f32 1.442695, %v1485_v9 }
 0x66a   :  { %v1501_v29 = vmul.f32 1.442695, %v1481_v25  ;;  %v1503_v20 = vmul.f32 1.442695, %v1482_v38 }
 0x66b   :  { %v12039_v28 = vpop.eup %10168 }
 0x66c   :  { %10174 = vpow2.f32 %v1501_v29  ;;  %v12045_v23 = vpop.eup %10170 }
 0x66d   :  { %10176 = vpow2.f32 %v1507_v52  ;;  %v1515_v52 = vmul.f32 1.442695, %v1488_v60 }
 0x67f   :  { %v12025_v46 = vpop.xlane.xlu1 %1883 }
 0x682   :  { %v12028_v42 = vpop.xlane.xlu0 %1881 }
 0x683   :  { %v12030_v63 = vpop.xlane.xlu1 %1879 }
 0x687   :  { %v12035_v13 = vpop.xlane.xlu1 %1885  ;;  %1545 = vadd.xlane.f32.xlu0 %v12032_v12  ;;  %v1892_v8 = vpop.xlane.xlu0 %1891 }
 0x688   :  { %v1917_v25 = vsub.f32 %v11915_v16, %v1892_v8  ;;  %v12049_v16 = vpop.eup %10172 }
 0x689   :  { %v12053_v10 = vpop.eup %10174 }
 0x68a   :  { %v1939_v5 = vmul.f32 1.442695, %v1917_v25  ;;  %v12062_v8 = vpop.eup %10176 }
 0x68b   :  { %v12042_v21 = vpop.xlane.xlu1 %1889  ;;  %1553 = vadd.xlane.f32.xlu0 %v12039_v28  ;;  %v1888_v30 = vpop.xlane.xlu0 %1887 }
 0x68c   :  { %v1915_v6 = vsub.f32 %v11923_v45, %v1888_v30  ;;  %10178 = vpow2.f32 %v1939_v5  ;;  %1537 = vadd.xlane.f32.xlu1 %v12045_v23 }
 0x68d   :  { %10180 = vpow2.f32 %v1503_v20  ;;  %v1492_v20 = vsub.f32 %v11887_v0, %v12017_v36  ;;  %v1490_v0 = vsub.f32 %v11896_v15, %v12021_v35 }
 0x68e   :  { %v1935_v11 = vmul.f32 1.442695, %v1915_v6 }
 0x68f   :  { %v1900_v4 = vpop.xlane.xlu1 %1899  ;;  %1549 = vadd.xlane.f32.xlu0 %v12049_v16  ;;  %v1894_v7 = vpop.xlane.xlu0 %1893  ;;  %v1523_v6 = vmul.f32 1.442695, %v1492_v20 }
 0x690   :  { %v1918_v29 = vsub.f32 %v11928_v55, %v1894_v7  ;;  %10182 = vpow2.f32 %v1935_v11  ;;  %v1921_v45 = vsub.f32 %v11931_v1, %v1900_v4  ;;  %1533 = vadd.xlane.f32.xlu1 %v12053_v10  ;;  %v1511_v1 = vmul.f32 1.442695, %v1486_v61 }
 0x691   :  { %10184 = vpow2.f32 %v1509_v2  ;;  %v1913_v4 = vsub.f32 %v11900_v37, %v12025_v46  ;;  %v1911_v37 = vsub.f32 %v11907_v22, %v12030_v63  ;;  %v1912_v22 = vsub.f32 %v11904_v32, %v12028_v42 }
 0x692   :  { %v1941_v14 = vmul.f32 1.442695, %v1918_v29  ;;  %v1947_v25 = vmul.f32 1.442695, %v1921_v45 }
 0x693   :  { %v1896_v39 = vpop.xlane.xlu1 %1895  ;;  %v12060_v38 = vpop.xlane.xlu0 %1897 }
 0x694   :  { %10186 = vpow2.f32 %v1941_v14  ;;  %v1919_v55 = vsub.f32 %v11939_v26, %v1896_v39  ;;  %1539 = vadd.xlane.f32.xlu1 %v12062_v8  ;;  %v1920_v42 = vsub.f32 %v11936_v27, %v12060_v38 }
 0x695   :  { %10188 = vpow2.f32 %v1515_v52  ;;  %v1931_v52 = vmul.f32 1.442695, %v1913_v4 }
 0x696   :  { %v12068_v9 = vpop.eup %10178  ;;  %10190 = vpow2.f32 %v1947_v25  ;;  %v1943_v30 = vmul.f32 1.442695, %v1919_v55 }
 0x697   :  { %v1902_v40 = vpop.xlane.xlu1 %1901  ;;  %v12070_v3 = vpop.xlane.xlu0 %1907  ;;  %1971 = vadd.xlane.f32.xlu0 %v12068_v9  ;;  %10192 = vpow2.f32 %v1511_v1 }
 0x698   :  { %v12072_v5 = vpop.eup %10180  ;;  %v1922_v26 = vsub.f32 %v11944_v34, %v1902_v40  ;;  %10194 = vpow2.f32 %v1943_v30  ;;  %v1519_v34 = vmul.f32 1.442695, %v1490_v0  ;;  %v1916_v30 = vsub.f32 %v11920_v41, %v12042_v21 }
 0x699   :  { %1535 = vadd.xlane.f32.xlu1 %v12072_v5  ;;  %10196 = vpow2.f32 %v1523_v6  ;;  %v1945_v41 = vmul.f32 1.442695, %v1920_v42  ;;  %v1925_v21 = vsub.f32 %v11946_v49, %v12070_v3  ;;  %v15452_v42 = vld [vmem:[#allocation19_spill] sm:$0xff] }
 0x69a   :  { %v12079_v36 = vpop.eup %10182  ;;  %v1949_v11 = vmul.f32 1.442695, %v1922_v26  ;;  %v1937_v32 = vmul.f32 1.442695, %v1916_v30  ;;  %v12183_v30 = vadd.f32 %v11966_v33, %v11775_v47  ;;  %v15454_v47 = vld [vmem:[#allocation17_spill] sm:$0xff]  ;;  %v15455_v33 = vld [vmem:[#allocation20_spill] sm:$0xff] }
 0x69b   :  { %v12081_v2 = vpop.xlane.xlu0 %1903  ;;  %v12083_v60 = vpop.eup %10184  ;;  %1967 = vadd.xlane.f32.xlu0 %v12079_v36 }
 0x69c   :  { %v1906_v7 = vpop.xlane.xlu1 %1905  ;;  %10198 = vpow2.f32 %v1949_v11  ;;  %v1923_v27 = vsub.f32 %v11953_v51, %v12081_v2 }
 0x69d   :  { %1541 = vadd.xlane.f32.xlu1 %v12083_v60  ;;  %v1924_v61 = vsub.f32 %v11951_v19, %v1906_v7  ;;  %10200 = vpow2.f32 %v1519_v34  ;;  %v1927_v19 = vmul.f32 1.442695, %v1911_v37  ;;  %v1955_v34 = vmul.f32 1.442695, %v1925_v21  ;;  %v15459_v21 = vld [vmem:[#allocation18_spill] sm:$0xff] }
 0x69e   :  { %v12089_v29 = vpop.eup %10186  ;;  %v1951_v4 = vmul.f32 1.442695, %v1923_v27  ;;  %v15461_v27 = vld [vmem:[#allocation35_spill] sm:$0xff] }
 0x69f   :  { %v1910_v35 = vpop.xlane.xlu0 %1909  ;;  %v12091_v15 = vpop.eup %10188  ;;  %1973 = vadd.xlane.f32.xlu0 %v12089_v29  ;;  %v1953_v25 = vmul.f32 1.442695, %v1924_v61 }
 0x6a0   :  { %v1926_v45 = vsub.f32 %v11957_v54, %v1910_v35  ;;  %v12099_v14 = vpop.eup %10190  ;;  %v1914_v54 = vsub.f32 %v11912_v31, %v12035_v13  ;;  %v1929_v13 = vmul.f32 1.442695, %v1912_v22 }
 0x6a1   :  { %1547 = vadd.xlane.f32.xlu1 %v12091_v15  ;;  %v12101_v39 = vpop.eup %10192 }
 0x6a2   :  { %v1957_v46 = vmul.f32 1.442695, %v1926_v45  ;;  %v12107_v55 = vpop.eup %10194  ;;  %v1933_v63 = vmul.f32 1.442695, %v1914_v54 }
 0x6a3   :  { %1979 = vadd.xlane.f32.xlu0 %v12099_v14  ;;  %v12109_v1 = vpop.eup %10196 }
 0x6a4   :  { %10202 = vpow2.f32 %v1957_v46 }
 0x6a5   :  { %1543 = vadd.xlane.f32.xlu1 %v12101_v39  ;;  %10204 = vpow2.f32 %v1931_v52 }
 0x6a6   :  { %10206 = vpow2.f32 %v1953_v25  ;;  %v12115_v20 = vpop.eup %10198 }
 0x6a7   :  { %1975 = vadd.xlane.f32.xlu0 %v12107_v55  ;;  %10208 = vpow2.f32 %v1927_v19  ;;  %v12117_v40 = vpop.eup %10200 }
 0x6a8   :  { %10210 = vpow2.f32 %v1933_v63 }
 0x6a9   :  { %1555 = vadd.xlane.f32.xlu1 %v12109_v1  ;;  %10212 = vpow2.f32 %v1929_v13 }
 0x6aa   :  { %10214 = vpow2.f32 %v1937_v32 }
 0x6ab   :  { %1981 = vadd.xlane.f32.xlu0 %v12115_v20  ;;  %10216 = vpow2.f32 %v1945_v41 }
 0x6ac   :  { %10218 = vpow2.f32 %v1955_v34  ;;  %v15460_v34 = vld [vmem:[#allocation23_spill] sm:$0xff] }
 0x6ad   :  { %1551 = vadd.xlane.f32.xlu1 %v12117_v40  ;;  %10220 = vpow2.f32 %v1951_v4  ;;  %v12210_v4 = vadd.f32 %v15461_v27, %v15460_v34 }
 0x6ae   :  { %v12121_v31 = vpop.eup %10202 }
 0x6af   :  { %v12125_v26 = vpop.eup %10204  ;;  %1989 = vadd.xlane.f32.xlu0 %v12121_v31 }
 0x6b0   :  { %v12131_v6 = vpop.eup %10206 }
 0x6b1   :  { %1963 = vadd.xlane.f32.xlu1 %v12125_v26  ;;  %v12133_v0 = vpop.eup %10208 }
 0x6b2   :  { %v12139_v11 = vpop.eup %10210 }
 0x6b3   :  { %1985 = vadd.xlane.f32.xlu0 %v12131_v6  ;;  %v12144_v38 = vpop.eup %10212 }
 0x6b4   :  { %v12147_v7 = vpop.eup %10214 }
 0x6b5   :  { %1959 = vadd.xlane.f32.xlu1 %v12133_v0  ;;  %v12150_v49 = vpop.eup %10216 }
 0x6b6   :  { %v12153_v3 = vpop.eup %10218 }
 0x6b7   :  { %v12158_v51 = vpop.eup %10220 }
 0x6b9   :  { %1965 = vadd.xlane.f32.xlu1 %v12139_v11 }
 0x6bd   :  { %1961 = vadd.xlane.f32.xlu1 %v12144_v38 }
 0x6c1   :  { %1969 = vadd.xlane.f32.xlu1 %v12147_v7 }
 0x6c5   :  { %1977 = vadd.xlane.f32.xlu1 %v12150_v49 }
 0x6c9   :  { %1987 = vadd.xlane.f32.xlu1 %v12153_v3  ;;  %3049 = vrot.lane.b32.xlu0 %v11546_v43, %s10895_s4 }
 0x6cd   :  { %1983 = vadd.xlane.f32.xlu1 %v12158_v51  ;;  %3053 = vrot.lane.b32.xlu0 %v11572_v59, %s10895_s4 }
 0x6d1   :  { %3025 = vrot.lane.b32.xlu0 %v11459_v50, %s10896_s27 }
 0x6d5   :  { %3029 = vrot.lane.b32.xlu0 %v11497_v53, %s10896_s27 }
 0x6dc   :  { %v1530_v2 = vpop.xlane.xlu1 %1529 }
 0x6de   :  { %3051 = vrot.lane.b32.xlu1 %v11558_v58, %s10895_s4 }
 0x6df   :  { %v1528_v35 = vpop.xlane.xlu0 %1527 }
 0x6e0   :  { %10222 = vrcp.f32 %v1528_v35  ;;  %v1526_v45 = vpop.xlane.xlu1 %1525  ;;  %v15463_v35 = vld [vmem:[#allocation11_spill] sm:$0xff] }
 0x6e1   :  { %10224 = vrcp.f32 %v1526_v45 }
 0x6e2   :  { %3023 = vrot.lane.b32.xlu1 %v11444_v48, %s10896_s27  ;;  %10226 = vrcp.f32 %v1530_v2  ;;  %v15462_v2 = vld [vmem:[#allocation40_spill] sm:$0xff] }
 0x6e3   :  { %v3046_v61 = vpop.permute.xlu0 %3045 }
 0x6e4   :  { %9997 = vmatprep.subr.msk.bf16.mxu1 %vm122_vm1, %v3046_v61  ;;  %v3089_v50 = vsel %vm122_vm1, %v3046_v61, 0  ;;  %v1532_v52 = vpop.xlane.xlu1 %1531 }
 0x6e5   :  { %9331 = vmatpush3.bf16.xpose.msra.mxu1 %v3089_v50  ;;  %10228 = vrcp.f32 %v1532_v52 }
 0x6e6   :  { %3027 = vrot.lane.b32.xlu1 %v11477_v17, %s10896_s27 }
 0x6e8   :  { %v3048_v53 = vpop.permute.xlu1 %3047 }
 0x6e9   :  { %9998 = vmatprep.subr.msk.bf16.mxu1 %vm122_vm1, %v3048_v53  ;;  %v3092_v48 = vsel %vm122_vm1, %v3048_v53, 0 }
 0x6ea   :  { %v10223_v37 = vpop.eup %10222 }
 0x6eb   :  { %v10225_v46 = vpop.eup %10224  ;;  %v1574_v25 = vmul.f32 %v10223_v37, %v12001_v56  ;;  %v15451_v56 = vld [vmem:[#allocation33_spill] sm:$0xff] }
 0x6ec   :  { %v1573_v19 = vmul.f32 %v10225_v46, %v12003_v44  ;;  %v10227_v54 = vpop.eup %10226  ;;  %v12189_v44 = vadd.f32 %v15451_v56, %v11767_v18  ;;  %v15457_v18 = vld [vmem:[#allocation22_spill] sm:$0xff] }
 0x6ed   :  { %9333 = vmatpush3.bf16.xpose.msra.mxu1 %v3092_v48  ;;  %v1575_v13 = vmul.f32 %v10227_v54, %v11998_v24  ;;  %v15453_v24 = vld [vmem:[#allocation16_spill] sm:$0xff] }
 0x6ee   :  { %v1589_v22 = vpack.c.bf16 %v1574_v25, %v1573_v19  ;;  %v15464_v54 = vld [vmem:[#allocation28_spill] sm:$0xff] }
 0x6ef   :  { %v10229_v63 = vpop.eup %10228 }
 0x6f0   :  { %9126 = vmatprep.mubr.bf16.mxu0 %v1589_v22  ;;  %v1576_v17 = vmul.f32 %v10229_v63, %v12007_v62  ;;  %v15458_v62 = vld [vmem:[#allocation34_spill] sm:$0xff]  ;;  %v15465_v22 = vld [vmem:[#allocation39_spill] sm:$0xff] }
 0x6f1   :  { %v12203_v41 = vadd.f32 %v15458_v62, %v15457_v18  ;;  %v12226_v63 = vadd.f32 %v15465_v22, %v15464_v54 }
 0x6f2   :  { %v1590_v32 = vpack.c.bf16 %v1576_v17, %v1575_v13 }
 0x6f4   :  { %2601 = vmax.xlane.f32.xlu0 %v12183_v30  ;;  %9127 = vmatmul.mubr.bf16.vlgmr.msra.gmra.mrb[76].mxu0 %v1590_v32 }
 0x6f5   :  { %9175 = vmatpush3.bf16.msra.mxu0 %v11706_v57  ;;  %v15456_v57 = vld [vmem:[#allocation21_spill] sm:$0xff] }
 0x6f6   :  { %9176 = vmatprep.subr.bf16.mxu0 %v15452_v42 }
 0x6f8   :  { %2603 = vmax.xlane.f32.xlu0 %v12189_v44 }
 0x6f9   :  { %9177 = vmatpush3.bf16.msra.mxu0 %v15452_v42  ;;  %v15466_v42 = vld [vmem:[#allocation24_spill] sm:$0xff] }
 0x6fa   :  { %9178 = vmatprep.subr.bf16.mxu0 %v15453_v24 }
 0x6fd   :  { %9179 = vmatpush3.bf16.msra.mxu0 %v15453_v24  ;;  %v15467_v24 = vld [vmem:[#allocation36_spill] sm:$0xff] }
 0x6fe   :  { %9180 = vmatprep.subr.bf16.mxu0 %v15454_v47 }
 0x701   :  { %9181 = vmatpush3.bf16.msra.mxu0 %v15454_v47  ;;  %v12233_v47 = vadd.f32 %v15467_v24, %v15466_v42 }
 0x702   :  { %9182 = vmatprep.subr.bf16.mxu0 %v15455_v33 }
 0x705   :  { %9183 = vmatpush3.bf16.msra.mxu0 %v15455_v33 }
 0x706   :  { %9184 = vmatprep.subr.bf16.mxu0 %v15456_v57 }
 0x709   :  { %9185 = vmatpush3.bf16.msra.mxu0 %v15456_v57 }
 0x70a   :  { %2599 = vmax.xlane.f32.xlu1 %v12203_v41  ;;  %9186 = vmatprep.subr.bf16.mxu0 %v15459_v21 }
 0x70d   :  { %9187 = vmatpush3.bf16.msra.mxu0 %v15459_v21 }
 0x70e   :  { %2605 = vmax.xlane.f32.xlu1 %v12210_v4  ;;  %9188 = vmatprep.subr.bf16.mxu0 %v15462_v2 }
 0x70f   :  { %3031 = vrot.lane.b32.xlu0 %v15463_v35, %s10896_s27  ;;  %v15469_v35 = vld [vmem:[#allocation42_spill] sm:$0xff] }
 0x711   :  { %9189 = vmatpush3.bf16.msra.mxu0 %v15462_v2  ;;  %v15468_v2 = vld [vmem:[#allocation29_spill] sm:$0xff] }
 0x714   :  { %v1546_v45 = vpop.xlane.xlu0 %1545 }
 0x718   :  { %v1554_v50 = vpop.xlane.xlu0 %1553 }
 0x719   :  { %v1538_v61 = vpop.xlane.xlu1 %1537 }
 0x71c   :  { %v1550_v53 = vpop.xlane.xlu0 %1549 }
 0x71d   :  { %v1534_v52 = vpop.xlane.xlu1 %1533 }
 0x71f   :  { %3033 = vrot.lane.b32.xlu1 %v11546_v43, %s10896_s27 }
 0x721   :  { %v1540_v37 = vpop.xlane.xlu1 %1539 }
 0x722   :  { %10230 = vrcp.f32 %v1540_v37 }
 0x723   :  { %10232 = vrcp.f32 %v1534_v52 }
 0x724   :  { %v12220_v46 = vpop.xlane.xlu0 %1971  ;;  %10234 = vrcp.f32 %v1538_v61  ;;  %v12244_v61 = vadd.f32 %v15469_v35, %v15468_v2 }
 0x726   :  { %v1536_v25 = vpop.xlane.xlu1 %1535 }
 0x727   :  { %10236 = vrcp.f32 %v1536_v25 }
 0x728   :  { %v12222_v48 = vpop.xlane.xlu0 %1967 }
 0x72a   :  { %v1542_v19 = vpop.xlane.xlu1 %1541 }
 0x72c   :  { %v12228_v13 = vpop.xlane.xlu0 %1973  ;;  %v10231_v17 = vpop.eup %10230 }
 0x72d   :  { %v10233_v32 = vpop.eup %10232  ;;  %v1580_v18 = vmul.f32 %v10231_v17, %v12062_v8 }
 0x72e   :  { %v1548_v43 = vpop.xlane.xlu1 %1547  ;;  %2609 = vmax.xlane.f32.xlu0 %v12226_v63  ;;  %v10235_v56 = vpop.eup %10234  ;;  %v1577_v21 = vmul.f32 %v10233_v32, %v12053_v10  ;;  %v15471_v10 = vld [vmem:[#allocation41_spill] sm:$0xff] }
 0x72f   :  { %10238 = vrcp.f32 %v1548_v43  ;;  %v1579_v27 = vmul.f32 %v10235_v56, %v12045_v23 }
 0x730   :  { %10240 = vrcp.f32 %v1542_v19  ;;  %v12235_v57 = vpop.xlane.xlu0 %1979 }
 0x731   :  { %v10237_v33 = vpop.eup %10236  ;;  %10242 = vrcp.f32 %v1546_v45  ;;  %v1592_v25 = vpack.c.bf16 %v1580_v18, %v1579_v27  ;;  %v15470_v45 = vld [vmem:[#allocation27_spill] sm:$0xff] }
 0x732   :  { %v1544_v62 = vpop.xlane.xlu1 %1543  ;;  %2611 = vmax.xlane.f32.xlu0 %v12233_v47  ;;  %v1578_v34 = vmul.f32 %v10237_v33, %v12072_v5  ;;  %v12251_v19 = vadd.f32 %v15471_v10, %v15470_v45 }
 0x733   :  { %10244 = vrcp.f32 %v1544_v62  ;;  %v15473_v62 = vld [vmem:[#allocation37_spill] sm:$0xff] }
 0x734   :  { %v1591_v52 = vpack.c.bf16 %v1578_v34, %v1577_v21  ;;  %v12246_v37 = vpop.xlane.xlu0 %1975 }
 0x736   :  { %v1556_v8 = vpop.xlane.xlu1 %1555  ;;  %2615 = vmax.xlane.f32.xlu0 %v12244_v61  ;;  %9130 = vmatprep.mubr.bf16.mxu0 %v1591_v52 }
 0x737   :  { %9131 = vmatmul.mubr.bf16.gmra.mrb[80].mxu0 %v1592_v25  ;;  %10246 = vrcp.f32 %v1556_v8  ;;  %v15474_v25 = vld [vmem:[#allocation26_spill] sm:$0xff] }
 0x738   :  { %10248 = vrcp.f32 %v1550_v53  ;;  %v12253_v23 = vpop.xlane.xlu0 %1981 }
 0x739   :  { %v10239_v5 = vpop.eup %10238  ;;  %10250 = vrcp.f32 %v1554_v50  ;;  %v15472_v50 = vld [vmem:[#allocation25_spill] sm:$0xff] }
 0x73a   :  { %v1552_v54 = vpop.xlane.xlu1 %1551  ;;  %2619 = vmax.xlane.f32.xlu0 %v12251_v19  ;;  %v10241_v22 = vpop.eup %10240  ;;  %v1584_v56 = vmul.f32 %v10239_v5, %v12091_v15  ;;  %v12264_v21 = vadd.f32 %v15473_v62, %v15472_v50 }
 0x73b   :  { %10252 = vrcp.f32 %v1552_v54  ;;  %v10243_v17 = vpop.eup %10242  ;;  %v1581_v24 = vmul.f32 %v10241_v22, %v12083_v60 }
 0x73c   :  { %v12256_v32 = vpop.xlane.xlu0 %1989  ;;  %v1583_v33 = vmul.f32 %v10243_v17, %v12032_v12 }
 0x73d   :  { %v10245_v43 = vpop.eup %10244 }
 0x73e   :  { %v1964_v42 = vpop.xlane.xlu1 %1963  ;;  %v1582_v53 = vmul.f32 %v10245_v43, %v12101_v39  ;;  %v1594_v27 = vpack.c.bf16 %v1584_v56, %v1583_v33  ;;  %v15475_v39 = vld [vmem:[#allocation38_spill] sm:$0xff]  ;;  %v15476_v56 = vld [vmem:[#allocation31_spill] sm:$0xff] }
 0x73f   :  { %v12269_v8 = vadd.f32 %v15475_v39, %v15474_v25 }
 0x740   :  { %v1593_v18 = vpack.c.bf16 %v1582_v53, %v1581_v24  ;;  %v1986_v34 = vpop.xlane.xlu0 %1985  ;;  %v15477_v24 = vld [vmem:[#allocation44_spill] sm:$0xff] }
 0x741   :  { %v10247_v2 = vpop.eup %10246  ;;  %v12280_v53 = vadd.f32 %v15477_v24, %v15476_v56 }
 0x742   :  { %v1960_v35 = vpop.xlane.xlu1 %1959  ;;  %9134 = vmatprep.mubr.bf16.mxu0 %v1593_v18  ;;  %v10249_v52 = vpop.eup %10248  ;;  %v1588_v45 = vmul.f32 %v10247_v2, %v12109_v1 }
 0x743   :  { %2607 = vmax.xlane.f32.xlu1 %v12264_v21  ;;  %9135 = vmatmul.mubr.bf16.gmra.mrb[84].mxu0 %v1594_v27  ;;  %v10251_v15 = vpop.eup %10250  ;;  %v1585_v54 = vmul.f32 %v10249_v52, %v12049_v16  ;;  %v15478_v16 = vld [vmem:[#allocation30_spill] sm:$0xff] }
 0x744   :  { %v3050_v12 = vpop.permute.xlu0 %3049  ;;  %v1587_v17 = vmul.f32 %v10251_v15, %v12039_v28 }
 0x745   :  { %v10253_v60 = vpop.eup %10252  ;;  %9999 = vmatprep.subr.msk.bf16.mxu1 %vm122_vm1, %v3050_v12  ;;  %v3095_v5 = vsel %vm122_vm1, %v3050_v12, 0 }
 0x746   :  { %v1966_v10 = vpop.xlane.xlu1 %1965  ;;  %v1586_v22 = vmul.f32 %v10253_v60, %v12117_v40  ;;  %9335 = vmatpush3.bf16.xpose.msra.mxu1 %v3095_v5  ;;  %v1596_v1 = vpack.c.bf16 %v1588_v45, %v1587_v17  ;;  %v15479_v40 = vld [vmem:[#allocation43_spill] sm:$0xff] }
 0x747   :  { %2613 = vmax.xlane.f32.xlu1 %v12269_v8  ;;  %10254 = vrcp.f32 %v1966_v10  ;;  %v12285_v18 = vadd.f32 %v15479_v40, %v15478_v16 }
 0x748   :  { %v1595_v43 = vpack.c.bf16 %v1586_v22, %v1585_v54  ;;  %10256 = vrcp.f32 %v1960_v35  ;;  %v3054_v5 = vpop.permute.xlu0 %3053 }
 0x749   :  { %10258 = vrcp.f32 %v1964_v42 }
 0x74a   :  { %v1962_v33 = vpop.xlane.xlu1 %1961  ;;  %9138 = vmatprep.mubr.bf16.mxu0 %v1595_v43 }
 0x74b   :  { %10260 = vrcp.f32 %v1962_v33  ;;  %2617 = vmax.xlane.f32.xlu1 %v12280_v53  ;;  %9139 = vmatmul.mubr.bf16.gmra.mrb[88].mxu0 %v1596_v1 }
 0x74c   :  { %10262 = vrcp.f32 %v12222_v48 }
 0x74e   :  { %v1970_v28 = vpop.xlane.xlu1 %1969 }
 0x74f   :  { %10264 = vrcp.f32 %v1970_v28  ;;  %2621 = vmax.xlane.f32.xlu1 %v12285_v18  ;;  %v15480_v28 = vld [vmem:[#allocation32_spill] sm:$0xff] }
 0x750   :  { %10266 = vrcp.f32 %v12228_v13  ;;  %3035 = vrot.lane.b32.xlu0 %v11558_v58, %s10896_s27 }
 0x751   :  { %10268 = vrcp.f32 %v12220_v46  ;;  %v10255_v42 = vpop.eup %10254 }
 0x752   :  { %10270 = vrcp.f32 %v12246_v37  ;;  %v1978_v50 = vpop.xlane.xlu1 %1977  ;;  %v10257_v62 = vpop.eup %10256  ;;  %v2010_v48 = vmul.f32 %v10255_v42, %v12139_v11  ;;  %v15481_v42 = vld [vmem:[#allocation48_spill] sm:$0xff] }
 0x753   :  { %10272 = vrcp.f32 %v1978_v50  ;;  %v10259_v27 = vpop.eup %10258  ;;  %v2007_v52 = vmul.f32 %v10257_v62, %v12133_v0  ;;  %v12320_v50 = vadd.f32 %v15481_v42, %v15480_v28 }
 0x754   :  { %v2009_v58 = vmul.f32 %v10259_v27, %v12125_v26  ;;  %10274 = vrcp.f32 %v12253_v23  ;;  %v15482_v27 = vld [vmem:[#allocation45_spill] sm:$0xff] }
 0x755   :  { %v10261_v2 = vpop.eup %10260  ;;  %10276 = vrcp.f32 %v12235_v57 }
 0x756   :  { %v1988_v35 = vpop.xlane.xlu1 %1987  ;;  %v2008_v13 = vmul.f32 %v10261_v2, %v12144_v38  ;;  %v10263_v15 = vpop.eup %10262  ;;  %v2024_v37 = vpack.c.bf16 %v2010_v48, %v2009_v58  ;;  %10278 = vrcp.f32 %v1986_v34  ;;  %v15484_v58 = vld [vmem:[#allocation47_spill] sm:$0xff] }
 0x757   :  { %v2011_v11 = vmul.f32 %v10263_v15, %v12079_v36  ;;  %v12351_v15 = vld [vmem:[%s15423_s23 + $0x78] sm:$0xff] }
 0x758   :  { %v2023_v46 = vpack.c.bf16 %v2008_v13, %v2007_v52 }
 0x759   :  { %v10265_v60 = vpop.eup %10264 }
 0x75a   :  { %v10267_v25 = vpop.eup %10266  ;;  %v1984_v39 = vpop.xlane.xlu1 %1983  ;;  %9190 = vmatprep.mubr.bf16.mxu0 %v2023_v46  ;;  %v2012_v0 = vmul.f32 %v10265_v60, %v12147_v7  ;;  %v12355_v46 = vadd.f32 %v12351_v15, %v15484_v58 }
 0x75b   :  { %v10269_v12 = vpop.eup %10268  ;;  %10280 = vrcp.f32 %v1984_v39  ;;  %9191 = vmatmul.mubr.bf16.vlgmr.msra.gmra.mrb[92].mxu0 %v2024_v37  ;;  %v2014_v23 = vmul.f32 %v10267_v25, %v12089_v29  ;;  %v15485_v37 = vld [vmem:[#allocation7_spill] sm:$0xff]  ;;  %v15486_v39 = vld [vmem:[#allocation9_spill] sm:$0xff] }
 0x75c   :  { %v10271_v38 = vpop.eup %10270  ;;  %v2025_v26 = vpack.c.bf16 %v2012_v0, %v2011_v11  ;;  %v2013_v36 = vmul.f32 %v10269_v12, %v12068_v9  ;;  %10282 = vrcp.f32 %v1988_v35  ;;  %v15483_v35 = vld [vmem:[#allocation46_spill] sm:$0xff] }
 0x75d   :  { %v10273_v45 = vpop.eup %10272  ;;  %v2015_v7 = vmul.f32 %v10271_v38, %v12107_v55  ;;  %10284 = vrcp.f32 %v12256_v32  ;;  %v3101_v55 = vsel %vm122_vm1, %v3054_v5, 0  ;;  %v15487_v11 = vld [vmem:[#allocation10_spill] sm:$0xff]  ;;  %v15489_v38 = vld [vmem:[#allocation8_spill] sm:$0xff] }
 0x75e   :  { %v3052_v10 = vpop.permute.xlu1 %3051  ;;  %9194 = vmatprep.mubr.bf16.mxu0 %v2025_v26  ;;  %v2016_v57 = vmul.f32 %v10273_v45, %v12150_v49  ;;  %v2026_v29 = vpack.c.bf16 %v2014_v23, %v2013_v36  ;;  %v10275_v54 = vpop.eup %10274  ;;  %v15488_v0 = vld [vmem:[#allocation14_spill] sm:$0xff]  ;;  %v15490_v45 = vld [vmem:[#allocation12_spill] sm:$0xff] }
 0x75f   :  { %10000 = vmatprep.subr.msk.bf16.mxu1 %vm122_vm1, %v3052_v10  ;;  %v3098_v34 = vsel %vm122_vm1, %v3052_v10, 0  ;;  %v10277_v17 = vpop.eup %10276  ;;  %v15491_v10 = vld [vmem:[#allocation13_spill] sm:$0xff] }
 0x760   :  { %3037 = vrot.lane.b32.xlu1 %v11572_v59, %s10896_s27  ;;  %9337 = vmatpush3.bf16.xpose.msra.mxu1 %v3098_v34  ;;  %v2027_v22 = vpack.c.bf16 %v2016_v57, %v2015_v7  ;;  %v10279_v9 = vpop.eup %10278  ;;  %v2018_v59 = vmul.f32 %v10275_v54, %v12115_v20  ;;  %v2017_v24 = vmul.f32 %v10277_v17, %v12099_v14  ;;  %v10058_v57 = vld [vmem:[%s15309_s12 + $0x8] sm:$0xff]   ;;  %v12381_v36 = vld [vmem:[%s15309_s12] sm:$0xff]  }
 0x761   :  { %10001 = vmatprep.subr.msk.bf16.mxu1 %vm122_vm1, %v3054_v5  ;;  %v2020_v32 = vmul.f32 %v10279_v9, %v12131_v6  ;;  %v12330_v6 = vld [vmem:[%s15423_s23 + $0x70] sm:$0xff]  ;;  %9206 = vmatprep.subr.bf16.mxu0 %v10058_v57 }
 0x762   :  { %v3024_v49 = vpop.permute.xlu1 %3023  ;;  %v2028_v1 = vpack.c.bf16 %v2018_v59, %v2017_v24  ;;  %v12334_v2 = vadd.f32 %v12330_v6, %v15482_v27  ;;  %9207 = vmatpush3.bf16.msra.mxu0 %v10058_v57 }
 0x763   :  { %9195 = vmatmul.mubr.bf16.gmra.mrb[96].mxu0 %v2026_v29  ;;  %9340 = vmatprep.mubr.msk.bf16.mxu1 %vm122_vm1, %v3024_v49 }
 0x764   :  { %9198 = vmatprep.mubr.bf16.mxu0 %v2027_v22  ;;  %9224 = vmatprep.subr.bf16.mxu0 %v12381_v36 }
 0x765   :  { %v10281_v43 = vpop.eup %10280 }
 0x766   :  { %v2019_v56 = vmul.f32 %v10281_v43, %v12158_v51  ;;  %v10283_v33 = vpop.eup %10282  ;;  %v3026_v51 = vpop.permute.xlu0 %3025 }
 0x767   :  { %v10285_v40 = vpop.eup %10284  ;;  %v2021_v20 = vmul.f32 %v10283_v33, %v12153_v3  ;;  %v3028_v62 = vpop.permute.xlu1 %3027 }
 0x768   :  { %9339 = vmatpush3.bf16.xpose.msra.mxu1 %v3101_v55  ;;  %v2029_v16 = vpack.c.bf16 %v2020_v32, %v2019_v56  ;;  %v2022_v14 = vmul.f32 %v10285_v40, %v12121_v31  ;;  %v12341_v31 = vld [vmem:[%s15423_s23 + $0x60] sm:$0xff] }
 0x769   :  { %v12345_v52 = vadd.f32 %v12341_v31, %v15483_v35 }
 0x76a   :  { %v2030_v3 = vpack.c.bf16 %v2022_v14, %v2021_v20  ;;  %v3030_v48 = vpop.permute.xlu0 %3029 }
 0x76b   :  { %9199 = vmatmul.mubr.bf16.gmra.mrb[100].mxu0 %v2028_v1 }
 0x76c   :  { %9202 = vmatprep.mubr.bf16.mxu0 %v2029_v16 }
 0x76f   :  { %2625 = vmax.xlane.f32.xlu0 %v12320_v50  ;;  %9341 = vmatmul.mubr.msk.bf16.vlgmr.msra.gmra.mrb[88].mxu1 %vm122_vm1, %v3026_v51 }
 0x770   :  { %9344 = vmatprep.mubr.msk.bf16.mxu1 %vm122_vm1, %v3028_v62 }
 0x773   :  { %2627 = vmax.xlane.f32.xlu0 %v12334_v2  ;;  %9203 = vmatmul.mubr.bf16.gmra.mrb[104].mxu0 %v2030_v3 }
 0x777   :  { %9345 = vmatmul.mubr.msk.bf16.gmra.mrb[92].mxu1 %vm122_vm1, %v3030_v48 }
 0x781   :  { %v2602_v13 = vpop.xlane.xlu0 %2601 }
 0x782   :  { %v2632_v22 = vsub.f32 %v12183_v30, %v2602_v13 }
 0x784   :  { %2623 = vmax.xlane.f32.xlu1 %v12345_v52  ;;  %v2649_v43 = vmul.f32 1.442695, %v2632_v22 }
 0x785   :  { %v2604_v60 = vpop.xlane.xlu0 %2603 }
 0x786   :  { %v2633_v34 = vsub.f32 %v12189_v44, %v2604_v60 }
 0x788   :  { %2629 = vmax.xlane.f32.xlu1 %v12355_v46  ;;  %v2651_v5 = vmul.f32 1.442695, %v2633_v34 }
 0x789   :  { %2751 = vrot.lane.b32.xlu0 %v15485_v37, %s10894_s8  ;;  %v3032_v25 = vpop.permute.xlu0 %3031 }
 0x78a   :  { %9348 = vmatprep.mubr.msk.bf16.mxu1 %vm122_vm1, %v3032_v25  ;;  %10286 = vpow2.f32 %v2651_v5 }
 0x78d   :  { %2755 = vrot.lane.b32.xlu0 %v15486_v39, %s10894_s8 }
 0x791   :  { %2757 = vrot.lane.b32.xlu0 %v15487_v11, %s10894_s8 }
 0x794   :  { %v12389_v24 = vpop.eup %10286 }
 0x795   :  { %2763 = vrot.lane.b32.xlu0 %v15488_v0, %s10894_s8 }
 0x797   :  { %v2600_v12 = vpop.xlane.xlu1 %2599 }
 0x798   :  { %v2631_v7 = vsub.f32 %v12203_v41, %v2600_v12 }
 0x799   :  { %2753 = vrot.lane.b32.xlu1 %v15489_v38, %s10894_s8 }
 0x79a   :  { %v2647_v29 = vmul.f32 1.442695, %v2631_v7 }
 0x79b   :  { %v2606_v26 = vpop.xlane.xlu1 %2605 }
 0x79c   :  { %v2634_v54 = vsub.f32 %v12210_v4, %v2606_v26  ;;  %10288 = vpow2.f32 %v2647_v29 }
 0x79d   :  { %2759 = vrot.lane.b32.xlu1 %v15490_v45, %s10894_s8 }
 0x79e   :  { %v2653_v44 = vmul.f32 1.442695, %v2634_v54 }
 0x79f   :  { %v3034_v23 = vpop.permute.xlu1 %3033 }
 0x7a0   :  { %9349 = vmatmul.mubr.msk.bf16.gmra.mrb[96].mxu1 %vm122_vm1, %v3034_v23  ;;  %10290 = vpow2.f32 %v2653_v44 }
 0x7a1   :  { %2761 = vrot.lane.b32.xlu1 %v15491_v10, %s10894_s8 }
 0x7a6   :  { %v12392_v30 = vpop.eup %10288 }
 0x7aa   :  { %v12405_v40 = vpop.eup %10290 }
 0x7bb   :  { %v2610_v49 = vpop.xlane.xlu0 %2609 }
 0x7bc   :  { %v2636_v59 = vsub.f32 %v12226_v63, %v2610_v49 }
 0x7be   :  { %v2657_v41 = vmul.f32 1.442695, %v2636_v59 }
 0x7bf   :  { %v2612_v17 = vpop.xlane.xlu0 %2611 }
 0x7c0   :  { %v2637_v9 = vsub.f32 %v12233_v47, %v2612_v17 }
 0x7c2   :  { %v2659_v56 = vmul.f32 1.442695, %v2637_v9 }
 0x7c3   :  { %v2616_v55 = vpop.xlane.xlu0 %2615 }
 0x7c4   :  { %10292 = vpow2.f32 %v2659_v56  ;;  %v2639_v25 = vsub.f32 %v12244_v61, %v2616_v55 }
 0x7c5   :  { %2683 = vadd.xlane.f32.xlu1 %v12389_v24  ;;  %10294 = vpow2.f32 %v2649_v43 }
 0x7c6   :  { %10296 = vpow2.f32 %v2657_v41  ;;  %v2663_v23 = vmul.f32 1.442695, %v2639_v25 }
 0x7c7   :  { %v2620_v4 = vpop.xlane.xlu0 %2619  ;;  %v12394_v32 = vpop.f32.mrb[76].mxu0 }
 0x7c8   :  { %v12396_v1 = vpop.f32.mrb[77].mxu0  ;;  %v2641_v3 = vsub.f32 %v12251_v19, %v2620_v4 }
 0x7c9   :  { %2679 = vadd.xlane.f32.xlu1 %v12392_v30  ;;  %v12399_v63 = vpop.f32.mrb[78].mxu0 }
 0x7ca   :  { %v12403_v33 = vpop.f32.mrb[79].mxu0  ;;  %v2667_v58 = vmul.f32 1.442695, %v2641_v3 }
 0x7cb   :  { %v3036_v16 = vpop.permute.xlu0 %3035  ;;  %v1694_v28 = vpack.c.bf16 %v12403_v33, %v12396_v1  ;;  %v10806_v1 = vld [vmem:[%s15423_s23 + $0x28] sm:$0xff] }
 0x7cc   :  { %9352 = vmatprep.mubr.msk.bf16.mxu1 %vm122_vm1, %v3036_v16 }
 0x7cd   :  { %2685 = vadd.xlane.f32.xlu1 %v12405_v40 }
 0x7ce   :  { %v12411_v42 = vpop.eup %10292 }
 0x7cf   :  { %2691 = vadd.xlane.f32.xlu0 %v12411_v42  ;;  %v12414_v20 = vpop.eup %10294 }
 0x7d0   :  { %v2608_v51 = vpop.xlane.xlu1 %2607  ;;  %v12418_v27 = vpop.eup %10296 }
 0x7d1   :  { %v2635_v62 = vsub.f32 %v12264_v21, %v2608_v51  ;;  %2681 = vadd.xlane.f32.xlu1 %v12414_v20 }
 0x7d3   :  { %v2655_v14 = vmul.f32 1.442695, %v2635_v62 }
 0x7d4   :  { %v2614_v48 = vpop.xlane.xlu1 %2613 }
 0x7d5   :  { %10298 = vpow2.f32 %v2655_v14  ;;  %v2638_v35 = vsub.f32 %v12269_v8, %v2614_v48  ;;  %2689 = vadd.xlane.f32.xlu1 %v12418_v27 }
 0x7d7   :  { %v2661_v13 = vmul.f32 1.442695, %v2638_v35 }
 0x7d8   :  { %v2618_v60 = vpop.xlane.xlu1 %2617 }
 0x7d9   :  { %10300 = vpow2.f32 %v2661_v13  ;;  %v2640_v21 = vsub.f32 %v12280_v53, %v2618_v60 }
 0x7da   :  { %10302 = vpow2.f32 %v2667_v58 }
 0x7db   :  { %v2665_v12 = vmul.f32 1.442695, %v2640_v21 }
 0x7dc   :  { %v2622_v26 = vpop.xlane.xlu1 %2621 }
 0x7dd   :  { %10304 = vpow2.f32 %v2665_v12  ;;  %v2642_v19 = vsub.f32 %v12285_v18, %v2622_v26 }
 0x7de   :  { %10306 = vpow2.f32 %v2663_v23 }
 0x7df   :  { %v12426_v57 = vpop.eup %10298  ;;  %v2669_v34 = vmul.f32 1.442695, %v2642_v19 }
 0x7e0   :  { %v3038_v8 = vpop.permute.xlu1 %3037  ;;  %2687 = vadd.xlane.f32.xlu0 %v12426_v57 }
 0x7e1   :  { %9353 = vmatmul.mubr.msk.bf16.gmra.mrb[100].mxu1 %vm122_vm1, %v3038_v8  ;;  %10308 = vpow2.f32 %v2669_v34 }
 0x7e3   :  { %v12430_v61 = vpop.eup %10300 }
 0x7e4   :  { %2693 = vadd.xlane.f32.xlu0 %v12430_v61  ;;  %v12433_v53 = vpop.eup %10302 }
 0x7e7   :  { %v12435_v5 = vpop.eup %10304 }
 0x7e8   :  { %2697 = vadd.xlane.f32.xlu1 %v12435_v5  ;;  %2699 = vadd.xlane.f32.xlu0 %v12433_v53  ;;  %v12439_v18 = vpop.eup %10306 }
 0x7eb   :  { %v12442_v7 = vpop.eup %10308 }
 0x7ec   :  { %2695 = vadd.xlane.f32.xlu0 %v12439_v18 }
 0x7f0   :  { %2701 = vadd.xlane.f32.xlu0 %v12442_v7 }
 0x7fc   :  { %v2626_v29 = vpop.xlane.xlu0 %2625 }
 0x7fd   :  { %v2644_v54 = vsub.f32 %v12320_v50, %v2626_v29  ;;  %v10803_v50 = vld [vmem:[%s15423_s23 + $0x10] sm:$0xff] }
 0x7ff   :  { %v2673_v49 = vmul.f32 1.442695, %v2644_v54 }
 0x800   :  { %v2628_v22 = vpop.xlane.xlu0 %2627 }
 0x801   :  { %10310 = vpow2.f32 %v2673_v49  ;;  %v2645_v44 = vsub.f32 %v12334_v2, %v2628_v22 }
 0x803   :  { %v2675_v17 = vmul.f32 1.442695, %v2645_v44 }
 0x805   :  { %10312 = vpow2.f32 %v2675_v17  ;;  %v15492_v17 = vld [vmem:[#allocation15_spill] sm:$0xff] }
 0x80a   :  { %v12447_v9 = vpop.f32.mrb[80].mxu0 }
 0x80b   :  { %v12449_v43 = vpop.eup %10310  ;;  %v12451_v59 = vpop.f32.mrb[81].mxu0 }
 0x80c   :  { %v12453_v56 = vpop.f32.mrb[82].mxu0  ;;  %2705 = vadd.xlane.f32.xlu0 %v12449_v43 }
 0x80d   :  { %v12458_v55 = vpop.f32.mrb[83].mxu0 }
 0x80f   :  { %v12462_v41 = vpop.eup %10312 }
 0x810   :  { %2707 = vadd.xlane.f32.xlu1 %v12462_v41 }
 0x811   :  { %v2624_v4 = vpop.xlane.xlu1 %2623 }
 0x812   :  { %v2643_v16 = vsub.f32 %v12345_v52, %v2624_v4  ;;  %v2752_v4 = vpop.permute.xlu0 %2751  ;;  %v10801_v52 = vld [vmem:[%s15423_s23] sm:$0xff] }
 0x814   :  { %v2671_v51 = vmul.f32 1.442695, %v2643_v16 }
 0x815   :  { %v2630_v62 = vpop.xlane.xlu1 %2629 }
 0x816   :  { %10314 = vpow2.f32 %v2671_v51  ;;  %v2646_v14 = vsub.f32 %v12355_v46, %v2630_v62  ;;  %v12467_v3 = vpop.f32.mrb[84].mxu0 }
 0x817   :  { %v12469_v48 = vpop.f32.mrb[85].mxu0 }
 0x818   :  { %v2677_v35 = vmul.f32 1.442695, %v2646_v14  ;;  %v12471_v13 = vpop.f32.mrb[86].mxu0 }
 0x819   :  { %v12475_v60 = vpop.f32.mrb[87].mxu0 }
 0x81a   :  { %10316 = vpow2.f32 %v2677_v35 }
 0x81e   :  { %v12479_v25 = vpop.f32.mrb[88].mxu0 }
 0x81f   :  { %v12481_v21 = vpop.f32.mrb[89].mxu0 }
 0x820   :  { %v12483_v46 = vpop.eup %10314  ;;  %v12485_v12 = vpop.f32.mrb[90].mxu0 }
 0x821   :  { %v12489_v23 = vpop.f32.mrb[91].mxu0  ;;  %2703 = vadd.xlane.f32.xlu1 %v12483_v46 }
 0x824   :  { %v12494_v8 = vpop.eup %10316 }
 0x825   :  { %2709 = vadd.xlane.f32.xlu0 %v12494_v8 }
 0x82e   :  { %v9192_v34 = vpop.f32.mrb[92].mxu0 }
 0x82f   :  { %v2097_v29 = vpop.f32.mrb[93].mxu0 }
 0x830   :  { %v9193_v54 = vpop.f32.mrb[94].mxu0 }
 0x831   :  { %v2161_v49 = vpack.c.bf16 %v9193_v54, %v9192_v34  ;;  %v2100_v22 = vpop.f32.mrb[95].mxu0 }
 0x832   :  { %v2160_v44 = vpack.c.bf16 %v2100_v22, %v2097_v29  ;;  %2765 = vrot.lane.b32.xlu1 %v15492_v17, %s10894_s8 }
 0x834   :  { %9208 = vmatprep.mubr.msk.bf16.mxu0 %vm122_vm1, %v2160_v44 }
 0x835   :  { %9209 = vmatmul.mubr.msk.bf16.vlgmr.msra.gmra.mrb[108].mxu0 %vm122_vm1, %v2161_v49  ;;  %v2754_v49 = vpop.permute.xlu1 %2753 }
 0x836   :  { %9225 = vmatpush3.bf16.msra.mxu0 %v12381_v36  ;;  %v9196_v16 = vpop.f32.mrb[96].mxu0 }
 0x837   :  { %9274 = vmatprep.subr.bf16.mxu0 %v2752_v4  ;;  %v2113_v51 = vpop.f32.mrb[97].mxu0 }
 0x838   :  { %v9197_v62 = vpop.f32.mrb[98].mxu0 }
 0x839   :  { %v2163_v14 = vpack.c.bf16 %v9197_v62, %v9196_v16  ;;  %v2116_v35 = vpop.f32.mrb[99].mxu0 }
 0x83a   :  { %v2162_v26 = vpack.c.bf16 %v2116_v35, %v2113_v51  ;;  %v2760_v35 = vpop.permute.xlu1 %2759 }
 0x83c   :  { %9212 = vmatprep.mubr.msk.bf16.mxu0 %vm122_vm1, %v2162_v26 }
 0x83d   :  { %9213 = vmatmul.mubr.msk.bf16.gmra.mrb[112].mxu0 %vm122_vm1, %v2163_v14 }
 0x83e   :  { %v9200_v34 = vpop.f32.mrb[100].mxu0 }
 0x83f   :  { %v2129_v29 = vpop.f32.mrb[101].mxu0 }
 0x840   :  { %v9201_v54 = vpop.f32.mrb[102].mxu0 }
 0x841   :  { %v2165_v22 = vpack.c.bf16 %v9201_v54, %v9200_v34  ;;  %v2132_v44 = vpop.f32.mrb[103].mxu0  ;;  %v10802_v34 = vld [vmem:[%s15423_s23 + $0x8] sm:$0xff] }
 0x842   :  { %v2164_v19 = vpack.c.bf16 %v2132_v44, %v2129_v29  ;;  %v9342_v58 = vpop.f32.mrb[88].mxu1 }
 0x843   :  { %v3137_v36 = vpop.f32.mrb[89].mxu1  ;;  %v12521_v2 = vadd.f32 %v10803_v50, %v9342_v58 }
 0x844   :  { %v12507_v16 = vadd.f32 %v10801_v52, %v3137_v36  ;;  %9216 = vmatprep.mubr.msk.bf16.mxu0 %vm122_vm1, %v2164_v19  ;;  %v9343_v26 = vpop.f32.mrb[90].mxu1 }
 0x845   :  { %9217 = vmatmul.mubr.msk.bf16.gmra.mrb[116].mxu0 %vm122_vm1, %v2165_v22  ;;  %v3140_v51 = vpop.f32.mrb[91].mxu1 }
 0x846   :  { %v9204_v62 = vpop.f32.mrb[104].mxu0  ;;  %3200 = vmax.xlane.f32.xlu0 %v12507_v16  ;;  %v12515_v29 = vadd.f32 %v10802_v34, %v3140_v51  ;;  %v2762_v34 = vpop.permute.xlu1 %2761 }
 0x847   :  { %v2145_v14 = vpop.f32.mrb[105].mxu0 }
 0x848   :  { %v9205_v54 = vpop.f32.mrb[106].mxu0 }
 0x849   :  { %v2167_v52 = vpack.c.bf16 %v9205_v54, %v9204_v62  ;;  %v2148_v44 = vpop.f32.mrb[107].mxu0  ;;  %v10804_v62 = vld [vmem:[%s15423_s23 + $0x18] sm:$0xff] }
 0x84a   :  { %v2166_v36 = vpack.c.bf16 %v2148_v44, %v2145_v14  ;;  %v9346_v19 = vpop.f32.mrb[92].mxu1  ;;  %3202 = vmax.xlane.f32.xlu0 %v12515_v29  ;;  %v12533_v50 = vadd.f32 %v10804_v62, %v9343_v26  ;;  %v10805_v14 = vld [vmem:[%s15423_s23 + $0x20] sm:$0xff]  ;;  %v15494_v26 = vpack.c.bf16 %v12458_v55, %v12451_v59  ;;  %v2756_v44 = vpop.permute.xlu0 %2755  ;;  %v10808_v59 = vld [vmem:[%s15423_s23 + $0x38] sm:$0xff] }
 0x84b   :  { %v3153_v22 = vpop.f32.mrb[93].mxu1 }
 0x84c   :  { %9220 = vmatprep.mubr.msk.bf16.mxu0 %vm122_vm1, %v2166_v36  ;;  %v9347_v47 = vpop.f32.mrb[94].mxu1  ;;  %v12541_v54 = vadd.f32 %v10805_v14, %v3153_v22  ;;  %v10807_v36 = vld [vmem:[%s15423_s23 + $0x30] sm:$0xff] }
 0x84d   :  { %9221 = vmatmul.mubr.msk.bf16.gmra.mrb[120].mxu0 %vm122_vm1, %v2167_v52  ;;  %v3156_v51 = vpop.f32.mrb[95].mxu1  ;;  %v12567_v55 = vadd.f32 %v10808_v59, %v9347_v47  ;;  %v15497_v47 = vpack.c.bf16 %v12471_v13, %v12467_v3  ;;  %v15499_v3 = vpack.c.bf16 %v12485_v12, %v12479_v25  ;;  %v10811_v12 = vld [vmem:[%s15423_s23 + $0x50] sm:$0xff] }
 0x84e   :  { %9226 = vmatprep.mubr.msk.bf16.mxu0 %vm122_vm1, %v1694_v28  ;;  %3204 = vmax.xlane.f32.xlu0 %v12521_v2  ;;  %v12546_v33 = vadd.f32 %v10806_v1, %v3156_v51  ;;  %v15493_v28 = vpack.c.bf16 %v12399_v63, %v12394_v32  ;;  %v12561_v32 = vadd.f32 %v10807_v36, %v9346_v19  ;;  %v2758_v22 = vpop.permute.xlu0 %2757 }
 0x852   :  { %v12535_v58 = vpop.xlane.xlu1 %2683  ;;  %3206 = vmax.xlane.f32.xlu0 %v12533_v50 }
 0x855   :  { %9227 = vmatmul.mubr.msk.bf16.vlgmr.msra.gmra.mrb[108].mxu0 %vm122_vm1, %v15493_v28  ;;  %v10812_v28 = vld [vmem:[%s15423_s23 + $0x58] sm:$0xff] }
 0x856   :  { %9275 = vmatpush3.bf16.msra.mxu0 %v2752_v4  ;;  %9230 = vmatprep.mubr.msk.bf16.mxu0 %vm122_vm1, %v15494_v26  ;;  %v2680_v52 = vpop.xlane.xlu1 %2679  ;;  %v15495_v4 = vpack.c.bf16 %v12453_v56, %v12447_v9  ;;  %v15498_v9 = vpack.c.bf16 %v12489_v23, %v12481_v21  ;;  %v10809_v23 = vld [vmem:[%s15423_s23 + $0x40] sm:$0xff] }
 0x857   :  { %3208 = vmax.xlane.f32.xlu0 %v12541_v54  ;;  %3210 = vmax.xlane.f32.xlu1 %v12546_v33  ;;  %10318 = vrcp.f32 %v2680_v52 }
 0x858   :  { %9276 = vmatprep.subr.bf16.mxu0 %v2754_v49 }
 0x85a   :  { %9277 = vmatpush3.bf16.msra.mxu0 %v2754_v49  ;;  %v2686_v63 = vpop.xlane.xlu1 %2685  ;;  %v15496_v49 = vpack.c.bf16 %v12475_v60, %v12469_v48  ;;  %v2764_v60 = vpop.permute.xlu0 %2763 }
 0x85b   :  { %3212 = vmax.xlane.f32.xlu0 %v12561_v32  ;;  %9278 = vmatprep.subr.bf16.mxu0 %v2756_v44 }
 0x85d   :  { %9231 = vmatmul.mubr.msk.bf16.gmra.mrb[112].mxu0 %vm122_vm1, %v15495_v4 }
 0x85e   :  { %9279 = vmatpush3.bf16.msra.mxu0 %v2756_v44  ;;  %9234 = vmatprep.mubr.msk.bf16.mxu0 %vm122_vm1, %v15496_v49  ;;  %v2682_v19 = vpop.xlane.xlu1 %2681  ;;  %v2692_v52 = vpop.xlane.xlu0 %2691 }
 0x85f   :  { %10320 = vrcp.f32 %v2682_v19  ;;  %3214 = vmax.xlane.f32.xlu0 %v12567_v55  ;;  %9280 = vmatprep.subr.bf16.mxu0 %v2758_v22 }
 0x860   :  { %10322 = vrcp.f32 %v2686_v63 }
 0x861   :  { %v10319_v56 = vpop.eup %10318 }
 0x862   :  { %9281 = vmatpush3.bf16.msra.mxu0 %v2758_v22  ;;  %v2727_v51 = vmul.f32 %v10319_v56, %v12392_v30  ;;  %v2690_v59 = vpop.xlane.xlu1 %2689 }
 0x863   :  { %9282 = vmatprep.subr.bf16.mxu0 %v2760_v35 }
 0x865   :  { %9235 = vmatmul.mubr.msk.bf16.gmra.mrb[116].mxu0 %vm122_vm1, %v15497_v47 }
 0x866   :  { %9283 = vmatpush3.bf16.msra.mxu0 %v2760_v35  ;;  %9238 = vmatprep.mubr.msk.bf16.mxu0 %vm122_vm1, %v15498_v9 }
 0x867   :  { %9284 = vmatprep.subr.bf16.mxu0 %v2762_v34 }
 0x869   :  { %v10321_v48 = vpop.eup %10320 }
 0x86a   :  { %9285 = vmatpush3.bf16.msra.mxu0 %v2762_v34  ;;  %v2728_v62 = vmul.f32 %v10321_v48, %v12414_v20  ;;  %v10810_v20 = vld [vmem:[%s15423_s23 + $0x48] sm:$0xff]  ;;  %v10323_v47 = vpop.eup %10322 }
 0x86b   :  { %9286 = vmatprep.subr.bf16.mxu0 %v2764_v60  ;;  %v2730_v63 = vmul.f32 %v10323_v47, %v12405_v40 }
 0x86c   :  { %v2743_v14 = vpack.c.bf16 %v2728_v62, %v2727_v51 }
 0x86d   :  { %9239 = vmatmul.mubr.msk.bf16.gmra.mrb[120].mxu0 %vm122_vm1, %v15499_v3  ;;  %v2688_v44 = vpop.xlane.xlu0 %2687 }
 0x86e   :  { %9287 = vmatpush3.bf16.msra.mxu0 %v2764_v60  ;;  %9290 = vmatprep.mubr.bf16.mxu0 %v2743_v14  ;;  %10324 = vrcp.f32 %v2688_v44 }
 0x86f   :  { %10326 = vrcp.f32 %v12535_v58 }
 0x870   :  { %10328 = vrcp.f32 %v2690_v59 }
 0x871   :  { %v2694_v36 = vpop.xlane.xlu0 %2693 }
 0x872   :  { %10330 = vrcp.f32 %v2694_v36  ;;  %v10813_v36 = vld [vmem:[%s15423_s23 + $0x68] sm:$0xff] }
 0x873   :  { %v9350_v13 = vpop.f32.mrb[96].mxu1 }
 0x874   :  { %v3169_v21 = vpop.f32.mrb[97].mxu1  ;;  %v12607_v1 = vadd.f32 %v10811_v12, %v9350_v13 }
 0x875   :  { %v12595_v35 = vadd.f32 %v10809_v23, %v3169_v21  ;;  %v9351_v30 = vpop.f32.mrb[98].mxu1  ;;  %v2700_v4 = vpop.xlane.xlu0 %2699 }
 0x876   :  { %v3172_v34 = vpop.f32.mrb[99].mxu1  ;;  %v12613_v26 = vadd.f32 %v10812_v28, %v9351_v30  ;;  %v2698_v22 = vpop.xlane.xlu1 %2697 }
 0x877   :  { %3216 = vmax.xlane.f32.xlu0 %v12595_v35  ;;  %v12601_v25 = vadd.f32 %v10810_v20, %v3172_v34 }
 0x878   :  { %v10325_v56 = vpop.eup %10324 }
 0x879   :  { %v2696_v49 = vpop.xlane.xlu0 %2695  ;;  %v10327_v48 = vpop.eup %10326  ;;  %v2731_v14 = vmul.f32 %v10325_v56, %v12426_v57 }
 0x87a   :  { %10332 = vrcp.f32 %v2696_v49  ;;  %v10329_v51 = vpop.eup %10328  ;;  %v2729_v58 = vmul.f32 %v10327_v48, %v12389_v24 }
 0x87b   :  { %3218 = vmax.xlane.f32.xlu0 %v12601_v25  ;;  %10334 = vrcp.f32 %v2692_v52  ;;  %v2732_v21 = vmul.f32 %v10329_v51, %v12418_v27 }
 0x87c   :  { %10336 = vrcp.f32 %v2698_v22  ;;  %v2744_v30 = vpack.c.bf16 %v2730_v63, %v2729_v58  ;;  %v10331_v34 = vpop.eup %10330 }
 0x87d   :  { %v2702_v60 = vpop.xlane.xlu0 %2701  ;;  %v2745_v12 = vpack.c.bf16 %v2732_v21, %v2731_v14 }
 0x87e   :  { %10338 = vrcp.f32 %v2702_v60 }
 0x87f   :  { %3220 = vmax.xlane.f32.xlu0 %v12607_v1 }
 0x883   :  { %3222 = vmax.xlane.f32.xlu0 %v12613_v26 }
 0x884   :  { %v10333_v57 = vpop.eup %10332 }
 0x885   :  { %v10335_v52 = vpop.eup %10334 }
 0x886   :  { %v10337_v27 = vpop.eup %10336 }
 0x887   :  { %v2736_v22 = vmul.f32 %v10337_v27, %v12435_v5 }
 0x888   :  { %v10339_v47 = vpop.eup %10338 }
 0x899   :  { %v2706_v3 = vpop.xlane.xlu0 %2705 }
 0x89d   :  { %v2708_v19 = vpop.xlane.xlu1 %2707 }
 0x8ae   :  { %v2704_v9 = vpop.xlane.xlu1 %2703 }
 0x8af   :  { %10340 = vrcp.f32 %v2704_v9 }
 0x8b0   :  { %10342 = vrcp.f32 %v2700_v4  ;;  %v2733_v4 = vmul.f32 %v10335_v52, %v12411_v42  ;;  %v2738_v42 = vmul.f32 %v10339_v47, %v12442_v7 }
 0x8b1   :  { %10344 = vrcp.f32 %v2706_v3 }
 0x8b2   :  { %v2766_v62 = vpop.permute.xlu1 %2765  ;;  %v2710_v44 = vpop.xlane.xlu0 %2709 }
 0x8b3   :  { %9288 = vmatprep.subr.bf16.mxu0 %v2766_v62  ;;  %10346 = vrcp.f32 %v2710_v44 }
 0x8b4   :  { %9289 = vmatpush3.bf16.msra.mxu0 %v2766_v62  ;;  %v9354_v13 = vpop.f32.mrb[100].mxu1  ;;  %10348 = vrcp.f32 %v2708_v19 }
 0x8b5   :  { %v3185_v23 = vpop.f32.mrb[101].mxu1 }
 0x8b6   :  { %v12622_v20 = vadd.f32 %v12341_v31, %v3185_v23  ;;  %v9355_v40 = vpop.f32.mrb[102].mxu1  ;;  %v2734_v31 = vmul.f32 %v10331_v34, %v12430_v61  ;;  %v12640_v61 = vadd.f32 %v12330_v6, %v9354_v13 }
 0x8b7   :  { %v12625_v24 = vadd.f32 %v12351_v15, %v9355_v40  ;;  %9291 = vmatmul.mubr.bf16.vlgmr.msra.gmra.mrb[124].mxu0 %v2744_v30  ;;  %v3188_v28 = vpop.f32.mrb[103].mxu1  ;;  %v2735_v15 = vmul.f32 %v10333_v57, %v12439_v18 }
 0x8b8   :  { %3224 = vmax.xlane.f32.xlu0 %v12622_v20  ;;  %9294 = vmatprep.mubr.bf16.mxu0 %v2745_v12  ;;  %v12633_v59 = vadd.f32 %v10813_v36, %v3188_v28  ;;  %v2746_v49 = vpack.c.bf16 %v2734_v31, %v2733_v4 }
 0x8b9   :  { %3230 = vmax.xlane.f32.xlu1 %v12625_v24  ;;  %v2747_v9 = vpack.c.bf16 %v2736_v22, %v2735_v15  ;;  %v10341_v56 = vpop.eup %10340 }
 0x8ba   :  { %v10343_v48 = vpop.eup %10342  ;;  %v2739_v60 = vmul.f32 %v10341_v56, %v12483_v46 }
 0x8bb   :  { %v10345_v18 = vpop.eup %10344  ;;  %v2737_v5 = vmul.f32 %v10343_v48, %v12433_v53  ;;  %v10060_v53 = vld [vmem:[%s15309_s12 + $0x10] sm:$0xff]  }
 0x8bc   :  { %3226 = vmax.xlane.f32.xlu0 %v12633_v59  ;;  %v2740_v51 = vmul.f32 %v10345_v18, %v12449_v43  ;;  %9306 = vmatprep.subr.bf16.mxu0 %v10060_v53 }
 0x8bd   :  { %v2748_v19 = vpack.c.bf16 %v2738_v42, %v2737_v5  ;;  %v10347_v63 = vpop.eup %10346  ;;  %9307 = vmatpush3.bf16.msra.mxu0 %v10060_v53 }
 0x8be   :  { %v2749_v6 = vpack.c.bf16 %v2740_v51, %v2739_v60  ;;  %v10349_v62 = vpop.eup %10348  ;;  %v2742_v14 = vmul.f32 %v10347_v63, %v12494_v8 }
 0x8bf   :  { %9295 = vmatmul.mubr.bf16.gmra.mrb[128].mxu0 %v2746_v49  ;;  %v2741_v58 = vmul.f32 %v10349_v62, %v12462_v41 }
 0x8c0   :  { %3228 = vmax.xlane.f32.xlu0 %v12640_v61  ;;  %9298 = vmatprep.mubr.bf16.mxu0 %v2747_v9 }
 0x8c1   :  { %v2750_v7 = vpack.c.bf16 %v2742_v14, %v2741_v58 }
 0x8c7   :  { %9299 = vmatmul.mubr.bf16.gmra.mrb[132].mxu0 %v2748_v19 }
 0x8c8   :  { %9302 = vmatprep.mubr.bf16.mxu0 %v2749_v6 }
 0x8ca   :  { %3354 = vrot.lane.b32.xlu1 %v15489_v38, %s10896_s27 }
 0x8ce   :  { %3362 = vrot.lane.b32.xlu1 %v15491_v10, %s10896_s27 }
 0x8cf   :  { %9303 = vmatmul.mubr.bf16.gmra.mrb[136].mxu0 %v2750_v7 }
 0x8d3   :  { %v3201_v43 = vpop.xlane.xlu0 %3200 }
 0x8d4   :  { %v3232_v8 = vsub.f32 %v12507_v16, %v3201_v43 }
 0x8d6   :  { %3352 = vrot.lane.b32.xlu0 %v15485_v37, %s10896_s27  ;;  %v3248_v21 = vmul.f32 1.442695, %v3232_v8 }
 0x8d7   :  { %v3203_v46 = vpop.xlane.xlu0 %3202 }
 0x8da   :  { %3356 = vrot.lane.b32.xlu0 %v15486_v39, %s10896_s27  ;;  %v3233_v39 = vsub.f32 %v12515_v29, %v3203_v46 }
 0x8db   :  { %v3205_v38 = vpop.xlane.xlu0 %3204 }
 0x8dc   :  { %v3234_v10 = vsub.f32 %v12521_v2, %v3205_v38  ;;  %v3250_v2 = vmul.f32 1.442695, %v3233_v39 }
 0x8de   :  { %3358 = vrot.lane.b32.xlu0 %v15487_v11, %s10896_s27  ;;  %v3252_v3 = vmul.f32 1.442695, %v3234_v10 }
 0x8df   :  { %v3207_v41 = vpop.xlane.xlu0 %3206 }
 0x8e0   :  { %10350 = vpow2.f32 %v3252_v3  ;;  %v3235_v37 = vsub.f32 %v12533_v50, %v3207_v41 }
 0x8e1   :  { %10352 = vpow2.f32 %v3248_v21 }
 0x8e2   :  { %3360 = vrot.lane.b32.xlu0 %v15490_v45, %s10896_s27  ;;  %v3254_v30 = vmul.f32 1.442695, %v3235_v37 }
 0x8e4   :  { %v3209_v13 = vpop.xlane.xlu0 %3208  ;;  %10354 = vpow2.f32 %v3254_v30  ;;  %v3211_v50 = vpop.xlane.xlu1 %3210 }
 0x8e5   :  { %v3236_v34 = vsub.f32 %v12541_v54, %v3209_v13  ;;  %10356 = vpow2.f32 %v3250_v2  ;;  %v3237_v29 = vsub.f32 %v12546_v33, %v3211_v50 }
 0x8e7   :  { %v3256_v57 = vmul.f32 1.442695, %v3236_v34  ;;  %v3258_v52 = vmul.f32 1.442695, %v3237_v29 }
 0x8e8   :  { %v3213_v23 = vpop.xlane.xlu0 %3212 }
 0x8e9   :  { %v3238_v11 = vsub.f32 %v12561_v32, %v3213_v23 }
 0x8ea   :  { %v12670_v40 = vpop.eup %10350 }
 0x8eb   :  { %v3260_v16 = vmul.f32 1.442695, %v3238_v11  ;;  %v12674_v28 = vpop.eup %10352 }
 0x8ec   :  { %v3215_v45 = vpop.xlane.xlu0 %3214 }
 0x8ed   :  { %v3239_v12 = vsub.f32 %v12567_v55, %v3215_v45  ;;  %10358 = vpow2.f32 %v3260_v16 }
 0x8ee   :  { %10360 = vpow2.f32 %v3256_v57  ;;  %v12678_v54 = vpop.eup %10354 }
 0x8ef   :  { %v3262_v32 = vmul.f32 1.442695, %v3239_v12  ;;  %v12681_v55 = vpop.eup %10356 }
 0x8f1   :  { %10362 = vpow2.f32 %v3262_v32 }
 0x8f2   :  { %3284 = vadd.xlane.f32.xlu1 %v12670_v40  ;;  %10364 = vpow2.f32 %v3258_v52 }
 0x8f6   :  { %3280 = vadd.xlane.f32.xlu1 %v12674_v28 }
 0x8f7   :  { %v12684_v27 = vpop.eup %10358 }
 0x8f8   :  { %v12686_v44 = vpop.eup %10360 }
 0x8fa   :  { %3286 = vadd.xlane.f32.xlu1 %v12678_v54 }
 0x8fb   :  { %v12690_v33 = vpop.eup %10362 }
 0x8fc   :  { %v12693_v31 = vpop.eup %10364 }
 0x8fe   :  { %3282 = vadd.xlane.f32.xlu1 %v12681_v55 }
 0x901   :  { %3292 = vadd.xlane.f32.xlu0 %v12684_v27 }
 0x902   :  { %3288 = vadd.xlane.f32.xlu1 %v12686_v44 }
 0x904   :  { %v3217_v36 = vpop.xlane.xlu0 %3216 }
 0x905   :  { %3294 = vadd.xlane.f32.xlu0 %v12690_v33  ;;  %v3240_v22 = vsub.f32 %v12595_v35, %v3217_v36 }
 0x907   :  { %v3264_v47 = vmul.f32 1.442695, %v3240_v22 }
 0x908   :  { %v3219_v15 = vpop.xlane.xlu0 %3218 }
 0x909   :  { %3290 = vadd.xlane.f32.xlu0 %v12693_v31  ;;  %v3241_v56 = vsub.f32 %v12601_v25, %v3219_v15  ;;  %10366 = vpow2.f32 %v3264_v47 }
 0x90b   :  { %v3266_v18 = vmul.f32 1.442695, %v3241_v56 }
 0x90c   :  { %v3221_v4 = vpop.xlane.xlu0 %3220 }
 0x90d   :  { %v3242_v42 = vsub.f32 %v12607_v1, %v3221_v4 }
 0x910   :  { %v3223_v49 = vpop.xlane.xlu0 %3222 }
 0x911   :  { %v3243_v9 = vsub.f32 %v12613_v26, %v3223_v49 }
 0x913   :  { %3366 = vrot.lane.b32.xlu1 %v15492_v17, %s10896_s27  ;;  %v3270_v48 = vmul.f32 1.442695, %v3243_v9  ;;  %v3268_v17 = vmul.f32 1.442695, %v3242_v42  ;;  %v12704_v60 = vpop.eup %10366 }
 0x915   :  { %10368 = vpow2.f32 %v3270_v48 }
 0x916   :  { %10370 = vpow2.f32 %v3266_v18 }
 0x917   :  { %10372 = vpow2.f32 %v3268_v17 }
 0x91f   :  { %3364 = vrot.lane.b32.xlu0 %v15488_v0, %s10896_s27  ;;  %v12707_v0 = vpop.eup %10368 }
 0x920   :  { %v12710_v35 = vpop.eup %10370 }
 0x921   :  { %v12713_v25 = vpop.eup %10372 }
 0x937   :  { %3296 = vadd.xlane.f32.xlu1 %v12704_v60 }
 0x93b   :  { %3302 = vadd.xlane.f32.xlu1 %v12707_v0 }
 0x93e   :  { %3298 = vadd.xlane.f32.xlu0 %v12710_v35 }
 0x942   :  { %3300 = vadd.xlane.f32.xlu0 %v12713_v25 }
 0x945   :  { %v3225_v1 = vpop.xlane.xlu0 %3224 }
 0x946   :  { %v3244_v26 = vsub.f32 %v12622_v20, %v3225_v1  ;;  %v3231_v5 = vpop.xlane.xlu1 %3230 }
 0x947   :  { %v3247_v19 = vsub.f32 %v12625_v24, %v3231_v5 }
 0x948   :  { %v3272_v51 = vmul.f32 1.442695, %v3244_v26 }
 0x949   :  { %v3227_v63 = vpop.xlane.xlu0 %3226  ;;  %v3278_v14 = vmul.f32 1.442695, %v3247_v19 }
 0x94a   :  { %10374 = vpow2.f32 %v3272_v51  ;;  %v3245_v6 = vsub.f32 %v12633_v59, %v3227_v63 }
 0x94c   :  { %v3274_v62 = vmul.f32 1.442695, %v3245_v6 }
 0x94d   :  { %v3229_v58 = vpop.xlane.xlu0 %3228 }
 0x94e   :  { %10376 = vpow2.f32 %v3274_v62  ;;  %v3246_v7 = vsub.f32 %v12640_v61, %v3229_v58  ;;  %v3355_v61 = vpop.permute.xlu1 %3354 }
 0x94f   :  { %10378 = vpow2.f32 %v3278_v14 }
 0x950   :  { %v3276_v53 = vmul.f32 1.442695, %v3246_v7 }
 0x951   :  { %v3353_v43 = vpop.permute.xlu0 %3352 }
 0x952   :  { %10380 = vpow2.f32 %v3276_v53  ;;  %9356 = vmatprep.subr.bf16.mxu0 %v3353_v43  ;;  %v12732_v38 = vpop.permute.xlu1 %3362 }
 0x954   :  { %v12720_v20 = vpop.eup %10374 }
 0x955   :  { %3304 = vadd.xlane.f32.xlu0 %v12720_v20  ;;  %v3357_v10 = vpop.permute.xlu0 %3356 }
 0x958   :  { %v12723_v24 = vpop.eup %10376 }
 0x959   :  { %3306 = vadd.xlane.f32.xlu1 %v12723_v24  ;;  %v12726_v59 = vpop.eup %10378  ;;  %v3359_v8 = vpop.permute.xlu0 %3358 }
 0x95c   :  { %v12728_v46 = vpop.eup %10380 }
 0x95d   :  { %3310 = vadd.xlane.f32.xlu1 %v12726_v59  ;;  %3308 = vadd.xlane.f32.xlu0 %v12728_v46  ;;  %v3361_v37 = vpop.permute.xlu0 %3360 }
 0x97f   :  { %v3285_v41 = vpop.xlane.xlu1 %3284 }
 0x983   :  { %v3281_v3 = vpop.xlane.xlu1 %3280 }
 0x987   :  { %v3287_v11 = vpop.xlane.xlu1 %3286 }
 0x98a   :  { %v9292_v13 = vpop.f32.mrb[124].mxu0 }
 0x98b   :  { %v2809_v21 = vpop.f32.mrb[125].mxu0  ;;  %v3283_v12 = vpop.xlane.xlu1 %3282 }
 0x98c   :  { %v9293_v23 = vpop.f32.mrb[126].mxu0  ;;  %10382 = vrcp.f32 %v3283_v12 }
 0x98d   :  { %v2873_v39 = vpack.c.bf16 %v9293_v23, %v9292_v13  ;;  %v2812_v30 = vpop.f32.mrb[127].mxu0  ;;  %10384 = vrcp.f32 %v3281_v3 }
 0x98e   :  { %v2872_v2 = vpack.c.bf16 %v2812_v30, %v2809_v21  ;;  %v3293_v34 = vpop.xlane.xlu0 %3292  ;;  %10386 = vrcp.f32 %v3287_v11 }
 0x98f   :  { %v3289_v9 = vpop.xlane.xlu1 %3288 }
 0x990   :  { %9308 = vmatprep.mubr.msk.bf16.mxu0 %vm122_vm1, %v2872_v2 }
 0x991   :  { %9309 = vmatmul.mubr.msk.bf16.vlgmr.msra.gmra.mrb[108].mxu0 %vm122_vm1, %v2873_v39 }
 0x992   :  { %9357 = vmatpush3.bf16.msra.mxu0 %v3353_v43  ;;  %v9296_v45 = vpop.f32.mrb[128].mxu0  ;;  %v3295_v32 = vpop.xlane.xlu0 %3294 }
 0x993   :  { %9358 = vmatprep.subr.bf16.mxu0 %v3355_v61  ;;  %v2825_v16 = vpop.f32.mrb[129].mxu0 }
 0x994   :  { %v9297_v50 = vpop.f32.mrb[130].mxu0 }
 0x995   :  { %v2875_v57 = vpack.c.bf16 %v9297_v50, %v9296_v45  ;;  %v2828_v29 = vpop.f32.mrb[131].mxu0 }
 0x996   :  { %v2874_v52 = vpack.c.bf16 %v2828_v29, %v2825_v16  ;;  %9359 = vmatpush3.bf16.msra.mxu0 %v3355_v61  ;;  %v3291_v4 = vpop.xlane.xlu0 %3290  ;;  %v10383_v48 = vpop.eup %10382 }
 0x997   :  { %9360 = vmatprep.subr.bf16.mxu0 %v3357_v10  ;;  %10388 = vrcp.f32 %v3291_v4  ;;  %v10385_v42 = vpop.eup %10384  ;;  %v3329_v26 = vmul.f32 %v10383_v48, %v12681_v55  ;;  %v3367_v55 = vpop.permute.xlu1 %3366 }
 0x998   :  { %9312 = vmatprep.mubr.msk.bf16.mxu0 %vm122_vm1, %v2874_v52  ;;  %10390 = vrcp.f32 %v3285_v41  ;;  %v3328_v6 = vmul.f32 %v10385_v42, %v12674_v28  ;;  %v10387_v62 = vpop.eup %10386  ;;  %v10061_v28 = vld [vmem:[%s15309_s12 + $0x18] sm:$0xff]  }
 0x999   :  { %9313 = vmatmul.mubr.msk.bf16.gmra.mrb[112].mxu0 %vm122_vm1, %v2875_v57  ;;  %10392 = vrcp.f32 %v3289_v9  ;;  %v3331_v43 = vmul.f32 %v10387_v62, %v12678_v54 }
 0x99a   :  { %9361 = vmatpush3.bf16.msra.mxu0 %v3357_v10  ;;  %v9300_v36 = vpop.f32.mrb[132].mxu0  ;;  %10394 = vrcp.f32 %v3295_v32  ;;  %v3365_v19 = vpop.permute.xlu0 %3364  ;;  %v3344_v14 = vpack.c.bf16 %v3329_v26, %v3328_v6 }
 0x99b   :  { %9362 = vmatprep.subr.bf16.mxu0 %v3359_v8  ;;  %v2841_v15 = vpop.f32.mrb[133].mxu0  ;;  %10396 = vrcp.f32 %v3293_v34 }
 0x99c   :  { %v9301_v22 = vpop.f32.mrb[134].mxu0 }
 0x99d   :  { %v2877_v49 = vpack.c.bf16 %v9301_v22, %v9300_v36  ;;  %v2844_v47 = vpop.f32.mrb[135].mxu0 }
 0x99e   :  { %v2876_v56 = vpack.c.bf16 %v2844_v47, %v2841_v15  ;;  %9363 = vmatpush3.bf16.msra.mxu0 %v3359_v8 }
 0x99f   :  { %9364 = vmatprep.subr.bf16.mxu0 %v3361_v37 }
 0x9a0   :  { %9316 = vmatprep.mubr.msk.bf16.mxu0 %vm122_vm1, %v2876_v56 }
 0x9a1   :  { %9317 = vmatmul.mubr.msk.bf16.gmra.mrb[116].mxu0 %vm122_vm1, %v2877_v49  ;;  %v10389_v58 = vpop.eup %10388 }
 0x9a2   :  { %9365 = vmatpush3.bf16.msra.mxu0 %v3361_v37  ;;  %v9304_v18 = vpop.f32.mrb[136].mxu0  ;;  %v10391_v7 = vpop.eup %10390  ;;  %v3333_v61 = vmul.f32 %v10389_v58, %v12693_v31 }
 0x9a3   :  { %9366 = vmatprep.subr.bf16.mxu0 %v12732_v38  ;;  %v2857_v17 = vpop.f32.mrb[137].mxu0  ;;  %v10393_v53 = vpop.eup %10392 }
 0x9a4   :  { %v9305_v1 = vpop.f32.mrb[138].mxu0  ;;  %v3332_v10 = vmul.f32 %v10393_v53, %v12686_v44  ;;  %v10395_v8 = vpop.eup %10394 }
 0x9a5   :  { %v2879_v5 = vpack.c.bf16 %v9305_v1, %v9304_v18  ;;  %v2860_v51 = vpop.f32.mrb[139].mxu0  ;;  %v10397_v13 = vpop.eup %10396  ;;  %v3335_v54 = vmul.f32 %v10395_v8, %v12690_v33  ;;  %v10815_v8 = vld [vmem:[#allocation2] sm:$0xff] }
 0x9a6   :  { %v2878_v63 = vpack.c.bf16 %v2860_v51, %v2857_v17  ;;  %9367 = vmatpush3.bf16.msra.mxu0 %v12732_v38  ;;  %v3330_v38 = vmul.f32 %v10391_v7, %v12670_v40  ;;  %v3346_v3 = vpack.c.bf16 %v3333_v61, %v3332_v10  ;;  %v3334_v21 = vmul.f32 %v10397_v13, %v12684_v27  ;;  %v12775_v61 = vld [vmem:[%s15310_s13] ss:$0 sm:$0xff]  ;;  %v10814_v10 = vld [vmem:[#allocation2 + $0x10] sm:$0xff] }
 0x9a7   :  { %9368 = vmatprep.subr.bf16.mxu0 %v3365_v19 }
 0x9a8   :  { %9320 = vmatprep.mubr.msk.bf16.mxu0 %vm122_vm1, %v2878_v63  ;;  %v3345_v41 = vpack.c.bf16 %v3331_v43, %v3330_v38  ;;  %v3347_v37 = vpack.c.bf16 %v3335_v54, %v3334_v21  ;;  %v15500_v43 = vmov 0  }
 0x9a9   :  { %9321 = vmatmul.mubr.msk.bf16.gmra.mrb[120].mxu0 %vm122_vm1, %v2879_v5 }
 0x9aa   :  { %9369 = vmatpush3.bf16.msra.mxu0 %v3365_v19  ;;  %9372 = vmatprep.mubr.bf16.mxu0 %v3344_v14 }
 0x9ab   :  { %9370 = vmatprep.subr.bf16.mxu0 %v3367_v55 }
 0x9ae   :  { %9371 = vmatpush3.bf16.msra.mxu0 %v3367_v55 }
 0x9af   :  { %9388 = vmatprep.subr.bf16.mxu0 %v10061_v28 }
 0x9b1   :  { %9373 = vmatmul.mubr.bf16.vlgmr.msra.gmra.mrb[140].mxu0 %v3345_v41 }
 0x9b2   :  { %9376 = vmatprep.mubr.bf16.mxu0 %v3346_v3  ;;  %9389 = vmatpush3.bf16.msra.mxu0 %v10061_v28 }
 0x9b9   :  { %9377 = vmatmul.mubr.bf16.gmra.mrb[144].mxu0 %v3347_v37  ;;  %v10816_v37 = vld [vmem:[#allocation2 + $0x18] sm:$0xff] }
 0x9c4   :  { %v3297_v31 = vpop.xlane.xlu1 %3296 }
 0x9c5   :  { %10398 = vrcp.f32 %v3297_v31 }
 0x9c8   :  { %v3303_v40 = vpop.xlane.xlu1 %3302 }
 0x9cb   :  { %v3299_v23 = vpop.xlane.xlu0 %3298 }
 0x9cc   :  { %10400 = vrcp.f32 %v3299_v23 }
 0x9cd   :  { %10402 = vrcp.f32 %v3303_v40  ;;  %v10817_v40 = vld [vmem:[#allocation2 + $0x8] sm:$0xff] }
 0x9cf   :  { %v3301_v44 = vpop.xlane.xlu0 %3300  ;;  %v10399_v39 = vpop.eup %10398 }
 0x9d0   :  { %10404 = vrcp.f32 %v3301_v44  ;;  %v3336_v11 = vmul.f32 %v10399_v39, %v12704_v60 }
 0x9d6   :  { %v10401_v30 = vpop.eup %10400 }
 0x9d7   :  { %v3337_v2 = vmul.f32 %v10401_v30, %v12710_v35  ;;  %v10403_v34 = vpop.eup %10402 }
 0x9d8   :  { %v3339_v16 = vmul.f32 %v10403_v34, %v12707_v0 }
 0x9d9   :  { %v3348_v33 = vpack.c.bf16 %v3337_v2, %v3336_v11 }
 0x9da   :  { %v10405_v45 = vpop.eup %10404 }
 0x9db   :  { %9380 = vmatprep.mubr.bf16.mxu0 %v3348_v33  ;;  %v3338_v27 = vmul.f32 %v10405_v45, %v12713_v25  ;;  %v10818_v45 = vld [vmem:[#allocation2 + $0x30] sm:$0xff] }
 0x9dd   :  { %v3349_v12 = vpack.c.bf16 %v3339_v16, %v3338_v27  ;;  %v10819_v16 = vld [vmem:[#allocation2 + $0x20] sm:$0xff] }
 0x9df   :  { %9381 = vmatmul.mubr.bf16.gmra.mrb[148].mxu0 %v3349_v12 }
 0x9e2   :  { %v3305_v50 = vpop.xlane.xlu0 %3304 }
 0x9e3   :  { %10406 = vrcp.f32 %v3305_v50 }
 0x9e6   :  { %v3307_v57 = vpop.xlane.xlu1 %3306 }
 0x9e7   :  { %10408 = vrcp.f32 %v3307_v57 }
 0x9ea   :  { %v3311_v29 = vpop.xlane.xlu1 %3310  ;;  %v3309_v32 = vpop.xlane.xlu0 %3308 }
 0x9eb   :  { %10410 = vrcp.f32 %v3311_v29 }
 0x9ec   :  { %10412 = vrcp.f32 %v3309_v32 }
 0x9ed   :  { %v10407_v60 = vpop.eup %10406 }
 0x9ee   :  { %v3340_v52 = vmul.f32 %v10407_v60, %v12720_v20  ;;  %v10820_v60 = vld [vmem:[#allocation2 + $0x38] sm:$0xff] }
 0x9f1   :  { %v10409_v35 = vpop.eup %10408 }
 0x9f2   :  { %v3341_v36 = vmul.f32 %v10409_v35, %v12723_v24 }
 0x9f4   :  { %v3350_v15 = vpack.c.bf16 %v3341_v36, %v3340_v52  ;;  %v10821_v52 = vld [vmem:[#allocation2 + $0x28] sm:$0xff] }
 0x9f5   :  { %v10411_v25 = vpop.eup %10410 }
 0x9f6   :  { %v10413_v4 = vpop.eup %10412  ;;  %9384 = vmatprep.mubr.bf16.mxu0 %v3350_v15  ;;  %v3343_v0 = vmul.f32 %v10411_v25, %v12726_v59 }
 0x9f7   :  { %v3342_v22 = vmul.f32 %v10413_v4, %v12728_v46 }
 0x9f9   :  { %v3351_v49 = vpack.c.bf16 %v3343_v0, %v3342_v22 }
 0x9fb   :  { %9385 = vmatmul.mubr.bf16.gmra.mrb[152].mxu0 %v3351_v49 }
 0xa84   :  { %v9374_v47 = vpop.f32.mrb[140].mxu0 }
 0xa85   :  { %v3410_v9 = vpop.f32.mrb[141].mxu0 }
 0xa86   :  { %v9375_v56 = vpop.f32.mrb[142].mxu0 }
 0xa87   :  { %v3474_v48 = vpack.c.bf16 %v9375_v56, %v9374_v47  ;;  %v3413_v18 = vpop.f32.mrb[143].mxu0 }
 0xa88   :  { %v3473_v42 = vpack.c.bf16 %v3413_v18, %v3410_v9  ;;  %v10822_v18 = vld [vmem:[#allocation2 + $0x50] sm:$0xff] }
 0xa8a   :  { %9390 = vmatprep.mubr.msk.bf16.mxu0 %vm122_vm1, %v3473_v42 }
 0xa8b   :  { %9391 = vmatmul.mubr.msk.bf16.vlgmr.msra.gmra.mrb[108].mxu0 %vm122_vm1, %v3474_v48 }
 0xa8c   :  { %v9378_v20 = vpop.f32.mrb[144].mxu0 }
 0xa8d   :  { %v3426_v24 = vpop.f32.mrb[145].mxu0 }
 0xa8e   :  { %v9379_v17 = vpop.f32.mrb[146].mxu0 }
 0xa8f   :  { %v3476_v1 = vpack.c.bf16 %v9379_v17, %v9378_v20  ;;  %v3429_v26 = vpop.f32.mrb[147].mxu0  ;;  %v10823_v20 = vld [vmem:[#allocation2 + $0x40] sm:$0xff] }
 0xa90   :  { %v3475_v59 = vpack.c.bf16 %v3429_v26, %v3426_v24 }
 0xa92   :  { %9394 = vmatprep.mubr.msk.bf16.mxu0 %vm122_vm1, %v3475_v59  ;;  %v10824_v59 = vld [vmem:[#allocation2 + $0x58] sm:$0xff] }
 0xa93   :  { %9395 = vmatmul.mubr.msk.bf16.gmra.mrb[112].mxu0 %vm122_vm1, %v3476_v1 }
 0xab2   :  { %v9382_v46 = vpop.f32.mrb[148].mxu0 }
 0xab3   :  { %v3442_v5 = vpop.f32.mrb[149].mxu0 }
 0xab4   :  { %v9383_v51 = vpop.f32.mrb[150].mxu0 }
 0xab5   :  { %v3478_v19 = vpack.c.bf16 %v9383_v51, %v9382_v46  ;;  %v3445_v63 = vpop.f32.mrb[151].mxu0 }
 0xab6   :  { %v3477_v6 = vpack.c.bf16 %v3445_v63, %v3442_v5  ;;  %v10825_v5 = vld [vmem:[#allocation2 + $0x48] sm:$0xff] }
 0xab8   :  { %9398 = vmatprep.mubr.msk.bf16.mxu0 %vm122_vm1, %v3477_v6 }
 0xab9   :  { %9399 = vmatmul.mubr.msk.bf16.gmra.mrb[116].mxu0 %vm122_vm1, %v3478_v19 }
 0xace   :  { %v9386_v62 = vpop.f32.mrb[152].mxu0 }
 0xacf   :  { %v3458_v14 = vpop.f32.mrb[153].mxu0 }
 0xad0   :  { %v9387_v58 = vpop.f32.mrb[154].mxu0 }
 0xad1   :  { %v3480_v7 = vpack.c.bf16 %v9387_v58, %v9386_v62  ;;  %v3461_v55 = vpop.f32.mrb[155].mxu0 }
 0xad2   :  { %v3479_v53 = vpack.c.bf16 %v3461_v55, %v3458_v14 }
 0xad4   :  { %9402 = vmatprep.mubr.msk.bf16.mxu0 %vm122_vm1, %v3479_v53 }
 0xad5   :  { %9403 = vmatmul.mubr.msk.bf16.gmra.mrb[120].mxu0 %vm122_vm1, %v3480_v7 }
 0xad6   :  { %4715 = vmatprep.mubr.bf16.mxu0 %v15500_v43 }
 0xb5e   :  { %v9392_v28 = vpop.f32.mrb[108].mxu0 }
 0xb5f   :  { %v3545_v38 = vpop.f32.mrb[109].mxu0  ;;  %v3626_v41 = vadd.f32 %v10814_v10, %v9392_v28  ;;  %v10826_v28 = vld [vmem:[#allocation2 + $0x70] sm:$0xff]  ;;  %v10827_v10 = vld [vmem:[#allocation2 + $0x60] sm:$0xff] }
 0xb60   :  { %v3624_v3 = vadd.f32 %v10815_v8, %v3545_v38  ;;  %v9393_v13 = vpop.f32.mrb[110].mxu0 }
 0xb61   :  { %v3548_v54 = vpop.f32.mrb[111].mxu0  ;;  %v3627_v31 = vadd.f32 %v10816_v37, %v9393_v13  ;;  %v12781_v44 = vadd.f32 %v12775_v61, %v3626_v41 }
 0xb62   :  { %v12778_v21 = vadd.f32 %v12775_v61, %v3624_v3  ;;  %v3625_v23 = vadd.f32 %v10817_v40, %v3548_v54  ;;  %v10828_v54 = vld [vmem:[#allocation2 + $0x78] sm:$0xff] }
 0xb63   :  { %v12789_v11 = vadd.f32 %v12775_v61, %v3627_v31  ;;  %v3671_v57 = vsel %vm73_vm4, %v12781_v44, 0.0  ;;  %v10829_v31 = vld [vmem:[#allocation2 + $0x68] sm:$0xff] }
 0xb64   :  { %v12784_v39 = vadd.f32 %v12775_v61, %v3625_v23  ;;  %v3665_v30 = vsel %vm73_vm4, %v12778_v21, 0.0 }
 0xb65   :  { %3666 = vadd.xlane.f32.xlu0 %v3665_v30  ;;  %v3674_v15 = vsel %vm73_vm4, %v12789_v11, 0.0 }
 0xb66   :  { %v9396_v2 = vpop.f32.mrb[112].mxu0  ;;  %v3668_v34 = vsel %vm73_vm4, %v12784_v39, 0.0 }
 0xb67   :  { %3669 = vadd.xlane.f32.xlu1 %v3668_v34  ;;  %v3561_v33 = vpop.f32.mrb[113].mxu0  ;;  %v3630_v27 = vadd.f32 %v10818_v45, %v9396_v2 }
 0xb68   :  { %v3628_v12 = vadd.f32 %v10819_v16, %v3561_v33  ;;  %v9397_v50 = vpop.f32.mrb[114].mxu0 }
 0xb69   :  { %3672 = vadd.xlane.f32.xlu0 %v3671_v57  ;;  %v3564_v29 = vpop.f32.mrb[115].mxu0  ;;  %v3631_v35 = vadd.f32 %v10820_v60, %v9397_v50  ;;  %v12801_v25 = vadd.f32 %v12775_v61, %v3630_v27 }
 0xb6a   :  { %v12796_v32 = vadd.f32 %v12775_v61, %v3628_v12  ;;  %v3629_v36 = vadd.f32 %v10821_v52, %v3564_v29 }
 0xb6b   :  { %3675 = vadd.xlane.f32.xlu1 %v3674_v15  ;;  %v12809_v22 = vadd.f32 %v12775_v61, %v3631_v35  ;;  %v3683_v47 = vsel %vm73_vm4, %v12801_v25, 0.0 }
 0xb6c   :  { %v12804_v4 = vadd.f32 %v12775_v61, %v3629_v36  ;;  %v3677_v0 = vsel %vm73_vm4, %v12796_v32, 0.0 }
 0xb6d   :  { %3678 = vadd.xlane.f32.xlu0 %v3677_v0  ;;  %v3686_v9 = vsel %vm73_vm4, %v12809_v22, 0.0 }
 0xb6e   :  { %v3680_v49 = vsel %vm73_vm4, %v12804_v4, 0.0 }
 0xb6f   :  { %3681 = vadd.xlane.f32.xlu1 %v3680_v49 }
 0xb71   :  { %3684 = vadd.xlane.f32.xlu0 %v3683_v47 }
 0xb73   :  { %3687 = vadd.xlane.f32.xlu1 %v3686_v9 }
 0xb8c   :  { %v9400_v56 = vpop.f32.mrb[116].mxu0 }
 0xb8d   :  { %v3577_v48 = vpop.f32.mrb[117].mxu0  ;;  %v3634_v42 = vadd.f32 %v10822_v18, %v9400_v56 }
 0xb8e   :  { %v3632_v24 = vadd.f32 %v10823_v20, %v3577_v48  ;;  %v9401_v17 = vpop.f32.mrb[118].mxu0 }
 0xb8f   :  { %v3580_v1 = vpop.f32.mrb[119].mxu0  ;;  %v3635_v46 = vadd.f32 %v10824_v59, %v9401_v17  ;;  %v12821_v19 = vadd.f32 %v12775_v61, %v3634_v42 }
 0xb90   :  { %v12818_v26 = vadd.f32 %v12775_v61, %v3632_v24  ;;  %v3633_v51 = vadd.f32 %v10825_v5, %v3580_v1 }
 0xb91   :  { %v12829_v62 = vadd.f32 %v12775_v61, %v3635_v46  ;;  %v3695_v58 = vsel %vm73_vm4, %v12821_v19, 0.0 }
 0xb92   :  { %v12824_v63 = vadd.f32 %v12775_v61, %v3633_v51  ;;  %v3689_v6 = vsel %vm73_vm4, %v12818_v26, 0.0 }
 0xb93   :  { %3690 = vadd.xlane.f32.xlu0 %v3689_v6  ;;  %v3698_v7 = vsel %vm73_vm4, %v12829_v62, 0.0 }
 0xb94   :  { %v3692_v14 = vsel %vm73_vm4, %v12824_v63, 0.0 }
 0xb95   :  { %3693 = vadd.xlane.f32.xlu1 %v3692_v14 }
 0xb97   :  { %3696 = vadd.xlane.f32.xlu0 %v3695_v58 }
 0xb99   :  { %3699 = vadd.xlane.f32.xlu1 %v3698_v7 }
 0xba8   :  { %v9404_v55 = vpop.f32.mrb[120].mxu0 }
 0xba9   :  { %v3593_v53 = vpop.f32.mrb[121].mxu0  ;;  %v3638_v38 = vadd.f32 %v10826_v28, %v9404_v55  ;;  %v10063_v28 = vld [vmem:[%s15313_s16 + $0x8] sm:$0xff]  }
 0xbaa   :  { %v3636_v41 = vadd.f32 %v10827_v10, %v3593_v53  ;;  %v9405_v8 = vpop.f32.mrb[122].mxu0 }
 0xbab   :  { %v3596_v3 = vpop.f32.mrb[123].mxu0  ;;  %v3639_v37 = vadd.f32 %v10828_v54, %v9405_v8  ;;  %v12841_v23 = vadd.f32 %v12775_v61, %v3638_v38  ;;  %v10064_v38 = vld [vmem:[%s15313_s16 + $0x10] sm:$0xff]   ;;  %v10065_v8 = vld [vmem:[%s15313_s16 + $0x18] sm:$0xff]  }
 0xbac   :  { %v12838_v13 = vadd.f32 %v12775_v61, %v3636_v41  ;;  %v3637_v40 = vadd.f32 %v10829_v31, %v3596_v3 }
 0xbad   :  { %v12849_v34 = vadd.f32 %v12775_v61, %v3639_v37  ;;  %v3707_v45 = vsel %vm73_vm4, %v12841_v23, 0.0 }
 0xbae   :  { %v12844_v30 = vadd.f32 %v12775_v61, %v3637_v40  ;;  %v3701_v2 = vsel %vm73_vm4, %v12838_v13, 0.0 }
 0xbaf   :  { %3702 = vadd.xlane.f32.xlu0 %v3701_v2  ;;  %v3710_v27 = vsel %vm73_vm4, %v12849_v34, 0.0 }
 0xbb0   :  { %v3704_v33 = vsel %vm73_vm4, %v12844_v30, 0.0 }
 0xbb1   :  { %3705 = vadd.xlane.f32.xlu1 %v3704_v33 }
 0xbb3   :  { %3708 = vadd.xlane.f32.xlu0 %v3707_v45 }
 0xbb5   :  { %3711 = vadd.xlane.f32.xlu1 %v3710_v27 }
 0xbf2   :  { %v3667_v16 = vpop.xlane.xlu0 %3666 }
 0xbf3   :  { %v3714_v12 = vmul.f32 0.015625, %v3667_v16 }
 0xbf4   :  { %v3670_v50 = vpop.xlane.xlu1 %3669 }
 0xbf5   :  { %v12858_v57 = vsub.f32 %v12778_v21, %v3714_v12  ;;  %v3715_v61 = vmul.f32 0.015625, %v3670_v50 }
 0xbf6   :  { %v3673_v29 = vpop.xlane.xlu0 %3672 }
 0xbf7   :  { %v12861_v60 = vsub.f32 %v12784_v39, %v3715_v61  ;;  %v3716_v35 = vmul.f32 0.015625, %v3673_v29  ;;  %v3746_v52 = vmul.f32 %v12858_v57, %v12858_v57 }
 0xbf8   :  { %v3676_v36 = vpop.xlane.xlu1 %3675 }
 0xbf9   :  { %v12866_v15 = vsub.f32 %v12781_v44, %v3716_v35  ;;  %v3717_v0 = vmul.f32 0.015625, %v3676_v36  ;;  %v3762_v49 = vsel %vm73_vm4, %v3746_v52, 0.0  ;;  %v3747_v21 = vmul.f32 %v12861_v60, %v12861_v60 }
 0xbfa   :  { %v3679_v47 = vpop.xlane.xlu0 %3678  ;;  %3763 = vadd.xlane.f32.xlu0 %v3762_v49 }
 0xbfb   :  { %v12872_v9 = vsub.f32 %v12789_v11, %v3717_v0  ;;  %v3718_v39 = vmul.f32 0.015625, %v3679_v47  ;;  %v3765_v56 = vsel %vm73_vm4, %v3747_v21, 0.0  ;;  %v3748_v48 = vmul.f32 %v12866_v15, %v12866_v15 }
 0xbfc   :  { %v3682_v18 = vpop.xlane.xlu1 %3681  ;;  %3766 = vadd.xlane.f32.xlu1 %v3765_v56 }
 0xbfd   :  { %v12878_v44 = vsub.f32 %v12796_v32, %v3718_v39  ;;  %v3719_v42 = vmul.f32 0.015625, %v3682_v18  ;;  %v3768_v20 = vsel %vm73_vm4, %v3748_v48, 0.0  ;;  %v3749_v24 = vmul.f32 %v12872_v9, %v12872_v9 }
 0xbfe   :  { %v3685_v17 = vpop.xlane.xlu0 %3684  ;;  %3769 = vadd.xlane.f32.xlu0 %v3768_v20 }
 0xbff   :  { %v12884_v11 = vsub.f32 %v12804_v4, %v3719_v42  ;;  %v3720_v1 = vmul.f32 0.015625, %v3685_v17  ;;  %v3771_v59 = vsel %vm73_vm4, %v3749_v24, 0.0  ;;  %v3750_v46 = vmul.f32 %v12878_v44, %v12878_v44 }
 0xc00   :  { %v3688_v5 = vpop.xlane.xlu1 %3687  ;;  %3772 = vadd.xlane.f32.xlu1 %v3771_v59 }
 0xc01   :  { %v12890_v32 = vsub.f32 %v12801_v25, %v3720_v1  ;;  %v3721_v51 = vmul.f32 0.015625, %v3688_v5  ;;  %v3774_v6 = vsel %vm73_vm4, %v3750_v46, 0.0  ;;  %v3751_v14 = vmul.f32 %v12884_v11, %v12884_v11 }
 0xc02   :  { %3775 = vadd.xlane.f32.xlu0 %v3774_v6 }
 0xc03   :  { %v12896_v4 = vsub.f32 %v12809_v22, %v3721_v51  ;;  %v3777_v58 = vsel %vm73_vm4, %v3751_v14, 0.0  ;;  %v3752_v7 = vmul.f32 %v12890_v32, %v12890_v32  ;;  %v10062_v22 = vld [vmem:[%s15313_s16] sm:$0xff]  }
 0xc04   :  { %3778 = vadd.xlane.f32.xlu1 %v3777_v58  ;;  %9406 = vmatprep.subr.bf16.mxu1 %v10062_v22 }
 0xc05   :  { %v3780_v55 = vsel %vm73_vm4, %v3752_v7, 0.0  ;;  %v3753_v25 = vmul.f32 %v12896_v4, %v12896_v4  ;;  %9407 = vmatpush3.bf16.msra.mxu1 %v10062_v22 }
 0xc06   :  { %3781 = vadd.xlane.f32.xlu0 %v3780_v55  ;;  %9408 = vmatprep.subr.bf16.mxu1 %v10063_v28 }
 0xc07   :  { %v3783_v53 = vsel %vm73_vm4, %v3753_v25, 0.0 }
 0xc08   :  { %3784 = vadd.xlane.f32.xlu1 %v3783_v53 }
 0xc09   :  { %9409 = vmatpush3.bf16.msra.mxu1 %v10063_v28 }
 0xc0a   :  { %9410 = vmatprep.subr.bf16.mxu1 %v10064_v38 }
 0xc0d   :  { %9411 = vmatpush3.bf16.msra.mxu1 %v10064_v38 }
 0xc0e   :  { %9412 = vmatprep.subr.bf16.mxu1 %v10065_v8 }
 0xc11   :  { %9413 = vmatpush3.bf16.msra.mxu1 %v10065_v8 }
 0xc20   :  { %v3691_v10 = vpop.xlane.xlu0 %3690 }
 0xc21   :  { %v3722_v41 = vmul.f32 0.015625, %v3691_v10 }
 0xc22   :  { %v3694_v3 = vpop.xlane.xlu1 %3693 }
 0xc23   :  { %v12918_v54 = vsub.f32 %v12818_v26, %v3722_v41  ;;  %v3723_v37 = vmul.f32 0.015625, %v3694_v3 }
 0xc24   :  { %v3697_v31 = vpop.xlane.xlu0 %3696 }
 0xc25   :  { %v12921_v40 = vsub.f32 %v12824_v63, %v3723_v37  ;;  %v3724_v2 = vmul.f32 0.015625, %v3697_v31  ;;  %v3754_v33 = vmul.f32 %v12918_v54, %v12918_v54 }
 0xc26   :  { %v3700_v45 = vpop.xlane.xlu1 %3699 }
 0xc27   :  { %v12926_v27 = vsub.f32 %v12821_v19, %v3724_v2  ;;  %v3725_v16 = vmul.f32 0.015625, %v3700_v45  ;;  %v3786_v12 = vsel %vm73_vm4, %v3754_v33, 0.0  ;;  %v3755_v26 = vmul.f32 %v12921_v40, %v12921_v40 }
 0xc28   :  { %3787 = vadd.xlane.f32.xlu0 %v3786_v12 }
 0xc29   :  { %v12932_v50 = vsub.f32 %v12829_v62, %v3725_v16  ;;  %v3789_v63 = vsel %vm73_vm4, %v3755_v26, 0.0  ;;  %v3756_v61 = vmul.f32 %v12926_v27, %v12926_v27  ;;  %v12974_v16 = vld [vmem:[%s15311_s14] ss:$0 sm:$0xff] }
 0xc2a   :  { %3790 = vadd.xlane.f32.xlu1 %v3789_v63 }
 0xc2b   :  { %v3792_v29 = vsel %vm73_vm4, %v3756_v61, 0.0  ;;  %v3757_v19 = vmul.f32 %v12932_v50, %v12932_v50 }
 0xc2c   :  { %3793 = vadd.xlane.f32.xlu0 %v3792_v29 }
 0xc2d   :  { %v3795_v35 = vsel %vm73_vm4, %v3757_v19, 0.0 }
 0xc2e   :  { %3796 = vadd.xlane.f32.xlu1 %v3795_v35 }
 0xc3c   :  { %v3703_v52 = vpop.xlane.xlu0 %3702 }
 0xc3d   :  { %v3726_v36 = vmul.f32 0.015625, %v3703_v52 }
 0xc3e   :  { %v3706_v0 = vpop.xlane.xlu1 %3705 }
 0xc3f   :  { %v12942_v62 = vsub.f32 %v12838_v13, %v3726_v36  ;;  %v3727_v49 = vmul.f32 0.015625, %v3706_v0  ;;  %v12982_v36 = vld [vmem:[%s15312_s15] ss:$0 sm:$0xff] }
 0xc40   :  { %v3709_v21 = vpop.xlane.xlu0 %3708 }
 0xc41   :  { %v12945_v47 = vsub.f32 %v12844_v30, %v3727_v49  ;;  %v3728_v39 = vmul.f32 0.015625, %v3709_v21  ;;  %v3758_v56 = vmul.f32 %v12942_v62, %v12942_v62 }
 0xc42   :  { %v3712_v48 = vpop.xlane.xlu1 %3711 }
 0xc43   :  { %v12950_v18 = vsub.f32 %v12841_v23, %v3728_v39  ;;  %v3729_v42 = vmul.f32 0.015625, %v3712_v48  ;;  %v3798_v20 = vsel %vm73_vm4, %v3758_v56, 0.0  ;;  %v3759_v13 = vmul.f32 %v12945_v47, %v12945_v47 }
 0xc44   :  { %3799 = vadd.xlane.f32.xlu0 %v3798_v20 }
 0xc45   :  { %v12956_v24 = vsub.f32 %v12849_v34, %v3729_v42  ;;  %v3801_v30 = vsel %vm73_vm4, %v3759_v13, 0.0  ;;  %v3760_v17 = vmul.f32 %v12950_v18, %v12950_v18  ;;  %v12968_v34 = vld [vmem:[%s15315_s18] sm:$0xff]  }
 0xc46   :  { %3802 = vadd.xlane.f32.xlu1 %v3801_v30  ;;  %9430 = vmatprep.subr.bf16.mxu1 %v12968_v34 }
 0xc47   :  { %v3804_v1 = vsel %vm73_vm4, %v3760_v17, 0.0  ;;  %v3761_v23 = vmul.f32 %v12956_v24, %v12956_v24 }
 0xc48   :  { %3805 = vadd.xlane.f32.xlu0 %v3804_v1 }
 0xc49   :  { %v3807_v59 = vsel %vm73_vm4, %v3761_v23, 0.0 }
 0xc4a   :  { %3808 = vadd.xlane.f32.xlu1 %v3807_v59 }
 0xc87   :  { %v3764_v46 = vpop.xlane.xlu0 %3763 }
 0xc88   :  { %v3810_v5 = vmul.f32 0.015625, %v3764_v46 }
 0xc89   :  { %v3767_v51 = vpop.xlane.xlu1 %3766 }
 0xc8a   :  { %v3826_v6 = vadd.f32 1e-05, %v3810_v5  ;;  %v3811_v14 = vmul.f32 0.015625, %v3767_v51  ;;  %v10067_v5 = vld [vmem:[%s15315_s18 + $0x8] sm:$0xff]  }
 0xc8b   :  { %v3770_v58 = vpop.xlane.xlu0 %3769 }
 0xc8c   :  { %10414 = vrsqrt.f32 %v3826_v6  ;;  %v3827_v7 = vadd.f32 1e-05, %v3811_v14  ;;  %v3812_v55 = vmul.f32 0.015625, %v3770_v58 }
 0xc8d   :  { %v3773_v25 = vpop.xlane.xlu1 %3772 }
 0xc8e   :  { %10416 = vrsqrt.f32 %v3827_v7  ;;  %v3828_v53 = vadd.f32 1e-05, %v3812_v55  ;;  %v3813_v22 = vmul.f32 0.015625, %v3773_v25  ;;  %v10068_v55 = vld [vmem:[%s15315_s18 + $0x10] sm:$0xff]  }
 0xc8f   :  { %v3776_v28 = vpop.xlane.xlu0 %3775 }
 0xc90   :  { %10418 = vrsqrt.f32 %v3828_v53  ;;  %v3829_v38 = vadd.f32 1e-05, %v3813_v22  ;;  %v3814_v10 = vmul.f32 0.015625, %v3776_v28  ;;  %v10069_v53 = vld [vmem:[%s15315_s18 + $0x18] sm:$0xff]   ;;  %v10070_v22 = vld [vmem:[%s15315_s18 + $0x20] sm:$0xff]   ;;  %v10071_v28 = vld [vmem:[%s15315_s18 + $0x28] sm:$0xff]  }
 0xc91   :  { %v3779_v41 = vpop.xlane.xlu1 %3778 }
 0xc92   :  { %10420 = vrsqrt.f32 %v3829_v38  ;;  %v3830_v8 = vadd.f32 1e-05, %v3814_v10  ;;  %v3815_v3 = vmul.f32 0.015625, %v3779_v41 }
 0xc93   :  { %v3782_v37 = vpop.xlane.xlu0 %3781 }
 0xc94   :  { %10422 = vrsqrt.f32 %v3830_v8  ;;  %v3831_v31 = vadd.f32 1e-05, %v3815_v3  ;;  %v3816_v2 = vmul.f32 0.015625, %v3782_v37 }
 0xc95   :  { %v3785_v33 = vpop.xlane.xlu1 %3784 }
 0xc96   :  { %v10415_v45 = vpop.eup %10414  ;;  %10424 = vrsqrt.f32 %v3831_v31  ;;  %v3832_v12 = vadd.f32 1e-05, %v3816_v2  ;;  %v3817_v26 = vmul.f32 0.015625, %v3785_v33 }
 0xc97   :  { %v3858_v63 = vmul.f32 %v10415_v45, %v12858_v57 }
 0xc98   :  { %v10417_v61 = vpop.eup %10416  ;;  %10426 = vrsqrt.f32 %v3832_v12  ;;  %v3833_v29 = vadd.f32 1e-05, %v3817_v26 }
 0xc99   :  { %v3859_v19 = vmul.f32 %v10417_v61, %v12861_v60  ;;  %v3880_v35 = vmul.f32 %v12974_v16, %v3858_v63 }
 0xc9a   :  { %v10419_v52 = vpop.eup %10418  ;;  %10428 = vrsqrt.f32 %v3833_v29 }
 0xc9b   :  { %v3860_v0 = vmul.f32 %v10419_v52, %v12866_v15  ;;  %v3881_v49 = vmul.f32 %v12974_v16, %v3859_v19  ;;  %v12989_v60 = vadd.f32 %v12982_v36, %v3880_v35 }
 0xc9c   :  { %v10421_v21 = vpop.eup %10420 }
 0xc9d   :  { %v3882_v57 = vmul.f32 %v12974_v16, %v3860_v0  ;;  %v3861_v39 = vmul.f32 %v10421_v21, %v12872_v9  ;;  %v12992_v56 = vadd.f32 %v12982_v36, %v3881_v49 }
 0xc9e   :  { %v10423_v48 = vpop.eup %10422 }
 0xc9f   :  { %v3883_v42 = vmul.f32 %v12974_v16, %v3861_v39  ;;  %v3918_v20 = vpack.c.bf16 %v12992_v56, %v12989_v60  ;;  %v3862_v15 = vmul.f32 %v10423_v48, %v12878_v44  ;;  %v12999_v30 = vadd.f32 %v12982_v36, %v3882_v57 }
 0xca0   :  { %v10425_v13 = vpop.eup %10424 }
 0xca1   :  { %v13002_v9 = vadd.f32 %v12982_v36, %v3883_v42  ;;  %9414 = vmatprep.mubr.msk.bf16.mxu1 %vm73_vm4, %v3918_v20  ;;  %v3863_v17 = vmul.f32 %v10425_v13, %v12884_v11  ;;  %v3884_v1 = vmul.f32 %v12974_v16, %v3862_v15 }
 0xca2   :  { %v10427_v23 = vpop.eup %10426 }
 0xca3   :  { %v3919_v59 = vpack.c.bf16 %v13002_v9, %v12999_v30  ;;  %v3885_v46 = vmul.f32 %v12974_v16, %v3863_v17  ;;  %v3864_v44 = vmul.f32 %v10427_v23, %v12890_v32  ;;  %v13016_v6 = vadd.f32 %v12982_v36, %v3884_v1 }
 0xca4   :  { %v10429_v51 = vpop.eup %10428 }
 0xca5   :  { %9415 = vmatmul.mubr.msk.bf16.vlgmr.msra.gmra.mrb[104].mxu1 %vm73_vm4, %v3919_v59  ;;  %v13019_v11 = vadd.f32 %v12982_v36, %v3885_v46  ;;  %v3865_v14 = vmul.f32 %v10429_v51, %v12896_v4  ;;  %v3886_v58 = vmul.f32 %v12974_v16, %v3864_v44 }
 0xca6   :  { %9431 = vmatpush3.bf16.msra.mxu1 %v12968_v34 }
 0xca7   :  { %v3920_v32 = vpack.c.bf16 %v13019_v11, %v13016_v6  ;;  %v3887_v7 = vmul.f32 %v12974_v16, %v3865_v14  ;;  %9432 = vmatprep.subr.bf16.mxu1 %v10067_v5  ;;  %v13032_v25 = vadd.f32 %v12982_v36, %v3886_v58 }
 0xca9   :  { %9418 = vmatprep.mubr.msk.bf16.mxu1 %vm73_vm4, %v3920_v32  ;;  %v13035_v4 = vadd.f32 %v12982_v36, %v3887_v7 }
 0xcaa   :  { %9433 = vmatpush3.bf16.msra.mxu1 %v10067_v5 }
 0xcab   :  { %v3921_v34 = vpack.c.bf16 %v13035_v4, %v13032_v25  ;;  %9434 = vmatprep.subr.bf16.mxu1 %v10068_v55 }
 0xcad   :  { %9419 = vmatmul.mubr.msk.bf16.gmra.mrb[108].mxu1 %vm73_vm4, %v3921_v34 }
 0xcae   :  { %9435 = vmatpush3.bf16.msra.mxu1 %v10068_v55 }
 0xcaf   :  { %9436 = vmatprep.subr.bf16.mxu1 %v10069_v53 }
 0xcb2   :  { %9437 = vmatpush3.bf16.msra.mxu1 %v10069_v53 }
 0xcb3   :  { %9438 = vmatprep.subr.bf16.mxu1 %v10070_v22 }
 0xcb5   :  { %v3788_v38 = vpop.xlane.xlu0 %3787 }
 0xcb6   :  { %v3818_v10 = vmul.f32 0.015625, %v3788_v38  ;;  %9439 = vmatpush3.bf16.msra.mxu1 %v10070_v22 }
 0xcb7   :  { %v3791_v41 = vpop.xlane.xlu1 %3790  ;;  %9440 = vmatprep.subr.bf16.mxu1 %v10071_v28 }
 0xcb8   :  { %v3834_v8 = vadd.f32 1e-05, %v3818_v10  ;;  %v3819_v3 = vmul.f32 0.015625, %v3791_v41 }
 0xcb9   :  { %v3794_v37 = vpop.xlane.xlu0 %3793 }
 0xcba   :  { %10430 = vrsqrt.f32 %v3834_v8  ;;  %v3835_v31 = vadd.f32 1e-05, %v3819_v3  ;;  %v3820_v2 = vmul.f32 0.015625, %v3794_v37  ;;  %9441 = vmatpush3.bf16.msra.mxu1 %v10071_v28 }
 0xcbb   :  { %v3797_v33 = vpop.xlane.xlu1 %3796 }
 0xcbc   :  { %10432 = vrsqrt.f32 %v3835_v31  ;;  %v3836_v45 = vadd.f32 1e-05, %v3820_v2  ;;  %v3821_v12 = vmul.f32 0.015625, %v3797_v33 }
 0xcbe   :  { %10434 = vrsqrt.f32 %v3836_v45  ;;  %v3837_v26 = vadd.f32 1e-05, %v3821_v12 }
 0xcc0   :  { %10436 = vrsqrt.f32 %v3837_v26 }
 0xcc4   :  { %v10431_v63 = vpop.eup %10430 }
 0xcc5   :  { %v3866_v61 = vmul.f32 %v10431_v63, %v12918_v54 }
 0xcc6   :  { %v10433_v29 = vpop.eup %10432 }
 0xcc7   :  { %v3867_v19 = vmul.f32 %v10433_v29, %v12921_v40  ;;  %v3888_v35 = vmul.f32 %v12974_v16, %v3866_v61 }
 0xcc8   :  { %v10435_v52 = vpop.eup %10434 }
 0xcc9   :  { %v3889_v0 = vmul.f32 %v12974_v16, %v3867_v19  ;;  %v3868_v49 = vmul.f32 %v10435_v52, %v12926_v27  ;;  %v13055_v57 = vadd.f32 %v12982_v36, %v3888_v35 }
 0xcca   :  { %v10437_v21 = vpop.eup %10436 }
 0xccb   :  { %v13058_v39 = vadd.f32 %v12982_v36, %v3889_v0  ;;  %v3869_v48 = vmul.f32 %v10437_v21, %v12932_v50  ;;  %v3890_v54 = vmul.f32 %v12974_v16, %v3868_v49 }
 0xccd   :  { %v3922_v40 = vpack.c.bf16 %v13058_v39, %v13055_v57  ;;  %v3891_v42 = vmul.f32 %v12974_v16, %v3869_v48  ;;  %v13067_v27 = vadd.f32 %v12982_v36, %v3890_v54 }
 0xccf   :  { %9422 = vmatprep.mubr.msk.bf16.mxu1 %vm73_vm4, %v3922_v40  ;;  %v13070_v20 = vadd.f32 %v12982_v36, %v3891_v42 }
 0xcd1   :  { %v3800_v15 = vpop.xlane.xlu0 %3799  ;;  %v3923_v13 = vpack.c.bf16 %v13070_v20, %v13067_v27 }
 0xcd2   :  { %v3822_v50 = vmul.f32 0.015625, %v3800_v15 }
 0xcd3   :  { %v3803_v17 = vpop.xlane.xlu1 %3802  ;;  %9423 = vmatmul.mubr.msk.bf16.gmra.mrb[112].mxu1 %vm73_vm4, %v3923_v13 }
 0xcd4   :  { %v3838_v1 = vadd.f32 1e-05, %v3822_v50  ;;  %v3823_v23 = vmul.f32 0.015625, %v3803_v17 }
 0xcd5   :  { %v3806_v59 = vpop.xlane.xlu0 %3805 }
 0xcd6   :  { %10438 = vrsqrt.f32 %v3838_v1  ;;  %v3839_v46 = vadd.f32 1e-05, %v3823_v23  ;;  %v3824_v44 = vmul.f32 0.015625, %v3806_v59 }
 0xcd7   :  { %v3809_v5 = vpop.xlane.xlu1 %3808 }
 0xcd8   :  { %10440 = vrsqrt.f32 %v3839_v46  ;;  %v3840_v51 = vadd.f32 1e-05, %v3824_v44  ;;  %v3825_v14 = vmul.f32 0.015625, %v3809_v5 }
 0xcda   :  { %10442 = vrsqrt.f32 %v3840_v51  ;;  %v3841_v58 = vadd.f32 1e-05, %v3825_v14 }
 0xcdc   :  { %10444 = vrsqrt.f32 %v3841_v58 }
 0xce0   :  { %v10439_v32 = vpop.eup %10438 }
 0xce1   :  { %v3870_v7 = vmul.f32 %v10439_v32, %v12942_v62 }
 0xce2   :  { %v10441_v55 = vpop.eup %10440 }
 0xce3   :  { %v3871_v34 = vmul.f32 %v10441_v55, %v12945_v47  ;;  %v3892_v53 = vmul.f32 %v12974_v16, %v3870_v7 }
 0xce4   :  { %v10443_v22 = vpop.eup %10442 }
 0xce5   :  { %v3893_v28 = vmul.f32 %v12974_v16, %v3871_v34  ;;  %v3872_v38 = vmul.f32 %v10443_v22, %v12950_v18  ;;  %v13081_v41 = vadd.f32 %v12982_v36, %v3892_v53 }
 0xce6   :  { %v10445_v10 = vpop.eup %10444 }
 0xce7   :  { %v13084_v8 = vadd.f32 %v12982_v36, %v3893_v28  ;;  %v3873_v3 = vmul.f32 %v10445_v10, %v12956_v24  ;;  %v3894_v62 = vmul.f32 %v12974_v16, %v3872_v38  ;;  %v10072_v24 = vld [vmem:[%s15315_s18 + $0x30] sm:$0xff]  }
 0xce8   :  { %9442 = vmatprep.subr.bf16.mxu1 %v10072_v24 }
 0xce9   :  { %v3924_v47 = vpack.c.bf16 %v13084_v8, %v13081_v41  ;;  %v3895_v37 = vmul.f32 %v12974_v16, %v3873_v3  ;;  %v13093_v18 = vadd.f32 %v12982_v36, %v3894_v62  ;;  %9443 = vmatpush3.bf16.msra.mxu1 %v10072_v24  ;;  %v10073_v16 = vld [vmem:[%s15315_s18 + $0x38] sm:$0xff]  }
 0xcea   :  { %9444 = vmatprep.subr.bf16.mxu1 %v10073_v16 }
 0xceb   :  { %9426 = vmatprep.mubr.msk.bf16.mxu1 %vm73_vm4, %v3924_v47  ;;  %v13096_v31 = vadd.f32 %v12982_v36, %v3895_v37  ;;  %v8295_v36 = vld [vmem:[%s15314_s17] ss:$0 sm:$0xff] }
 0xced   :  { %v3925_v2 = vpack.c.bf16 %v13096_v31, %v13093_v18  ;;  %9445 = vmatpush3.bf16.msra.mxu1 %v10073_v16 }
 0xcef   :  { %9427 = vmatmul.mubr.msk.bf16.gmra.mrb[116].mxu1 %vm73_vm4, %v3925_v2 }
 0xd78   :  { %v9416_v33 = vpop.f32.mrb[104].mxu1 }
 0xd79   :  { %v4032_v45 = vadd.f32 %v9416_v33, %v8295_v36  ;;  %v4023_v12 = vpop.f32.mrb[105].mxu1 }
 0xd7a   :  { %v4024_v26 = vadd.f32 %v8295_v36, %v4023_v12  ;;  %v9417_v63 = vpop.f32.mrb[106].mxu1 }
 0xd7b   :  { %v4035_v61 = vadd.f32 %v9417_v63, %v8295_v36  ;;  %v4026_v29 = vpop.f32.mrb[107].mxu1  ;;  %v4088_v35 = vmax.f32 %v4032_v45, 0.0 }
 0xd7c   :  { %v4027_v19 = vadd.f32 %v8295_v36, %v4026_v29  ;;  %v4086_v0 = vmax.f32 %v4024_v26, 0.0 }
 0xd7d   :  { %v4089_v52 = vmax.f32 %v4035_v61, 0.0 }
 0xd7e   :  { %v4087_v49 = vmax.f32 %v4027_v19, 0.0 }
 0xd7f   :  { %v4103_v21 = vpack.c.bf16 %v4089_v52, %v4088_v35 }
 0xd80   :  { %v4102_v48 = vpack.c.bf16 %v4087_v49, %v4086_v0  ;;  %v9420_v54 = vpop.f32.mrb[108].mxu1  ;;  %v13113_v0 = vld [vmem:[%s15316_s19] ss:$0 sm:$0xff] }
 0xd81   :  { %v4048_v40 = vadd.f32 %v9420_v54, %v8295_v36  ;;  %v4039_v42 = vpop.f32.mrb[109].mxu1 }
 0xd82   :  { %v4040_v15 = vadd.f32 %v8295_v36, %v4039_v42  ;;  %v9421_v13 = vpop.f32.mrb[110].mxu1  ;;  %9446 = vmatprep.mubr.bf16.mxu1 %v4102_v48 }
 0xd83   :  { %v4051_v50 = vadd.f32 %v9421_v13, %v8295_v36  ;;  %v4042_v17 = vpop.f32.mrb[111].mxu1  ;;  %9447 = vmatmul.mubr.bf16.vlgmr.msra.gmra.mrb[120].mxu1 %v4103_v21  ;;  %v4092_v23 = vmax.f32 %v4048_v40, 0.0 }
 0xd84   :  { %v4043_v1 = vadd.f32 %v8295_v36, %v4042_v17  ;;  %v4090_v46 = vmax.f32 %v4040_v15, 0.0 }
 0xd85   :  { %v4093_v59 = vmax.f32 %v4051_v50, 0.0 }
 0xd86   :  { %v4091_v44 = vmax.f32 %v4043_v1, 0.0 }
 0xd87   :  { %v4105_v5 = vpack.c.bf16 %v4093_v59, %v4092_v23 }
 0xd88   :  { %v4104_v51 = vpack.c.bf16 %v4091_v44, %v4090_v46 }
 0xd8a   :  { %9450 = vmatprep.mubr.bf16.mxu1 %v4104_v51 }
 0xd8b   :  { %9451 = vmatmul.mubr.bf16.gmra.mrb[124].mxu1 %v4105_v5 }
 0xda6   :  { %v9424_v14 = vpop.f32.mrb[112].mxu1 }
 0xda7   :  { %v4064_v58 = vadd.f32 %v9424_v14, %v8295_v36  ;;  %v4055_v32 = vpop.f32.mrb[113].mxu1 }
 0xda8   :  { %v4056_v7 = vadd.f32 %v8295_v36, %v4055_v32  ;;  %v9425_v55 = vpop.f32.mrb[114].mxu1 }
 0xda9   :  { %v4067_v34 = vadd.f32 %v9425_v55, %v8295_v36  ;;  %v4058_v53 = vpop.f32.mrb[115].mxu1  ;;  %v4096_v28 = vmax.f32 %v4064_v58, 0.0 }
 0xdaa   :  { %v4059_v22 = vadd.f32 %v8295_v36, %v4058_v53  ;;  %v4094_v10 = vmax.f32 %v4056_v7, 0.0 }
 0xdab   :  { %v4097_v38 = vmax.f32 %v4067_v34, 0.0 }
 0xdac   :  { %v4095_v3 = vmax.f32 %v4059_v22, 0.0 }
 0xdad   :  { %v4107_v62 = vpack.c.bf16 %v4097_v38, %v4096_v28 }
 0xdae   :  { %v4106_v47 = vpack.c.bf16 %v4095_v3, %v4094_v10 }
 0xdb0   :  { %9454 = vmatprep.mubr.bf16.mxu1 %v4106_v47 }
 0xdb1   :  { %9455 = vmatmul.mubr.bf16.gmra.mrb[128].mxu1 %v4107_v62 }
 0xdc2   :  { %v9428_v37 = vpop.f32.mrb[116].mxu1 }
 0xdc3   :  { %v4080_v2 = vadd.f32 %v9428_v37, %v8295_v36  ;;  %v4071_v24 = vpop.f32.mrb[117].mxu1 }
 0xdc4   :  { %v4072_v16 = vadd.f32 %v8295_v36, %v4071_v24  ;;  %v9429_v33 = vpop.f32.mrb[118].mxu1 }
 0xdc5   :  { %v4083_v45 = vadd.f32 %v9429_v33, %v8295_v36  ;;  %v4074_v12 = vpop.f32.mrb[119].mxu1  ;;  %v4100_v63 = vmax.f32 %v4080_v2, 0.0 }
 0xdc6   :  { %v4075_v26 = vadd.f32 %v8295_v36, %v4074_v12  ;;  %v4098_v29 = vmax.f32 %v4072_v16, 0.0 }
 0xdc7   :  { %v4101_v61 = vmax.f32 %v4083_v45, 0.0 }
 0xdc8   :  { %v4099_v19 = vmax.f32 %v4075_v26, 0.0 }
 0xdc9   :  { %v4109_v35 = vpack.c.bf16 %v4101_v61, %v4100_v63 }
 0xdca   :  { %v4108_v52 = vpack.c.bf16 %v4099_v19, %v4098_v29 }
 0xdcc   :  { %9458 = vmatprep.mubr.bf16.mxu1 %v4108_v52 }
 0xdcd   :  { %9459 = vmatmul.mubr.bf16.gmra.mrb[132].mxu1 %v4109_v35 }
 0xe56   :  { %v9448_v49 = vpop.f32.mrb[120].mxu1 }
 0xe57   :  { %v4215_v21 = vpop.f32.mrb[121].mxu1  ;;  %v4224_v48 = vadd.f32 %v9448_v49, %v13113_v0 }
 0xe58   :  { %v4216_v54 = vadd.f32 %v13113_v0, %v4215_v21  ;;  %v9449_v36 = vpop.f32.mrb[122].mxu1 }
 0xe59   :  { %v4218_v40 = vpop.f32.mrb[123].mxu1  ;;  %v4227_v15 = vadd.f32 %v9449_v36, %v13113_v0  ;;  %v13123_v50 = vadd.f32 %v4224_v48, %v12999_v30 }
 0xe5a   :  { %v13118_v42 = vadd.f32 %v4216_v54, %v12989_v60  ;;  %v4219_v13 = vadd.f32 %v13113_v0, %v4218_v40 }
 0xe5b   :  { %v13131_v23 = vadd.f32 %v4227_v15, %v13002_v9 }
 0xe5c   :  { %v13126_v17 = vadd.f32 %v4219_v13, %v12992_v56  ;;  %v4296_v1 = vsel %vm73_vm4, %v13118_v42, 0.0  ;;  %v4302_v56 = vsel %vm73_vm4, %v13123_v50, 0.0 }
 0xe5d   :  { %4297 = vadd.xlane.f32.xlu0 %v4296_v1  ;;  %v4305_v32 = vsel %vm73_vm4, %v13131_v23, 0.0 }
 0xe5e   :  { %v9452_v59 = vpop.f32.mrb[124].mxu1  ;;  %v4299_v60 = vsel %vm73_vm4, %v13126_v17, 0.0 }
 0xe5f   :  { %v4231_v46 = vpop.f32.mrb[125].mxu1  ;;  %4300 = vadd.xlane.f32.xlu1 %v4299_v60  ;;  %v4240_v44 = vadd.f32 %v9452_v59, %v13113_v0 }
 0xe60   :  { %v4232_v30 = vadd.f32 %v13113_v0, %v4231_v46  ;;  %v9453_v5 = vpop.f32.mrb[126].mxu1 }
 0xe61   :  { %v4234_v51 = vpop.f32.mrb[127].mxu1  ;;  %4303 = vadd.xlane.f32.xlu0 %v4302_v56  ;;  %v4243_v9 = vadd.f32 %v9453_v5, %v13113_v0  ;;  %v13147_v7 = vadd.f32 %v4240_v44, %v13032_v25 }
 0xe62   :  { %v13140_v14 = vadd.f32 %v4232_v30, %v13016_v6  ;;  %v4235_v58 = vadd.f32 %v13113_v0, %v4234_v51 }
 0xe63   :  { %4306 = vadd.xlane.f32.xlu1 %v4305_v32  ;;  %v13155_v6 = vadd.f32 %v4243_v9, %v13035_v4  ;;  %v4314_v22 = vsel %vm73_vm4, %v13147_v7, 0.0 }
 0xe64   :  { %v13150_v55 = vadd.f32 %v4235_v58, %v13019_v11  ;;  %v4308_v34 = vsel %vm73_vm4, %v13140_v14, 0.0 }
 0xe65   :  { %4309 = vadd.xlane.f32.xlu0 %v4308_v34  ;;  %v4317_v25 = vsel %vm73_vm4, %v13155_v6, 0.0 }
 0xe66   :  { %v4311_v53 = vsel %vm73_vm4, %v13150_v55, 0.0 }
 0xe67   :  { %4312 = vadd.xlane.f32.xlu1 %v4311_v53 }
 0xe69   :  { %4315 = vadd.xlane.f32.xlu0 %v4314_v22 }
 0xe6b   :  { %4318 = vadd.xlane.f32.xlu1 %v4317_v25 }
 0xe84   :  { %v9456_v11 = vpop.f32.mrb[128].mxu1 }
 0xe85   :  { %v4247_v28 = vpop.f32.mrb[129].mxu1  ;;  %v4256_v38 = vadd.f32 %v9456_v11, %v13113_v0 }
 0xe86   :  { %v4248_v10 = vadd.f32 %v13113_v0, %v4247_v28  ;;  %v9457_v4 = vpop.f32.mrb[130].mxu1 }
 0xe87   :  { %v4250_v3 = vpop.f32.mrb[131].mxu1  ;;  %v4259_v47 = vadd.f32 %v9457_v4, %v13113_v0  ;;  %v13171_v2 = vadd.f32 %v4256_v38, %v13067_v27 }
 0xe88   :  { %v13166_v62 = vadd.f32 %v4248_v10, %v13055_v57  ;;  %v4251_v37 = vadd.f32 %v13113_v0, %v4250_v3 }
 0xe89   :  { %v13179_v33 = vadd.f32 %v4259_v47, %v13070_v20  ;;  %v4326_v45 = vsel %vm73_vm4, %v13171_v2, 0.0 }
 0xe8a   :  { %v13174_v24 = vadd.f32 %v4251_v37, %v13058_v39  ;;  %v4320_v16 = vsel %vm73_vm4, %v13166_v62, 0.0 }
 0xe8b   :  { %4321 = vadd.xlane.f32.xlu0 %v4320_v16  ;;  %v4329_v27 = vsel %vm73_vm4, %v13179_v33, 0.0 }
 0xe8c   :  { %v4323_v57 = vsel %vm73_vm4, %v13174_v24, 0.0 }
 0xe8d   :  { %4324 = vadd.xlane.f32.xlu1 %v4323_v57 }
 0xe8f   :  { %4327 = vadd.xlane.f32.xlu0 %v4326_v45  ;;  %v10074_v45 = vld [vmem:[%s15307_s10 + $0x40] ss:$8 sps:$4 sm:$0xff]  }
 0xe91   :  { %4330 = vadd.xlane.f32.xlu1 %v4329_v27  ;;  %v10079_v27 = vld [vmem:[%s15307_s10 + $0x54] ss:$8 sps:$4 sm:$0xff]  }
 0xea0   :  { %v9460_v39 = vpop.f32.mrb[132].mxu1 }
 0xea1   :  { %v4263_v12 = vpop.f32.mrb[133].mxu1  ;;  %v4272_v26 = vadd.f32 %v9460_v39, %v13113_v0  ;;  %v10077_v39 = vld [vmem:[%s15307_s10 + $0x50] ss:$8 sps:$4 sm:$0xff]  }
 0xea2   :  { %v4264_v63 = vadd.f32 %v13113_v0, %v4263_v12  ;;  %v9461_v20 = vpop.f32.mrb[134].mxu1 }
 0xea3   :  { %v4266_v61 = vpop.f32.mrb[135].mxu1  ;;  %v4275_v19 = vadd.f32 %v9461_v20, %v13113_v0  ;;  %v13195_v52 = vadd.f32 %v4272_v26, %v13093_v18 }
 0xea4   :  { %v13190_v29 = vadd.f32 %v4264_v63, %v13081_v41  ;;  %v4267_v35 = vadd.f32 %v13113_v0, %v4266_v61  ;;  %v10082_v63 = vld [vmem:[%s15307_s10 + $0x64] ss:$8 sps:$4 sm:$0xff]   ;;  %v10080_v61 = vld [vmem:[%s15307_s10 + $0x60] ss:$8 sps:$4 sm:$0xff]  }
 0xea5   :  { %v13203_v48 = vadd.f32 %v4275_v19, %v13096_v31  ;;  %v4338_v0 = vsel %vm73_vm4, %v13195_v52, 0.0 }
 0xea6   :  { %v13198_v49 = vadd.f32 %v4267_v35, %v13084_v8  ;;  %v4332_v21 = vsel %vm73_vm4, %v13190_v29, 0.0 }
 0xea7   :  { %4333 = vadd.xlane.f32.xlu0 %v4332_v21  ;;  %v4341_v18 = vsel %vm73_vm4, %v13203_v48, 0.0 }
 0xea8   :  { %v4335_v41 = vsel %vm73_vm4, %v13198_v49, 0.0 }
 0xea9   :  { %4336 = vadd.xlane.f32.xlu1 %v4335_v41 }
 0xeab   :  { %4339 = vadd.xlane.f32.xlu0 %v4338_v0 }
 0xead   :  { %4342 = vadd.xlane.f32.xlu1 %v4341_v18 }
 0xeea   :  { %v4298_v8 = vpop.xlane.xlu0 %4297 }
 0xeeb   :  { %v4344_v54 = vmul.f32 0.015625, %v4298_v8  ;;  %v10085_v8 = vld [vmem:[%s15307_s10 + $0x74] ss:$8 sps:$4 sm:$0xff]  }
 0xeec   :  { %v4301_v36 = vpop.xlane.xlu1 %4300 }
 0xeed   :  { %v13212_v40 = vsub.f32 %v13118_v42, %v4344_v54  ;;  %v4345_v31 = vmul.f32 0.015625, %v4301_v36 }
 0xeee   :  { %v4304_v15 = vpop.xlane.xlu0 %4303 }
 0xeef   :  { %v13215_v13 = vsub.f32 %v13126_v17, %v4345_v31  ;;  %v4346_v1 = vmul.f32 0.015625, %v4304_v15  ;;  %v4376_v59 = vmul.f32 %v13212_v40, %v13212_v40 }
 0xef0   :  { %v4307_v60 = vpop.xlane.xlu1 %4306 }
 0xef1   :  { %v13220_v46 = vsub.f32 %v13123_v50, %v4346_v1  ;;  %v4347_v44 = vmul.f32 0.015625, %v4307_v60  ;;  %v4392_v30 = vsel %vm73_vm4, %v4376_v59, 0.0  ;;  %v4377_v42 = vmul.f32 %v13215_v13, %v13215_v13 }
 0xef2   :  { %v4310_v5 = vpop.xlane.xlu0 %4309  ;;  %4393 = vadd.xlane.f32.xlu0 %v4392_v30 }
 0xef3   :  { %v13226_v56 = vsub.f32 %v13131_v23, %v4347_v44  ;;  %v4348_v17 = vmul.f32 0.015625, %v4310_v5  ;;  %v4395_v51 = vsel %vm73_vm4, %v4377_v42, 0.0  ;;  %v4378_v9 = vmul.f32 %v13220_v46, %v13220_v46 }
 0xef4   :  { %v4313_v58 = vpop.xlane.xlu1 %4312  ;;  %4396 = vadd.xlane.f32.xlu1 %v4395_v51 }
 0xef5   :  { %v13232_v50 = vsub.f32 %v13140_v14, %v4348_v17  ;;  %v4349_v32 = vmul.f32 0.015625, %v4313_v58  ;;  %v4398_v34 = vsel %vm73_vm4, %v4378_v9, 0.0  ;;  %v4379_v53 = vmul.f32 %v13226_v56, %v13226_v56 }
 0xef6   :  { %v4316_v22 = vpop.xlane.xlu0 %4315  ;;  %4399 = vadd.xlane.f32.xlu0 %v4398_v34 }
 0xef7   :  { %v13238_v23 = vsub.f32 %v13150_v55, %v4349_v32  ;;  %v4350_v25 = vmul.f32 0.015625, %v4316_v22  ;;  %v4401_v11 = vsel %vm73_vm4, %v4379_v53, 0.0  ;;  %v4380_v28 = vmul.f32 %v13232_v50, %v13232_v50 }
 0xef8   :  { %v4319_v38 = vpop.xlane.xlu1 %4318  ;;  %4402 = vadd.xlane.f32.xlu1 %v4401_v11 }
 0xef9   :  { %v13244_v14 = vsub.f32 %v13147_v7, %v4350_v25  ;;  %v4351_v10 = vmul.f32 0.015625, %v4319_v38  ;;  %v4404_v4 = vsel %vm73_vm4, %v4380_v28, 0.0  ;;  %v4381_v3 = vmul.f32 %v13238_v23, %v13238_v23 }
 0xefa   :  { %4405 = vadd.xlane.f32.xlu0 %v4404_v4 }
 0xefb   :  { %v13250_v55 = vsub.f32 %v13155_v6, %v4351_v10  ;;  %v4407_v47 = vsel %vm73_vm4, %v4381_v3, 0.0  ;;  %v4382_v37 = vmul.f32 %v13244_v14, %v13244_v14  ;;  %v10076_v6 = vld [vmem:[%s15307_s10 + $0x44] ss:$8 sps:$4 sm:$0xff]  }
 0xefc   :  { %4408 = vadd.xlane.f32.xlu1 %v4407_v47  ;;  %4683 = vmatprep.subr.bf16.mxu0 %v10076_v6 }
 0xefd   :  { %v4410_v16 = vsel %vm73_vm4, %v4382_v37, 0.0  ;;  %v4383_v7 = vmul.f32 %v13250_v55, %v13250_v55  ;;  %4684 = vmatpush1.bf16.msra.mxu0 %v10074_v45 }
 0xefe   :  { %4411 = vadd.xlane.f32.xlu0 %v4410_v16  ;;  %4685 = vmatprep.subr.bf16.mxu0 %v10079_v27 }
 0xeff   :  { %v4413_v57 = vsel %vm73_vm4, %v4383_v7, 0.0 }
 0xf00   :  { %4414 = vadd.xlane.f32.xlu1 %v4413_v57 }
 0xf01   :  { %4686 = vmatpush1.bf16.msra.mxu0 %v10077_v39 }
 0xf02   :  { %4687 = vmatprep.subr.bf16.mxu0 %v10082_v63 }
 0xf05   :  { %4688 = vmatpush1.bf16.msra.mxu0 %v10080_v61 }
 0xf06   :  { %4689 = vmatprep.subr.bf16.mxu0 %v10085_v8 }
 0xf18   :  { %v4322_v12 = vpop.xlane.xlu0 %4321 }
 0xf19   :  { %v4352_v26 = vmul.f32 0.015625, %v4322_v12 }
 0xf1a   :  { %v4325_v20 = vpop.xlane.xlu1 %4324 }
 0xf1b   :  { %v13278_v19 = vsub.f32 %v13166_v62, %v4352_v26  ;;  %v4353_v35 = vmul.f32 0.015625, %v4325_v20  ;;  %v10083_v62 = vld [vmem:[%s15307_s10 + $0x70] ss:$8 sps:$4 sm:$0xff]  }
 0xf1c   :  { %v4328_v21 = vpop.xlane.xlu0 %4327  ;;  %4690 = vmatpush1.bf16.msra.mxu0 %v10083_v62  ;;  %v13334_v62 = vld [vmem:[%s15317_s20] ss:$0 sm:$0xff] }
 0xf1d   :  { %v13281_v41 = vsub.f32 %v13174_v24, %v4353_v35  ;;  %v4354_v0 = vmul.f32 0.015625, %v4328_v21  ;;  %v4384_v18 = vmul.f32 %v13278_v19, %v13278_v19 }
 0xf1e   :  { %v4331_v54 = vpop.xlane.xlu1 %4330 }
 0xf1f   :  { %v13292_v36 = vsub.f32 %v13171_v2, %v4354_v0  ;;  %v4355_v31 = vmul.f32 0.015625, %v4331_v54  ;;  %v4416_v24 = vsel %vm73_vm4, %v4384_v18, 0.0  ;;  %v4385_v15 = vmul.f32 %v13281_v41, %v13281_v41 }
 0xf20   :  { %4417 = vadd.xlane.f32.xlu0 %v4416_v24 }
 0xf21   :  { %v13298_v1 = vsub.f32 %v13179_v33, %v4355_v31  ;;  %v4419_v59 = vsel %vm73_vm4, %v4385_v15, 0.0  ;;  %v4386_v60 = vmul.f32 %v13292_v36, %v13292_v36 }
 0xf22   :  { %4420 = vadd.xlane.f32.xlu1 %v4419_v59 }
 0xf23   :  { %v4422_v2 = vsel %vm73_vm4, %v4386_v60, 0.0  ;;  %v4387_v44 = vmul.f32 %v13298_v1, %v13298_v1  ;;  %v13340_v60 = vld [vmem:[%s15318_s21] ss:$0 sm:$0xff] }
 0xf24   :  { %4423 = vadd.xlane.f32.xlu0 %v4422_v2 }
 0xf25   :  { %v4425_v30 = vsel %vm73_vm4, %v4387_v44, 0.0 }
 0xf26   :  { %4426 = vadd.xlane.f32.xlu1 %v4425_v30 }
 0xf34   :  { %v4334_v42 = vpop.xlane.xlu0 %4333 }
 0xf35   :  { %v4356_v5 = vmul.f32 0.015625, %v4334_v42 }
 0xf36   :  { %v4337_v17 = vpop.xlane.xlu1 %4336 }
 0xf37   :  { %v13308_v33 = vsub.f32 %v13190_v29, %v4356_v5  ;;  %v4357_v51 = vmul.f32 0.015625, %v4337_v17 }
 0xf38   :  { %v4340_v9 = vpop.xlane.xlu0 %4339 }
 0xf39   :  { %v13311_v58 = vsub.f32 %v13198_v49, %v4357_v51  ;;  %v4358_v32 = vmul.f32 0.015625, %v4340_v9  ;;  %v4388_v34 = vmul.f32 %v13308_v33, %v13308_v33 }
 0xf3a   :  { %v4343_v53 = vpop.xlane.xlu1 %4342 }
 0xf3b   :  { %v13316_v22 = vsub.f32 %v13195_v52, %v4358_v32  ;;  %v4359_v25 = vmul.f32 0.015625, %v4343_v53  ;;  %v4428_v11 = vsel %vm73_vm4, %v4388_v34, 0.0  ;;  %v4389_v29 = vmul.f32 %v13311_v58, %v13311_v58 }
 0xf3c   :  { %4429 = vadd.xlane.f32.xlu0 %v4428_v11 }
 0xf3d   :  { %v13322_v28 = vsub.f32 %v13203_v48, %v4359_v25  ;;  %v4431_v49 = vsel %vm73_vm4, %v4389_v29, 0.0  ;;  %v4390_v38 = vmul.f32 %v13316_v22, %v13316_v22 }
 0xf3e   :  { %4432 = vadd.xlane.f32.xlu1 %v4431_v49 }
 0xf3f   :  { %v4434_v10 = vsel %vm73_vm4, %v4390_v38, 0.0  ;;  %v4391_v52 = vmul.f32 %v13322_v28, %v13322_v28 }
 0xf40   :  { %4435 = vadd.xlane.f32.xlu0 %v4434_v10 }
 0xf41   :  { %v4437_v4 = vsel %vm73_vm4, %v4391_v52, 0.0 }
 0xf42   :  { %4438 = vadd.xlane.f32.xlu1 %v4437_v4 }
 0xf7f   :  { %v4394_v3 = vpop.xlane.xlu0 %4393 }
 0xf80   :  { %v4440_v47 = vmul.f32 0.015625, %v4394_v3 }
 0xf81   :  { %v4397_v37 = vpop.xlane.xlu1 %4396 }
 0xf82   :  { %v4456_v48 = vadd.f32 1e-05, %v4440_v47  ;;  %v4441_v16 = vmul.f32 0.015625, %v4397_v37 }
 0xf83   :  { %v4400_v7 = vpop.xlane.xlu0 %4399 }
 0xf84   :  { %10446 = vrsqrt.f32 %v4456_v48  ;;  %v4457_v57 = vadd.f32 1e-05, %v4441_v16  ;;  %v4442_v6 = vmul.f32 0.015625, %v4400_v7 }
 0xf85   :  { %v4403_v45 = vpop.xlane.xlu1 %4402 }
 0xf86   :  { %10448 = vrsqrt.f32 %v4457_v57  ;;  %v4458_v27 = vadd.f32 1e-05, %v4442_v6  ;;  %v4443_v39 = vmul.f32 0.015625, %v4403_v45 }
 0xf87   :  { %v4406_v12 = vpop.xlane.xlu0 %4405 }
 0xf88   :  { %10450 = vrsqrt.f32 %v4458_v27  ;;  %v4459_v26 = vadd.f32 1e-05, %v4443_v39  ;;  %v4444_v63 = vmul.f32 0.015625, %v4406_v12 }
 0xf89   :  { %v4409_v20 = vpop.xlane.xlu1 %4408 }
 0xf8a   :  { %10452 = vrsqrt.f32 %v4459_v26  ;;  %v4460_v61 = vadd.f32 1e-05, %v4444_v63  ;;  %v4445_v35 = vmul.f32 0.015625, %v4409_v20 }
 0xf8b   :  { %v4412_v21 = vpop.xlane.xlu0 %4411 }
 0xf8c   :  { %10454 = vrsqrt.f32 %v4460_v61  ;;  %v4461_v0 = vadd.f32 1e-05, %v4445_v35  ;;  %v4446_v18 = vmul.f32 0.015625, %v4412_v21 }
 0xf8d   :  { %v4415_v8 = vpop.xlane.xlu1 %4414 }
 0xf8e   :  { %v10447_v54 = vpop.eup %10446  ;;  %10456 = vrsqrt.f32 %v4461_v0  ;;  %v4462_v31 = vadd.f32 1e-05, %v4446_v18  ;;  %v4447_v24 = vmul.f32 0.015625, %v4415_v8 }
 0xf8f   :  { %v4488_v15 = vmul.f32 %v10447_v54, %v13212_v40 }
 0xf90   :  { %v10449_v59 = vpop.eup %10448  ;;  %10458 = vrsqrt.f32 %v4462_v31  ;;  %v4463_v2 = vadd.f32 1e-05, %v4447_v24 }
 0xf91   :  { %v4510_v44 = vmul.f32 %v13334_v62, %v4488_v15  ;;  %v4489_v30 = vmul.f32 %v10449_v59, %v13215_v13 }
 0xf92   :  { %v10451_v42 = vpop.eup %10450  ;;  %10460 = vrsqrt.f32 %v4463_v2 }
 0xf93   :  { %v4532_v5 = vadd.f32 %v13340_v60, %v4510_v44  ;;  %v4511_v17 = vmul.f32 %v13334_v62, %v4489_v30  ;;  %v4490_v40 = vmul.f32 %v10451_v42, %v13220_v46 }
 0xf94   :  { %v10453_v51 = vpop.eup %10452 }
 0xf95   :  { %4548 = vst.msk [vmem:[#allocation2] sm:$0xff] %vm73_vm4, %v4532_v5  ;;  %v4533_v9 = vadd.f32 %v13340_v60, %v4511_v17  ;;  %v4512_v32 = vmul.f32 %v13334_v62, %v4490_v40  ;;  %v4491_v34 = vmul.f32 %v10453_v51, %v13226_v56 }
 0xf96   :  { %v10455_v53 = vpop.eup %10454 }
 0xf97   :  { %4549 = vst.msk [vmem:[#allocation2 + $0x8] sm:$0xff] %vm73_vm4, %v4533_v9  ;;  %v4534_v13 = vadd.f32 %v13340_v60, %v4512_v32  ;;  %v4513_v25 = vmul.f32 %v13334_v62, %v4491_v34  ;;  %v4492_v11 = vmul.f32 %v10455_v53, %v13232_v50 }
 0xf98   :  { %v10457_v29 = vpop.eup %10456 }
 0xf99   :  { %4550 = vst.msk [vmem:[#allocation2 + $0x10] sm:$0xff] %vm73_vm4, %v4534_v13  ;;  %v4535_v46 = vadd.f32 %v13340_v60, %v4513_v25  ;;  %v4514_v49 = vmul.f32 %v13334_v62, %v4492_v11  ;;  %v4493_v38 = vmul.f32 %v10457_v29, %v13238_v23 }
 0xf9a   :  { %v10459_v10 = vpop.eup %10458 }
 0xf9b   :  { %4551 = vst.msk [vmem:[#allocation2 + $0x18] sm:$0xff] %vm73_vm4, %v4535_v46  ;;  %v4536_v56 = vadd.f32 %v13340_v60, %v4514_v49  ;;  %v4515_v52 = vmul.f32 %v13334_v62, %v4493_v38  ;;  %v4494_v4 = vmul.f32 %v10459_v10, %v13244_v14 }
 0xf9c   :  { %v10461_v3 = vpop.eup %10460  ;;  %v4584_v48 = vld [vmem:[#allocation2] sm:$0xff] }
 0xf9d   :  { %4552 = vst.msk [vmem:[#allocation2 + $0x20] sm:$0xff] %vm73_vm4, %v4536_v56  ;;  %v4537_v50 = vadd.f32 %v13340_v60, %v4515_v52  ;;  %v4516_v47 = vmul.f32 %v13334_v62, %v4494_v4  ;;  %v4495_v37 = vmul.f32 %v10461_v3, %v13250_v55 }
 0xf9e   :  { %v4585_v23 = vld [vmem:[#allocation2 + $0x8] sm:$0xff] }
 0xf9f   :  { %4553 = vst.msk [vmem:[#allocation2 + $0x28] sm:$0xff] %vm73_vm4, %v4537_v50  ;;  %v4538_v16 = vadd.f32 %v13340_v60, %v4516_v47  ;;  %v4517_v7 = vmul.f32 %v13334_v62, %v4495_v37  ;;  %v4600_v57 = vpack.c.bf16 %v4585_v23, %v4584_v48 }
 0xfa0   :  { %v4586_v6 = vld [vmem:[#allocation2 + $0x10] sm:$0xff] }
 0xfa1   :  { %4554 = vst.msk [vmem:[#allocation2 + $0x30] sm:$0xff] %vm73_vm4, %v4538_v16  ;;  %v4539_v14 = vadd.f32 %v13340_v60, %v4517_v7  ;;  %8344 = vmatmul.mubr.msk.bf16.vlgmr.msra.gmra.mrb[156].mxu0 %vm73_vm4, %v4600_v57 }
 0xfa2   :  { %4725 = vmatprep.mubr.bf16.mxu0 %v15500_v43  ;;  %v4587_v55 = vld [vmem:[#allocation2 + $0x18] sm:$0xff] }
 0xfa3   :  { %4555 = vst.msk [vmem:[#allocation2 + $0x38] sm:$0xff] %vm73_vm4, %v4539_v14  ;;  %v4601_v45 = vpack.c.bf16 %v4587_v55, %v4586_v6 }
 0xfa4   :  { %v4588_v26 = vld [vmem:[#allocation2 + $0x20] sm:$0xff] }
 0xfa6   :  { %v4589_v27 = vld [vmem:[#allocation2 + $0x28] sm:$0xff] }
 0xfa7   :  { %v4602_v20 = vpack.c.bf16 %v4589_v27, %v4588_v26 }
 0xfa8   :  { %v4590_v59 = vld [vmem:[#allocation2 + $0x30] sm:$0xff] }
 0xfa9   :  { %8345 = vmatmul.mubr.msk.bf16.gmra.mrb[160].mxu0 %vm73_vm4, %v4601_v45 }
 0xfaa   :  { %4735 = vmatprep.mubr.bf16.mxu0 %v15500_v43  ;;  %v4591_v24 = vld [vmem:[#allocation2 + $0x38] sm:$0xff] }
 0xfab   :  { %v4603_v2 = vpack.c.bf16 %v4591_v24, %v4590_v59 }
 0xfad   :  { %v4418_v39 = vpop.xlane.xlu0 %4417 }
 0xfae   :  { %v4448_v12 = vmul.f32 0.015625, %v4418_v39 }
 0xfaf   :  { %v4421_v63 = vpop.xlane.xlu1 %4420 }
 0xfb0   :  { %v4464_v61 = vadd.f32 1e-05, %v4448_v12  ;;  %v4449_v35 = vmul.f32 0.015625, %v4421_v63 }
 0xfb1   :  { %8346 = vmatmul.mubr.msk.bf16.gmra.mrb[164].mxu0 %vm73_vm4, %v4602_v20  ;;  %v4424_v21 = vpop.xlane.xlu0 %4423 }
 0xfb2   :  { %10462 = vrsqrt.f32 %v4464_v61  ;;  %v4465_v0 = vadd.f32 1e-05, %v4449_v35  ;;  %v4450_v18 = vmul.f32 0.015625, %v4424_v21  ;;  %4745 = vmatprep.mubr.bf16.mxu0 %v15500_v43 }
 0xfb3   :  { %v4427_v8 = vpop.xlane.xlu1 %4426 }
 0xfb4   :  { %10464 = vrsqrt.f32 %v4465_v0  ;;  %v4466_v54 = vadd.f32 1e-05, %v4450_v18  ;;  %v4451_v31 = vmul.f32 0.015625, %v4427_v8 }
 0xfb6   :  { %10466 = vrsqrt.f32 %v4466_v54  ;;  %v4467_v15 = vadd.f32 1e-05, %v4451_v31  ;;  %v15501_v31 = vld [vmem:[#allocation6_spill] sm:$0xff] }
 0xfb7   :  { %v15503_v59 = vsub.s32 1, %v15501_v31 }
 0xfb8   :  { %10468 = vrsqrt.f32 %v4467_v15 }
 0xfb9   :  { %8347 = vmatmul.mubr.msk.bf16.gmra.mrb[168].mxu0 %vm73_vm4, %v4603_v2 }
 0xfba   :  { %4755 = vmatprep.mubr.bf16.mxu0 %v15500_v43 }
 0xfbc   :  { %v10463_v44 = vpop.eup %10462 }
 0xfbd   :  { %v4496_v30 = vmul.f32 %v10463_v44, %v13278_v19 }
 0xfbe   :  { %v10465_v42 = vpop.eup %10464 }
 0xfbf   :  { %v4518_v5 = vmul.f32 %v13334_v62, %v4496_v30  ;;  %v4497_v17 = vmul.f32 %v10465_v42, %v13281_v41 }
 0xfc0   :  { %v10467_v40 = vpop.eup %10466 }
 0xfc1   :  { %v4540_v51 = vadd.f32 %v13340_v60, %v4518_v5  ;;  %v4519_v9 = vmul.f32 %v13334_v62, %v4497_v17  ;;  %v4498_v32 = vmul.f32 %v10467_v40, %v13292_v36 }
 0xfc2   :  { %v10469_v34 = vpop.eup %10468 }
 0xfc3   :  { %4556 = vst.msk [vmem:[#allocation2 + $0x40] sm:$0xff] %vm73_vm4, %v4540_v51  ;;  %v4541_v53 = vadd.f32 %v13340_v60, %v4519_v9  ;;  %v4520_v13 = vmul.f32 %v13334_v62, %v4498_v32  ;;  %v4499_v19 = vmul.f32 %v10469_v34, %v13298_v1 }
 0xfc5   :  { %4557 = vst.msk [vmem:[#allocation2 + $0x48] sm:$0xff] %vm73_vm4, %v4541_v53  ;;  %v4542_v41 = vadd.f32 %v13340_v60, %v4520_v13  ;;  %v4521_v25 = vmul.f32 %v13334_v62, %v4499_v19 }
 0xfc7   :  { %4558 = vst.msk [vmem:[#allocation2 + $0x50] sm:$0xff] %vm73_vm4, %v4542_v41  ;;  %v4543_v11 = vadd.f32 %v13340_v60, %v4521_v25 }
 0xfc9   :  { %4559 = vst.msk [vmem:[#allocation2 + $0x58] sm:$0xff] %vm73_vm4, %v4543_v11  ;;  %v4430_v36 = vpop.xlane.xlu0 %4429 }
 0xfca   :  { %v4452_v29 = vmul.f32 0.015625, %v4430_v36  ;;  %v4592_v10 = vld [vmem:[#allocation2 + $0x40] sm:$0xff] }
 0xfcb   :  { %v4433_v46 = vpop.xlane.xlu1 %4432 }
 0xfcc   :  { %v4468_v49 = vadd.f32 1e-05, %v4452_v29  ;;  %v4453_v38 = vmul.f32 0.015625, %v4433_v46  ;;  %v4593_v56 = vld [vmem:[#allocation2 + $0x48] sm:$0xff] }
 0xfcd   :  { %v4436_v1 = vpop.xlane.xlu0 %4435  ;;  %v4604_v52 = vpack.c.bf16 %v4593_v56, %v4592_v10 }
 0xfce   :  { %10470 = vrsqrt.f32 %v4468_v49  ;;  %v4469_v4 = vadd.f32 1e-05, %v4453_v38  ;;  %v4454_v3 = vmul.f32 0.015625, %v4436_v1  ;;  %v4594_v16 = vld [vmem:[#allocation2 + $0x50] sm:$0xff] }
 0xfcf   :  { %v4439_v50 = vpop.xlane.xlu1 %4438  ;;  %8348 = vmatmul.mubr.msk.bf16.gmra.mrb[172].mxu0 %vm73_vm4, %v4604_v52 }
 0xfd0   :  { %10472 = vrsqrt.f32 %v4469_v4  ;;  %v4470_v47 = vadd.f32 1e-05, %v4454_v3  ;;  %v4455_v37 = vmul.f32 0.015625, %v4439_v50  ;;  %4765 = vmatprep.mubr.bf16.mxu0 %v15500_v43  ;;  %v4595_v23 = vld [vmem:[#allocation2 + $0x58] sm:$0xff] }
 0xfd1   :  { %v4605_v7 = vpack.c.bf16 %v4595_v23, %v4594_v16 }
 0xfd2   :  { %10474 = vrsqrt.f32 %v4470_v47  ;;  %v4471_v48 = vadd.f32 1e-05, %v4455_v37 }
 0xfd4   :  { %10476 = vrsqrt.f32 %v4471_v48 }
 0xfd7   :  { %8349 = vmatmul.mubr.msk.bf16.gmra.mrb[176].mxu0 %vm73_vm4, %v4605_v7 }
 0xfd8   :  { %v10471_v57 = vpop.eup %10470  ;;  %4775 = vmatprep.mubr.bf16.mxu0 %v15500_v43 }
 0xfd9   :  { %v4500_v14 = vmul.f32 %v10471_v57, %v13308_v33 }
 0xfda   :  { %v10473_v55 = vpop.eup %10472 }
 0xfdb   :  { %v4522_v6 = vmul.f32 %v13334_v62, %v4500_v14  ;;  %v4501_v45 = vmul.f32 %v10473_v55, %v13311_v58 }
 0xfdc   :  { %v10475_v27 = vpop.eup %10474 }
 0xfdd   :  { %v4544_v39 = vadd.f32 %v13340_v60, %v4522_v6  ;;  %v4523_v12 = vmul.f32 %v13334_v62, %v4501_v45  ;;  %v4502_v26 = vmul.f32 %v10475_v27, %v13316_v22 }
 0xfde   :  { %v10477_v63 = vpop.eup %10476 }
 0xfdf   :  { %4560 = vst.msk [vmem:[#allocation2 + $0x60] sm:$0xff] %vm73_vm4, %v4544_v39  ;;  %v4545_v20 = vadd.f32 %v13340_v60, %v4523_v12  ;;  %v4524_v61 = vmul.f32 %v13334_v62, %v4502_v26  ;;  %v4503_v33 = vmul.f32 %v10477_v63, %v13322_v28 }
 0xfe1   :  { %4561 = vst.msk [vmem:[#allocation2 + $0x68] sm:$0xff] %vm73_vm4, %v4545_v20  ;;  %v4546_v58 = vadd.f32 %v13340_v60, %v4524_v61  ;;  %v4525_v35 = vmul.f32 %v13334_v62, %v4503_v33  ;;  %v8327_v62 = vld [vmem:[%s15308_s11 + $0x2] sm:$0x3] }
 0xfe2   :  { %v13429_v2 = vrot.slane %v8327_v62, %v15503_v59 }
 0xfe3   :  { %4562 = vst.msk [vmem:[#allocation2 + $0x70] sm:$0xff] %vm73_vm4, %v4546_v58  ;;  %v4547_v21 = vadd.f32 %v13340_v60, %v4525_v35  ;;  %v15502_v60 = vsub.s32 0, %v15501_v31 }
 0xfe5   :  { %4563 = vst.msk [vmem:[#allocation2 + $0x78] sm:$0xff] %vm73_vm4, %v4547_v21  ;;  %v13425_v24 = vrot.slane %v8327_v62, %v15502_v60 }
 0xfe6   :  { %v4596_v22 = vld [vmem:[#allocation2 + $0x60] sm:$0xff] }
 0xfe8   :  { %v4597_v0 = vld [vmem:[#allocation2 + $0x68] sm:$0xff] }
 0xfe9   :  { %v4606_v18 = vpack.c.bf16 %v4597_v0, %v4596_v22 }
 0xfea   :  { %v4598_v8 = vld [vmem:[#allocation2 + $0x70] sm:$0xff] }
 0xfeb   :  { %8350 = vmatmul.mubr.msk.bf16.gmra.mrb[180].mxu0 %vm73_vm4, %v4606_v18 }
 0xfec   :  { %4785 = vmatprep.mubr.bf16.mxu0 %v15500_v43  ;;  %v4599_v28 = vld [vmem:[#allocation2 + $0x78] sm:$0xff] }
 0xfed   :  { %v4607_v54 = vpack.c.bf16 %v4599_v28, %v4598_v8 }
 0xff3   :  { %8351 = vmatmul.mubr.msk.bf16.gmra.mrb[184].mxu0 %vm73_vm4, %v4607_v54 }
0x1074   :  { %v4717_v15 = vpop.f32.mrb[156].mxu0 }
0x1075   :  { %v4719_v44 = vpop.f32.mrb[157].mxu0  ;;  %v4718_v30 = vadd.f32 %v4717_v15, %v13425_v24 }
0x1076   :  { %v4721_v43 = vpop.f32.mrb[158].mxu0  ;;  %v4720_v17 = vadd.f32 %v4719_v44, %v13429_v2 }
0x1077   :  { %v4722_v42 = vadd.f32 %v4721_v43, %v13425_v24  ;;  %v4723_v5 = vpop.f32.mrb[159].mxu0 }
0x1078   :  { %v4724_v40 = vadd.f32 %v4723_v5, %v13429_v2 }
0x1079   :  { %v13435_v51 = vpack.c.bf16 %v4722_v42, %v4718_v30 }
0x107a   :  { %v13437_v9 = vpack.c.bf16 %v4724_v40, %v4720_v17 }
0x107b   :  { %4836 = vrot.lane.b32.xlu0 %v13435_v51, %s10890_s3  ;;  %9478 = vmatprep.mubr.msk.bf16.mxu1 %vm122_vm1, %v13435_v51 }
0x107c   :  { %15504 = vst [vmem:[#allocation33_spill] sm:$0xff] %v13437_v9  ;;  %v4727_v32 = vpop.f32.mrb[160].mxu0  ;;  %9494 = vmatprep.subr.bf16.mxu0 %v13437_v9 }
0x107d   :  { %v4729_v34 = vpop.f32.mrb[161].mxu0  ;;  %9495 = vmatpush3.bf16.msra.mxu0 %v13437_v9  ;;  %v4728_v13 = vadd.f32 %v4727_v32, %v13425_v24 }
0x107e   :  { %v4731_v53 = vpop.f32.mrb[162].mxu0  ;;  %v4730_v25 = vadd.f32 %v4729_v34, %v13429_v2 }
0x107f   :  { %v4732_v19 = vadd.f32 %v4731_v53, %v13425_v24  ;;  %v4733_v41 = vpop.f32.mrb[163].mxu0 }
0x1080   :  { %v4734_v11 = vadd.f32 %v4733_v41, %v13429_v2 }
0x1081   :  { %v13449_v36 = vpack.c.bf16 %v4732_v19, %v4728_v13 }
0x1082   :  { %v13451_v29 = vpack.c.bf16 %v4734_v11, %v4730_v25 }
0x1083   :  { %4838 = vrot.lane.b32.xlu1 %v13449_v36, %s10890_s3 }
0x1084   :  { %15505 = vst [vmem:[#allocation19_spill] sm:$0xff] %v13451_v29  ;;  %v4737_v46 = vpop.f32.mrb[164].mxu0  ;;  %9496 = vmatprep.subr.bf16.mxu0 %v13451_v29 }
0x1085   :  { %v4739_v49 = vpop.f32.mrb[165].mxu0  ;;  %9497 = vmatpush3.bf16.msra.mxu0 %v13451_v29  ;;  %v4738_v10 = vadd.f32 %v4737_v46, %v13425_v24 }
0x1086   :  { %v4741_v38 = vpop.f32.mrb[166].mxu0  ;;  %v4740_v52 = vadd.f32 %v4739_v49, %v13429_v2 }
0x1087   :  { %v4742_v56 = vadd.f32 %v4741_v38, %v13425_v24  ;;  %v4743_v1 = vpop.f32.mrb[167].mxu0 }
0x1088   :  { %v4744_v4 = vadd.f32 %v4743_v1, %v13429_v2 }
0x1089   :  { %v13461_v3 = vpack.c.bf16 %v4742_v56, %v4738_v10 }
0x108a   :  { %v13463_v50 = vpack.c.bf16 %v4744_v4, %v4740_v52 }
0x108b   :  { %4840 = vrot.lane.b32.xlu1 %v13461_v3, %s10890_s3 }
0x108c   :  { %15506 = vst [vmem:[#allocation16_spill] sm:$0xff] %v13463_v50  ;;  %v4747_v47 = vpop.f32.mrb[168].mxu0  ;;  %9498 = vmatprep.subr.bf16.mxu0 %v13463_v50 }
0x108d   :  { %v4749_v37 = vpop.f32.mrb[169].mxu0  ;;  %9499 = vmatpush3.bf16.msra.mxu0 %v13463_v50  ;;  %v4748_v23 = vadd.f32 %v4747_v47, %v13425_v24 }
0x108e   :  { %v4751_v48 = vpop.f32.mrb[170].mxu0  ;;  %v4750_v57 = vadd.f32 %v4749_v37, %v13429_v2 }
0x108f   :  { %v4752_v16 = vadd.f32 %v4751_v48, %v13425_v24  ;;  %v4753_v7 = vpop.f32.mrb[171].mxu0 }
0x1090   :  { %v4754_v14 = vadd.f32 %v4753_v7, %v13429_v2 }
0x1091   :  { %v13473_v55 = vpack.c.bf16 %v4752_v16, %v4748_v23 }
0x1092   :  { %v13475_v6 = vpack.c.bf16 %v4754_v14, %v4750_v57 }
0x1093   :  { %4842 = vrot.lane.b32.xlu1 %v13473_v55, %s10890_s3 }
0x1094   :  { %15507 = vst [vmem:[#allocation17_spill] sm:$0xff] %v13475_v6  ;;  %9500 = vmatprep.subr.bf16.mxu0 %v13475_v6 }
0x1095   :  { %9501 = vmatpush3.bf16.msra.mxu0 %v13475_v6 }
0x10a2   :  { %v4757_v45 = vpop.f32.mrb[172].mxu0 }
0x10a3   :  { %v4759_v27 = vpop.f32.mrb[173].mxu0  ;;  %v4758_v12 = vadd.f32 %v4757_v45, %v13425_v24 }
0x10a4   :  { %v4761_v39 = vpop.f32.mrb[174].mxu0  ;;  %v4760_v20 = vadd.f32 %v4759_v27, %v13429_v2 }
0x10a5   :  { %v4762_v26 = vadd.f32 %v4761_v39, %v13425_v24  ;;  %v4763_v63 = vpop.f32.mrb[175].mxu0 }
0x10a6   :  { %v4764_v61 = vadd.f32 %v4763_v63, %v13429_v2 }
0x10a7   :  { %v13485_v33 = vpack.c.bf16 %v4762_v26, %v4758_v12 }
0x10a8   :  { %v13487_v58 = vpack.c.bf16 %v4764_v61, %v4760_v20 }
0x10a9   :  { %4844 = vrot.lane.b32.xlu0 %v13485_v33, %s10890_s3 }
0x10aa   :  { %15508 = vst [vmem:[#allocation20_spill] sm:$0xff] %v13487_v58  ;;  %v4767_v35 = vpop.f32.mrb[176].mxu0  ;;  %9502 = vmatprep.subr.bf16.mxu0 %v13487_v58 }
0x10ab   :  { %v4769_v21 = vpop.f32.mrb[177].mxu0  ;;  %9503 = vmatpush3.bf16.msra.mxu0 %v13487_v58  ;;  %v4768_v0 = vadd.f32 %v4767_v35, %v13425_v24 }
0x10ac   :  { %v4771_v22 = vpop.f32.mrb[178].mxu0  ;;  %v4770_v8 = vadd.f32 %v4769_v21, %v13429_v2 }
0x10ad   :  { %v4772_v18 = vadd.f32 %v4771_v22, %v13425_v24  ;;  %v4773_v28 = vpop.f32.mrb[179].mxu0 }
0x10ae   :  { %v4774_v54 = vadd.f32 %v4773_v28, %v13429_v2 }
0x10af   :  { %v13497_v62 = vpack.c.bf16 %v4772_v18, %v4768_v0 }
0x10b0   :  { %v13499_v31 = vpack.c.bf16 %v4774_v54, %v4770_v8 }
0x10b1   :  { %4846 = vrot.lane.b32.xlu1 %v13497_v62, %s10890_s3 }
0x10b2   :  { %15509 = vst [vmem:[#allocation21_spill] sm:$0xff] %v13499_v31  ;;  %9504 = vmatprep.subr.bf16.mxu0 %v13499_v31 }
0x10b3   :  { %9505 = vmatpush3.bf16.msra.mxu0 %v13499_v31 }
0x10be   :  { %v4777_v60 = vpop.f32.mrb[180].mxu0 }
0x10bf   :  { %v4779_v15 = vpop.f32.mrb[181].mxu0  ;;  %v4778_v44 = vadd.f32 %v4777_v60, %v13425_v24 }
0x10c0   :  { %v4781_v59 = vpop.f32.mrb[182].mxu0  ;;  %v4780_v42 = vadd.f32 %v4779_v15, %v13429_v2 }
0x10c1   :  { %v4782_v43 = vadd.f32 %v4781_v59, %v13425_v24  ;;  %v4783_v30 = vpop.f32.mrb[183].mxu0 }
0x10c2   :  { %v4784_v5 = vadd.f32 %v4783_v30, %v13429_v2 }
0x10c3   :  { %v13509_v17 = vpack.c.bf16 %v4782_v43, %v4778_v44 }
0x10c4   :  { %v13511_v40 = vpack.c.bf16 %v4784_v5, %v4780_v42 }
0x10c5   :  { %4848 = vrot.lane.b32.xlu0 %v13509_v17, %s10890_s3 }
0x10c6   :  { %v4787_v32 = vpop.f32.mrb[184].mxu0  ;;  %9506 = vmatprep.subr.bf16.mxu0 %v13511_v40 }
0x10c7   :  { %v4789_v34 = vpop.f32.mrb[185].mxu0  ;;  %9507 = vmatpush3.bf16.msra.mxu0 %v13511_v40  ;;  %v4788_v13 = vadd.f32 %v4787_v32, %v13425_v24 }
0x10c8   :  { %v4791_v53 = vpop.f32.mrb[186].mxu0  ;;  %v4790_v25 = vadd.f32 %v4789_v34, %v13429_v2 }
0x10c9   :  { %v4792_v19 = vadd.f32 %v4791_v53, %v13425_v24  ;;  %5270 = vrot.lane.b32.xlu0 %v13435_v51, %s10891_s28  ;;  %v4793_v41 = vpop.f32.mrb[187].mxu0 }
0x10ca   :  { %v4794_v11 = vadd.f32 %v4793_v41, %v13429_v2 }
0x10cb   :  { %v13523_v46 = vpack.c.bf16 %v4792_v19, %v4788_v13 }
0x10cc   :  { %v13525_v49 = vpack.c.bf16 %v4794_v11, %v4790_v25 }
0x10cd   :  { %5274 = vrot.lane.b32.xlu0 %v13461_v3, %s10891_s28  ;;  %4850 = vrot.lane.b32.xlu1 %v13523_v46, %s10890_s3 }
0x10ce   :  { %9508 = vmatprep.subr.bf16.mxu0 %v13525_v49 }
0x10cf   :  { %9509 = vmatpush3.bf16.msra.mxu0 %v13525_v49 }
0x10d1   :  { %5278 = vrot.lane.b32.xlu0 %v13485_v33, %s10891_s28  ;;  %5272 = vrot.lane.b32.xlu1 %v13449_v36, %s10891_s28 }
0x10d5   :  { %5282 = vrot.lane.b32.xlu0 %v13509_v17, %s10891_s28  ;;  %5276 = vrot.lane.b32.xlu1 %v13473_v55, %s10891_s28 }
0x10d9   :  { %5254 = vrot.lane.b32.xlu0 %v13435_v51, %s10892_s29  ;;  %5280 = vrot.lane.b32.xlu1 %v13497_v62, %s10891_s28 }
0x10dd   :  { %5258 = vrot.lane.b32.xlu0 %v13461_v3, %s10892_s29  ;;  %5284 = vrot.lane.b32.xlu1 %v13523_v46, %s10891_s28 }
0x10e1   :  { %5262 = vrot.lane.b32.xlu0 %v13485_v33, %s10892_s29  ;;  %5256 = vrot.lane.b32.xlu1 %v13449_v36, %s10892_s29 }
0x10e5   :  { %5266 = vrot.lane.b32.xlu0 %v13509_v17, %s10892_s29  ;;  %5260 = vrot.lane.b32.xlu1 %v13473_v55, %s10892_s29 }
0x10e9   :  { %5990 = vrot.lane.b32.xlu0 %v13435_v51, %s10893_s30  ;;  %5264 = vrot.lane.b32.xlu1 %v13497_v62, %s10892_s29 }
0x10ed   :  { %5994 = vrot.lane.b32.xlu0 %v13461_v3, %s10893_s30  ;;  %5268 = vrot.lane.b32.xlu1 %v13523_v46, %s10892_s29  ;;  %v4837_v24 = vpop.permute.xlu0 %4836 }
0x10ee   :  { %10002 = vmatprep.subr.msk.bf16.mxu1 %vm122_vm1, %v4837_v24  ;;  %v4877_v2 = vsel %vm122_vm1, %v4837_v24, 0 }
0x10ef   :  { %9463 = vmatpush3.bf16.xpose.msra.mxu1 %v4877_v2 }
0x10f1   :  { %5998 = vrot.lane.b32.xlu0 %v13485_v33, %s10893_s30  ;;  %5992 = vrot.lane.b32.xlu1 %v13449_v36, %s10893_s30 }
0x10f5   :  { %6002 = vrot.lane.b32.xlu0 %v13509_v17, %s10893_s30  ;;  %5996 = vrot.lane.b32.xlu1 %v13473_v55, %s10893_s30  ;;  %v4839_v38 = vpop.permute.xlu1 %4838 }
0x10f6   :  { %10003 = vmatprep.subr.msk.bf16.mxu1 %vm122_vm1, %v4839_v38  ;;  %v4880_v10 = vsel %vm122_vm1, %v4839_v38, 0 }
0x10f7   :  { %9465 = vmatpush3.bf16.xpose.msra.mxu1 %v4880_v10 }
0x10f9   :  { %5978 = vrot.lane.b32.xlu0 %v13461_v3, %s10894_s8  ;;  %6000 = vrot.lane.b32.xlu1 %v13497_v62, %s10893_s30 }
0x10fd   :  { %5980 = vrot.lane.b32.xlu0 %v13473_v55, %s10894_s8  ;;  %5974 = vrot.lane.b32.xlu1 %v13435_v51, %s10894_s8  ;;  %v4841_v56 = vpop.permute.xlu1 %4840 }
0x10fe   :  { %10004 = vmatprep.subr.msk.bf16.mxu1 %vm122_vm1, %v4841_v56  ;;  %v4883_v1 = vsel %vm122_vm1, %v4841_v56, 0 }
0x10ff   :  { %9467 = vmatpush3.bf16.xpose.msra.mxu1 %v4883_v1 }
0x1101   :  { %5986 = vrot.lane.b32.xlu0 %v13509_v17, %s10894_s8  ;;  %5976 = vrot.lane.b32.xlu1 %v13449_v36, %s10894_s8 }
0x1105   :  { %5591 = vrot.lane.b32.xlu0 %v13437_v9, %s10892_s29  ;;  %5982 = vrot.lane.b32.xlu1 %v13485_v33, %s10894_s8  ;;  %v4843_v52 = vpop.permute.xlu1 %4842 }
0x1106   :  { %10005 = vmatprep.subr.msk.bf16.mxu1 %vm122_vm1, %v4843_v52  ;;  %v4886_v4 = vsel %vm122_vm1, %v4843_v52, 0 }
0x1107   :  { %9469 = vmatpush3.bf16.xpose.msra.mxu1 %v4886_v4 }
0x1109   :  { %5595 = vrot.lane.b32.xlu0 %v13463_v50, %s10892_s29  ;;  %5984 = vrot.lane.b32.xlu1 %v13497_v62, %s10894_s8 }
0x110d   :  { %6004 = vrot.lane.b32.xlu0 %v13523_v46, %s10893_s30  ;;  %5593 = vrot.lane.b32.xlu1 %v13451_v29, %s10892_s29 }
0x1111   :  { %5988 = vrot.lane.b32.xlu0 %v13523_v46, %s10894_s8  ;;  %5599 = vrot.lane.b32.xlu1 %v13487_v58, %s10892_s29 }
0x1115   :  { %5601 = vrot.lane.b32.xlu1 %v13499_v31, %s10892_s29 }
0x111b   :  { %v4845_v47 = vpop.permute.xlu0 %4844 }
0x111c   :  { %10006 = vmatprep.subr.msk.bf16.mxu1 %vm122_vm1, %v4845_v47  ;;  %v4889_v37 = vsel %vm122_vm1, %v4845_v47, 0 }
0x111d   :  { %9471 = vmatpush3.bf16.xpose.msra.mxu1 %v4889_v37 }
0x1123   :  { %v4847_v48 = vpop.permute.xlu1 %4846 }
0x1124   :  { %10007 = vmatprep.subr.msk.bf16.mxu1 %vm122_vm1, %v4847_v48  ;;  %v4892_v23 = vsel %vm122_vm1, %v4847_v48, 0 }
0x1125   :  { %9473 = vmatpush3.bf16.xpose.msra.mxu1 %v4892_v23 }
0x1137   :  { %v4849_v16 = vpop.permute.xlu0 %4848 }
0x1138   :  { %10008 = vmatprep.subr.msk.bf16.mxu1 %vm122_vm1, %v4849_v16  ;;  %v4895_v7 = vsel %vm122_vm1, %v4849_v16, 0 }
0x1139   :  { %9475 = vmatpush3.bf16.xpose.msra.mxu1 %v4895_v7 }
0x113b   :  { %v5271_v57 = vpop.permute.xlu0 %5270 }
0x113c   :  { %v5311_v26 = vsel %vm122_vm1, %v5271_v57, 0 }
0x113f   :  { %v4851_v14 = vpop.permute.xlu1 %4850  ;;  %v5275_v45 = vpop.permute.xlu0 %5274 }
0x1140   :  { %10009 = vmatprep.subr.msk.bf16.mxu1 %vm122_vm1, %v4851_v14  ;;  %v4898_v27 = vsel %vm122_vm1, %v4851_v14, 0  ;;  %v5317_v0 = vsel %vm122_vm1, %v5275_v45, 0 }
0x1141   :  { %9477 = vmatpush3.bf16.xpose.msra.mxu1 %v4898_v27 }
0x1142   :  { %10010 = vmatprep.subr.msk.bf16.mxu1 %vm122_vm1, %v5271_v57 }
0x1143   :  { %v5279_v39 = vpop.permute.xlu0 %5278  ;;  %v5273_v63 = vpop.permute.xlu1 %5272 }
0x1144   :  { %v5314_v35 = vsel %vm122_vm1, %v5273_v63, 0  ;;  %v5323_v44 = vsel %vm122_vm1, %v5279_v39, 0 }
0x1147   :  { %v5283_v12 = vpop.permute.xlu0 %5282  ;;  %v5277_v18 = vpop.permute.xlu1 %5276 }
0x1148   :  { %9479 = vmatmul.mubr.msk.bf16.vlgmr.msra.gmra.mrb[136].mxu1 %vm122_vm1, %v13449_v36  ;;  %v5320_v54 = vsel %vm122_vm1, %v5277_v18, 0  ;;  %v5329_v19 = vsel %vm122_vm1, %v5283_v12, 0 }
0x1149   :  { %9482 = vmatprep.mubr.msk.bf16.mxu1 %vm122_vm1, %v13461_v3  ;;  %9527 = vmatpush3.bf16.xpose.msra.mxu1 %v5311_v26 }
0x114a   :  { %10011 = vmatprep.subr.msk.bf16.mxu1 %vm122_vm1, %v5273_v63 }
0x114b   :  { %v5255_v20 = vpop.permute.xlu0 %5254  ;;  %v5281_v15 = vpop.permute.xlu1 %5280 }
0x114c   :  { %v5326_v5 = vsel %vm122_vm1, %v5281_v15, 0 }
0x114f   :  { %v5259_v61 = vpop.permute.xlu0 %5258  ;;  %v5285_v43 = vpop.permute.xlu1 %5284 }
0x1150   :  { %9483 = vmatmul.mubr.msk.bf16.gmra.mrb[140].mxu1 %vm122_vm1, %v13473_v55  ;;  %v5332_v25 = vsel %vm122_vm1, %v5285_v43, 0 }
0x1151   :  { %9486 = vmatprep.mubr.msk.bf16.mxu1 %vm122_vm1, %v13485_v33  ;;  %9529 = vmatpush3.bf16.xpose.msra.mxu1 %v5314_v35 }
0x1152   :  { %10012 = vmatprep.subr.msk.bf16.mxu1 %vm122_vm1, %v5275_v45 }
0x1153   :  { %v5263_v21 = vpop.permute.xlu0 %5262  ;;  %v5257_v32 = vpop.permute.xlu1 %5256 }
0x1157   :  { %v5267_v22 = vpop.permute.xlu0 %5266  ;;  %v5261_v53 = vpop.permute.xlu1 %5260 }
0x1158   :  { %9487 = vmatmul.mubr.msk.bf16.gmra.mrb[144].mxu1 %vm122_vm1, %v13497_v62 }
0x1159   :  { %9490 = vmatprep.mubr.msk.bf16.mxu1 %vm122_vm1, %v13509_v17  ;;  %9531 = vmatpush3.bf16.xpose.msra.mxu1 %v5317_v0 }
0x115a   :  { %10013 = vmatprep.subr.msk.bf16.mxu1 %vm122_vm1, %v5277_v18  ;;  %v13714_v18 = vld [vmem:[%s15423_s23 + $0x18] sm:$0xff] }
0x115b   :  { %v5991_v28 = vpop.permute.xlu0 %5990  ;;  %v5265_v41 = vpop.permute.xlu1 %5264  ;;  %15513 = vst [vmem:[#allocation23_spill] sm:$0xff] %v13714_v18 }
0x115c   :  { %v6031_v24 = vsel %vm122_vm1, %v5991_v28, 0 }
0x115f   :  { %v5995_v8 = vpop.permute.xlu0 %5994  ;;  %v5269_v11 = vpop.permute.xlu1 %5268 }
0x1160   :  { %9491 = vmatmul.mubr.msk.bf16.gmra.mrb[148].mxu1 %vm122_vm1, %v13523_v46  ;;  %v6037_v56 = vsel %vm122_vm1, %v5995_v8, 0 }
0x1161   :  { %9533 = vmatpush3.bf16.xpose.msra.mxu1 %v5320_v54  ;;  %9542 = vmatprep.mubr.msk.bf16.mxu1 %vm122_vm1, %v5255_v20  ;;  %v13697_v20 = vld [vmem:[%s15423_s23 + $0x8] sm:$0xff] }
0x1162   :  { %10014 = vmatprep.subr.msk.bf16.mxu1 %vm122_vm1, %v5279_v39  ;;  %v13689_v39 = vld [vmem:[%s15423_s23 + $0x10] sm:$0xff]  ;;  %15511 = vst [vmem:[#allocation34_spill] sm:$0xff] %v13697_v20 }
0x1163   :  { %v5999_v60 = vpop.permute.xlu0 %5998  ;;  %v5993_v2 = vpop.permute.xlu1 %5992  ;;  %15510 = vst [vmem:[#allocation22_spill] sm:$0xff] %v13689_v39 }
0x1164   :  { %v6034_v38 = vsel %vm122_vm1, %v5993_v2, 0  ;;  %v6043_v47 = vsel %vm122_vm1, %v5999_v60, 0 }
0x1167   :  { %v6003_v59 = vpop.permute.xlu0 %6002  ;;  %v5997_v10 = vpop.permute.xlu1 %5996 }
0x1168   :  { %v6040_v4 = vsel %vm122_vm1, %v5997_v10, 0  ;;  %v6049_v23 = vsel %vm122_vm1, %v6003_v59, 0 }
0x1169   :  { %9535 = vmatpush3.bf16.xpose.msra.mxu1 %v5323_v44 }
0x116a   :  { %10015 = vmatprep.subr.msk.bf16.mxu1 %vm122_vm1, %v5281_v15 }
0x116b   :  { %v5979_v30 = vpop.permute.xlu0 %5978  ;;  %v6001_v1 = vpop.permute.xlu1 %6000 }
0x116c   :  { %v6046_v37 = vsel %vm122_vm1, %v6001_v1, 0 }
0x116f   :  { %v5981_v42 = vpop.permute.xlu0 %5980  ;;  %v5975_v52 = vpop.permute.xlu1 %5974 }
0x1171   :  { %9537 = vmatpush3.bf16.xpose.msra.mxu1 %v5326_v5 }
0x1172   :  { %10016 = vmatprep.subr.msk.bf16.mxu1 %vm122_vm1, %v5283_v12 }
0x1173   :  { %v5987_v34 = vpop.permute.xlu0 %5986  ;;  %v5977_v57 = vpop.permute.xlu1 %5976 }
0x1177   :  { %v13647_v13 = vpop.permute.xlu0 %5591  ;;  %v5983_v14 = vpop.permute.xlu1 %5982 }
0x1178   :  { %9558 = vmatprep.subr.bf16.mxu0 %v13647_v13 }
0x1179   :  { %9539 = vmatpush3.bf16.xpose.msra.mxu1 %v5329_v19 }
0x117a   :  { %10017 = vmatprep.subr.msk.bf16.mxu1 %vm122_vm1, %v5285_v43 }
0x117b   :  { %v13674_v48 = vpop.permute.xlu0 %5595  ;;  %v5985_v45 = vpop.permute.xlu1 %5984 }
0x117f   :  { %v6005_v16 = vpop.permute.xlu0 %6004 }
0x1180   :  { %v6052_v7 = vsel %vm122_vm1, %v6005_v16, 0 }
0x1181   :  { %9541 = vmatpush3.bf16.xpose.msra.mxu1 %v5332_v25 }
0x1182   :  { %10018 = vmatprep.subr.msk.bf16.mxu1 %vm122_vm1, %v5991_v28  ;;  %v13720_v28 = vld [vmem:[%s15423_s23 + $0x30] sm:$0xff] }
0x1183   :  { %v5989_v27 = vpop.permute.xlu0 %5988  ;;  %15514 = vst [vmem:[#allocation35_spill] sm:$0xff] %v13720_v28 }
0x1188   :  { %9543 = vmatmul.mubr.msk.bf16.vlgmr.msra.gmra.mrb[152].mxu1 %vm122_vm1, %v5257_v32 }
0x1189   :  { %9546 = vmatprep.mubr.msk.bf16.mxu1 %vm122_vm1, %v5259_v61  ;;  %9627 = vmatpush3.bf16.xpose.msra.mxu1 %v6031_v24  ;;  %v13702_v61 = vld [vmem:[%s15423_s23] sm:$0xff] }
0x118a   :  { %10019 = vmatprep.subr.msk.bf16.mxu1 %vm122_vm1, %v5993_v2  ;;  %15512 = vst [vmem:[#allocation18_spill] sm:$0xff] %v13702_v61 }
0x1190   :  { %9547 = vmatmul.mubr.msk.bf16.gmra.mrb[156].mxu1 %vm122_vm1, %v5261_v53  ;;  %v13751_v53 = vld [vmem:[%s15423_s23 + $0x28] sm:$0xff] }
0x1191   :  { %9550 = vmatprep.mubr.msk.bf16.mxu1 %vm122_vm1, %v5263_v21  ;;  %9629 = vmatpush3.bf16.xpose.msra.mxu1 %v6034_v38  ;;  %15517 = vst [vmem:[#allocation28_spill] sm:$0xff] %v13751_v53 }
0x1192   :  { %10020 = vmatprep.subr.msk.bf16.mxu1 %vm122_vm1, %v5995_v8 }
0x1198   :  { %9551 = vmatmul.mubr.msk.bf16.gmra.mrb[160].mxu1 %vm122_vm1, %v5265_v41 }
0x1199   :  { %9554 = vmatprep.mubr.msk.bf16.mxu1 %vm122_vm1, %v5267_v22  ;;  %9631 = vmatpush3.bf16.xpose.msra.mxu1 %v6037_v56 }
0x119a   :  { %10021 = vmatprep.subr.msk.bf16.mxu1 %vm122_vm1, %v5997_v10  ;;  %v13769_v10 = vld [vmem:[%s15423_s23 + $0x70] sm:$0xff] }
0x119b   :  { %15519 = vst [vmem:[#allocation24_spill] sm:$0xff] %v13769_v10 }
0x11a0   :  { %9555 = vmatmul.mubr.msk.bf16.gmra.mrb[164].mxu1 %vm122_vm1, %v5269_v11  ;;  %v13760_v11 = vld [vmem:[%s15423_s23 + $0x48] sm:$0xff] }
0x11a1   :  { %9633 = vmatpush3.bf16.xpose.msra.mxu1 %v6040_v4  ;;  %9642 = vmatprep.mubr.msk.bf16.mxu1 %vm122_vm1, %v5975_v52  ;;  %15518 = vst [vmem:[#allocation39_spill] sm:$0xff] %v13760_v11  ;;  %v13778_v4 = vld [vmem:[%s15423_s23 + $0x60] sm:$0xff] }
0x11a2   :  { %10022 = vmatprep.subr.msk.bf16.mxu1 %vm122_vm1, %v5999_v60  ;;  %15520 = vst [vmem:[#allocation36_spill] sm:$0xff] %v13778_v4 }
0x11a9   :  { %9635 = vmatpush3.bf16.xpose.msra.mxu1 %v6043_v47 }
0x11aa   :  { %10023 = vmatprep.subr.msk.bf16.mxu1 %vm122_vm1, %v6001_v1 }
0x11b1   :  { %9637 = vmatpush3.bf16.xpose.msra.mxu1 %v6046_v37  ;;  %v13789_v37 = vld [vmem:[%s15423_s23 + $0x78] sm:$0xff] }
0x11b2   :  { %10024 = vmatprep.subr.msk.bf16.mxu1 %vm122_vm1, %v6003_v59  ;;  %v13732_v59 = vld [vmem:[%s15423_s23 + $0x20] sm:$0xff]  ;;  %15521 = vst [vmem:[#allocation29_spill] sm:$0xff] %v13789_v37 }
0x11b3   :  { %15515 = vst [vmem:[#allocation40_spill] sm:$0xff] %v13732_v59 }
0x11b9   :  { %9639 = vmatpush3.bf16.xpose.msra.mxu1 %v6049_v23 }
0x11ba   :  { %10025 = vmatprep.subr.msk.bf16.mxu1 %vm122_vm1, %v6005_v16  ;;  %v13798_v16 = vld [vmem:[%s15423_s23 + $0x68] sm:$0xff] }
0x11bb   :  { %15522 = vst [vmem:[#allocation42_spill] sm:$0xff] %v13798_v16 }
0x11c1   :  { %9641 = vmatpush3.bf16.xpose.msra.mxu1 %v6052_v7 }
0x11c8   :  { %9643 = vmatmul.mubr.msk.bf16.vlgmr.msra.gmra.mrb[168].mxu1 %vm122_vm1, %v5977_v57  ;;  %v13808_v57 = vld [vmem:[%s15423_s23 + $0x50] sm:$0xff] }
0x11c9   :  { %9646 = vmatprep.mubr.msk.bf16.mxu1 %vm122_vm1, %v5979_v30  ;;  %15523 = vst [vmem:[#allocation27_spill] sm:$0xff] %v13808_v57 }
0x11d0   :  { %9647 = vmatmul.mubr.msk.bf16.gmra.mrb[172].mxu1 %vm122_vm1, %v5981_v42  ;;  %v13742_v42 = vld [vmem:[%s15423_s23 + $0x38] sm:$0xff] }
0x11d1   :  { %9650 = vmatprep.mubr.msk.bf16.mxu1 %vm122_vm1, %v5983_v14  ;;  %15516 = vst [vmem:[#allocation11_spill] sm:$0xff] %v13742_v42 }
0x11d8   :  { %9651 = vmatmul.mubr.msk.bf16.gmra.mrb[176].mxu1 %vm122_vm1, %v5985_v45  ;;  %v13816_v45 = vld [vmem:[%s15423_s23 + $0x40] sm:$0xff] }
0x11d9   :  { %9654 = vmatprep.mubr.msk.bf16.mxu1 %vm122_vm1, %v5987_v34  ;;  %15524 = vst [vmem:[#allocation41_spill] sm:$0xff] %v13816_v45 }
0x11e0   :  { %9655 = vmatmul.mubr.msk.bf16.gmra.mrb[180].mxu1 %vm122_vm1, %v5989_v27 }
0x121b   :  { %v9480_v12 = vpop.f32.mrb[136].mxu1 }
0x121c   :  { %v13692_v26 = vadd.f32 %v9480_v12, %v13689_v39  ;;  %v4934_v63 = vpop.f32.mrb[137].mxu1 }
0x121d   :  { %v9481_v35 = vpop.f32.mrb[138].mxu1  ;;  %v13709_v0 = vadd.f32 %v4934_v63, %v13702_v61 }
0x121e   :  { %5001 = vmax.xlane.f32.xlu0 %v13692_v26  ;;  %v4937_v21 = vpop.f32.mrb[139].mxu1  ;;  %v13724_v54 = vadd.f32 %v9481_v35, %v13714_v18 }
0x121f   :  { %v13706_v22 = vadd.f32 %v4937_v21, %v13697_v20 }
0x1221   :  { %4999 = vmax.xlane.f32.xlu1 %v13706_v22 }
0x1222   :  { %4997 = vmax.xlane.f32.xlu0 %v13709_v0 }
0x1223   :  { %v9484_v8 = vpop.f32.mrb[140].mxu1 }
0x1224   :  { %v13727_v60 = vadd.f32 %v9484_v8, %v13720_v28  ;;  %v4950_v15 = vpop.f32.mrb[141].mxu1  ;;  %v13828_v8 = vld [vmem:[%s15423_s23 + $0x58] sm:$0xff] }
0x1225   :  { %v9485_v44 = vpop.f32.mrb[142].mxu1  ;;  %v13737_v30 = vadd.f32 %v4950_v15, %v13732_v59  ;;  %15525 = vst [vmem:[#allocation25_spill] sm:$0xff] %v13828_v8 }
0x1226   :  { %v4953_v43 = vpop.f32.mrb[143].mxu1  ;;  %5009 = vmax.xlane.f32.xlu1 %v13727_v60  ;;  %5003 = vmax.xlane.f32.xlu0 %v13724_v54  ;;  %v13746_v32 = vadd.f32 %v9485_v44, %v13742_v42 }
0x1227   :  { %v13755_v25 = vadd.f32 %v4953_v43, %v13751_v53 }
0x122a   :  { %5005 = vmax.xlane.f32.xlu1 %v13737_v30 }
0x122b   :  { %v9488_v5 = vpop.f32.mrb[144].mxu1 }
0x122c   :  { %v4966_v34 = vpop.f32.mrb[145].mxu1  ;;  %v13811_v14 = vadd.f32 %v9488_v5, %v13808_v57 }
0x122d   :  { %v9489_v19 = vpop.f32.mrb[146].mxu1  ;;  %v13823_v35 = vadd.f32 %v4966_v34, %v13816_v45 }
0x122e   :  { %v4969_v41 = vpop.f32.mrb[147].mxu1  ;;  %5011 = vmax.xlane.f32.xlu1 %v13746_v32  ;;  %v13836_v43 = vadd.f32 %v9489_v19, %v13828_v8 }
0x122f   :  { %v13764_v2 = vadd.f32 %v4969_v41, %v13760_v11 }
0x1232   :  { %5007 = vmax.xlane.f32.xlu1 %v13755_v25 }
0x1233   :  { %v9492_v24 = vpop.f32.mrb[148].mxu1 }
0x1234   :  { %v4982_v38 = vpop.f32.mrb[149].mxu1  ;;  %v13773_v52 = vadd.f32 %v9492_v24, %v13769_v10 }
0x1235   :  { %v9493_v56 = vpop.f32.mrb[150].mxu1  ;;  %v13782_v47 = vadd.f32 %v4982_v38, %v13778_v4 }
0x1236   :  { %v4985_v1 = vpop.f32.mrb[151].mxu1  ;;  %5015 = vmax.xlane.f32.xlu1 %v13764_v2  ;;  %v13793_v23 = vadd.f32 %v9493_v56, %v13789_v37 }
0x1237   :  { %v13802_v7 = vadd.f32 %v4985_v1, %v13798_v16 }
0x123a   :  { %5025 = vmax.xlane.f32.xlu1 %v13773_v52 }
0x123c   :  { %5597 = vrot.lane.b32.xlu0 %v13475_v6, %s10892_s29 }
0x123e   :  { %5021 = vmax.xlane.f32.xlu1 %v13782_v47 }
0x1242   :  { %5027 = vmax.xlane.f32.xlu1 %v13793_v23 }
0x1246   :  { %5023 = vmax.xlane.f32.xlu1 %v13802_v7 }
0x125b   :  { %5017 = vmax.xlane.f32.xlu0 %v13811_v14  ;;  %v9544_v27 = vpop.f32.mrb[152].mxu1 }
0x125c   :  { %v13820_v12 = vadd.f32 %v9544_v27, %v13689_v39  ;;  %v5368_v63 = vpop.f32.mrb[153].mxu1 }
0x125d   :  { %v9545_v21 = vpop.f32.mrb[154].mxu1  ;;  %v13833_v44 = vadd.f32 %v5368_v63, %v13702_v61 }
0x125e   :  { %5435 = vmax.xlane.f32.xlu1 %v13820_v12  ;;  %v5371_v15 = vpop.f32.mrb[155].mxu1  ;;  %v13841_v34 = vadd.f32 %v9545_v21, %v13714_v18 }
0x125f   :  { %5013 = vmax.xlane.f32.xlu0 %v13823_v35  ;;  %v13844_v24 = vadd.f32 %v5371_v15, %v13697_v20 }
0x1262   :  { %5431 = vmax.xlane.f32.xlu1 %v13833_v44 }
0x1263   :  { %5019 = vmax.xlane.f32.xlu0 %v13836_v43  ;;  %v9548_v5 = vpop.f32.mrb[156].mxu1 }
0x1264   :  { %v5384_v41 = vpop.f32.mrb[157].mxu1  ;;  %v13852_v19 = vadd.f32 %v9548_v5, %v13720_v28 }
0x1265   :  { %v9549_v38 = vpop.f32.mrb[158].mxu1  ;;  %v13860_v15 = vadd.f32 %v5384_v41, %v13732_v59 }
0x1266   :  { %5437 = vmax.xlane.f32.xlu1 %v13841_v34  ;;  %v5387_v56 = vpop.f32.mrb[159].mxu1  ;;  %v13868_v50 = vadd.f32 %v9549_v38, %v13742_v42 }
0x1267   :  { %v13848_v1 = vadd.f32 %v5387_v56, %v13751_v53  ;;  %5433 = vmax.xlane.f32.xlu0 %v13844_v24 }
0x126a   :  { %5441 = vmax.xlane.f32.xlu1 %v13848_v1 }
0x126b   :  { %5443 = vmax.xlane.f32.xlu0 %v13852_v19  ;;  %v9552_v27 = vpop.f32.mrb[160].mxu1 }
0x126c   :  { %v13857_v63 = vadd.f32 %v9552_v27, %v13808_v57  ;;  %v5400_v21 = vpop.f32.mrb[161].mxu1 }
0x126d   :  { %v9553_v6 = vpop.f32.mrb[162].mxu1  ;;  %v13865_v5 = vadd.f32 %v5400_v21, %v13816_v45 }
0x126e   :  { %5451 = vmax.xlane.f32.xlu1 %v13857_v63  ;;  %v5403_v56 = vpop.f32.mrb[163].mxu1  ;;  %v13873_v41 = vadd.f32 %v9553_v6, %v13828_v8 }
0x126f   :  { %5439 = vmax.xlane.f32.xlu0 %v13860_v15  ;;  %v13876_v31 = vadd.f32 %v5403_v56, %v13760_v11 }
0x1272   :  { %5447 = vmax.xlane.f32.xlu1 %v13865_v5 }
0x1273   :  { %5445 = vmax.xlane.f32.xlu0 %v13868_v50  ;;  %v9556_v27 = vpop.f32.mrb[164].mxu1 }
0x1274   :  { %v5416_v9 = vpop.f32.mrb[165].mxu1  ;;  %v13884_v38 = vadd.f32 %v9556_v27, %v13769_v10  ;;  %v13902_v10 = vpop.permute.xlu1 %5593 }
0x1275   :  { %v9557_v57 = vpop.f32.mrb[166].mxu1  ;;  %v13889_v6 = vadd.f32 %v5416_v9, %v13778_v4 }
0x1276   :  { %5453 = vmax.xlane.f32.xlu1 %v13873_v41  ;;  %v5419_v21 = vpop.f32.mrb[167].mxu1  ;;  %v13893_v56 = vadd.f32 %v9557_v57, %v13789_v37 }
0x1277   :  { %v13880_v58 = vadd.f32 %v5419_v21, %v13798_v16  ;;  %5449 = vmax.xlane.f32.xlu0 %v13876_v31 }
0x1278   :  { %v13908_v9 = vpop.permute.xlu1 %5599 }
0x127a   :  { %5457 = vmax.xlane.f32.xlu1 %v13880_v58 }
0x127b   :  { %5459 = vmax.xlane.f32.xlu0 %v13884_v38 }
0x127c   :  { %v13916_v39 = vpop.permute.xlu1 %5601 }
0x127f   :  { %5455 = vmax.xlane.f32.xlu0 %v13889_v6 }
0x1283   :  { %5461 = vmax.xlane.f32.xlu0 %v13893_v56 }
0x129b   :  { %v13896_v21 = vpop.f32.mrb[168].mxu1 }
0x129c   :  { %15526 = vst [vmem:[#allocation37_spill] sm:$0xff] %v13896_v21  ;;  %v13898_v45 = vpop.f32.mrb[169].mxu1 }
0x129d   :  { %15527 = vst [vmem:[#allocation26_spill] sm:$0xff] %v13898_v45  ;;  %v13900_v27 = vpop.f32.mrb[170].mxu1 }
0x129e   :  { %15528 = vst [vmem:[#allocation38_spill] sm:$0xff] %v13900_v27  ;;  %v13904_v29 = vpop.f32.mrb[171].mxu1 }
0x129f   :  { %15529 = vst [vmem:[#allocation31_spill] sm:$0xff] %v13904_v29 }
0x12a3   :  { %v13906_v28 = vpop.f32.mrb[172].mxu1 }
0x12a4   :  { %15530 = vst [vmem:[#allocation44_spill] sm:$0xff] %v13906_v28  ;;  %v13910_v4 = vpop.f32.mrb[173].mxu1 }
0x12a5   :  { %15531 = vst [vmem:[#allocation30_spill] sm:$0xff] %v13910_v4  ;;  %v13912_v57 = vpop.f32.mrb[174].mxu1 }
0x12a6   :  { %15532 = vst [vmem:[#allocation43_spill] sm:$0xff] %v13912_v57  ;;  %v13914_v59 = vpop.f32.mrb[175].mxu1 }
0x12a7   :  { %15533 = vst [vmem:[#allocation32_spill] sm:$0xff] %v13914_v59 }
0x12ab   :  { %v13918_v21 = vpop.f32.mrb[176].mxu1  ;;  %v5002_v20 = vpop.xlane.xlu0 %5001 }
0x12ac   :  { %15534 = vst [vmem:[#allocation48_spill] sm:$0xff] %v13918_v21  ;;  %v5031_v37 = vsub.f32 %v13692_v26, %v5002_v20  ;;  %v13921_v16 = vpop.f32.mrb[177].mxu1 }
0x12ad   :  { %15535 = vst [vmem:[#allocation45_spill] sm:$0xff] %v13921_v16  ;;  %v13923_v29 = vpop.f32.mrb[178].mxu1 }
0x12ae   :  { %15536 = vst [vmem:[#allocation46_spill] sm:$0xff] %v13923_v29  ;;  %v5049_v28 = vmul.f32 1.442695, %v5031_v37  ;;  %v5000_v8 = vpop.xlane.xlu1 %4999  ;;  %v13925_v11 = vpop.f32.mrb[179].mxu1 }
0x12af   :  { %15537 = vst [vmem:[#allocation47_spill] sm:$0xff] %v13925_v11  ;;  %v5030_v4 = vsub.f32 %v13706_v22, %v5000_v8  ;;  %v4998_v57 = vpop.xlane.xlu0 %4997 }
0x12b0   :  { %10478 = vpow2.f32 %v5049_v28  ;;  %v5029_v42 = vsub.f32 %v13709_v0, %v4998_v57 }
0x12b1   :  { %v5047_v59 = vmul.f32 1.442695, %v5030_v4 }
0x12b2   :  { %v5045_v53 = vmul.f32 1.442695, %v5029_v42 }
0x12b3   :  { %10480 = vpow2.f32 %v5047_v59  ;;  %v5010_v21 = vpop.xlane.xlu1 %5009  ;;  %v13929_v27 = vpop.f32.mrb[180].mxu1 }
0x12b4   :  { %15538 = vst [vmem:[#allocation7_spill] sm:$0xff] %v13929_v27  ;;  %10482 = vpow2.f32 %v5045_v53  ;;  %v5004_v26 = vpop.xlane.xlu0 %5003  ;;  %v13931_v20 = vpop.f32.mrb[181].mxu1  ;;  %v5035_v37 = vsub.f32 %v13727_v60, %v5010_v21 }
0x12b5   :  { %15539 = vst [vmem:[#allocation9_spill] sm:$0xff] %v13931_v20  ;;  %v5032_v16 = vsub.f32 %v13724_v54, %v5004_v26  ;;  %v13935_v29 = vpop.f32.mrb[182].mxu1 }
0x12b6   :  { %15540 = vst [vmem:[#allocation10_spill] sm:$0xff] %v13935_v29  ;;  %v13937_v22 = vpop.f32.mrb[183].mxu1  ;;  %v5057_v4 = vmul.f32 1.442695, %v5035_v37 }
0x12b7   :  { %15541 = vst [vmem:[#allocation14_spill] sm:$0xff] %v13937_v22  ;;  %v5051_v28 = vmul.f32 1.442695, %v5032_v16  ;;  %v5006_v0 = vpop.xlane.xlu1 %5005 }
0x12b8   :  { %v5033_v59 = vsub.f32 %v13737_v30, %v5006_v0 }
0x12b9   :  { %10484 = vpow2.f32 %v5051_v28 }
0x12ba   :  { %v13940_v42 = vpop.eup %10478  ;;  %10486 = vpow2.f32 %v5057_v4  ;;  %v5053_v60 = vmul.f32 1.442695, %v5033_v59 }
0x12bb   :  { %v5012_v53 = vpop.xlane.xlu1 %5011  ;;  %5081 = vadd.xlane.f32.xlu1 %v13940_v42 }
0x12bc   :  { %v5036_v54 = vsub.f32 %v13746_v32, %v5012_v53  ;;  %10488 = vpow2.f32 %v5053_v60  ;;  %v13966_v53 = vpop.permute.xlu0 %5597 }
0x12bd   :  { %v13943_v8 = vpop.eup %10480 }
0x12be   :  { %v13946_v21 = vpop.eup %10482  ;;  %5079 = vadd.xlane.f32.xlu0 %v13943_v8  ;;  %v5059_v30 = vmul.f32 1.442695, %v5036_v54 }
0x12bf   :  { %v5008_v16 = vpop.xlane.xlu1 %5007  ;;  %5077 = vadd.xlane.f32.xlu1 %v13946_v21 }
0x12c0   :  { %v5034_v57 = vsub.f32 %v13755_v25, %v5008_v16  ;;  %10490 = vpow2.f32 %v5059_v30 }
0x12c2   :  { %v5055_v37 = vmul.f32 1.442695, %v5034_v57 }
0x12c3   :  { %v13951_v26 = vpop.eup %10484  ;;  %v5016_v4 = vpop.xlane.xlu1 %5015 }
0x12c4   :  { %5083 = vadd.xlane.f32.xlu1 %v13951_v26  ;;  %v13954_v28 = vpop.eup %10486  ;;  %10492 = vpow2.f32 %v5055_v37  ;;  %v5038_v61 = vsub.f32 %v13764_v2, %v5016_v4 }
0x12c6   :  { %v13957_v32 = vpop.eup %10488 }
0x12c7   :  { %v5026_v59 = vpop.xlane.xlu1 %5025 }
0x12c8   :  { %5089 = vadd.xlane.f32.xlu1 %v13954_v28  ;;  %v5043_v54 = vsub.f32 %v13773_v52, %v5026_v59 }
0x12ca   :  { %v13960_v0 = vpop.eup %10490  ;;  %v5073_v37 = vmul.f32 1.442695, %v5043_v54 }
0x12cb   :  { %v5022_v60 = vpop.xlane.xlu1 %5021 }
0x12cc   :  { %5085 = vadd.xlane.f32.xlu1 %v13957_v32  ;;  %v5041_v27 = vsub.f32 %v13782_v47, %v5022_v60 }
0x12ce   :  { %v13963_v25 = vpop.eup %10492  ;;  %v5069_v18 = vmul.f32 1.442695, %v5041_v27 }
0x12cf   :  { %v5028_v20 = vpop.xlane.xlu1 %5027 }
0x12d0   :  { %5091 = vadd.xlane.f32.xlu1 %v13960_v0  ;;  %v5044_v47 = vsub.f32 %v13793_v23, %v5028_v20 }
0x12d2   :  { %v5075_v2 = vmul.f32 1.442695, %v5044_v47 }
0x12d3   :  { %v5024_v59 = vpop.xlane.xlu1 %5023 }
0x12d4   :  { %5087 = vadd.xlane.f32.xlu1 %v13963_v25 }
0x12e8   :  { %v5018_v16 = vpop.xlane.xlu0 %5017 }
0x12e9   :  { %v5039_v30 = vsub.f32 %v13811_v14, %v5018_v16  ;;  %v5063_v16 = vmul.f32 1.442695, %v5038_v61 }
0x12eb   :  { %v5065_v57 = vmul.f32 1.442695, %v5039_v30  ;;  %v5436_v60 = vpop.xlane.xlu1 %5435 }
0x12ec   :  { %v5014_v29 = vpop.xlane.xlu0 %5013  ;;  %v5465_v23 = vsub.f32 %v13820_v12, %v5436_v60 }
0x12ed   :  { %10494 = vpow2.f32 %v5065_v57  ;;  %v5037_v22 = vsub.f32 %v13823_v35, %v5014_v29 }
0x12ee   :  { %10496 = vpow2.f32 %v5073_v37 }
0x12ef   :  { %v5061_v11 = vmul.f32 1.442695, %v5037_v22 }
0x12f0   :  { %v5020_v45 = vpop.xlane.xlu0 %5019 }
0x12f1   :  { %10498 = vpow2.f32 %v5061_v11  ;;  %v5040_v52 = vsub.f32 %v13836_v43, %v5020_v45  ;;  %v5042_v11 = vsub.f32 %v13802_v7, %v5024_v59  ;;  %v5483_v7 = vmul.f32 1.442695, %v5465_v23 }
0x12f2   :  { %10500 = vpow2.f32 %v5069_v18  ;;  %v5432_v18 = vpop.xlane.xlu1 %5431 }
0x12f3   :  { %v5067_v14 = vmul.f32 1.442695, %v5040_v52  ;;  %v5071_v61 = vmul.f32 1.442695, %v5042_v11  ;;  %v5463_v22 = vsub.f32 %v13833_v44, %v5432_v18 }
0x12f4   :  { %v5434_v54 = vpop.xlane.xlu0 %5433 }
0x12f5   :  { %10502 = vpow2.f32 %v5067_v14  ;;  %v5479_v12 = vmul.f32 1.442695, %v5463_v22 }
0x12f6   :  { %10504 = vpow2.f32 %v5063_v16  ;;  %v5438_v4 = vpop.xlane.xlu1 %5437  ;;  %v5464_v16 = vsub.f32 %v13844_v24, %v5434_v54 }
0x12f7   :  { %v13975_v30 = vpop.eup %10494  ;;  %10506 = vpow2.f32 %v5075_v2  ;;  %v5466_v52 = vsub.f32 %v13841_v34, %v5438_v4 }
0x12f8   :  { %5097 = vadd.xlane.f32.xlu0 %v13975_v30  ;;  %v13978_v29 = vpop.xlane.xlu0 %5443  ;;  %v13981_v45 = vpop.eup %10496  ;;  %10508 = vpow2.f32 %v5071_v61  ;;  %v5481_v2 = vmul.f32 1.442695, %v5464_v16 }
0x12f9   :  { %10510 = vpow2.f32 %v5483_v7  ;;  %v5485_v14 = vmul.f32 1.442695, %v5466_v52 }
0x12fa   :  { %10512 = vpow2.f32 %v5479_v12  ;;  %v5442_v47 = vpop.xlane.xlu1 %5441 }
0x12fb   :  { %v13983_v35 = vpop.eup %10498  ;;  %10514 = vpow2.f32 %v5485_v14  ;;  %v5468_v11 = vsub.f32 %v13848_v1, %v5442_v47 }
0x12fc   :  { %5105 = vadd.xlane.f32.xlu0 %v13981_v45  ;;  %5093 = vadd.xlane.f32.xlu1 %v13983_v35  ;;  %v13988_v43 = vpop.eup %10500  ;;  %v5440_v27 = vpop.xlane.xlu0 %5439  ;;  %10516 = vpow2.f32 %v5481_v2 }
0x12fd   :  { %v5489_v61 = vmul.f32 1.442695, %v5468_v11 }
0x12fe   :  { %v5452_v47 = vpop.xlane.xlu1 %5451 }
0x12ff   :  { %v13990_v20 = vpop.eup %10502  ;;  %10518 = vpow2.f32 %v5489_v61 }
0x1300   :  { %5101 = vadd.xlane.f32.xlu0 %v13988_v43  ;;  %5099 = vadd.xlane.f32.xlu1 %v13990_v20  ;;  %v13995_v57 = vpop.eup %10504  ;;  %v5446_v37 = vpop.xlane.xlu0 %5445 }
0x1301   :  { %v13999_v59 = vpop.eup %10506 }
0x1302   :  { %v14003_v60 = vpop.eup %10508 }
0x1303   :  { %v14007_v18 = vpop.eup %10510 }
0x1304   :  { %5095 = vadd.xlane.f32.xlu1 %v13995_v57  ;;  %v5450_v44 = vpop.xlane.xlu0 %5449  ;;  %v14011_v24 = vpop.eup %10512 }
0x1305   :  { %v5472_v23 = vsub.f32 %v13876_v31, %v5450_v44  ;;  %v14017_v1 = vpop.eup %10514  ;;  %v5467_v44 = vsub.f32 %v13860_v15, %v5440_v27 }
0x1306   :  { %v14021_v12 = vpop.eup %10516 }
0x1307   :  { %v5497_v54 = vmul.f32 1.442695, %v5472_v23  ;;  %v5487_v11 = vmul.f32 1.442695, %v5467_v44  ;;  %v5448_v23 = vpop.xlane.xlu1 %5447 }
0x1308   :  { %5107 = vadd.xlane.f32.xlu1 %v13999_v59  ;;  %v5460_v34 = vpop.xlane.xlu0 %5459  ;;  %v5471_v15 = vsub.f32 %v13865_v5, %v5448_v23 }
0x1309   :  { %v5477_v7 = vsub.f32 %v13884_v38, %v5460_v34  ;;  %10520 = vpow2.f32 %v5497_v54  ;;  %v14024_v14 = vpop.eup %10518  ;;  %v5469_v38 = vsub.f32 %v13852_v19, %v13978_v29  ;;  %v5470_v34 = vsub.f32 %v13868_v50, %v5446_v37 }
0x130a   :  { %v5473_v19 = vsub.f32 %v13857_v63, %v5452_v47  ;;  %v5495_v50 = vmul.f32 1.442695, %v5471_v15 }
0x130b   :  { %v5507_v4 = vmul.f32 1.442695, %v5477_v7  ;;  %v5493_v29 = vmul.f32 1.442695, %v5470_v34  ;;  %v5454_v54 = vpop.xlane.xlu1 %5453 }
0x130c   :  { %5103 = vadd.xlane.f32.xlu1 %v14003_v60  ;;  %v5456_v22 = vpop.xlane.xlu0 %5455  ;;  %v5499_v7 = vmul.f32 1.442695, %v5473_v19  ;;  %v5474_v37 = vsub.f32 %v13873_v41, %v5454_v54 }
0x130d   :  { %v5475_v31 = vsub.f32 %v13889_v6, %v5456_v22  ;;  %10522 = vpow2.f32 %v5507_v4  ;;  %v5491_v6 = vmul.f32 1.442695, %v5469_v38 }
0x130e   :  { %v5501_v63 = vmul.f32 1.442695, %v5474_v37 }
0x130f   :  { %v5503_v52 = vmul.f32 1.442695, %v5475_v31  ;;  %v5458_v22 = vpop.xlane.xlu1 %5457 }
0x1310   :  { %5515 = vadd.xlane.f32.xlu1 %v14007_v18  ;;  %v5476_v31 = vsub.f32 %v13880_v58, %v5458_v22 }
0x1311   :  { %10524 = vpow2.f32 %v5503_v52  ;;  %v5462_v52 = vpop.xlane.xlu0 %5461 }
0x1312   :  { %10526 = vpow2.f32 %v5491_v6  ;;  %v5505_v38 = vmul.f32 1.442695, %v5476_v31  ;;  %v5478_v41 = vsub.f32 %v13893_v56, %v5462_v52 }
0x1313   :  { %v14029_v16 = vpop.eup %10520  ;;  %10528 = vpow2.f32 %v5487_v11 }
0x1314   :  { %5511 = vadd.xlane.f32.xlu1 %v14011_v24  ;;  %10530 = vpow2.f32 %v5493_v29  ;;  %v5509_v58 = vmul.f32 1.442695, %v5478_v41 }
0x1315   :  { %10532 = vpow2.f32 %v5499_v7 }
0x1316   :  { %5603 = vrot.lane.b32.xlu0 %v13511_v40, %s10892_s29  ;;  %10534 = vpow2.f32 %v5495_v50 }
0x1317   :  { %v14033_v2 = vpop.eup %10522  ;;  %10536 = vpow2.f32 %v5501_v63 }
0x1318   :  { %5517 = vadd.xlane.f32.xlu1 %v14017_v1  ;;  %10538 = vpow2.f32 %v5505_v38 }
0x1319   :  { %10540 = vpow2.f32 %v5509_v58 }
0x131b   :  { %v14037_v61 = vpop.eup %10524 }
0x131c   :  { %5513 = vadd.xlane.f32.xlu1 %v14021_v12  ;;  %v14042_v27 = vpop.eup %10526 }
0x131d   :  { %v14046_v4 = vpop.eup %10528 }
0x131e   :  { %v14050_v5 = vpop.eup %10530 }
0x131f   :  { %v14056_v47 = vpop.eup %10532 }
0x1320   :  { %5521 = vadd.xlane.f32.xlu1 %v14024_v14  ;;  %v14061_v6 = vpop.eup %10534 }
0x1321   :  { %v14066_v44 = vpop.eup %10536 }
0x1322   :  { %v14071_v34 = vpop.eup %10538 }
0x1323   :  { %v14076_v19 = vpop.eup %10540 }
0x1324   :  { %5529 = vadd.xlane.f32.xlu1 %v14029_v16 }
0x1328   :  { %5539 = vadd.xlane.f32.xlu1 %v14033_v2 }
0x132c   :  { %5535 = vadd.xlane.f32.xlu1 %v14037_v61 }
0x1335   :  { %5523 = vadd.xlane.f32.xlu0 %v14042_v27 }
0x1339   :  { %5519 = vadd.xlane.f32.xlu0 %v14046_v4 }
0x133d   :  { %5525 = vadd.xlane.f32.xlu0 %v14050_v5  ;;  %5605 = vrot.lane.b32.xlu1 %v13525_v49, %s10892_s29 }
0x1341   :  { %5531 = vadd.xlane.f32.xlu0 %v14056_v47  ;;  %6593 = vrot.lane.b32.xlu1 %v13449_v36, %s10895_s4 }
0x1345   :  { %5527 = vadd.xlane.f32.xlu0 %v14061_v6  ;;  %6595 = vrot.lane.b32.xlu1 %v13461_v3, %s10895_s4 }
0x1348   :  { %v5082_v56 = vpop.xlane.xlu1 %5081 }
0x1349   :  { %5533 = vadd.xlane.f32.xlu0 %v14066_v44  ;;  %6599 = vrot.lane.b32.xlu1 %v13485_v33, %s10895_s4 }
0x134b   :  { %v5080_v11 = vpop.xlane.xlu0 %5079 }
0x134c   :  { %10542 = vrcp.f32 %v5080_v11  ;;  %v5078_v23 = vpop.xlane.xlu1 %5077 }
0x134d   :  { %10544 = vrcp.f32 %v5078_v23  ;;  %5537 = vadd.xlane.f32.xlu0 %v14071_v34  ;;  %6603 = vrot.lane.b32.xlu1 %v13509_v17, %s10895_s4 }
0x134e   :  { %10546 = vrcp.f32 %v5082_v56 }
0x1351   :  { %v5084_v29 = vpop.xlane.xlu1 %5083  ;;  %6575 = vrot.lane.b32.xlu1 %v13435_v51, %s10896_s27  ;;  %5541 = vadd.xlane.f32.xlu0 %v14076_v19 }
0x1352   :  { %10548 = vrcp.f32 %v5084_v29  ;;  %v15548_v29 = vld [vmem:[#allocation11_spill] sm:$0xff] }
0x1355   :  { %v5090_v54 = vpop.xlane.xlu1 %5089  ;;  %6579 = vrot.lane.b32.xlu1 %v13461_v3, %s10896_s27 }
0x1356   :  { %v10543_v7 = vpop.eup %10542 }
0x1357   :  { %v10545_v15 = vpop.eup %10544  ;;  %v5126_v50 = vmul.f32 %v10543_v7, %v13943_v8 }
0x1358   :  { %v5125_v37 = vmul.f32 %v10545_v15, %v13946_v21  ;;  %v10547_v63 = vpop.eup %10546 }
0x1359   :  { %v5086_v22 = vpop.xlane.xlu1 %5085  ;;  %6583 = vrot.lane.b32.xlu1 %v13485_v33, %s10896_s27  ;;  %v5127_v38 = vmul.f32 %v10547_v63, %v13940_v42 }
0x135a   :  { %v5141_v31 = vpack.c.bf16 %v5126_v50, %v5125_v37  ;;  %10550 = vrcp.f32 %v5086_v22  ;;  %v15551_v37 = vld [vmem:[#allocation47_spill] sm:$0xff] }
0x135c   :  { %v10549_v52 = vpop.eup %10548  ;;  %9510 = vmatprep.mubr.bf16.mxu0 %v5141_v31 }
0x135d   :  { %v5128_v41 = vmul.f32 %v10549_v52, %v13951_v26  ;;  %v5092_v58 = vpop.xlane.xlu1 %5091  ;;  %6587 = vrot.lane.b32.xlu1 %v13509_v17, %s10896_s27  ;;  %v15552_v52 = vld [vmem:[#allocation25_spill] sm:$0xff] }
0x135e   :  { %10552 = vrcp.f32 %v5092_v58 }
0x135f   :  { %v5142_v3 = vpack.c.bf16 %v5128_v41, %v5127_v38  ;;  %10554 = vrcp.f32 %v5090_v54  ;;  %v15549_v54 = vld [vmem:[#allocation43_spill] sm:$0xff]  ;;  %v15553_v38 = vld [vmem:[#allocation46_spill] sm:$0xff] }
0x1360   :  { %v14139_v7 = vadd.f32 %v15549_v54, %v15548_v29  ;;  %v14149_v41 = vadd.f32 %v15553_v38, %v15552_v52 }
0x1361   :  { %v5088_v8 = vpop.xlane.xlu1 %5087  ;;  %9511 = vmatmul.mubr.bf16.vlgmr.msra.gmra.mrb[188].mxu0 %v5142_v3  ;;  %v15554_v3 = vld [vmem:[#allocation42_spill] sm:$0xff] }
0x1362   :  { %10556 = vrcp.f32 %v5088_v8  ;;  %9559 = vmatpush3.bf16.msra.mxu0 %v13647_v13  ;;  %v15555_v8 = vld [vmem:[#allocation14_spill] sm:$0xff] }
0x1363   :  { %9560 = vmatprep.subr.bf16.mxu0 %v13902_v10 }
0x1364   :  { %v10551_v33 = vpop.eup %10550 }
0x1365   :  { %v5129_v21 = vmul.f32 %v10551_v33, %v13957_v32  ;;  %v15542_v32 = vld [vmem:[#allocation18_spill] sm:$0xff]  ;;  %v14154_v33 = vadd.f32 %v15555_v8, %v15554_v3  ;;  %v15562_v3 = vld [vmem:[#allocation40_spill] sm:$0xff] }
0x1366   :  { %9561 = vmatpush3.bf16.msra.mxu0 %v13902_v10  ;;  %v15563_v8 = vld [vmem:[#allocation30_spill] sm:$0xff] }
0x1367   :  { %9562 = vmatprep.subr.bf16.mxu0 %v13674_v48  ;;  %6591 = vrot.lane.b32.xlu0 %v13435_v51, %s10895_s4 }
0x1368   :  { %v10553_v17 = vpop.eup %10552 }
0x1369   :  { %v10555_v42 = vpop.eup %10554  ;;  %v5132_v26 = vmul.f32 %v10553_v17, %v13960_v0 }
0x136a   :  { %9563 = vmatpush3.bf16.msra.mxu0 %v13674_v48  ;;  %v5131_v48 = vmul.f32 %v10555_v42, %v13954_v28  ;;  %v15543_v28 = vld [vmem:[#allocation26_spill] sm:$0xff] }
0x136b   :  { %9564 = vmatprep.subr.bf16.mxu0 %v13966_v53  ;;  %6597 = vrot.lane.b32.xlu0 %v13473_v55, %s10895_s4  ;;  %v14120_v0 = vadd.f32 %v15543_v28, %v15542_v32 }
0x136c   :  { %v10557_v13 = vpop.eup %10556  ;;  %v5144_v56 = vpack.c.bf16 %v5132_v26, %v5131_v48  ;;  %v15557_v26 = vld [vmem:[#allocation10_spill] sm:$0xff] }
0x136d   :  { %v5130_v10 = vmul.f32 %v10557_v13, %v13963_v25  ;;  %v15545_v25 = vld [vmem:[#allocation38_spill] sm:$0xff] }
0x136e   :  { %9565 = vmatpush3.bf16.msra.mxu0 %v13966_v53 }
0x136f   :  { %9566 = vmatprep.subr.bf16.mxu0 %v13908_v9  ;;  %6601 = vrot.lane.b32.xlu0 %v13497_v62, %s10895_s4  ;;  %v5143_v51 = vpack.c.bf16 %v5130_v10, %v5129_v21  ;;  %v15556_v10 = vld [vmem:[#allocation29_spill] sm:$0xff] }
0x1371   :  { %9514 = vmatprep.mubr.bf16.mxu0 %v5143_v51  ;;  %v14159_v51 = vadd.f32 %v15557_v26, %v15556_v10  ;;  %v15568_v10 = vld [vmem:[#allocation45_spill] sm:$0xff] }
0x1372   :  { %9567 = vmatpush3.bf16.msra.mxu0 %v13908_v9  ;;  %v15544_v9 = vld [vmem:[#allocation23_spill] sm:$0xff] }
0x1373   :  { %9515 = vmatmul.mubr.bf16.gmra.mrb[192].mxu0 %v5144_v56  ;;  %9568 = vmatprep.subr.bf16.mxu0 %v13916_v39  ;;  %v14127_v53 = vadd.f32 %v15545_v25, %v15544_v9 }
0x1374   :  { %6605 = vrot.lane.b32.xlu0 %v13523_v46, %s10895_s4 }
0x1376   :  { %9569 = vmatpush3.bf16.msra.mxu0 %v13916_v39  ;;  %v15547_v39 = vld [vmem:[#allocation32_spill] sm:$0xff] }
0x1378   :  { %6577 = vrot.lane.b32.xlu0 %v13449_v36, %s10896_s27 }
0x137c   :  { %6581 = vrot.lane.b32.xlu0 %v13473_v55, %s10896_s27  ;;  %v15546_v55 = vld [vmem:[#allocation28_spill] sm:$0xff] }
0x137d   :  { %v14134_v11 = vadd.f32 %v15547_v39, %v15546_v55 }
0x1380   :  { %6585 = vrot.lane.b32.xlu0 %v13497_v62, %s10896_s27 }
0x1381   :  { %6151 = vmax.xlane.f32.xlu1 %v14120_v0 }
0x1384   :  { %6589 = vrot.lane.b32.xlu0 %v13523_v46, %s10896_s27  ;;  %v15550_v46 = vld [vmem:[#allocation39_spill] sm:$0xff] }
0x1385   :  { %6157 = vmax.xlane.f32.xlu1 %v14127_v53  ;;  %v5098_v36 = vpop.xlane.xlu0 %5097  ;;  %v14144_v22 = vadd.f32 %v15551_v37, %v15550_v46  ;;  %v15561_v46 = vld [vmem:[#allocation37_spill] sm:$0xff] }
0x1389   :  { %v5094_v23 = vpop.xlane.xlu1 %5093  ;;  %6161 = vmax.xlane.f32.xlu1 %v14134_v11  ;;  %v5106_v62 = vpop.xlane.xlu0 %5105 }
0x138d   :  { %v5100_v15 = vpop.xlane.xlu1 %5099  ;;  %6165 = vmax.xlane.f32.xlu1 %v14139_v7  ;;  %v5102_v50 = vpop.xlane.xlu0 %5101 }
0x138e   :  { %10558 = vrcp.f32 %v5100_v15 }
0x138f   :  { %10560 = vrcp.f32 %v5094_v23  ;;  %v15558_v23 = vld [vmem:[#allocation34_spill] sm:$0xff] }
0x1390   :  { %10562 = vrcp.f32 %v5098_v36 }
0x1391   :  { %v5096_v63 = vpop.xlane.xlu1 %5095  ;;  %6169 = vmax.xlane.f32.xlu1 %v14144_v22  ;;  %v5604_v31 = vpop.permute.xlu0 %5603 }
0x1392   :  { %10564 = vrcp.f32 %v5096_v63  ;;  %9570 = vmatprep.subr.bf16.mxu0 %v5604_v31 }
0x1393   :  { %9571 = vmatpush3.bf16.msra.mxu0 %v5604_v31 }
0x1395   :  { %v5108_v58 = vpop.xlane.xlu1 %5107  ;;  %6173 = vmax.xlane.f32.xlu1 %v14149_v41 }
0x1396   :  { %10566 = vrcp.f32 %v5108_v58 }
0x1397   :  { %10568 = vrcp.f32 %v5102_v50 }
0x1398   :  { %v10559_v17 = vpop.eup %10558  ;;  %10570 = vrcp.f32 %v5106_v62  ;;  %v15559_v62 = vld [vmem:[#allocation31_spill] sm:$0xff] }
0x1399   :  { %v5104_v42 = vpop.xlane.xlu1 %5103  ;;  %6177 = vmax.xlane.f32.xlu1 %v14154_v33  ;;  %v10561_v13 = vpop.eup %10560  ;;  %v5136_v56 = vmul.f32 %v10559_v17, %v13990_v20  ;;  %v14168_v29 = vadd.f32 %v15559_v62, %v15558_v23  ;;  %v14182_v17 = vadd.f32 %v15563_v8, %v15562_v3 }
0x139a   :  { %10572 = vrcp.f32 %v5104_v42  ;;  %v10563_v21 = vpop.eup %10562  ;;  %v5133_v28 = vmul.f32 %v10561_v13, %v13983_v35  ;;  %v15565_v42 = vld [vmem:[#allocation44_spill] sm:$0xff]  ;;  %v15566_v13 = vld [vmem:[#allocation19_spill] sm:$0xff] }
0x139b   :  { %v5135_v25 = vmul.f32 %v10563_v21, %v13975_v30  ;;  %v15567_v21 = vld [vmem:[#allocation41_spill] sm:$0xff] }
0x139c   :  { %v10565_v48 = vpop.eup %10564  ;;  %v14194_v26 = vadd.f32 %v15568_v10, %v15567_v21 }
0x139d   :  { %v5516_v32 = vpop.xlane.xlu1 %5515  ;;  %6181 = vmax.xlane.f32.xlu1 %v14159_v51  ;;  %v5134_v9 = vmul.f32 %v10565_v48, %v13995_v57  ;;  %v5146_v55 = vpack.c.bf16 %v5136_v56, %v5135_v25  ;;  %v15560_v57 = vld [vmem:[#allocation22_spill] sm:$0xff]  ;;  %v15570_v25 = vld [vmem:[#allocation27_spill] sm:$0xff] }
0x139e   :  { %v14174_v30 = vadd.f32 %v15561_v46, %v15560_v57 }
0x139f   :  { %v5145_v36 = vpack.c.bf16 %v5134_v9, %v5133_v28  ;;  %v15569_v28 = vld [vmem:[#allocation20_spill] sm:$0xff] }
0x13a0   :  { %v10567_v39 = vpop.eup %10566 }
0x13a1   :  { %v5512_v54 = vpop.xlane.xlu1 %5511  ;;  %9518 = vmatprep.mubr.bf16.mxu0 %v5145_v36  ;;  %v10569_v15 = vpop.eup %10568  ;;  %v5140_v35 = vmul.f32 %v10567_v39, %v13999_v59  ;;  %v15571_v36 = vld [vmem:[#allocation48_spill] sm:$0xff] }
0x13a2   :  { %9519 = vmatmul.mubr.bf16.gmra.mrb[196].mxu0 %v5146_v55  ;;  %v10571_v20 = vpop.eup %10570  ;;  %v5137_v63 = vmul.f32 %v10569_v15, %v13988_v43  ;;  %10574 = vrcp.f32 %v5512_v54  ;;  %v15564_v43 = vld [vmem:[#allocation35_spill] sm:$0xff]  ;;  %v14201_v55 = vadd.f32 %v15571_v36, %v15570_v25  ;;  %v15572_v54 = vld [vmem:[#allocation21_spill] sm:$0xff] }
0x13a3   :  { %6153 = vmax.xlane.f32.xlu0 %v14168_v29  ;;  %v5139_v52 = vmul.f32 %v10571_v20, %v13981_v45  ;;  %v15573_v20 = vld [vmem:[#allocation36_spill] sm:$0xff] }
0x13a4   :  { %v10573_v50 = vpop.eup %10572 }
0x13a5   :  { %v5518_v37 = vpop.xlane.xlu1 %5517  ;;  %v5138_v31 = vmul.f32 %v10573_v50, %v14003_v60  ;;  %v5148_v58 = vpack.c.bf16 %v5140_v35, %v5139_v52  ;;  %v14187_v60 = vadd.f32 %v15565_v42, %v15564_v43  ;;  %v15574_v50 = vld [vmem:[#allocation9_spill] sm:$0xff] }
0x13a6   :  { %v14210_v35 = vadd.f32 %v15574_v50, %v15573_v20 }
0x13a7   :  { %6155 = vmax.xlane.f32.xlu0 %v14174_v30  ;;  %v5147_v38 = vpack.c.bf16 %v5138_v31, %v5137_v63 }
0x13a9   :  { %v5514_v59 = vpop.xlane.xlu1 %5513  ;;  %9522 = vmatprep.mubr.bf16.mxu0 %v5147_v38 }
0x13aa   :  { %10576 = vrcp.f32 %v5514_v59  ;;  %9523 = vmatmul.mubr.bf16.gmra.mrb[200].mxu0 %v5148_v58 }
0x13ab   :  { %6159 = vmax.xlane.f32.xlu0 %v14182_v17  ;;  %10578 = vrcp.f32 %v5518_v37  ;;  %v15575_v37 = vld [vmem:[#allocation24_spill] sm:$0xff] }
0x13ac   :  { %10580 = vrcp.f32 %v5516_v32  ;;  %v10575_v56 = vpop.eup %10574 }
0x13ad   :  { %v5522_v45 = vpop.xlane.xlu1 %5521  ;;  %v5559_v23 = vmul.f32 %v10575_v56, %v14011_v24 }
0x13ae   :  { %6305 = vrot.lane.b32.xlu1 %v15566_v13, %s10894_s8  ;;  %10582 = vrcp.f32 %v5522_v45 }
0x13af   :  { %6163 = vmax.xlane.f32.xlu0 %v14187_v60 }
0x13b1   :  { %v5530_v48 = vpop.xlane.xlu1 %5529 }
0x13b2   :  { %6311 = vrot.lane.b32.xlu1 %v15569_v28, %s10894_s8 }
0x13b3   :  { %6167 = vmax.xlane.f32.xlu0 %v14194_v26 }
0x13b4   :  { %v10577_v9 = vpop.eup %10576 }
0x13b5   :  { %v5540_v39 = vpop.xlane.xlu1 %5539  ;;  %v5560_v62 = vmul.f32 %v10577_v9, %v14021_v12  ;;  %v10579_v15 = vpop.eup %10578  ;;  %v15576_v12 = vld [vmem:[#allocation7_spill] sm:$0xff] }
0x13b6   :  { %6313 = vrot.lane.b32.xlu1 %v15572_v54, %s10894_s8  ;;  %v10581_v46 = vpop.eup %10580  ;;  %v5562_v24 = vmul.f32 %v10579_v15, %v14017_v1  ;;  %v14216_v63 = vadd.f32 %v15576_v12, %v15575_v37  ;;  %v15579_v37 = vld [vmem:[#allocation17_spill] sm:$0xff] }
0x13b7   :  { %6171 = vmax.xlane.f32.xlu0 %v14201_v55  ;;  %v5575_v32 = vpack.c.bf16 %v5560_v62, %v5559_v23  ;;  %v5561_v52 = vmul.f32 %v10581_v46, %v14007_v18 }
0x13b8   :  { %v10583_v21 = vpop.eup %10582 }
0x13b9   :  { %v5536_v57 = vpop.xlane.xlu1 %5535  ;;  %9574 = vmatprep.mubr.bf16.mxu0 %v5575_v32  ;;  %v5576_v38 = vpack.c.bf16 %v5562_v24, %v5561_v52  ;;  %v5564_v25 = vmul.f32 %v10583_v21, %v14024_v14  ;;  %v15577_v32 = vld [vmem:[#allocation33_spill] sm:$0xff] }
0x13bb   :  { %6175 = vmax.xlane.f32.xlu0 %v14210_v35 }
0x13bd   :  { %v5606_v31 = vpop.permute.xlu1 %5605 }
0x13be   :  { %9572 = vmatprep.subr.bf16.mxu0 %v5606_v31 }
0x13bf   :  { %6179 = vmax.xlane.f32.xlu0 %v14216_v63  ;;  %9573 = vmatpush3.bf16.msra.mxu0 %v5606_v31 }
0x13c1   :  { %v14220_v58 = vpop.permute.xlu1 %6593 }
0x13c2   :  { %9575 = vmatmul.mubr.bf16.vlgmr.msra.gmra.mrb[204].mxu0 %v5576_v38  ;;  %v5524_v3 = vpop.xlane.xlu0 %5523 }
0x13c5   :  { %v14222_v8 = vpop.permute.xlu1 %6595 }
0x13c6   :  { %v5520_v1 = vpop.xlane.xlu0 %5519 }
0x13c7   :  { %10584 = vrcp.f32 %v5520_v1 }
0x13c8   :  { %10586 = vrcp.f32 %v5524_v3 }
0x13c9   :  { %v14224_v59 = vpop.permute.xlu1 %6599 }
0x13ca   :  { %v5526_v43 = vpop.xlane.xlu0 %5525 }
0x13cb   :  { %10588 = vrcp.f32 %v5526_v43 }
0x13cc   :  { %10590 = vrcp.f32 %v5530_v48 }
0x13cd   :  { %v14226_v18 = vpop.permute.xlu1 %6603 }
0x13ce   :  { %v5532_v42 = vpop.xlane.xlu0 %5531 }
0x13d1   :  { %v10585_v10 = vpop.eup %10584  ;;  %v6576_v56 = vpop.permute.xlu1 %6575 }
0x13d2   :  { %9724 = vmatprep.mubr.msk.bf16.mxu1 %vm122_vm1, %v6576_v56  ;;  %v5528_v9 = vpop.xlane.xlu0 %5527  ;;  %v5563_v45 = vmul.f32 %v10585_v10, %v14046_v4  ;;  %v10587_v36 = vpop.eup %10586  ;;  %v15578_v4 = vld [vmem:[#allocation16_spill] sm:$0xff] }
0x13d3   :  { %10592 = vrcp.f32 %v5528_v9  ;;  %v5565_v48 = vmul.f32 %v10587_v36, %v14042_v27 }
0x13d4   :  { %v5577_v23 = vpack.c.bf16 %v5564_v25, %v5563_v45  ;;  %10594 = vrcp.f32 %v5532_v42  ;;  %v6635_v45 = vsel %vm122_vm1, %v14220_v58, 0 }
0x13d5   :  { %v10589_v62 = vpop.eup %10588  ;;  %6303 = vrot.lane.b32.xlu0 %v15577_v32, %s10894_s8 }
0x13d6   :  { %9578 = vmatprep.mubr.bf16.mxu0 %v5577_v23  ;;  %v5534_v15 = vpop.xlane.xlu0 %5533  ;;  %v5566_v20 = vmul.f32 %v10589_v62, %v14050_v5  ;;  %v10591_v46 = vpop.eup %10590 }
0x13d7   :  { %10596 = vrcp.f32 %v5534_v15  ;;  %v5568_v5 = vmul.f32 %v10591_v46, %v14029_v16  ;;  %v6580_v62 = vpop.permute.xlu1 %6579 }
0x13d8   :  { %v5578_v50 = vpack.c.bf16 %v5566_v20, %v5565_v48  ;;  %10598 = vrcp.f32 %v5536_v57  ;;  %v14279_v20 = vld [vmem:[%s15309_s12 + $0x20] sm:$0xff]  }
0x13d9   :  { %6307 = vrot.lane.b32.xlu0 %v15578_v4, %s10894_s8 }
0x13da   :  { %9579 = vmatmul.mubr.bf16.gmra.mrb[208].mxu0 %v5578_v50  ;;  %v5538_v14 = vpop.xlane.xlu0 %5537 }
0x13db   :  { %10600 = vrcp.f32 %v5538_v14 }
0x13dc   :  { %10602 = vrcp.f32 %v5540_v39 }
0x13dd   :  { %v10593_v24 = vpop.eup %10592  ;;  %6309 = vrot.lane.b32.xlu0 %v15579_v37, %s10894_s8 }
0x13de   :  { %v5542_v12 = vpop.xlane.xlu0 %5541  ;;  %v5567_v27 = vmul.f32 %v10593_v24, %v14061_v6  ;;  %v10595_v31 = vpop.eup %10594 }
0x13df   :  { %10604 = vrcp.f32 %v5542_v12  ;;  %v5569_v3 = vmul.f32 %v10595_v31, %v14056_v47 }
0x13e0   :  { %v5579_v57 = vpack.c.bf16 %v5568_v5, %v5567_v27 }
0x13e1   :  { %v10597_v52 = vpop.eup %10596  ;;  %6315 = vrot.lane.b32.xlu0 %v13511_v40, %s10894_s8 }
0x13e2   :  { %9582 = vmatprep.mubr.bf16.mxu0 %v5579_v57  ;;  %v6592_v38 = vpop.permute.xlu0 %6591  ;;  %v5570_v39 = vmul.f32 %v10597_v52, %v14066_v44  ;;  %v10599_v1 = vpop.eup %10598 }
0x13e3   :  { %10026 = vmatprep.subr.msk.bf16.mxu1 %vm122_vm1, %v6592_v38  ;;  %v6632_v6 = vsel %vm122_vm1, %v6592_v38, 0  ;;  %v5571_v42 = vmul.f32 %v10599_v1, %v14037_v61  ;;  %v6638_v61 = vsel %vm122_vm1, %v14222_v8, 0 }
0x13e4   :  { %9709 = vmatpush3.bf16.xpose.msra.mxu1 %v6632_v6  ;;  %v5580_v16 = vpack.c.bf16 %v5570_v39, %v5569_v3 }
0x13e5   :  { %v10601_v43 = vpop.eup %10600  ;;  %10027 = vmatprep.subr.msk.bf16.mxu1 %vm122_vm1, %v14220_v58 }
0x13e6   :  { %9583 = vmatmul.mubr.bf16.gmra.mrb[212].mxu0 %v5580_v16  ;;  %v5572_v21 = vmul.f32 %v10601_v43, %v14071_v34  ;;  %v10603_v10 = vpop.eup %10602  ;;  %v6598_v34 = vpop.permute.xlu0 %6597 }
0x13e7   :  { %v5573_v44 = vmul.f32 %v10603_v10, %v14033_v2  ;;  %v6641_v2 = vsel %vm122_vm1, %v6598_v34, 0 }
0x13e8   :  { %v5581_v47 = vpack.c.bf16 %v5572_v21, %v5571_v42 }
0x13e9   :  { %v10605_v56 = vpop.eup %10604 }
0x13ea   :  { %9586 = vmatprep.mubr.bf16.mxu0 %v5581_v47  ;;  %v5574_v9 = vmul.f32 %v10605_v56, %v14076_v19  ;;  %v6644_v19 = vsel %vm122_vm1, %v14224_v59, 0  ;;  %v6602_v58 = vpop.permute.xlu0 %6601 }
0x13eb   :  { %v6647_v36 = vsel %vm122_vm1, %v6602_v58, 0 }
0x13ec   :  { %9711 = vmatpush3.bf16.xpose.msra.mxu1 %v6635_v45  ;;  %v5582_v25 = vpack.c.bf16 %v5574_v9, %v5573_v44 }
0x13ed   :  { %10028 = vmatprep.subr.msk.bf16.mxu1 %vm122_vm1, %v14222_v8  ;;  %v6650_v8 = vsel %vm122_vm1, %v14226_v18, 0 }
0x13ee   :  { %9587 = vmatmul.mubr.bf16.gmra.mrb[216].mxu0 %v5582_v25  ;;  %v6606_v23 = vpop.permute.xlu0 %6605 }
0x13ef   :  { %v6653_v48 = vsel %vm122_vm1, %v6606_v23, 0 }
0x13f2   :  { %v6578_v15 = vpop.permute.xlu0 %6577 }
0x13f4   :  { %9713 = vmatpush3.bf16.xpose.msra.mxu1 %v6638_v61 }
0x13f5   :  { %10029 = vmatprep.subr.msk.bf16.mxu1 %vm122_vm1, %v6598_v34 }
0x13f6   :  { %v6582_v50 = vpop.permute.xlu0 %6581 }
0x13fa   :  { %v6586_v46 = vpop.permute.xlu0 %6585 }
0x13fc   :  { %9715 = vmatpush3.bf16.xpose.msra.mxu1 %v6641_v2 }
0x13fd   :  { %10030 = vmatprep.subr.msk.bf16.mxu1 %vm122_vm1, %v14224_v59  ;;  %v10086_v59 = vld [vmem:[%s15309_s12 + $0x28] sm:$0xff]  }
0x13fe   :  { %9590 = vmatprep.subr.bf16.mxu0 %v10086_v59  ;;  %v6590_v12 = vpop.permute.xlu0 %6589 }
0x13ff   :  { %9591 = vmatpush3.bf16.msra.mxu0 %v10086_v59 }
0x1400   :  { %9608 = vmatprep.subr.bf16.mxu0 %v14279_v20 }
0x1404   :  { %9717 = vmatpush3.bf16.xpose.msra.mxu1 %v6644_v19 }
0x1405   :  { %10031 = vmatprep.subr.msk.bf16.mxu1 %vm122_vm1, %v6602_v58 }
0x140c   :  { %9719 = vmatpush3.bf16.xpose.msra.mxu1 %v6647_v36 }
0x140d   :  { %10032 = vmatprep.subr.msk.bf16.mxu1 %vm122_vm1, %v14226_v18  ;;  %v6584_v18 = vpop.permute.xlu1 %6583 }
0x1411   :  { %v6588_v14 = vpop.permute.xlu1 %6587 }
0x1414   :  { %9721 = vmatpush3.bf16.xpose.msra.mxu1 %v6650_v8 }
0x1415   :  { %10033 = vmatprep.subr.msk.bf16.mxu1 %vm122_vm1, %v6606_v23  ;;  %v6152_v24 = vpop.xlane.xlu1 %6151 }
0x1416   :  { %v6183_v38 = vsub.f32 %v14120_v0, %v6152_v24 }
0x1418   :  { %v6199_v47 = vmul.f32 1.442695, %v6183_v38 }
0x1419   :  { %v6158_v27 = vpop.xlane.xlu1 %6157 }
0x141a   :  { %v6186_v42 = vsub.f32 %v14127_v53, %v6158_v27 }
0x141c   :  { %9723 = vmatpush3.bf16.xpose.msra.mxu1 %v6653_v48 }
0x141d   :  { %v6162_v31 = vpop.xlane.xlu1 %6161 }
0x141e   :  { %v6188_v53 = vsub.f32 %v14134_v11, %v6162_v31 }
0x1421   :  { %v6166_v0 = vpop.xlane.xlu1 %6165 }
0x1422   :  { %v6190_v19 = vsub.f32 %v14139_v7, %v6166_v0 }
0x1423   :  { %9725 = vmatmul.mubr.msk.bf16.vlgmr.msra.gmra.mrb[184].mxu1 %vm122_vm1, %v6578_v15 }
0x1424   :  { %9728 = vmatprep.mubr.msk.bf16.mxu1 %vm122_vm1, %v6580_v62 }
0x1425   :  { %v6170_v61 = vpop.xlane.xlu1 %6169 }
0x1426   :  { %v6192_v8 = vsub.f32 %v14144_v22, %v6170_v61 }
0x1428   :  { %v6217_v15 = vmul.f32 1.442695, %v6192_v8 }
0x1429   :  { %v6174_v23 = vpop.xlane.xlu1 %6173 }
0x142b   :  { %9729 = vmatmul.mubr.msk.bf16.gmra.mrb[188].mxu1 %vm122_vm1, %v6582_v50 }
0x142c   :  { %9732 = vmatprep.mubr.msk.bf16.mxu1 %vm122_vm1, %v6584_v18 }
0x142d   :  { %v6178_v27 = vpop.xlane.xlu1 %6177 }
0x1430   :  { %v6154_v5 = vpop.xlane.xlu0 %6153 }
0x1431   :  { %v6184_v56 = vsub.f32 %v14168_v29, %v6154_v5  ;;  %v6209_v29 = vmul.f32 1.442695, %v6188_v53 }
0x1433   :  { %9733 = vmatmul.mubr.msk.bf16.gmra.mrb[192].mxu1 %vm122_vm1, %v6586_v46  ;;  %v6201_v34 = vmul.f32 1.442695, %v6184_v56 }
0x1434   :  { %v14287_v57 = vpop.f32.mrb[188].mxu0  ;;  %v6156_v52 = vpop.xlane.xlu0 %6155  ;;  %9736 = vmatprep.mubr.msk.bf16.mxu1 %vm122_vm1, %v6588_v14 }
0x1435   :  { %v6185_v3 = vsub.f32 %v14174_v30, %v6156_v52  ;;  %v14292_v39 = vpop.f32.mrb[189].mxu0  ;;  %v6205_v30 = vmul.f32 1.442695, %v6186_v42 }
0x1436   :  { %v14294_v1 = vpop.f32.mrb[190].mxu0 }
0x1437   :  { %v6203_v6 = vmul.f32 1.442695, %v6185_v3  ;;  %v5247_v16 = vpack.c.bf16 %v14294_v1, %v14287_v57  ;;  %v14298_v43 = vpop.f32.mrb[191].mxu0 }
0x1438   :  { %v5246_v21 = vpack.c.bf16 %v14298_v43, %v14292_v39  ;;  %v6160_v10 = vpop.xlane.xlu0 %6159 }
0x1439   :  { %10606 = vpow2.f32 %v6203_v6  ;;  %v6187_v9 = vsub.f32 %v14182_v17, %v6160_v10 }
0x143a   :  { %10608 = vpow2.f32 %v6199_v47 }
0x143b   :  { %9737 = vmatmul.mubr.msk.bf16.gmra.mrb[196].mxu1 %vm122_vm1, %v6590_v12  ;;  %10610 = vpow2.f32 %v6205_v30  ;;  %v6207_v58 = vmul.f32 1.442695, %v6187_v9 }
0x143c   :  { %v6164_v44 = vpop.xlane.xlu0 %6163 }
0x143d   :  { %v6189_v45 = vsub.f32 %v14187_v60, %v6164_v44  ;;  %v6213_v60 = vmul.f32 1.442695, %v6190_v19 }
0x143f   :  { %v6211_v25 = vmul.f32 1.442695, %v6189_v45 }
0x1440   :  { %v6168_v2 = vpop.xlane.xlu0 %6167 }
0x1441   :  { %10612 = vpow2.f32 %v6211_v25  ;;  %v6191_v48 = vsub.f32 %v14194_v26, %v6168_v2  ;;  %v6194_v26 = vsub.f32 %v14149_v41, %v6174_v23  ;;  %v6196_v41 = vsub.f32 %v14154_v33, %v6178_v27 }
0x1442   :  { %10614 = vpow2.f32 %v6201_v34 }
0x1443   :  { %v14309_v36 = vpop.eup %10606  ;;  %10616 = vpow2.f32 %v6207_v58  ;;  %v6215_v5 = vmul.f32 1.442695, %v6191_v48  ;;  %v6221_v10 = vmul.f32 1.442695, %v6194_v26 }
0x1444   :  { %6235 = vadd.xlane.f32.xlu1 %v14309_v36  ;;  %v6172_v17 = vpop.xlane.xlu0 %6171  ;;  %v14316_v59 = vpop.eup %10608  ;;  %10618 = vpow2.f32 %v6209_v29 }
0x1445   :  { %v6193_v11 = vsub.f32 %v14201_v55, %v6172_v17  ;;  %10620 = vpow2.f32 %v6213_v60  ;;  %v14328_v46 = vpop.eup %10610 }
0x1446   :  { %v14314_v62 = vpop.f32.mrb[192].mxu0  ;;  %10622 = vpow2.f32 %v6217_v15 }
0x1447   :  { %v14318_v7 = vpop.f32.mrb[193].mxu0  ;;  %v6219_v50 = vmul.f32 1.442695, %v6193_v11 }
0x1448   :  { %v14321_v22 = vpop.f32.mrb[194].mxu0  ;;  %6231 = vadd.xlane.f32.xlu1 %v14316_v59  ;;  %v6176_v18 = vpop.xlane.xlu0 %6175 }
0x1449   :  { %v5249_v55 = vpack.c.bf16 %v14321_v22, %v14314_v62  ;;  %v14326_v14 = vpop.f32.mrb[195].mxu0  ;;  %10624 = vpow2.f32 %v6219_v50  ;;  %v6195_v52 = vsub.f32 %v14210_v35, %v6176_v18  ;;  %v6182_v35 = vpop.xlane.xlu1 %6181 }
0x144a   :  { %v5248_v24 = vpack.c.bf16 %v14326_v14, %v14318_v7  ;;  %10626 = vpow2.f32 %v6215_v5  ;;  %v6198_v56 = vsub.f32 %v14159_v51, %v6182_v35 }
0x144b   :  { %v14332_v12 = vpop.eup %10612  ;;  %v6223_v47 = vmul.f32 1.442695, %v6195_v52 }
0x144c   :  { %6237 = vadd.xlane.f32.xlu1 %v14328_v46  ;;  %6243 = vadd.xlane.f32.xlu0 %v14332_v12  ;;  %v6180_v31 = vpop.xlane.xlu0 %6179  ;;  %v14339_v3 = vpop.eup %10614  ;;  %v6229_v33 = vmul.f32 1.442695, %v6198_v56 }
0x144d   :  { %v6197_v38 = vsub.f32 %v14216_v63, %v6180_v31  ;;  %v14341_v6 = vpop.eup %10616  ;;  %v6225_v63 = vmul.f32 1.442695, %v6196_v41 }
0x144e   :  { %v14346_v0 = vpop.eup %10618 }
0x144f   :  { %v6227_v42 = vmul.f32 1.442695, %v6197_v38  ;;  %v14348_v30 = vpop.eup %10620 }
0x1450   :  { %6233 = vadd.xlane.f32.xlu1 %v14339_v3  ;;  %6239 = vadd.xlane.f32.xlu0 %v14341_v6  ;;  %v14353_v44 = vpop.eup %10622  ;;  %v6304_v38 = vpop.permute.xlu0 %6303 }
0x1451   :  { %10628 = vpow2.f32 %v6227_v42 }
0x1452   :  { %10630 = vpow2.f32 %v6221_v10 }
0x1453   :  { %10632 = vpow2.f32 %v6223_v47  ;;  %v14355_v9 = vpop.eup %10624 }
0x1454   :  { %6241 = vadd.xlane.f32.xlu1 %v14346_v0  ;;  %6245 = vadd.xlane.f32.xlu0 %v14348_v30  ;;  %10634 = vpow2.f32 %v6225_v63  ;;  %v14359_v45 = vpop.eup %10626 }
0x1455   :  { %10636 = vpow2.f32 %v6229_v33 }
0x1458   :  { %6249 = vadd.xlane.f32.xlu1 %v14353_v44  ;;  %6251 = vadd.xlane.f32.xlu0 %v14355_v9 }
0x145b   :  { %v14361_v25 = vpop.eup %10628 }
0x145c   :  { %6247 = vadd.xlane.f32.xlu0 %v14359_v45  ;;  %6259 = vadd.xlane.f32.xlu1 %v14361_v25  ;;  %v14365_v51 = vpop.eup %10630 }
0x145d   :  { %v14367_v53 = vpop.eup %10632 }
0x145e   :  { %v14371_v61 = vpop.eup %10634 }
0x145f   :  { %v14374_v34 = vpop.eup %10636 }
0x1460   :  { %6253 = vadd.xlane.f32.xlu0 %v14365_v51  ;;  %6255 = vadd.xlane.f32.xlu1 %v14367_v53 }
0x1464   :  { %6257 = vadd.xlane.f32.xlu0 %v14371_v61 }
0x1468   :  { %6261 = vadd.xlane.f32.xlu0 %v14374_v34 }
0x1471   :  { %6317 = vrot.lane.b32.xlu1 %v13525_v49, %s10894_s8 }
0x1475   :  { %v14379_v2 = vpop.f32.mrb[196].mxu0 }
0x1476   :  { %v14381_v19 = vpop.f32.mrb[197].mxu0 }
0x1477   :  { %v14383_v58 = vpop.f32.mrb[198].mxu0 }
0x1478   :  { %v5251_v29 = vpack.c.bf16 %v14383_v58, %v14379_v2  ;;  %v14387_v8 = vpop.f32.mrb[199].mxu0 }
0x1479   :  { %v5250_v17 = vpack.c.bf16 %v14387_v8, %v14381_v19 }
0x147d   :  { %v14391_v60 = vpop.f32.mrb[200].mxu0 }
0x147e   :  { %v14393_v11 = vpop.f32.mrb[201].mxu0 }
0x147f   :  { %v14395_v23 = vpop.f32.mrb[202].mxu0 }
0x1480   :  { %v5253_v15 = vpack.c.bf16 %v14395_v23, %v14391_v60  ;;  %v14399_v48 = vpop.f32.mrb[203].mxu0 }
0x1481   :  { %v5252_v18 = vpack.c.bf16 %v14399_v48, %v14393_v11 }
0x1495   :  { %v9576_v50 = vpop.f32.mrb[204].mxu0 }
0x1496   :  { %v5649_v26 = vpop.f32.mrb[205].mxu0 }
0x1497   :  { %v9577_v27 = vpop.f32.mrb[206].mxu0 }
0x1498   :  { %v5713_v5 = vpack.c.bf16 %v9577_v27, %v9576_v50  ;;  %v5652_v31 = vpop.f32.mrb[207].mxu0 }
0x1499   :  { %v5712_v52 = vpack.c.bf16 %v5652_v31, %v5649_v26 }
0x149b   :  { %9592 = vmatprep.mubr.msk.bf16.mxu0 %vm122_vm1, %v5712_v52 }
0x149c   :  { %9593 = vmatmul.mubr.msk.bf16.vlgmr.msra.gmra.mrb[220].mxu0 %vm122_vm1, %v5713_v5 }
0x149d   :  { %9609 = vmatpush3.bf16.msra.mxu0 %v14279_v20  ;;  %v6306_v20 = vpop.permute.xlu1 %6305 }
0x149e   :  { %9658 = vmatprep.subr.bf16.mxu0 %v6304_v38 }
0x14ad   :  { %v9580_v42 = vpop.f32.mrb[208].mxu0 }
0x14ae   :  { %v5665_v10 = vpop.f32.mrb[209].mxu0 }
0x14af   :  { %v9581_v41 = vpop.f32.mrb[210].mxu0 }
0x14b0   :  { %v5715_v47 = vpack.c.bf16 %v9581_v41, %v9580_v42  ;;  %v5668_v35 = vpop.f32.mrb[211].mxu0  ;;  %v6312_v41 = vpop.permute.xlu1 %6311 }
0x14b1   :  { %v5714_v63 = vpack.c.bf16 %v5668_v35, %v5665_v10 }
0x14b3   :  { %9596 = vmatprep.mubr.msk.bf16.mxu0 %vm122_vm1, %v5714_v63 }
0x14b4   :  { %9597 = vmatmul.mubr.msk.bf16.gmra.mrb[224].mxu0 %vm122_vm1, %v5715_v47  ;;  %v6308_v47 = vpop.permute.xlu0 %6307  ;;  %v6314_v35 = vpop.permute.xlu1 %6313 }
0x14b8   :  { %v6310_v63 = vpop.permute.xlu0 %6309 }
0x14b9   :  { %v9584_v56 = vpop.f32.mrb[212].mxu0 }
0x14ba   :  { %v5681_v33 = vpop.f32.mrb[213].mxu0 }
0x14bb   :  { %v9585_v19 = vpop.f32.mrb[214].mxu0 }
0x14bc   :  { %v5717_v8 = vpack.c.bf16 %v9585_v19, %v9584_v56  ;;  %v5684_v50 = vpop.f32.mrb[215].mxu0 }
0x14bd   :  { %v5716_v26 = vpack.c.bf16 %v5684_v50, %v5681_v33  ;;  %v6316_v33 = vpop.permute.xlu0 %6315 }
0x14bf   :  { %9600 = vmatprep.mubr.msk.bf16.mxu0 %vm122_vm1, %v5716_v26 }
0x14c0   :  { %9601 = vmatmul.mubr.msk.bf16.gmra.mrb[228].mxu0 %vm122_vm1, %v5717_v8 }
0x14c1   :  { %v9588_v27 = vpop.f32.mrb[216].mxu0 }
0x14c2   :  { %v5697_v5 = vpop.f32.mrb[217].mxu0 }
0x14c3   :  { %v9589_v31 = vpop.f32.mrb[218].mxu0 }
0x14c4   :  { %v5719_v52 = vpack.c.bf16 %v9589_v31, %v9588_v27  ;;  %v5700_v42 = vpop.f32.mrb[219].mxu0 }
0x14c5   :  { %v5718_v10 = vpack.c.bf16 %v5700_v42, %v5697_v5 }
0x14c7   :  { %9604 = vmatprep.mubr.msk.bf16.mxu0 %vm122_vm1, %v5718_v10 }
0x14c8   :  { %9605 = vmatmul.mubr.msk.bf16.gmra.mrb[232].mxu0 %vm122_vm1, %v5719_v52 }
0x14c9   :  { %9610 = vmatprep.mubr.msk.bf16.mxu0 %vm122_vm1, %v5246_v21 }
0x14d0   :  { %9611 = vmatmul.mubr.msk.bf16.vlgmr.msra.gmra.mrb[220].mxu0 %vm122_vm1, %v5247_v16 }
0x14d1   :  { %v6236_v56 = vpop.xlane.xlu1 %6235  ;;  %9659 = vmatpush3.bf16.msra.mxu0 %v6304_v38  ;;  %9614 = vmatprep.mubr.msk.bf16.mxu0 %vm122_vm1, %v5248_v24 }
0x14d2   :  { %9660 = vmatprep.subr.bf16.mxu0 %v6306_v20 }
0x14d5   :  { %v6232_v19 = vpop.xlane.xlu1 %6231  ;;  %9661 = vmatpush3.bf16.msra.mxu0 %v6306_v20 }
0x14d6   :  { %9662 = vmatprep.subr.bf16.mxu0 %v6308_v47  ;;  %10638 = vrcp.f32 %v6232_v19 }
0x14d8   :  { %9615 = vmatmul.mubr.msk.bf16.gmra.mrb[224].mxu0 %vm122_vm1, %v5249_v55 }
0x14d9   :  { %v6238_v57 = vpop.xlane.xlu1 %6237  ;;  %9663 = vmatpush3.bf16.msra.mxu0 %v6308_v47  ;;  %v6244_v39 = vpop.xlane.xlu0 %6243  ;;  %9618 = vmatprep.mubr.msk.bf16.mxu0 %vm122_vm1, %v5250_v17 }
0x14da   :  { %9664 = vmatprep.subr.bf16.mxu0 %v6310_v63 }
0x14dd   :  { %v6234_v1 = vpop.xlane.xlu1 %6233  ;;  %9665 = vmatpush3.bf16.msra.mxu0 %v6310_v63  ;;  %v6240_v16 = vpop.xlane.xlu0 %6239 }
0x14de   :  { %10640 = vrcp.f32 %v6234_v1  ;;  %9666 = vmatprep.subr.bf16.mxu0 %v6312_v41 }
0x14df   :  { %10642 = vrcp.f32 %v6238_v57 }
0x14e0   :  { %9619 = vmatmul.mubr.msk.bf16.gmra.mrb[228].mxu0 %vm122_vm1, %v5251_v29  ;;  %v10639_v22 = vpop.eup %10638 }
0x14e1   :  { %v6242_v43 = vpop.xlane.xlu1 %6241  ;;  %9667 = vmatpush3.bf16.msra.mxu0 %v6312_v41  ;;  %v6246_v21 = vpop.xlane.xlu0 %6245  ;;  %9622 = vmatprep.mubr.msk.bf16.mxu0 %vm122_vm1, %v5252_v18  ;;  %v6279_v2 = vmul.f32 %v10639_v22, %v14316_v59 }
0x14e2   :  { %9668 = vmatprep.subr.bf16.mxu0 %v6314_v35  ;;  %10644 = vrcp.f32 %v6242_v43 }
0x14e3   :  { %10646 = vrcp.f32 %v6236_v56 }
0x14e4   :  { %10648 = vrcp.f32 %v6240_v16 }
0x14e5   :  { %v6250_v62 = vpop.xlane.xlu1 %6249  ;;  %9669 = vmatpush3.bf16.msra.mxu0 %v6314_v35  ;;  %v6252_v7 = vpop.xlane.xlu0 %6251  ;;  %10650 = vrcp.f32 %v6246_v21 }
0x14e6   :  { %9670 = vmatprep.subr.bf16.mxu0 %v6316_v33 }
0x14e8   :  { %v10641_v55 = vpop.eup %10640  ;;  %9623 = vmatmul.mubr.msk.bf16.gmra.mrb[232].mxu0 %vm122_vm1, %v5253_v15 }
0x14e9   :  { %v6260_v14 = vpop.xlane.xlu1 %6259  ;;  %9671 = vmatpush3.bf16.msra.mxu0 %v6316_v33  ;;  %v6248_v24 = vpop.xlane.xlu0 %6247  ;;  %v6280_v58 = vmul.f32 %v10641_v55, %v14339_v3  ;;  %v10831_v33 = vld [vmem:[%s15423_s23 + $0x8] sm:$0xff] }
0x14ea   :  { %10652 = vrcp.f32 %v6248_v24  ;;  %v10643_v17 = vpop.eup %10642 }
0x14eb   :  { %v6295_v29 = vpack.c.bf16 %v6280_v58, %v6279_v2  ;;  %10654 = vrcp.f32 %v6244_v39  ;;  %v6282_v15 = vmul.f32 %v10643_v17, %v14328_v46 }
0x14ec   :  { %v10645_v18 = vpop.eup %10644  ;;  %10656 = vrcp.f32 %v6250_v62 }
0x14ed   :  { %9674 = vmatprep.mubr.bf16.mxu0 %v6295_v29  ;;  %v6256_v11 = vpop.xlane.xlu1 %6255  ;;  %v6254_v48 = vpop.xlane.xlu0 %6253  ;;  %v6284_v59 = vmul.f32 %v10645_v18, %v14346_v0  ;;  %v10834_v29 = vld [vmem:[%s15423_s23 + $0x18] sm:$0xff] }
0x14ee   :  { %v10647_v60 = vpop.eup %10646  ;;  %10658 = vrcp.f32 %v6254_v48 }
0x14ef   :  { %v10649_v23 = vpop.eup %10648  ;;  %v6281_v3 = vmul.f32 %v10647_v60, %v14309_v36  ;;  %v10830_v36 = vld [vmem:[%s15423_s23] sm:$0xff] }
0x14f0   :  { %v6283_v50 = vmul.f32 %v10649_v23, %v14341_v6  ;;  %v10651_v20 = vpop.eup %10650 }
0x14f1   :  { %v6318_v38 = vpop.permute.xlu1 %6317  ;;  %v6258_v8 = vpop.xlane.xlu0 %6257  ;;  %v6296_v26 = vpack.c.bf16 %v6282_v15, %v6281_v3  ;;  %v6286_v41 = vmul.f32 %v10651_v20, %v14348_v30 }
0x14f2   :  { %9672 = vmatprep.subr.bf16.mxu0 %v6318_v38  ;;  %10660 = vrcp.f32 %v6258_v8  ;;  %v6297_v27 = vpack.c.bf16 %v6284_v59, %v6283_v50  ;;  %v10836_v59 = vld [vmem:[%s15423_s23 + $0x30] sm:$0xff] }
0x14f3   :  { %9673 = vmatpush3.bf16.msra.mxu0 %v6318_v38  ;;  %10662 = vrcp.f32 %v6252_v7 }
0x14f4   :  { %v10653_v5 = vpop.eup %10652  ;;  %10664 = vrcp.f32 %v6256_v11 }
0x14f5   :  { %v10655_v31 = vpop.eup %10654  ;;  %v6262_v42 = vpop.xlane.xlu0 %6261  ;;  %v6287_v35 = vmul.f32 %v10653_v5, %v14359_v45 }
0x14f6   :  { %9675 = vmatmul.mubr.bf16.vlgmr.msra.gmra.mrb[236].mxu0 %v6296_v26  ;;  %v9726_v46 = vpop.f32.mrb[184].mxu1  ;;  %v10657_v0 = vpop.eup %10656  ;;  %v6285_v63 = vmul.f32 %v10655_v31, %v14332_v12  ;;  %10666 = vrcp.f32 %v6262_v42  ;;  %v10840_v42 = vld [vmem:[%s15423_s23 + $0x48] sm:$0xff] }
0x14f7   :  { %9678 = vmatprep.mubr.bf16.mxu0 %v6297_v27  ;;  %v6689_v52 = vpop.f32.mrb[185].mxu1  ;;  %v6288_v56 = vmul.f32 %v10657_v0, %v14353_v44  ;;  %10668 = vrcp.f32 %v6260_v14  ;;  %v10832_v44 = vld [vmem:[%s15423_s23 + $0x10] sm:$0xff]  ;;  %v10833_v14 = vld [vmem:[%s15423_s23 + $0x28] sm:$0xff] }
0x14f8   :  { %v14450_v10 = vadd.f32 %v10830_v36, %v6689_v52  ;;  %v9727_v6 = vpop.f32.mrb[186].mxu1  ;;  %v6298_v57 = vpack.c.bf16 %v6286_v41, %v6285_v63  ;;  %v10659_v39 = vpop.eup %10658  ;;  %v14466_v21 = vadd.f32 %v10832_v44, %v9726_v46  ;;  %v10839_v52 = vld [vmem:[%s15423_s23 + $0x40] sm:$0xff] }
0x14f9   :  { %v6692_v47 = vpop.f32.mrb[187].mxu1  ;;  %v6299_v30 = vpack.c.bf16 %v6288_v56, %v6287_v35  ;;  %v6290_v7 = vmul.f32 %v10659_v39, %v14365_v51  ;;  %v14481_v51 = vadd.f32 %v10834_v29, %v9727_v6  ;;  %v10841_v6 = vld [vmem:[%s15423_s23 + $0x50] sm:$0xff]  ;;  %v10843_v63 = vld [vmem:[%s15423_s23 + $0x60] sm:$0xff] }
0x14fa   :  { %6752 = vmax.xlane.f32.xlu0 %v14450_v10  ;;  %v14460_v19 = vadd.f32 %v10831_v33, %v6692_v47  ;;  %v10842_v47 = vld [vmem:[%s15423_s23 + $0x58] sm:$0xff]  ;;  %v10844_v33 = vld [vmem:[%s15423_s23 + $0x68] sm:$0xff]  ;;  %v10845_v39 = vld [vmem:[%s15423_s23 + $0x70] sm:$0xff] }
0x14fc   :  { %v10661_v1 = vpop.eup %10660 }
0x14fd   :  { %v10663_v16 = vpop.eup %10662  ;;  %v6292_v55 = vmul.f32 %v10661_v1, %v14371_v61 }
0x14fe   :  { %9679 = vmatmul.mubr.bf16.gmra.mrb[240].mxu0 %v6298_v57  ;;  %v9730_v45 = vpop.f32.mrb[188].mxu1  ;;  %6754 = vmax.xlane.f32.xlu0 %v14460_v19  ;;  %v10665_v43 = vpop.eup %10664  ;;  %v6289_v2 = vmul.f32 %v10663_v16, %v14355_v9 }
0x14ff   :  { %9682 = vmatprep.mubr.bf16.mxu0 %v6299_v30  ;;  %v6705_v12 = vpop.f32.mrb[189].mxu1  ;;  %v6291_v58 = vmul.f32 %v10665_v43, %v14367_v53  ;;  %v10835_v53 = vld [vmem:[%s15423_s23 + $0x20] sm:$0xff]  ;;  %v14496_v3 = vadd.f32 %v10836_v59, %v9730_v45 }
0x1500   :  { %v9731_v62 = vpop.f32.mrb[190].mxu1  ;;  %v6300_v61 = vpack.c.bf16 %v6290_v7, %v6289_v2  ;;  %v10667_v17 = vpop.eup %10666  ;;  %v14488_v60 = vadd.f32 %v10835_v53, %v6705_v12 }
0x1501   :  { %v6708_v22 = vpop.f32.mrb[191].mxu1  ;;  %v6301_v11 = vpack.c.bf16 %v6292_v55, %v6291_v58  ;;  %v10669_v18 = vpop.eup %10668  ;;  %v6294_v15 = vmul.f32 %v10667_v17, %v14374_v34  ;;  %v10837_v34 = vld [vmem:[%s15423_s23 + $0x38] sm:$0xff] }
0x1502   :  { %v14473_v24 = vadd.f32 %v10833_v14, %v6708_v22  ;;  %6756 = vmax.xlane.f32.xlu0 %v14466_v21  ;;  %v6293_v8 = vmul.f32 %v10669_v18, %v14361_v25  ;;  %v14502_v27 = vadd.f32 %v10837_v34, %v9731_v62  ;;  %v10838_v25 = vld [vmem:[%s15423_s23 + $0x78] sm:$0xff] }
0x1504   :  { %6762 = vmax.xlane.f32.xlu1 %v14473_v24  ;;  %v6302_v50 = vpack.c.bf16 %v6294_v15, %v6293_v8 }
0x1506   :  { %9683 = vmatmul.mubr.bf16.gmra.mrb[244].mxu0 %v6300_v61  ;;  %v9734_v48 = vpop.f32.mrb[192].mxu1  ;;  %6758 = vmax.xlane.f32.xlu0 %v14481_v51 }
0x1507   :  { %9686 = vmatprep.mubr.bf16.mxu0 %v6301_v11  ;;  %v6721_v9 = vpop.f32.mrb[193].mxu1  ;;  %v14526_v41 = vadd.f32 %v10841_v6, %v9734_v48 }
0x1508   :  { %v9735_v23 = vpop.f32.mrb[194].mxu1  ;;  %v14514_v0 = vadd.f32 %v10839_v52, %v6721_v9 }
0x1509   :  { %v6724_v38 = vpop.f32.mrb[195].mxu1  ;;  %v14532_v35 = vadd.f32 %v10842_v47, %v9735_v23 }
0x150a   :  { %6760 = vmax.xlane.f32.xlu0 %v14488_v60  ;;  %v14520_v36 = vadd.f32 %v10840_v42, %v6724_v38 }
0x150e   :  { %9687 = vmatmul.mubr.bf16.gmra.mrb[248].mxu0 %v6302_v50  ;;  %v9738_v26 = vpop.f32.mrb[196].mxu1  ;;  %6764 = vmax.xlane.f32.xlu0 %v14496_v3 }
0x150f   :  { %v6737_v20 = vpop.f32.mrb[197].mxu1  ;;  %v14554_v30 = vadd.f32 %v10845_v39, %v9738_v26 }
0x1510   :  { %v9739_v5 = vpop.f32.mrb[198].mxu1  ;;  %v14538_v56 = vadd.f32 %v10843_v63, %v6737_v20 }
0x1511   :  { %v14507_v46 = vadd.f32 %v10838_v25, %v9739_v5  ;;  %v6740_v31 = vpop.f32.mrb[199].mxu1 }
0x1512   :  { %6766 = vmax.xlane.f32.xlu0 %v14502_v27  ;;  %v14546_v57 = vadd.f32 %v10844_v33, %v6740_v31 }
0x1513   :  { %6782 = vmax.xlane.f32.xlu1 %v14507_v46 }
0x1516   :  { %6768 = vmax.xlane.f32.xlu0 %v14514_v0 }
0x151a   :  { %6770 = vmax.xlane.f32.xlu0 %v14520_v36 }
0x151e   :  { %6772 = vmax.xlane.f32.xlu0 %v14526_v41 }
0x1522   :  { %6774 = vmax.xlane.f32.xlu0 %v14532_v35 }
0x1524   :  { %6906 = vrot.lane.b32.xlu1 %v15566_v13, %s10896_s27  ;;  %v10088_v13 = vld [vmem:[%s15309_s12 + $0x30] sm:$0xff]  }
0x1525   :  { %9690 = vmatprep.subr.bf16.mxu0 %v10088_v13 }
0x1526   :  { %6776 = vmax.xlane.f32.xlu0 %v14538_v56  ;;  %9691 = vmatpush3.bf16.msra.mxu0 %v10088_v13 }
0x1528   :  { %6912 = vrot.lane.b32.xlu1 %v15569_v28, %s10896_s27 }
0x152a   :  { %6778 = vmax.xlane.f32.xlu0 %v14546_v57 }
0x152c   :  { %6914 = vrot.lane.b32.xlu1 %v15572_v54, %s10896_s27 }
0x152e   :  { %6780 = vmax.xlane.f32.xlu0 %v14554_v30 }
0x1544   :  { %6904 = vrot.lane.b32.xlu0 %v15577_v32, %s10896_s27 }
0x1548   :  { %6908 = vrot.lane.b32.xlu0 %v15578_v4, %s10896_s27 }
0x154c   :  { %6910 = vrot.lane.b32.xlu0 %v15579_v37, %s10896_s27 }
0x1587   :  { %v6753_v28 = vpop.xlane.xlu0 %6752 }
0x1588   :  { %v6784_v45 = vsub.f32 %v14450_v10, %v6753_v28 }
0x158a   :  { %v6800_v44 = vmul.f32 1.442695, %v6784_v45 }
0x158b   :  { %v6755_v1 = vpop.xlane.xlu0 %6754 }
0x158c   :  { %v6785_v32 = vsub.f32 %v14460_v19, %v6755_v1 }
0x158e   :  { %v6802_v37 = vmul.f32 1.442695, %v6785_v32 }
0x158f   :  { %v6757_v54 = vpop.xlane.xlu0 %6756 }
0x1590   :  { %v6786_v16 = vsub.f32 %v14466_v21, %v6757_v54 }
0x1591   :  { %v6763_v4 = vpop.xlane.xlu1 %6762 }
0x1592   :  { %v6804_v12 = vmul.f32 1.442695, %v6786_v16  ;;  %v6789_v55 = vsub.f32 %v14473_v24, %v6763_v4 }
0x1593   :  { %v6759_v43 = vpop.xlane.xlu0 %6758 }
0x1594   :  { %10670 = vpow2.f32 %v6804_v12  ;;  %v6787_v62 = vsub.f32 %v14481_v51, %v6759_v43  ;;  %v6810_v29 = vmul.f32 1.442695, %v6789_v55 }
0x1595   :  { %10672 = vpow2.f32 %v6800_v44 }
0x1596   :  { %v6806_v22 = vmul.f32 1.442695, %v6787_v62 }
0x1597   :  { %v6761_v7 = vpop.xlane.xlu0 %6760 }
0x1598   :  { %10674 = vpow2.f32 %v6806_v22  ;;  %v6788_v10 = vsub.f32 %v14488_v60, %v6761_v7 }
0x1599   :  { %10676 = vpow2.f32 %v6802_v37 }
0x159a   :  { %v6808_v51 = vmul.f32 1.442695, %v6788_v10 }
0x159b   :  { %v6765_v14 = vpop.xlane.xlu0 %6764 }
0x159c   :  { %v6790_v21 = vsub.f32 %v14496_v3, %v6765_v14 }
0x159e   :  { %v14575_v2 = vpop.eup %10670  ;;  %v6812_v58 = vmul.f32 1.442695, %v6790_v21 }
0x159f   :  { %6836 = vadd.xlane.f32.xlu1 %v14575_v2  ;;  %v6767_v19 = vpop.xlane.xlu0 %6766  ;;  %v14579_v17 = vpop.eup %10672 }
0x15a0   :  { %10678 = vpow2.f32 %v6812_v58  ;;  %v6791_v61 = vsub.f32 %v14502_v27, %v6767_v19  ;;  %v6783_v28 = vpop.xlane.xlu1 %6782 }
0x15a1   :  { %10680 = vpow2.f32 %v6810_v29 }
0x15a2   :  { %v6814_v24 = vmul.f32 1.442695, %v6791_v61  ;;  %10682 = vpow2.f32 %v6808_v51  ;;  %v14583_v18 = vpop.eup %10674 }
0x15a3   :  { %6832 = vadd.xlane.f32.xlu1 %v14579_v17  ;;  %v6769_v11 = vpop.xlane.xlu0 %6768  ;;  %v14586_v60 = vpop.eup %10676 }
0x15a4   :  { %v6792_v48 = vsub.f32 %v14514_v0, %v6769_v11  ;;  %10684 = vpow2.f32 %v6814_v24  ;;  %v6907_v12 = vpop.permute.xlu1 %6906 }
0x15a6   :  { %v6816_v9 = vmul.f32 1.442695, %v6792_v48 }
0x15a7   :  { %6838 = vadd.xlane.f32.xlu1 %v14583_v18  ;;  %v6771_v53 = vpop.xlane.xlu0 %6770 }
0x15a8   :  { %10686 = vpow2.f32 %v6816_v9  ;;  %v6793_v26 = vsub.f32 %v14520_v36, %v6771_v53  ;;  %v6913_v10 = vpop.permute.xlu1 %6912 }
0x15aa   :  { %v14588_v23 = vpop.eup %10678  ;;  %v6818_v31 = vmul.f32 1.442695, %v6793_v26 }
0x15ab   :  { %6834 = vadd.xlane.f32.xlu1 %v14586_v60  ;;  %6844 = vadd.xlane.f32.xlu0 %v14588_v23  ;;  %v6773_v15 = vpop.xlane.xlu0 %6772  ;;  %v14593_v8 = vpop.eup %10680 }
0x15ac   :  { %v6794_v38 = vsub.f32 %v14526_v41, %v6773_v15  ;;  %v14595_v59 = vpop.eup %10682  ;;  %v6915_v51 = vpop.permute.xlu1 %6914  ;;  %v6799_v15 = vsub.f32 %v14507_v46, %v6783_v28 }
0x15ae   :  { %v6820_v3 = vmul.f32 1.442695, %v6794_v38  ;;  %v14601_v34 = vpop.eup %10684  ;;  %v6830_v38 = vmul.f32 1.442695, %v6799_v15 }
0x15af   :  { %6842 = vadd.xlane.f32.xlu1 %v14593_v8  ;;  %6840 = vadd.xlane.f32.xlu0 %v14595_v59  ;;  %v6775_v50 = vpop.xlane.xlu0 %6774 }
0x15b0   :  { %10688 = vpow2.f32 %v6820_v3  ;;  %v6795_v20 = vsub.f32 %v14532_v35, %v6775_v50 }
0x15b2   :  { %v14603_v27 = vpop.eup %10686  ;;  %v6822_v5 = vmul.f32 1.442695, %v6795_v20 }
0x15b3   :  { %6846 = vadd.xlane.f32.xlu0 %v14601_v34  ;;  %6848 = vadd.xlane.f32.xlu1 %v14603_v27  ;;  %v6777_v25 = vpop.xlane.xlu0 %6776 }
0x15b4   :  { %10690 = vpow2.f32 %v6822_v5  ;;  %v6796_v36 = vsub.f32 %v14538_v56, %v6777_v25 }
0x15b5   :  { %10692 = vpow2.f32 %v6818_v31 }
0x15b6   :  { %v6824_v63 = vmul.f32 1.442695, %v6796_v36 }
0x15b7   :  { %v14607_v52 = vpop.xlane.xlu0 %6778 }
0x15b8   :  { %v6797_v9 = vsub.f32 %v14546_v57, %v14607_v52 }
0x15ba   :  { %v14609_v0 = vpop.eup %10688 }
0x15bb   :  { %6852 = vadd.xlane.f32.xlu0 %v14609_v0  ;;  %v6781_v42 = vpop.xlane.xlu0 %6780 }
0x15bc   :  { %v6798_v6 = vsub.f32 %v14554_v30, %v6781_v42 }
0x15be   :  { %v14614_v41 = vpop.eup %10690  ;;  %v6828_v47 = vmul.f32 1.442695, %v6798_v6 }
0x15bf   :  { %6854 = vadd.xlane.f32.xlu0 %v14614_v41  ;;  %v6905_v35 = vpop.permute.xlu0 %6904  ;;  %v14617_v33 = vpop.eup %10692 }
0x15c0   :  { %10694 = vpow2.f32 %v6828_v47  ;;  %9740 = vmatprep.subr.bf16.mxu0 %v6905_v35 }
0x15c1   :  { %10696 = vpow2.f32 %v6824_v63 }
0x15c3   :  { %6850 = vadd.xlane.f32.xlu0 %v14617_v33  ;;  %v6909_v62 = vpop.permute.xlu0 %6908 }
0x15c7   :  { %v6911_v37 = vpop.permute.xlu0 %6910 }
0x15c9   :  { %v9676_v39 = vpop.f32.mrb[236].mxu0 }
0x15ca   :  { %v14620_v13 = vpop.eup %10694  ;;  %v6361_v56 = vpop.f32.mrb[237].mxu0 }
0x15cb   :  { %v9677_v30 = vpop.f32.mrb[238].mxu0  ;;  %6860 = vadd.xlane.f32.xlu1 %v14620_v13  ;;  %v14623_v16 = vpop.eup %10696 }
0x15cc   :  { %v6425_v1 = vpack.c.bf16 %v9677_v30, %v9676_v39  ;;  %v6364_v54 = vpop.f32.mrb[239].mxu0 }
0x15cd   :  { %v6424_v45 = vpack.c.bf16 %v6364_v54, %v6361_v56 }
0x15cf   :  { %9692 = vmatprep.mubr.msk.bf16.mxu0 %vm122_vm1, %v6424_v45  ;;  %6856 = vadd.xlane.f32.xlu1 %v14623_v16 }
0x15d0   :  { %9693 = vmatmul.mubr.msk.bf16.vlgmr.msra.gmra.mrb[220].mxu0 %vm122_vm1, %v6425_v1 }
0x15d1   :  { %9741 = vmatpush3.bf16.msra.mxu0 %v6905_v35  ;;  %v9680_v43 = vpop.f32.mrb[240].mxu0 }
0x15d2   :  { %9742 = vmatprep.subr.bf16.mxu0 %v6907_v12  ;;  %v6377_v44 = vpop.f32.mrb[241].mxu0 }
0x15d3   :  { %v9681_v32 = vpop.f32.mrb[242].mxu0 }
0x15d4   :  { %v6427_v7 = vpack.c.bf16 %v9681_v32, %v9680_v43  ;;  %v6380_v4 = vpop.f32.mrb[243].mxu0 }
0x15d5   :  { %v6426_v22 = vpack.c.bf16 %v6380_v4, %v6377_v44  ;;  %9743 = vmatpush3.bf16.msra.mxu0 %v6907_v12  ;;  %v10089_v44 = vld [vmem:[%s15309_s12 + $0x38] sm:$0xff]  }
0x15d6   :  { %9744 = vmatprep.subr.bf16.mxu0 %v6909_v62 }
0x15d7   :  { %9696 = vmatprep.mubr.msk.bf16.mxu0 %vm122_vm1, %v6426_v22 }
0x15d8   :  { %9697 = vmatmul.mubr.msk.bf16.gmra.mrb[224].mxu0 %vm122_vm1, %v6427_v7 }
0x15d9   :  { %9745 = vmatpush3.bf16.msra.mxu0 %v6909_v62  ;;  %v9684_v55 = vpop.f32.mrb[244].mxu0  ;;  %6916 = vrot.lane.b32.xlu0 %v13511_v40, %s10896_s27 }
0x15da   :  { %9746 = vmatprep.subr.bf16.mxu0 %v6911_v37  ;;  %v6393_v14 = vpop.f32.mrb[245].mxu0 }
0x15db   :  { %v9685_v21 = vpop.f32.mrb[246].mxu0 }
0x15dc   :  { %v6429_v58 = vpack.c.bf16 %v9685_v21, %v9684_v55  ;;  %v6396_v29 = vpop.f32.mrb[247].mxu0 }
0x15dd   :  { %v6428_v19 = vpack.c.bf16 %v6396_v29, %v6393_v14  ;;  %9747 = vmatpush3.bf16.msra.mxu0 %v6911_v37 }
0x15de   :  { %9748 = vmatprep.subr.bf16.mxu0 %v6913_v10 }
0x15df   :  { %9700 = vmatprep.mubr.msk.bf16.mxu0 %vm122_vm1, %v6428_v19 }
0x15e0   :  { %9701 = vmatmul.mubr.msk.bf16.gmra.mrb[228].mxu0 %vm122_vm1, %v6429_v58  ;;  %6918 = vrot.lane.b32.xlu1 %v13525_v49, %s10896_s27  ;;  %v6826_v49 = vmul.f32 1.442695, %v6797_v9 }
0x15e1   :  { %9749 = vmatpush3.bf16.msra.mxu0 %v6913_v10  ;;  %v9688_v61 = vpop.f32.mrb[248].mxu0 }
0x15e2   :  { %9750 = vmatprep.subr.bf16.mxu0 %v6915_v51  ;;  %v6409_v40 = vpop.f32.mrb[249].mxu0  ;;  %10698 = vpow2.f32 %v6826_v49 }
0x15e3   :  { %v9689_v24 = vpop.f32.mrb[250].mxu0  ;;  %10700 = vpow2.f32 %v6830_v38 }
0x15e4   :  { %v6431_v11 = vpack.c.bf16 %v9689_v24, %v9688_v61  ;;  %v6412_v48 = vpop.f32.mrb[251].mxu0 }
0x15e5   :  { %v6430_v53 = vpack.c.bf16 %v6412_v48, %v6409_v40  ;;  %9751 = vmatpush3.bf16.msra.mxu0 %v6915_v51 }
0x15e7   :  { %9704 = vmatprep.mubr.msk.bf16.mxu0 %vm122_vm1, %v6430_v53 }
0x15e8   :  { %9705 = vmatmul.mubr.msk.bf16.gmra.mrb[232].mxu0 %vm122_vm1, %v6431_v11 }
0x15ec   :  { %v14641_v3 = vpop.eup %10698 }
0x15ed   :  { %v14644_v50 = vpop.eup %10700 }
0x15f8   :  { %6858 = vadd.xlane.f32.xlu0 %v14641_v3 }
0x15fc   :  { %6862 = vadd.xlane.f32.xlu0 %v14644_v50 }
0x162c   :  { %v6837_v57 = vpop.xlane.xlu1 %6836 }
0x1630   :  { %v6833_v26 = vpop.xlane.xlu1 %6832 }
0x1631   :  { %10702 = vrcp.f32 %v6833_v26 }
0x1634   :  { %v6839_v20 = vpop.xlane.xlu1 %6838 }
0x1638   :  { %v6835_v5 = vpop.xlane.xlu1 %6834  ;;  %v6845_v25 = vpop.xlane.xlu0 %6844 }
0x1639   :  { %10704 = vrcp.f32 %v6835_v5 }
0x163a   :  { %10706 = vrcp.f32 %v6839_v20 }
0x163b   :  { %v10703_v31 = vpop.eup %10702 }
0x163c   :  { %v6841_v46 = vpop.xlane.xlu0 %6840  ;;  %v6880_v36 = vmul.f32 %v10703_v31, %v14579_v17  ;;  %v6843_v39 = vpop.xlane.xlu1 %6842 }
0x163d   :  { %10708 = vrcp.f32 %v6843_v39 }
0x163e   :  { %10710 = vrcp.f32 %v6841_v46 }
0x163f   :  { %10712 = vrcp.f32 %v6837_v57 }
0x1640   :  { %v6847_v42 = vpop.xlane.xlu0 %6846  ;;  %v6849_v28 = vpop.xlane.xlu1 %6848 }
0x1641   :  { %10714 = vrcp.f32 %v6847_v42 }
0x1643   :  { %v10705_v52 = vpop.eup %10704 }
0x1644   :  { %v6881_v6 = vmul.f32 %v10705_v52, %v14586_v60  ;;  %v10707_v54 = vpop.eup %10706 }
0x1645   :  { %v6883_v43 = vmul.f32 %v10707_v54, %v14583_v18 }
0x1646   :  { %v6896_v47 = vpack.c.bf16 %v6881_v6, %v6880_v36 }
0x1647   :  { %v10709_v17 = vpop.eup %10708 }
0x1648   :  { %9756 = vmatprep.mubr.bf16.mxu0 %v6896_v47  ;;  %v6853_v35 = vpop.xlane.xlu0 %6852  ;;  %v10711_v45 = vpop.eup %10710  ;;  %v6885_v7 = vmul.f32 %v10709_v17, %v14593_v8  ;;  %v14677_v17 = vld [vmem:[%s15310_s13 + $0x1] ss:$0 sm:$0xff] }
0x1649   :  { %v10713_v12 = vpop.eup %10712  ;;  %v6884_v32 = vmul.f32 %v10711_v45, %v14595_v59 }
0x164a   :  { %v6882_v4 = vmul.f32 %v10713_v12, %v14575_v2 }
0x164b   :  { %v10715_v37 = vpop.eup %10714  ;;  %v6898_v55 = vpack.c.bf16 %v6885_v7, %v6884_v32 }
0x164c   :  { %v6855_v63 = vpop.xlane.xlu0 %6854  ;;  %v6897_v22 = vpack.c.bf16 %v6883_v43, %v6882_v4  ;;  %v6887_v59 = vmul.f32 %v10715_v37, %v14601_v34  ;;  %v10847_v43 = vld [vmem:[#allocation2] sm:$0xff] }
0x1650   :  { %v6851_v56 = vpop.xlane.xlu0 %6850 }
0x1651   :  { %10716 = vrcp.f32 %v6851_v56 }
0x1652   :  { %10718 = vrcp.f32 %v6845_v25 }
0x1653   :  { %10720 = vrcp.f32 %v6849_v28 }
0x1654   :  { %v6917_v30 = vpop.permute.xlu0 %6916  ;;  %10722 = vrcp.f32 %v6855_v63 }
0x1655   :  { %9752 = vmatprep.subr.bf16.mxu0 %v6917_v30  ;;  %10724 = vrcp.f32 %v6853_v35 }
0x1656   :  { %9753 = vmatpush3.bf16.msra.mxu0 %v6917_v30 }
0x1658   :  { %v6861_v1 = vpop.xlane.xlu1 %6860 }
0x165b   :  { %v10717_v18 = vpop.eup %10716 }
0x165c   :  { %v6857_v60 = vpop.xlane.xlu1 %6856  ;;  %v10719_v14 = vpop.eup %10718  ;;  %v6889_v8 = vmul.f32 %v10717_v18, %v14617_v33 }
0x165d   :  { %v10721_v10 = vpop.eup %10720  ;;  %v6886_v2 = vmul.f32 %v10719_v14, %v14588_v23  ;;  %10726 = vrcp.f32 %v6857_v60  ;;  %v10846_v60 = vld [vmem:[#allocation2 + $0x10] sm:$0xff] }
0x165e   :  { %v6888_v21 = vmul.f32 %v10721_v10, %v14603_v27  ;;  %v10723_v29 = vpop.eup %10722  ;;  %v10849_v10 = vld [vmem:[#allocation2 + $0x8] sm:$0xff] }
0x165f   :  { %v6899_v58 = vpack.c.bf16 %v6887_v59, %v6886_v2  ;;  %v10725_v51 = vpop.eup %10724  ;;  %v6891_v61 = vmul.f32 %v10723_v29, %v14614_v41 }
0x1660   :  { %v6919_v62 = vpop.permute.xlu1 %6918  ;;  %v6900_v19 = vpack.c.bf16 %v6889_v8, %v6888_v21  ;;  %v6890_v40 = vmul.f32 %v10725_v51, %v14609_v0  ;;  %v10850_v21 = vld [vmem:[#allocation2 + $0x20] sm:$0xff] }
0x1661   :  { %9754 = vmatprep.subr.bf16.mxu0 %v6919_v62 }
0x1662   :  { %9755 = vmatpush3.bf16.msra.mxu0 %v6919_v62  ;;  %v6901_v24 = vpack.c.bf16 %v6891_v61, %v6890_v40  ;;  %v10851_v40 = vld [vmem:[#allocation2 + $0x30] sm:$0xff] }
0x1663   :  { %9772 = vmatprep.subr.bf16.mxu0 %v10089_v44 }
0x1665   :  { %9757 = vmatmul.mubr.bf16.vlgmr.msra.gmra.mrb[252].mxu0 %v6897_v22  ;;  %v10848_v22 = vld [vmem:[#allocation2 + $0x18] sm:$0xff] }
0x1666   :  { %9760 = vmatprep.mubr.bf16.mxu0 %v6898_v55  ;;  %9773 = vmatpush3.bf16.msra.mxu0 %v10089_v44 }
0x1667   :  { %v10727_v23 = vpop.eup %10726 }
0x1668   :  { %v6892_v11 = vmul.f32 %v10727_v23, %v14623_v16 }
0x166d   :  { %9761 = vmatmul.mubr.bf16.gmra.mrb[0].mxu0 %v6899_v58 }
0x166e   :  { %9764 = vmatprep.mubr.bf16.mxu0 %v6900_v19 }
0x1675   :  { %9765 = vmatmul.mubr.bf16.gmra.mrb[4].mxu0 %v6901_v24 }
0x1685   :  { %v6859_v34 = vpop.xlane.xlu0 %6858 }
0x1686   :  { %10728 = vrcp.f32 %v6859_v34 }
0x1687   :  { %10730 = vrcp.f32 %v6861_v1 }
0x1689   :  { %v6863_v33 = vpop.xlane.xlu0 %6862 }
0x168a   :  { %10732 = vrcp.f32 %v6863_v33 }
0x1690   :  { %v10729_v27 = vpop.eup %10728 }
0x1691   :  { %v6893_v48 = vmul.f32 %v10729_v27, %v14641_v3  ;;  %v10731_v9 = vpop.eup %10730 }
0x1692   :  { %v6894_v41 = vmul.f32 %v10731_v9, %v14620_v13 }
0x1693   :  { %v6902_v53 = vpack.c.bf16 %v6893_v48, %v6892_v11  ;;  %v10852_v11 = vld [vmem:[#allocation2 + $0x38] sm:$0xff] }
0x1694   :  { %v10733_v15 = vpop.eup %10732 }
0x1695   :  { %v6895_v0 = vmul.f32 %v10733_v15, %v14644_v50  ;;  %9768 = vmatprep.mubr.bf16.mxu0 %v6902_v53 }
0x1697   :  { %v6903_v49 = vpack.c.bf16 %v6895_v0, %v6894_v41 }
0x1699   :  { %9769 = vmatmul.mubr.bf16.gmra.mrb[8].mxu0 %v6903_v49  ;;  %v10853_v49 = vld [vmem:[#allocation2 + $0x28] sm:$0xff] }
0x1738   :  { %v9758_v38 = vpop.f32.mrb[252].mxu0 }
0x1739   :  { %v6962_v57 = vpop.f32.mrb[253].mxu0 }
0x173a   :  { %v9759_v26 = vpop.f32.mrb[254].mxu0 }
0x173b   :  { %v7026_v20 = vpack.c.bf16 %v9759_v26, %v9758_v38  ;;  %v6965_v5 = vpop.f32.mrb[255].mxu0 }
0x173c   :  { %v7025_v25 = vpack.c.bf16 %v6965_v5, %v6962_v57 }
0x173e   :  { %9774 = vmatprep.mubr.msk.bf16.mxu0 %vm122_vm1, %v7025_v25 }
0x173f   :  { %9775 = vmatmul.mubr.msk.bf16.vlgmr.msra.gmra.mrb[220].mxu0 %vm122_vm1, %v7026_v20  ;;  %v10854_v20 = vld [vmem:[#allocation2 + $0x50] sm:$0xff] }
0x1740   :  { %v9762_v16 = vpop.f32.mrb[0].mxu0 }
0x1741   :  { %v6978_v3 = vpop.f32.mrb[1].mxu0 }
0x1742   :  { %v9763_v46 = vpop.f32.mrb[2].mxu0 }
0x1743   :  { %v7028_v31 = vpack.c.bf16 %v9763_v46, %v9762_v16  ;;  %v6981_v13 = vpop.f32.mrb[3].mxu0 }
0x1744   :  { %v7027_v52 = vpack.c.bf16 %v6981_v13, %v6978_v3  ;;  %v10855_v3 = vld [vmem:[#allocation2 + $0x40] sm:$0xff] }
0x1746   :  { %9778 = vmatprep.mubr.msk.bf16.mxu0 %vm122_vm1, %v7027_v52  ;;  %v10856_v52 = vld [vmem:[#allocation2 + $0x58] sm:$0xff] }
0x1747   :  { %9779 = vmatmul.mubr.msk.bf16.gmra.mrb[224].mxu0 %vm122_vm1, %v7028_v31 }
0x1748   :  { %v9766_v50 = vpop.f32.mrb[4].mxu0 }
0x1749   :  { %v6994_v42 = vpop.f32.mrb[5].mxu0 }
0x174a   :  { %v9767_v36 = vpop.f32.mrb[6].mxu0 }
0x174b   :  { %v7030_v6 = vpack.c.bf16 %v9767_v36, %v9766_v50  ;;  %v6997_v47 = vpop.f32.mrb[7].mxu0 }
0x174c   :  { %v7029_v35 = vpack.c.bf16 %v6997_v47, %v6994_v42 }
0x174e   :  { %9782 = vmatprep.mubr.msk.bf16.mxu0 %vm122_vm1, %v7029_v35 }
0x174f   :  { %9783 = vmatmul.mubr.msk.bf16.gmra.mrb[228].mxu0 %vm122_vm1, %v7030_v6  ;;  %v10857_v6 = vld [vmem:[#allocation2 + $0x48] sm:$0xff] }
0x176c   :  { %v9770_v63 = vpop.f32.mrb[8].mxu0 }
0x176d   :  { %v7010_v39 = vpop.f32.mrb[9].mxu0 }
0x176e   :  { %v9771_v56 = vpop.f32.mrb[10].mxu0 }
0x176f   :  { %v7032_v28 = vpack.c.bf16 %v9771_v56, %v9770_v63  ;;  %v7013_v30 = vpop.f32.mrb[11].mxu0 }
0x1770   :  { %v7031_v1 = vpack.c.bf16 %v7013_v30, %v7010_v39  ;;  %v10858_v30 = vld [vmem:[#allocation2 + $0x70] sm:$0xff] }
0x1772   :  { %9786 = vmatprep.mubr.msk.bf16.mxu0 %vm122_vm1, %v7031_v1 }
0x1773   :  { %9787 = vmatmul.mubr.msk.bf16.gmra.mrb[232].mxu0 %vm122_vm1, %v7032_v28 }
0x1812   :  { %v9776_v54 = vpop.f32.mrb[220].mxu0 }
0x1813   :  { %v7178_v45 = vadd.f32 %v10846_v60, %v9776_v54  ;;  %v7097_v12 = vpop.f32.mrb[221].mxu0  ;;  %v10859_v60 = vld [vmem:[#allocation2 + $0x60] sm:$0xff] }
0x1814   :  { %v7176_v44 = vadd.f32 %v10847_v43, %v7097_v12  ;;  %v9777_v62 = vpop.f32.mrb[222].mxu0 }
0x1815   :  { %v14680_v32 = vadd.f32 %v14677_v17, %v7178_v45  ;;  %v7100_v7 = vpop.f32.mrb[223].mxu0  ;;  %v7179_v37 = vadd.f32 %v10848_v22, %v9777_v62 }
0x1816   :  { %v14683_v4 = vadd.f32 %v14677_v17, %v7176_v44  ;;  %v7177_v59 = vadd.f32 %v10849_v10, %v7100_v7  ;;  %v10860_v7 = vld [vmem:[#allocation2 + $0x68] sm:$0xff] }
0x1817   :  { %v7226_v55 = vsel %vm73_vm4, %v14680_v32, 0.0  ;;  %v14688_v14 = vadd.f32 %v14677_v17, %v7179_v37 }
0x1818   :  { %7227 = vadd.xlane.f32.xlu0 %v7226_v55  ;;  %v7220_v2 = vsel %vm73_vm4, %v14683_v4, 0.0  ;;  %v14696_v61 = vadd.f32 %v14677_v17, %v7177_v59  ;;  %v10861_v55 = vld [vmem:[#allocation2 + $0x78] sm:$0xff] }
0x1819   :  { %v7229_v34 = vsel %vm73_vm4, %v14688_v14, 0.0 }
0x181a   :  { %v9780_v18 = vpop.f32.mrb[224].mxu0  ;;  %v7223_v53 = vsel %vm73_vm4, %v14696_v61, 0.0 }
0x181b   :  { %v7113_v8 = vpop.f32.mrb[225].mxu0  ;;  %v7182_v24 = vadd.f32 %v10851_v40, %v9780_v18 }
0x181c   :  { %v7180_v58 = vadd.f32 %v10850_v21, %v7113_v8  ;;  %7221 = vadd.xlane.f32.xlu0 %v7220_v2  ;;  %v9781_v29 = vpop.f32.mrb[226].mxu0 }
0x181d   :  { %v7116_v19 = vpop.f32.mrb[227].mxu0  ;;  %v14703_v27 = vadd.f32 %v14677_v17, %v7182_v24  ;;  %v7183_v48 = vadd.f32 %v10852_v11, %v9781_v29 }
0x181e   :  { %v14693_v51 = vadd.f32 %v14677_v17, %v7180_v58  ;;  %v7181_v38 = vadd.f32 %v10853_v49, %v7116_v19 }
0x181f   :  { %v14708_v0 = vadd.f32 %v14677_v17, %v7183_v48  ;;  %v7238_v57 = vsel %vm73_vm4, %v14703_v27, 0.0 }
0x1820   :  { %7230 = vadd.xlane.f32.xlu0 %v7229_v34  ;;  %v7232_v33 = vsel %vm73_vm4, %v14693_v51, 0.0  ;;  %v14713_v26 = vadd.f32 %v14677_v17, %v7181_v38 }
0x1821   :  { %7233 = vadd.xlane.f32.xlu1 %v7232_v33  ;;  %v7241_v25 = vsel %vm73_vm4, %v14708_v0, 0.0 }
0x1822   :  { %v9784_v23 = vpop.f32.mrb[228].mxu0  ;;  %v7235_v31 = vsel %vm73_vm4, %v14713_v26, 0.0 }
0x1823   :  { %v7129_v9 = vpop.f32.mrb[229].mxu0  ;;  %v7186_v5 = vadd.f32 %v10854_v20, %v9784_v23 }
0x1824   :  { %7224 = vadd.xlane.f32.xlu0 %v7223_v53  ;;  %v9785_v15 = vpop.f32.mrb[230].mxu0  ;;  %v7184_v46 = vadd.f32 %v10855_v3, %v7129_v9 }
0x1825   :  { %v7132_v41 = vpop.f32.mrb[231].mxu0  ;;  %v14718_v16 = vadd.f32 %v14677_v17, %v7186_v5  ;;  %v7187_v50 = vadd.f32 %v10856_v52, %v9785_v15 }
0x1826   :  { %v14723_v13 = vadd.f32 %v14677_v17, %v7184_v46  ;;  %v7185_v47 = vadd.f32 %v10857_v6, %v7132_v41 }
0x1827   :  { %v7250_v42 = vsel %vm73_vm4, %v14718_v16, 0.0  ;;  %v14728_v36 = vadd.f32 %v14677_v17, %v7187_v50 }
0x1828   :  { %7239 = vadd.xlane.f32.xlu0 %v7238_v57  ;;  %v7244_v35 = vsel %vm73_vm4, %v14723_v13, 0.0  ;;  %v14733_v63 = vadd.f32 %v14677_v17, %v7185_v47 }
0x1829   :  { %v7253_v39 = vsel %vm73_vm4, %v14728_v36, 0.0 }
0x182a   :  { %v7247_v56 = vsel %vm73_vm4, %v14733_v63, 0.0 }
0x182c   :  { %7242 = vadd.xlane.f32.xlu0 %v7241_v25 }
0x1830   :  { %7236 = vadd.xlane.f32.xlu0 %v7235_v31 }
0x1834   :  { %7251 = vadd.xlane.f32.xlu0 %v7250_v42 }
0x1838   :  { %7245 = vadd.xlane.f32.xlu0 %v7244_v35 }
0x183c   :  { %7254 = vadd.xlane.f32.xlu0 %v7253_v39 }
0x1840   :  { %7248 = vadd.xlane.f32.xlu0 %v7247_v56 }
0x1846   :  { %v9788_v28 = vpop.f32.mrb[232].mxu0 }
0x1847   :  { %v7190_v1 = vadd.f32 %v10858_v30, %v9788_v28  ;;  %v7145_v54 = vpop.f32.mrb[233].mxu0 }
0x1848   :  { %v7188_v45 = vadd.f32 %v10859_v60, %v7145_v54  ;;  %v9789_v12 = vpop.f32.mrb[234].mxu0 }
0x1849   :  { %v14740_v43 = vadd.f32 %v14677_v17, %v7190_v1  ;;  %v7148_v44 = vpop.f32.mrb[235].mxu0  ;;  %v7191_v18 = vadd.f32 %v10861_v55, %v9789_v12 }
0x184a   :  { %v14743_v62 = vadd.f32 %v14677_v17, %v7188_v45  ;;  %v7189_v22 = vadd.f32 %v10860_v7, %v7148_v44 }
0x184b   :  { %v7262_v37 = vsel %vm73_vm4, %v14740_v43, 0.0  ;;  %v14753_v8 = vadd.f32 %v14677_v17, %v7191_v18 }
0x184c   :  { %v14748_v10 = vadd.f32 %v14677_v17, %v7189_v22  ;;  %7263 = vadd.xlane.f32.xlu1 %v7262_v37  ;;  %v7256_v59 = vsel %vm73_vm4, %v14743_v62, 0.0 }
0x184d   :  { %7257 = vadd.xlane.f32.xlu0 %v7256_v59  ;;  %v7265_v21 = vsel %vm73_vm4, %v14753_v8, 0.0 }
0x184e   :  { %v7259_v2 = vsel %vm73_vm4, %v14748_v10, 0.0 }
0x1851   :  { %7260 = vadd.xlane.f32.xlu0 %v7259_v2 }
0x1855   :  { %7266 = vadd.xlane.f32.xlu0 %v7265_v21  ;;  %v10090_v21 = vld [vmem:[%s15313_s16 + $0x20] sm:$0xff]  }
0x1856   :  { %9790 = vmatprep.subr.bf16.mxu1 %v10090_v21 }
0x1857   :  { %9791 = vmatpush3.bf16.msra.mxu1 %v10090_v21 }
0x18a5   :  { %v7228_v58 = vpop.xlane.xlu0 %7227 }
0x18a6   :  { %v7270_v29 = vmul.f32 0.015625, %v7228_v58 }
0x18a8   :  { %v14760_v24 = vsub.f32 %v14680_v32, %v7270_v29 }
0x18a9   :  { %v7222_v19 = vpop.xlane.xlu0 %7221 }
0x18aa   :  { %v7268_v40 = vmul.f32 0.015625, %v7222_v19  ;;  %v7302_v53 = vmul.f32 %v14760_v24, %v14760_v24 }
0x18ac   :  { %v14763_v34 = vsub.f32 %v14683_v4, %v7268_v40  ;;  %v7322_v38 = vsel %vm73_vm4, %v7302_v53, 0.0  ;;  %v10093_v53 = vld [vmem:[%s15313_s16 + $0x38] sm:$0xff]  }
0x18ad   :  { %v7231_v17 = vpop.xlane.xlu0 %7230 }
0x18ae   :  { %v7234_v33 = vpop.xlane.xlu1 %7233  ;;  %v7300_v23 = vmul.f32 %v14763_v34, %v14763_v34  ;;  %v7271_v48 = vmul.f32 0.015625, %v7231_v17 }
0x18af   :  { %v7272_v11 = vmul.f32 0.015625, %v7234_v33  ;;  %v10092_v33 = vld [vmem:[%s15313_s16 + $0x30] sm:$0xff]  }
0x18b0   :  { %v7316_v9 = vsel %vm73_vm4, %v7300_v23, 0.0  ;;  %v14774_v4 = vsub.f32 %v14688_v14, %v7271_v48 }
0x18b1   :  { %v14771_v15 = vsub.f32 %v14693_v51, %v7272_v11  ;;  %v7225_v32 = vpop.xlane.xlu0 %7224  ;;  %7317 = vadd.xlane.f32.xlu1 %v7316_v9 }
0x18b2   :  { %v7269_v41 = vmul.f32 0.015625, %v7225_v32 }
0x18b3   :  { %v7304_v57 = vmul.f32 %v14771_v15, %v14771_v15 }
0x18b4   :  { %v14777_v49 = vsub.f32 %v14696_v61, %v7269_v41  ;;  %v7303_v61 = vmul.f32 %v14774_v4, %v14774_v4 }
0x18b5   :  { %v7240_v20 = vpop.xlane.xlu0 %7239  ;;  %7323 = vadd.xlane.f32.xlu1 %v7322_v38  ;;  %v7328_v14 = vsel %vm73_vm4, %v7304_v57, 0.0 }
0x18b6   :  { %v7274_v5 = vmul.f32 0.015625, %v7240_v20  ;;  %v7301_v51 = vmul.f32 %v14777_v49, %v14777_v49  ;;  %v7325_v42 = vsel %vm73_vm4, %v7303_v61, 0.0 }
0x18b8   :  { %v14785_v25 = vsub.f32 %v14703_v27, %v7274_v5  ;;  %v7319_v3 = vsel %vm73_vm4, %v7301_v51, 0.0 }
0x18b9   :  { %v7243_v46 = vpop.xlane.xlu0 %7242  ;;  %7329 = vadd.xlane.f32.xlu1 %v7328_v14  ;;  %7320 = vadd.xlane.f32.xlu0 %v7319_v3 }
0x18ba   :  { %v7306_v31 = vmul.f32 %v14785_v25, %v14785_v25  ;;  %v7275_v52 = vmul.f32 0.015625, %v7243_v46  ;;  %v14870_v46 = vld [vmem:[%s15315_s18 + $0x40] sm:$0xff]  }
0x18bc   :  { %v7334_v50 = vsel %vm73_vm4, %v7306_v31, 0.0  ;;  %v14796_v47 = vsub.f32 %v14708_v0, %v7275_v52 }
0x18bd   :  { %v7237_v27 = vpop.xlane.xlu0 %7236  ;;  %7335 = vadd.xlane.f32.xlu1 %v7334_v50  ;;  %7326 = vadd.xlane.f32.xlu0 %v7325_v42 }
0x18be   :  { %v7273_v6 = vmul.f32 0.015625, %v7237_v27  ;;  %v7307_v1 = vmul.f32 %v14796_v47, %v14796_v47 }
0x18c0   :  { %v14799_v35 = vsub.f32 %v14713_v26, %v7273_v6  ;;  %v7337_v26 = vsel %vm73_vm4, %v7307_v1, 0.0 }
0x18c1   :  { %v7252_v39 = vpop.xlane.xlu0 %7251 }
0x18c2   :  { %v7305_v56 = vmul.f32 %v14799_v35, %v14799_v35  ;;  %v7278_v28 = vmul.f32 0.015625, %v7252_v39 }
0x18c4   :  { %v7331_v30 = vsel %vm73_vm4, %v7305_v56, 0.0  ;;  %v14807_v45 = vsub.f32 %v14718_v16, %v7278_v28 }
0x18c5   :  { %v7246_v54 = vpop.xlane.xlu0 %7245  ;;  %7332 = vadd.xlane.f32.xlu0 %v7331_v30 }
0x18c6   :  { %v7276_v60 = vmul.f32 0.015625, %v7246_v54  ;;  %v7310_v37 = vmul.f32 %v14807_v45, %v14807_v45 }
0x18c8   :  { %v14810_v0 = vsub.f32 %v14723_v13, %v7276_v60  ;;  %v7346_v59 = vsel %vm73_vm4, %v7310_v37, 0.0 }
0x18c9   :  { %v7255_v12 = vpop.xlane.xlu0 %7254  ;;  %7338 = vadd.xlane.f32.xlu0 %v7337_v26 }
0x18ca   :  { %v7308_v44 = vmul.f32 %v14810_v0, %v14810_v0  ;;  %v7279_v7 = vmul.f32 0.015625, %v7255_v12 }
0x18cc   :  { %v7340_v22 = vsel %vm73_vm4, %v7308_v44, 0.0  ;;  %v14819_v18 = vsub.f32 %v14728_v36, %v7279_v7  ;;  %v10091_v36 = vld [vmem:[%s15313_s16 + $0x28] sm:$0xff]  }
0x18cd   :  { %v7249_v55 = vpop.xlane.xlu0 %7248  ;;  %7341 = vadd.xlane.f32.xlu1 %v7340_v22  ;;  %9792 = vmatprep.subr.bf16.mxu1 %v10091_v36 }
0x18ce   :  { %v7277_v16 = vmul.f32 0.015625, %v7249_v55  ;;  %v7311_v29 = vmul.f32 %v14819_v18, %v14819_v18  ;;  %9793 = vmatpush3.bf16.msra.mxu1 %v10091_v36 }
0x18cf   :  { %9794 = vmatprep.subr.bf16.mxu1 %v10092_v33 }
0x18d0   :  { %v14822_v13 = vsub.f32 %v14733_v63, %v7277_v16  ;;  %v7349_v63 = vsel %vm73_vm4, %v7311_v29, 0.0 }
0x18d1   :  { %7347 = vadd.xlane.f32.xlu1 %v7346_v59  ;;  %v14877_v59 = vld [vmem:[%s15311_s14 + $0x1] ss:$0 sm:$0xff] }
0x18d2   :  { %v7309_v2 = vmul.f32 %v14822_v13, %v14822_v13  ;;  %9795 = vmatpush3.bf16.msra.mxu1 %v10092_v33 }
0x18d3   :  { %9796 = vmatprep.subr.bf16.mxu1 %v10093_v53 }
0x18d4   :  { %v7343_v58 = vsel %vm73_vm4, %v7309_v2, 0.0 }
0x18d5   :  { %7344 = vadd.xlane.f32.xlu0 %v7343_v58 }
0x18d6   :  { %9797 = vmatpush3.bf16.msra.mxu1 %v10093_v53 }
0x18d7   :  { %9814 = vmatprep.subr.bf16.mxu1 %v14870_v46 }
0x18d9   :  { %v7264_v19 = vpop.xlane.xlu1 %7263  ;;  %7350 = vadd.xlane.f32.xlu0 %v7349_v63 }
0x18da   :  { %v7282_v40 = vmul.f32 0.015625, %v7264_v19  ;;  %v7258_v17 = vpop.xlane.xlu0 %7257 }
0x18db   :  { %v7280_v23 = vmul.f32 0.015625, %v7258_v17 }
0x18dc   :  { %v14841_v11 = vsub.f32 %v14740_v43, %v7282_v40 }
0x18dd   :  { %v14844_v48 = vsub.f32 %v14743_v62, %v7280_v23 }
0x18de   :  { %v7261_v9 = vpop.xlane.xlu0 %7260  ;;  %v7314_v62 = vmul.f32 %v14841_v11, %v14841_v11 }
0x18df   :  { %v7281_v32 = vmul.f32 0.015625, %v7261_v9  ;;  %v7312_v41 = vmul.f32 %v14844_v48, %v14844_v48 }
0x18e0   :  { %v7358_v14 = vsel %vm73_vm4, %v7314_v62, 0.0 }
0x18e1   :  { %v14852_v38 = vsub.f32 %v14748_v10, %v7281_v32  ;;  %v7352_v43 = vsel %vm73_vm4, %v7312_v41, 0.0 }
0x18e2   :  { %7353 = vadd.xlane.f32.xlu1 %v7352_v43  ;;  %v7267_v57 = vpop.xlane.xlu0 %7266 }
0x18e3   :  { %v7283_v20 = vmul.f32 0.015625, %v7267_v57  ;;  %v7313_v5 = vmul.f32 %v14852_v38, %v14852_v38 }
0x18e5   :  { %v14860_v51 = vsub.f32 %v14753_v8, %v7283_v20  ;;  %v7355_v10 = vsel %vm73_vm4, %v7313_v5, 0.0 }
0x18e6   :  { %7359 = vadd.xlane.f32.xlu1 %v7358_v14  ;;  %7356 = vadd.xlane.f32.xlu0 %v7355_v10 }
0x18e7   :  { %v7315_v3 = vmul.f32 %v14860_v51, %v14860_v51 }
0x18e9   :  { %v7361_v61 = vsel %vm73_vm4, %v7315_v3, 0.0 }
0x18ea   :  { %7362 = vadd.xlane.f32.xlu0 %v7361_v61 }
0x193e   :  { %v7318_v8 = vpop.xlane.xlu1 %7317 }
0x193f   :  { %v7364_v31 = vmul.f32 0.015625, %v7318_v8 }
0x1941   :  { %v7380_v52 = vadd.f32 1e-05, %v7364_v31 }
0x1942   :  { %v7324_v50 = vpop.xlane.xlu1 %7323 }
0x1943   :  { %v7366_v42 = vmul.f32 0.015625, %v7324_v50  ;;  %10734 = vrsqrt.f32 %v7380_v52 }
0x1945   :  { %v7382_v27 = vadd.f32 1e-05, %v7366_v42 }
0x1946   :  { %v7330_v6 = vpop.xlane.xlu1 %7329  ;;  %v7321_v39 = vpop.xlane.xlu0 %7320 }
0x1947   :  { %v7365_v56 = vmul.f32 0.015625, %v7321_v39  ;;  %10736 = vrsqrt.f32 %v7382_v27  ;;  %v7368_v28 = vmul.f32 0.015625, %v7330_v6 }
0x1949   :  { %v7381_v30 = vadd.f32 1e-05, %v7365_v56  ;;  %v7384_v26 = vadd.f32 1e-05, %v7368_v28 }
0x194a   :  { %v7336_v1 = vpop.xlane.xlu1 %7335  ;;  %v7327_v54 = vpop.xlane.xlu0 %7326 }
0x194b   :  { %v7367_v60 = vmul.f32 0.015625, %v7327_v54  ;;  %10738 = vrsqrt.f32 %v7381_v30  ;;  %v7370_v12 = vmul.f32 0.015625, %v7336_v1 }
0x194d   :  { %v7383_v44 = vadd.f32 1e-05, %v7367_v60  ;;  %v10735_v7 = vpop.eup %10734  ;;  %v7386_v22 = vadd.f32 1e-05, %v7370_v12 }
0x194e   :  { %v7412_v37 = vmul.f32 %v10735_v7, %v14763_v34  ;;  %v14884_v34 = vld [vmem:[%s15312_s15 + $0x1] ss:$0 sm:$0xff] }
0x194f   :  { %10740 = vrsqrt.f32 %v7383_v44 }
0x1950   :  { %10742 = vrsqrt.f32 %v7384_v26  ;;  %v7434_v63 = vmul.f32 %v14877_v59, %v7412_v37 }
0x1951   :  { %v10737_v16 = vpop.eup %10736  ;;  %10744 = vrsqrt.f32 %v7386_v22 }
0x1952   :  { %v7333_v55 = vpop.xlane.xlu0 %7332  ;;  %v7414_v29 = vmul.f32 %v10737_v16, %v14760_v24  ;;  %v14890_v24 = vadd.f32 %v14884_v34, %v7434_v63 }
0x1953   :  { %v7369_v2 = vmul.f32 0.015625, %v7333_v55 }
0x1954   :  { %v7436_v9 = vmul.f32 %v14877_v59, %v7414_v29 }
0x1955   :  { %v7385_v21 = vadd.f32 1e-05, %v7369_v2  ;;  %v10739_v58 = vpop.eup %10738 }
0x1956   :  { %v7339_v36 = vpop.xlane.xlu0 %7338  ;;  %v7413_v19 = vmul.f32 %v10739_v58, %v14777_v49  ;;  %v14901_v3 = vadd.f32 %v14884_v34, %v7436_v9 }
0x1957   :  { %10746 = vrsqrt.f32 %v7385_v21  ;;  %v7371_v40 = vmul.f32 0.015625, %v7339_v36  ;;  %v10098_v21 = vld [vmem:[%s15315_s18 + $0x60] sm:$0xff]  }
0x1958   :  { %v7435_v33 = vmul.f32 %v14877_v59, %v7413_v19 }
0x1959   :  { %v7387_v17 = vadd.f32 1e-05, %v7371_v40  ;;  %v10741_v23 = vpop.eup %10740 }
0x195a   :  { %v7342_v53 = vpop.xlane.xlu1 %7341  ;;  %v10743_v32 = vpop.eup %10742  ;;  %v7415_v41 = vmul.f32 %v10741_v23, %v14774_v4  ;;  %v14894_v62 = vadd.f32 %v14884_v34, %v7435_v33 }
0x195b   :  { %10748 = vrsqrt.f32 %v7387_v17  ;;  %v7372_v43 = vmul.f32 0.015625, %v7342_v53  ;;  %v7416_v5 = vmul.f32 %v10743_v32, %v14771_v15  ;;  %v10745_v10 = vpop.eup %10744  ;;  %v10095_v15 = vld [vmem:[%s15315_s18 + $0x48] sm:$0xff]  }
0x195c   :  { %v7437_v49 = vmul.f32 %v14877_v59, %v7415_v41  ;;  %v7472_v20 = vpack.c.bf16 %v14894_v62, %v14890_v24  ;;  %v7418_v50 = vmul.f32 %v10745_v10, %v14785_v25  ;;  %v10096_v25 = vld [vmem:[%s15315_s18 + $0x50] sm:$0xff]  }
0x195d   :  { %v7388_v57 = vadd.f32 1e-05, %v7372_v43  ;;  %v7438_v6 = vmul.f32 %v14877_v59, %v7416_v5 }
0x195e   :  { %v7348_v14 = vpop.xlane.xlu1 %7347  ;;  %v14904_v4 = vadd.f32 %v14884_v34, %v7437_v49  ;;  %9798 = vmatprep.mubr.msk.bf16.mxu1 %vm73_vm4, %v7472_v20  ;;  %v7440_v26 = vmul.f32 %v14877_v59, %v7418_v50 }
0x195f   :  { %v7374_v61 = vmul.f32 0.015625, %v7348_v14  ;;  %10750 = vrsqrt.f32 %v7388_v57  ;;  %v14923_v54 = vadd.f32 %v14884_v34, %v7438_v6 }
0x1960   :  { %v7473_v52 = vpack.c.bf16 %v14904_v4, %v14901_v3  ;;  %v14937_v37 = vadd.f32 %v14884_v34, %v7440_v26 }
0x1961   :  { %v10747_v8 = vpop.eup %10746  ;;  %v7390_v31 = vadd.f32 1e-05, %v7374_v61 }
0x1962   :  { %v7417_v42 = vmul.f32 %v10747_v8, %v14799_v35  ;;  %v7345_v27 = vpop.xlane.xlu0 %7344  ;;  %9799 = vmatmul.mubr.msk.bf16.vlgmr.msra.gmra.mrb[200].mxu1 %vm73_vm4, %v7473_v52 }
0x1963   :  { %v7373_v39 = vmul.f32 0.015625, %v7345_v27  ;;  %10752 = vrsqrt.f32 %v7390_v31  ;;  %9815 = vmatpush3.bf16.msra.mxu1 %v14870_v46 }
0x1964   :  { %v7439_v56 = vmul.f32 %v14877_v59, %v7417_v42  ;;  %9816 = vmatprep.subr.bf16.mxu1 %v10095_v15 }
0x1965   :  { %v10749_v28 = vpop.eup %10748  ;;  %v7389_v30 = vadd.f32 1e-05, %v7373_v39 }
0x1966   :  { %v7419_v35 = vmul.f32 %v10749_v28, %v14796_v47  ;;  %v7351_v1 = vpop.xlane.xlu0 %7350  ;;  %v14926_v60 = vadd.f32 %v14884_v34, %v7439_v56  ;;  %v10097_v47 = vld [vmem:[%s15315_s18 + $0x58] sm:$0xff]  }
0x1967   :  { %10754 = vrsqrt.f32 %v7389_v30  ;;  %v7375_v46 = vmul.f32 0.015625, %v7351_v1  ;;  %9817 = vmatpush3.bf16.msra.mxu1 %v10095_v15 }
0x1968   :  { %v7474_v12 = vpack.c.bf16 %v14926_v60, %v14923_v54  ;;  %v7441_v44 = vmul.f32 %v14877_v59, %v7419_v35  ;;  %9818 = vmatprep.subr.bf16.mxu1 %v10096_v25 }
0x1969   :  { %v7391_v7 = vadd.f32 1e-05, %v7375_v46  ;;  %v10751_v22 = vpop.eup %10750 }
0x196a   :  { %9802 = vmatprep.mubr.msk.bf16.mxu1 %vm73_vm4, %v7474_v12  ;;  %v14940_v55 = vadd.f32 %v14884_v34, %v7441_v44  ;;  %v7420_v2 = vmul.f32 %v10751_v22, %v14810_v0  ;;  %v10099_v0 = vld [vmem:[%s15315_s18 + $0x68] sm:$0xff]   ;;  %v10101_v44 = vld [vmem:[%s15315_s18 + $0x78] sm:$0xff]  }
0x196b   :  { %10756 = vrsqrt.f32 %v7391_v7  ;;  %9819 = vmatpush3.bf16.msra.mxu1 %v10096_v25 }
0x196c   :  { %v7475_v16 = vpack.c.bf16 %v14940_v55, %v14937_v37  ;;  %9820 = vmatprep.subr.bf16.mxu1 %v10097_v47  ;;  %v7442_v40 = vmul.f32 %v14877_v59, %v7420_v2 }
0x196d   :  { %v10753_v58 = vpop.eup %10752 }
0x196e   :  { %9803 = vmatmul.mubr.msk.bf16.gmra.mrb[204].mxu1 %vm73_vm4, %v7475_v16  ;;  %v7422_v19 = vmul.f32 %v10753_v58, %v14807_v45  ;;  %v14957_v45 = vadd.f32 %v14884_v34, %v7442_v40 }
0x196f   :  { %v7354_v29 = vpop.xlane.xlu1 %7353  ;;  %9821 = vmatpush3.bf16.msra.mxu1 %v10097_v47 }
0x1970   :  { %v7376_v36 = vmul.f32 0.015625, %v7354_v29  ;;  %9822 = vmatprep.subr.bf16.mxu1 %v10098_v21  ;;  %v7444_v49 = vmul.f32 %v14877_v59, %v7422_v19 }
0x1971   :  { %v10755_v63 = vpop.eup %10754 }
0x1972   :  { %v7421_v17 = vmul.f32 %v10755_v63, %v14822_v13  ;;  %v7392_v33 = vadd.f32 1e-05, %v7376_v36 }
0x1973   :  { %v7360_v23 = vpop.xlane.xlu1 %7359  ;;  %v7357_v9 = vpop.xlane.xlu0 %7356  ;;  %9823 = vmatpush3.bf16.msra.mxu1 %v10098_v21 }
0x1974   :  { %10758 = vrsqrt.f32 %v7392_v33  ;;  %v7378_v53 = vmul.f32 0.015625, %v7360_v23  ;;  %v7377_v32 = vmul.f32 0.015625, %v7357_v9  ;;  %v7443_v41 = vmul.f32 %v14877_v59, %v7421_v17  ;;  %9824 = vmatprep.subr.bf16.mxu1 %v10099_v0 }
0x1975   :  { %v10757_v43 = vpop.eup %10756 }
0x1976   :  { %v7423_v57 = vmul.f32 %v10757_v43, %v14819_v18  ;;  %v7394_v20 = vadd.f32 1e-05, %v7378_v53  ;;  %v7393_v13 = vadd.f32 1e-05, %v7377_v32  ;;  %v14962_v5 = vadd.f32 %v14884_v34, %v7443_v41 }
0x1977   :  { %v7363_v14 = vpop.xlane.xlu0 %7362  ;;  %9825 = vmatpush3.bf16.msra.mxu1 %v10099_v0  ;;  %v14969_v18 = vadd.f32 %v14884_v34, %v7444_v49 }
0x1978   :  { %10760 = vrsqrt.f32 %v7394_v20  ;;  %v7379_v10 = vmul.f32 0.015625, %v7363_v14  ;;  %v7476_v61 = vpack.c.bf16 %v14962_v5, %v14957_v45  ;;  %v7445_v8 = vmul.f32 %v14877_v59, %v7423_v57 }
0x1979   :  { %10762 = vrsqrt.f32 %v7393_v13 }
0x197a   :  { %v7395_v31 = vadd.f32 1e-05, %v7379_v10  ;;  %9806 = vmatprep.mubr.msk.bf16.mxu1 %vm73_vm4, %v7476_v61  ;;  %v14972_v52 = vadd.f32 %v14884_v34, %v7445_v8 }
0x197c   :  { %10764 = vrsqrt.f32 %v7395_v31  ;;  %v7477_v15 = vpack.c.bf16 %v14972_v52, %v14969_v18 }
0x197e   :  { %v10759_v50 = vpop.eup %10758  ;;  %9807 = vmatmul.mubr.msk.bf16.gmra.mrb[208].mxu1 %vm73_vm4, %v7477_v15 }
0x197f   :  { %v7424_v42 = vmul.f32 %v10759_v50, %v14844_v48 }
0x1981   :  { %v7446_v28 = vmul.f32 %v14877_v59, %v7424_v42 }
0x1982   :  { %v10761_v27 = vpop.eup %10760 }
0x1983   :  { %v10763_v6 = vpop.eup %10762  ;;  %v7426_v39 = vmul.f32 %v10761_v27, %v14841_v11  ;;  %v14985_v26 = vadd.f32 %v14884_v34, %v7446_v28 }
0x1984   :  { %v7425_v56 = vmul.f32 %v10763_v6, %v14852_v38 }
0x1985   :  { %v7448_v1 = vmul.f32 %v14877_v59, %v7426_v39 }
0x1986   :  { %v10765_v30 = vpop.eup %10764  ;;  %v7447_v25 = vmul.f32 %v14877_v59, %v7425_v56 }
0x1987   :  { %v7427_v35 = vmul.f32 %v10765_v30, %v14860_v51  ;;  %v14994_v38 = vadd.f32 %v14884_v34, %v7448_v1 }
0x1988   :  { %v14988_v48 = vadd.f32 %v14884_v34, %v7447_v25 }
0x1989   :  { %v7449_v46 = vmul.f32 %v14877_v59, %v7427_v35  ;;  %v10100_v59 = vld [vmem:[%s15315_s18 + $0x70] sm:$0xff]  }
0x198a   :  { %v7478_v11 = vpack.c.bf16 %v14988_v48, %v14985_v26  ;;  %9826 = vmatprep.subr.bf16.mxu1 %v10100_v59 }
0x198b   :  { %v14997_v12 = vadd.f32 %v14884_v34, %v7449_v46  ;;  %9827 = vmatpush3.bf16.msra.mxu1 %v10100_v59  ;;  %v8435_v34 = vld [vmem:[%s15314_s17 + $0x1] ss:$0 sm:$0xff] }
0x198c   :  { %9810 = vmatprep.mubr.msk.bf16.mxu1 %vm73_vm4, %v7478_v11  ;;  %9828 = vmatprep.subr.bf16.mxu1 %v10101_v44 }
0x198d   :  { %v7479_v51 = vpack.c.bf16 %v14997_v12, %v14994_v38 }
0x198f   :  { %9811 = vmatmul.mubr.msk.bf16.gmra.mrb[212].mxu1 %vm73_vm4, %v7479_v51 }
0x1990   :  { %9829 = vmatpush3.bf16.msra.mxu1 %v10101_v44 }
0x1a35   :  { %v9800_v7 = vpop.f32.mrb[200].mxu1 }
0x1a36   :  { %v7588_v47 = vadd.f32 %v9800_v7, %v8435_v34  ;;  %v7579_v22 = vpop.f32.mrb[201].mxu1 }
0x1a37   :  { %v7580_v16 = vadd.f32 %v8435_v34, %v7579_v22  ;;  %v9801_v2 = vpop.f32.mrb[202].mxu1 }
0x1a38   :  { %v7591_v21 = vadd.f32 %v9801_v2, %v8435_v34  ;;  %v7582_v58 = vpop.f32.mrb[203].mxu1  ;;  %v7644_v36 = vmax.f32 %v7588_v47, 0.0 }
0x1a39   :  { %v7583_v29 = vadd.f32 %v8435_v34, %v7582_v58  ;;  %v7642_v19 = vmax.f32 %v7580_v16, 0.0 }
0x1a3a   :  { %v7645_v63 = vmax.f32 %v7591_v21, 0.0 }
0x1a3b   :  { %v7643_v40 = vmax.f32 %v7583_v29, 0.0 }
0x1a3c   :  { %v7659_v0 = vpack.c.bf16 %v7645_v63, %v7644_v36  ;;  %v15015_v63 = vld [vmem:[%s15316_s19 + $0x1] ss:$0 sm:$0xff] }
0x1a3d   :  { %v7658_v17 = vpack.c.bf16 %v7643_v40, %v7642_v19 }
0x1a3f   :  { %9830 = vmatprep.mubr.bf16.mxu1 %v7658_v17 }
0x1a40   :  { %9831 = vmatmul.mubr.bf16.vlgmr.msra.gmra.mrb[216].mxu1 %v7659_v0 }
0x1a41   :  { %v9804_v33 = vpop.f32.mrb[204].mxu1 }
0x1a42   :  { %v7604_v23 = vadd.f32 %v9804_v33, %v8435_v34  ;;  %v7595_v9 = vpop.f32.mrb[205].mxu1 }
0x1a43   :  { %v7596_v53 = vadd.f32 %v8435_v34, %v7595_v9  ;;  %v9805_v32 = vpop.f32.mrb[206].mxu1 }
0x1a44   :  { %v7607_v41 = vadd.f32 %v9805_v32, %v8435_v34  ;;  %v7598_v43 = vpop.f32.mrb[207].mxu1  ;;  %v7648_v57 = vmax.f32 %v7604_v23, 0.0 }
0x1a45   :  { %v7599_v49 = vadd.f32 %v8435_v34, %v7598_v43  ;;  %v7646_v13 = vmax.f32 %v7596_v53, 0.0 }
0x1a46   :  { %v7649_v20 = vmax.f32 %v7607_v41, 0.0 }
0x1a47   :  { %v7647_v14 = vmax.f32 %v7599_v49, 0.0 }
0x1a48   :  { %v7661_v10 = vpack.c.bf16 %v7649_v20, %v7648_v57 }
0x1a49   :  { %v7660_v61 = vpack.c.bf16 %v7647_v14, %v7646_v13 }
0x1a4b   :  { %9834 = vmatprep.mubr.bf16.mxu1 %v7660_v61 }
0x1a4c   :  { %9835 = vmatmul.mubr.bf16.gmra.mrb[220].mxu1 %v7661_v10 }
0x1a51   :  { %v9808_v8 = vpop.f32.mrb[208].mxu1 }
0x1a52   :  { %v7620_v31 = vadd.f32 %v9808_v8, %v8435_v34  ;;  %v7611_v15 = vpop.f32.mrb[209].mxu1 }
0x1a53   :  { %v7612_v50 = vadd.f32 %v8435_v34, %v7611_v15  ;;  %v9809_v42 = vpop.f32.mrb[210].mxu1 }
0x1a54   :  { %v7623_v27 = vadd.f32 %v9809_v42, %v8435_v34  ;;  %v7614_v6 = vpop.f32.mrb[211].mxu1  ;;  %v7652_v56 = vmax.f32 %v7620_v31, 0.0 }
0x1a55   :  { %v7615_v39 = vadd.f32 %v8435_v34, %v7614_v6  ;;  %v7650_v30 = vmax.f32 %v7612_v50, 0.0 }
0x1a56   :  { %v7653_v28 = vmax.f32 %v7623_v27, 0.0 }
0x1a57   :  { %v7651_v25 = vmax.f32 %v7615_v39, 0.0 }
0x1a58   :  { %v7663_v35 = vpack.c.bf16 %v7653_v28, %v7652_v56 }
0x1a59   :  { %v7662_v1 = vpack.c.bf16 %v7651_v25, %v7650_v30 }
0x1a5b   :  { %9838 = vmatprep.mubr.bf16.mxu1 %v7662_v1 }
0x1a5c   :  { %9839 = vmatmul.mubr.bf16.gmra.mrb[224].mxu1 %v7663_v35 }
0x1a62   :  { %v9812_v46 = vpop.f32.mrb[212].mxu1 }
0x1a63   :  { %v7636_v11 = vadd.f32 %v9812_v46, %v8435_v34  ;;  %v7627_v51 = vpop.f32.mrb[213].mxu1 }
0x1a64   :  { %v7628_v59 = vadd.f32 %v8435_v34, %v7627_v51  ;;  %v9813_v44 = vpop.f32.mrb[214].mxu1 }
0x1a65   :  { %v7639_v7 = vadd.f32 %v9813_v44, %v8435_v34  ;;  %v7630_v47 = vpop.f32.mrb[215].mxu1  ;;  %v7656_v16 = vmax.f32 %v7636_v11, 0.0 }
0x1a66   :  { %v7631_v22 = vadd.f32 %v8435_v34, %v7630_v47  ;;  %v7654_v21 = vmax.f32 %v7628_v59, 0.0 }
0x1a67   :  { %v7657_v2 = vmax.f32 %v7639_v7, 0.0 }
0x1a68   :  { %v7655_v58 = vmax.f32 %v7631_v22, 0.0 }
0x1a69   :  { %v7665_v29 = vpack.c.bf16 %v7657_v2, %v7656_v16 }
0x1a6a   :  { %v7664_v36 = vpack.c.bf16 %v7655_v58, %v7654_v21 }
0x1a6c   :  { %9842 = vmatprep.mubr.bf16.mxu1 %v7664_v36 }
0x1a6d   :  { %9843 = vmatmul.mubr.bf16.gmra.mrb[228].mxu1 %v7665_v29 }
0x1b13   :  { %v9832_v19 = vpop.f32.mrb[216].mxu1 }
0x1b14   :  { %v7782_v40 = vadd.f32 %v9832_v19, %v15015_v63  ;;  %v7773_v0 = vpop.f32.mrb[217].mxu1 }
0x1b15   :  { %v7774_v17 = vadd.f32 %v15015_v63, %v7773_v0  ;;  %v9833_v34 = vpop.f32.mrb[218].mxu1 }
0x1b16   :  { %v15020_v33 = vadd.f32 %v7782_v40, %v14901_v3  ;;  %v7785_v23 = vadd.f32 %v9833_v34, %v15015_v63  ;;  %v7776_v9 = vpop.f32.mrb[219].mxu1 }
0x1b17   :  { %v7777_v53 = vadd.f32 %v15015_v63, %v7776_v9  ;;  %v15025_v32 = vadd.f32 %v7774_v17, %v14890_v24 }
0x1b18   :  { %v15028_v41 = vadd.f32 %v7785_v23, %v14904_v4  ;;  %v7862_v43 = vsel %vm73_vm4, %v15020_v33, 0.0 }
0x1b19   :  { %7863 = vadd.xlane.f32.xlu1 %v7862_v43  ;;  %v15033_v49 = vadd.f32 %v7777_v53, %v14894_v62  ;;  %v7856_v57 = vsel %vm73_vm4, %v15025_v32, 0.0 }
0x1b1a   :  { %v7865_v3 = vsel %vm73_vm4, %v15028_v41, 0.0 }
0x1b1b   :  { %7866 = vadd.xlane.f32.xlu0 %v7865_v3  ;;  %v7859_v4 = vsel %vm73_vm4, %v15033_v49, 0.0 }
0x1b1d   :  { %7857 = vadd.xlane.f32.xlu1 %v7856_v57 }
0x1b1f   :  { %v9836_v24 = vpop.f32.mrb[220].mxu1  ;;  %7860 = vadd.xlane.f32.xlu0 %v7859_v4 }
0x1b20   :  { %v7798_v20 = vadd.f32 %v9836_v24, %v15015_v63  ;;  %v7789_v13 = vpop.f32.mrb[221].mxu1 }
0x1b21   :  { %v7790_v14 = vadd.f32 %v15015_v63, %v7789_v13  ;;  %v9837_v62 = vpop.f32.mrb[222].mxu1 }
0x1b22   :  { %v15044_v10 = vadd.f32 %v7798_v20, %v14937_v37  ;;  %v7792_v61 = vpop.f32.mrb[223].mxu1  ;;  %v7801_v15 = vadd.f32 %v9837_v62, %v15015_v63 }
0x1b23   :  { %v7793_v8 = vadd.f32 %v15015_v63, %v7792_v61  ;;  %v15048_v31 = vadd.f32 %v7790_v14, %v14923_v54 }
0x1b24   :  { %v7874_v50 = vsel %vm73_vm4, %v15044_v10, 0.0  ;;  %v15059_v37 = vadd.f32 %v7801_v15, %v14940_v55 }
0x1b25   :  { %v15054_v42 = vadd.f32 %v7793_v8, %v14926_v60  ;;  %7875 = vadd.xlane.f32.xlu1 %v7874_v50  ;;  %v7868_v54 = vsel %vm73_vm4, %v15048_v31, 0.0 }
0x1b26   :  { %v7877_v6 = vsel %vm73_vm4, %v15059_v37, 0.0 }
0x1b27   :  { %v7871_v27 = vsel %vm73_vm4, %v15054_v42, 0.0 }
0x1b28   :  { %7872 = vadd.xlane.f32.xlu0 %v7871_v27 }
0x1b29   :  { %7869 = vadd.xlane.f32.xlu1 %v7868_v54 }
0x1b2d   :  { %7878 = vadd.xlane.f32.xlu1 %v7877_v6 }
0x1b2f   :  { %v9840_v39 = vpop.f32.mrb[224].mxu1 }
0x1b30   :  { %v7805_v56 = vpop.f32.mrb[225].mxu1  ;;  %v7814_v44 = vadd.f32 %v9840_v39, %v15015_v63 }
0x1b31   :  { %v7806_v60 = vadd.f32 %v15015_v63, %v7805_v56  ;;  %v9841_v28 = vpop.f32.mrb[226].mxu1 }
0x1b32   :  { %v7808_v30 = vpop.f32.mrb[227].mxu1  ;;  %v7817_v55 = vadd.f32 %v9841_v28, %v15015_v63  ;;  %v15090_v2 = vadd.f32 %v7814_v44, %v14969_v18 }
0x1b33   :  { %v15067_v25 = vadd.f32 %v7806_v60, %v14957_v45  ;;  %v7809_v35 = vadd.f32 %v15015_v63, %v7808_v30 }
0x1b34   :  { %v15077_v11 = vadd.f32 %v7817_v55, %v14972_v52  ;;  %v7886_v18 = vsel %vm73_vm4, %v15090_v2, 0.0 }
0x1b35   :  { %v15072_v1 = vadd.f32 %v7809_v35, %v14962_v5  ;;  %v7880_v46 = vsel %vm73_vm4, %v15067_v25, 0.0 }
0x1b36   :  { %7881 = vadd.xlane.f32.xlu0 %v7880_v46  ;;  %v7889_v45 = vsel %vm73_vm4, %v15077_v11, 0.0 }
0x1b37   :  { %v7883_v51 = vsel %vm73_vm4, %v15072_v1, 0.0 }
0x1b38   :  { %7884 = vadd.xlane.f32.xlu1 %v7883_v51 }
0x1b3c   :  { %7890 = vadd.xlane.f32.xlu1 %v7889_v45 }
0x1b40   :  { %v9844_v59 = vpop.f32.mrb[228].mxu1 }
0x1b41   :  { %v7830_v5 = vadd.f32 %v9844_v59, %v15015_v63  ;;  %v7821_v7 = vpop.f32.mrb[229].mxu1 }
0x1b42   :  { %v9845_v47 = vpop.f32.mrb[230].mxu1  ;;  %v7822_v21 = vadd.f32 %v15015_v63, %v7821_v7 }
0x1b43   :  { %v15086_v22 = vadd.f32 %v7830_v5, %v14994_v38  ;;  %v7824_v52 = vpop.f32.mrb[231].mxu1  ;;  %v7833_v19 = vadd.f32 %v9845_v47, %v15015_v63 }
0x1b44   :  { %v7825_v16 = vadd.f32 %v15015_v63, %v7824_v52  ;;  %v15101_v38 = vadd.f32 %v7822_v21, %v14985_v26 }
0x1b45   :  { %v7898_v58 = vsel %vm73_vm4, %v15086_v22, 0.0  ;;  %v15107_v40 = vadd.f32 %v7833_v19, %v14997_v12 }
0x1b46   :  { %v15096_v29 = vadd.f32 %v7825_v16, %v14988_v48  ;;  %7899 = vadd.xlane.f32.xlu0 %v7898_v58  ;;  %v7892_v48 = vsel %vm73_vm4, %v15101_v38, 0.0 }
0x1b47   :  { %v7901_v0 = vsel %vm73_vm4, %v15107_v40, 0.0 }
0x1b48   :  { %v7895_v36 = vsel %vm73_vm4, %v15096_v29, 0.0 }
0x1b49   :  { %7896 = vadd.xlane.f32.xlu1 %v7895_v36 }
0x1b4a   :  { %7887 = vadd.xlane.f32.xlu0 %v7886_v18 }
0x1b4e   :  { %7893 = vadd.xlane.f32.xlu0 %v7892_v48 }
0x1b52   :  { %7902 = vadd.xlane.f32.xlu0 %v7901_v0 }
0x1ba6   :  { %v7864_v26 = vpop.xlane.xlu1 %7863 }
0x1ba7   :  { %v7906_v17 = vmul.f32 0.015625, %v7864_v26 }
0x1ba8   :  { %v7867_v34 = vpop.xlane.xlu0 %7866 }
0x1ba9   :  { %v15114_v63 = vsub.f32 %v15020_v33, %v7906_v17  ;;  %v7907_v23 = vmul.f32 0.015625, %v7867_v34 }
0x1baa   :  { %v7858_v9 = vpop.xlane.xlu1 %7857 }
0x1bab   :  { %v15117_v53 = vsub.f32 %v15028_v41, %v7907_v23  ;;  %v7904_v12 = vmul.f32 0.015625, %v7858_v9  ;;  %v7938_v43 = vmul.f32 %v15114_v63, %v15114_v63 }
0x1bac   :  { %v7861_v3 = vpop.xlane.xlu0 %7860 }
0x1bad   :  { %v15122_v57 = vsub.f32 %v15025_v32, %v7904_v12  ;;  %v7905_v24 = vmul.f32 0.015625, %v7861_v3  ;;  %v7958_v4 = vsel %vm73_vm4, %v7938_v43, 0.0  ;;  %v7939_v33 = vmul.f32 %v15117_v53, %v15117_v53 }
0x1bae   :  { %7959 = vadd.xlane.f32.xlu1 %v7958_v4 }
0x1baf   :  { %v15128_v20 = vsub.f32 %v15033_v49, %v7905_v24  ;;  %v7961_v41 = vsel %vm73_vm4, %v7939_v33, 0.0  ;;  %v7936_v13 = vmul.f32 %v15122_v57, %v15122_v57 }
0x1bb0   :  { %7962 = vadd.xlane.f32.xlu0 %v7961_v41 }
0x1bb1   :  { %v7952_v32 = vsel %vm73_vm4, %v7936_v13, 0.0  ;;  %v7937_v62 = vmul.f32 %v15128_v20, %v15128_v20 }
0x1bb2   :  { %v7876_v14 = vpop.xlane.xlu1 %7875  ;;  %7953 = vadd.xlane.f32.xlu1 %v7952_v32 }
0x1bb3   :  { %v7910_v61 = vmul.f32 0.015625, %v7876_v14  ;;  %v7955_v8 = vsel %vm73_vm4, %v7937_v62, 0.0 }
0x1bb4   :  { %7956 = vadd.xlane.f32.xlu0 %v7955_v8 }
0x1bb5   :  { %v15138_v15 = vsub.f32 %v15044_v10, %v7910_v61  ;;  %v7873_v49 = vpop.xlane.xlu0 %7872 }
0x1bb6   :  { %v7909_v50 = vmul.f32 0.015625, %v7873_v49  ;;  %v7870_v27 = vpop.xlane.xlu1 %7869 }
0x1bb7   :  { %v7908_v54 = vmul.f32 0.015625, %v7870_v27  ;;  %v7942_v6 = vmul.f32 %v15138_v15, %v15138_v15 }
0x1bb8   :  { %v15143_v39 = vsub.f32 %v15054_v42, %v7909_v50 }
0x1bb9   :  { %v15146_v56 = vsub.f32 %v15048_v31, %v7908_v54  ;;  %v7970_v60 = vsel %vm73_vm4, %v7942_v6, 0.0 }
0x1bba   :  { %v7879_v28 = vpop.xlane.xlu1 %7878  ;;  %7971 = vadd.xlane.f32.xlu1 %v7970_v60  ;;  %v7941_v10 = vmul.f32 %v15143_v39, %v15143_v39 }
0x1bbb   :  { %v7911_v30 = vmul.f32 0.015625, %v7879_v28  ;;  %v7940_v55 = vmul.f32 %v15146_v56, %v15146_v56 }
0x1bbc   :  { %v7967_v35 = vsel %vm73_vm4, %v7941_v10, 0.0 }
0x1bbd   :  { %v15155_v46 = vsub.f32 %v15059_v37, %v7911_v30  ;;  %7968 = vadd.xlane.f32.xlu0 %v7967_v35  ;;  %v7964_v31 = vsel %vm73_vm4, %v7940_v55, 0.0 }
0x1bbe   :  { %7965 = vadd.xlane.f32.xlu1 %v7964_v31 }
0x1bbf   :  { %v7943_v42 = vmul.f32 %v15155_v46, %v15155_v46 }
0x1bc1   :  { %v7973_v51 = vsel %vm73_vm4, %v7943_v42, 0.0 }
0x1bc2   :  { %7974 = vadd.xlane.f32.xlu1 %v7973_v51 }
0x1bc3   :  { %v7882_v45 = vpop.xlane.xlu0 %7881 }
0x1bc4   :  { %v7912_v59 = vmul.f32 0.015625, %v7882_v45 }
0x1bc5   :  { %v7885_v44 = vpop.xlane.xlu1 %7884 }
0x1bc6   :  { %v15162_v5 = vsub.f32 %v15067_v25, %v7912_v59  ;;  %v7913_v7 = vmul.f32 0.015625, %v7885_v44  ;;  %v15212_v59 = vld [vmem:[%s15317_s20 + $0x1] ss:$0 sm:$0xff]  ;;  %s10897_s20 = smov [#allocation3]  }
0x1bc8   :  { %v15165_v37 = vsub.f32 %v15072_v1, %v7913_v7  ;;  %v7944_v47 = vmul.f32 %v15162_v5, %v15162_v5 }
0x1bc9   :  { %v7891_v52 = vpop.xlane.xlu1 %7890 }
0x1bca   :  { %v7915_v16 = vmul.f32 0.015625, %v7891_v52  ;;  %v7976_v21 = vsel %vm73_vm4, %v7944_v47, 0.0  ;;  %v7945_v58 = vmul.f32 %v15165_v37, %v15165_v37 }
0x1bcb   :  { %7977 = vadd.xlane.f32.xlu0 %v7976_v21  ;;  %v15218_v21 = vld [vmem:[%s15318_s21 + $0x1] ss:$0 sm:$0xff]  ;;  %s8134_s21 = sshll.u32 %s10897_s20, 4  ;;  %s8135_s21 = int_to_ptr.vmem [resolvable:$true] %s8134_s21 }
0x1bcc   :  { %v15173_v36 = vsub.f32 %v15077_v11, %v7915_v16  ;;  %v7979_v25 = vsel %vm73_vm4, %v7945_v58, 0.0  ;;  %s10862_s16 = scalar_lea.vmem %s8135_s21, 32  ;;  %p10867_p1 = scmp.lt.s32.totalorder %s8135_s21, %s8135_s21 }
0x1bcd   :  { %7980 = vadd.xlane.f32.xlu1 %v7979_v25  ;;  %p10863_p0 = scmp.ne.s32.totalorder %s8135_s21, %s10862_s16  ;;  %p10868_p2 = scmp.lt.s32.totalorder %s10862_s16, %s10862_s16 }
0x1bce   :  { %v7947_v1 = vmul.f32 %v15173_v36, %v15173_v36 }
0x1bcf   :  { %p10869_p3 = por %p10868_p2, %p10867_p1 }
0x1bd0   :  { %v7985_v19 = vsel %vm73_vm4, %v7947_v1, 0.0 }
0x1bd1   :  { %7986 = vadd.xlane.f32.xlu1 %v7985_v19  ;;  %p10870_p4 = pnand %p10869_p3, %p10863_p0 }
0x1bd3   :  { %v7900_v18 = vpop.xlane.xlu0 %7899 }
0x1bd4   :  { %v7918_v48 = vmul.f32 0.015625, %v7900_v18 }
0x1bd6   :  { %v15180_v0 = vsub.f32 %v15086_v22, %v7918_v48  ;;  %v7897_v26 = vpop.xlane.xlu1 %7896 }
0x1bd7   :  { %v7917_v17 = vmul.f32 0.015625, %v7897_v26  ;;  %v7888_v34 = vpop.xlane.xlu0 %7887 }
0x1bd8   :  { %v7914_v23 = vmul.f32 0.015625, %v7888_v34  ;;  %v7950_v11 = vmul.f32 %v15180_v0, %v15180_v0 }
0x1bd9   :  { %v15185_v9 = vsub.f32 %v15096_v29, %v7917_v17 }
0x1bda   :  { %v15188_v12 = vsub.f32 %v15090_v2, %v7914_v23  ;;  %v7994_v43 = vsel %vm73_vm4, %v7950_v11, 0.0 }
0x1bdb   :  { %7995 = vadd.xlane.f32.xlu0 %v7994_v43  ;;  %v7894_v3 = vpop.xlane.xlu0 %7893  ;;  %v7949_v22 = vmul.f32 %v15185_v9, %v15185_v9 }
0x1bdc   :  { %v7916_v24 = vmul.f32 0.015625, %v7894_v3  ;;  %v7946_v4 = vmul.f32 %v15188_v12, %v15188_v12 }
0x1bdd   :  { %v7991_v33 = vsel %vm73_vm4, %v7949_v22, 0.0 }
0x1bde   :  { %v15197_v41 = vsub.f32 %v15101_v38, %v7916_v24  ;;  %7992 = vadd.xlane.f32.xlu1 %v7991_v33  ;;  %v7982_v2 = vsel %vm73_vm4, %v7946_v4, 0.0 }
0x1bdf   :  { %7983 = vadd.xlane.f32.xlu0 %v7982_v2  ;;  %v7903_v29 = vpop.xlane.xlu0 %7902 }
0x1be0   :  { %v7919_v13 = vmul.f32 0.015625, %v7903_v29  ;;  %v7948_v14 = vmul.f32 %v15197_v41, %v15197_v41 }
0x1be2   :  { %v15203_v32 = vsub.f32 %v15107_v40, %v7919_v13  ;;  %v7988_v62 = vsel %vm73_vm4, %v7948_v14, 0.0 }
0x1be3   :  { %7989 = vadd.xlane.f32.xlu0 %v7988_v62 }
0x1be4   :  { %v7951_v61 = vmul.f32 %v15203_v32, %v15203_v32 }
0x1be6   :  { %v7997_v38 = vsel %vm73_vm4, %v7951_v61, 0.0 }
0x1be7   :  { %7998 = vadd.xlane.f32.xlu0 %v7997_v38 }
0x1c3b   :  { %v7960_v8 = vpop.xlane.xlu1 %7959 }
0x1c3c   :  { %v8002_v49 = vmul.f32 0.015625, %v7960_v8 }
0x1c3d   :  { %v7963_v50 = vpop.xlane.xlu0 %7962 }
0x1c3e   :  { %v8018_v27 = vadd.f32 1e-05, %v8002_v49  ;;  %v8003_v54 = vmul.f32 0.015625, %v7963_v50 }
0x1c3f   :  { %v7954_v6 = vpop.xlane.xlu1 %7953 }
0x1c40   :  { %10766 = vrsqrt.f32 %v8018_v27  ;;  %v8019_v60 = vadd.f32 1e-05, %v8003_v54  ;;  %v8000_v28 = vmul.f32 0.015625, %v7954_v6 }
0x1c41   :  { %v7957_v40 = vpop.xlane.xlu0 %7956 }
0x1c42   :  { %10768 = vrsqrt.f32 %v8019_v60  ;;  %v8016_v10 = vadd.f32 1e-05, %v8000_v28  ;;  %v8001_v30 = vmul.f32 0.015625, %v7957_v40 }
0x1c44   :  { %10770 = vrsqrt.f32 %v8016_v10  ;;  %v8017_v55 = vadd.f32 1e-05, %v8001_v30 }
0x1c46   :  { %10772 = vrsqrt.f32 %v8017_v55 }
0x1c47   :  { %v7972_v35 = vpop.xlane.xlu1 %7971 }
0x1c48   :  { %v8006_v31 = vmul.f32 0.015625, %v7972_v35 }
0x1c4a   :  { %v8022_v42 = vadd.f32 1e-05, %v8006_v31  ;;  %v7969_v51 = vpop.xlane.xlu0 %7968  ;;  %v10767_v45 = vpop.eup %10766 }
0x1c4b   :  { %v8005_v44 = vmul.f32 0.015625, %v7969_v51  ;;  %v7966_v7 = vpop.xlane.xlu1 %7965  ;;  %v8050_v47 = vmul.f32 %v10767_v45, %v15114_v63 }
0x1c4c   :  { %10774 = vrsqrt.f32 %v8022_v42  ;;  %v8004_v52 = vmul.f32 0.015625, %v7966_v7  ;;  %v10769_v16 = vpop.eup %10768 }
0x1c4d   :  { %v8021_v58 = vadd.f32 1e-05, %v8005_v44  ;;  %v8072_v25 = vmul.f32 %v15212_v59, %v8050_v47  ;;  %v8051_v1 = vmul.f32 %v10769_v16, %v15117_v53 }
0x1c4e   :  { %v8020_v19 = vadd.f32 1e-05, %v8004_v52  ;;  %v10771_v18 = vpop.eup %10770 }
0x1c4f   :  { %10776 = vrsqrt.f32 %v8021_v58  ;;  %v7975_v48 = vpop.xlane.xlu1 %7974  ;;  %v8094_v26 = vadd.f32 %v15218_v21, %v8072_v25  ;;  %v8073_v63 = vmul.f32 %v15212_v59, %v8051_v1  ;;  %v8048_v17 = vmul.f32 %v10771_v18, %v15122_v57 }
0x1c50   :  { %10778 = vrsqrt.f32 %v8020_v19  ;;  %v10773_v34 = vpop.eup %10772  ;;  %v8007_v23 = vmul.f32 0.015625, %v7975_v48 }
0x1c51   :  { %8110 = vst.msk [vmem:[#allocation2 + $0x10] sm:$0xff] %vm73_vm4, %v8094_v26  ;;  %v8095_v11 = vadd.f32 %v15218_v21, %v8073_v63  ;;  %v8070_v43 = vmul.f32 %v15212_v59, %v8048_v17  ;;  %v8049_v53 = vmul.f32 %v10773_v34, %v15128_v20 }
0x1c52   :  { %v8023_v3 = vadd.f32 1e-05, %v8007_v23 }
0x1c53   :  { %8111 = vst.msk [vmem:[#allocation2 + $0x18] sm:$0xff] %vm73_vm4, %v8095_v11  ;;  %v8092_v22 = vadd.f32 %v15218_v21, %v8070_v43  ;;  %v8071_v24 = vmul.f32 %v15212_v59, %v8049_v53 }
0x1c54   :  { %10780 = vrsqrt.f32 %v8023_v3 }
0x1c55   :  { %8108 = vst.msk [vmem:[#allocation2] sm:$0xff] %vm73_vm4, %v8092_v22  ;;  %v8093_v4 = vadd.f32 %v15218_v21, %v8071_v24 }
0x1c56   :  { %v10775_v57 = vpop.eup %10774 }
0x1c57   :  { %v8054_v33 = vmul.f32 %v10775_v57, %v15138_v15  ;;  %8109 = vst.msk [vmem:[#allocation2 + $0x8] sm:$0xff] %vm73_vm4, %v8093_v4 }
0x1c58   :  { %v7978_v2 = vpop.xlane.xlu0 %7977 }
0x1c59   :  { %v10777_v29 = vpop.eup %10776  ;;  %v8076_v20 = vmul.f32 %v15212_v59, %v8054_v33  ;;  %v8008_v13 = vmul.f32 0.015625, %v7978_v2 }
0x1c5a   :  { %v10779_v14 = vpop.eup %10778  ;;  %v8053_v62 = vmul.f32 %v10777_v29, %v15143_v39  ;;  %v7981_v61 = vpop.xlane.xlu1 %7980 }
0x1c5b   :  { %v8098_v38 = vadd.f32 %v15218_v21, %v8076_v20  ;;  %v8052_v8 = vmul.f32 %v10779_v14, %v15146_v56  ;;  %v8024_v49 = vadd.f32 1e-05, %v8008_v13  ;;  %v8009_v50 = vmul.f32 0.015625, %v7981_v61 }
0x1c5c   :  { %v8075_v27 = vmul.f32 %v15212_v59, %v8053_v62 }
0x1c5d   :  { %8114 = vst.msk [vmem:[#allocation2 + $0x30] sm:$0xff] %vm73_vm4, %v8098_v38  ;;  %v8074_v15 = vmul.f32 %v15212_v59, %v8052_v8  ;;  %10782 = vrsqrt.f32 %v8024_v49  ;;  %v8025_v54 = vadd.f32 1e-05, %v8009_v50 }
0x1c5e   :  { %v8097_v6 = vadd.f32 %v15218_v21, %v8075_v27  ;;  %v7987_v60 = vpop.xlane.xlu1 %7986  ;;  %v10781_v28 = vpop.eup %10780 }
0x1c5f   :  { %v8096_v39 = vadd.f32 %v15218_v21, %v8074_v15  ;;  %10784 = vrsqrt.f32 %v8025_v54  ;;  %v8011_v40 = vmul.f32 0.015625, %v7987_v60  ;;  %v8055_v56 = vmul.f32 %v10781_v28, %v15155_v46 }
0x1c60   :  { %8113 = vst.msk [vmem:[#allocation2 + $0x28] sm:$0xff] %vm73_vm4, %v8097_v6 }
0x1c61   :  { %8112 = vst.msk [vmem:[#allocation2 + $0x20] sm:$0xff] %vm73_vm4, %v8096_v39  ;;  %v8027_v10 = vadd.f32 1e-05, %v8011_v40  ;;  %v8077_v30 = vmul.f32 %v15212_v59, %v8055_v56 }
0x1c63   :  { %10786 = vrsqrt.f32 %v8027_v10  ;;  %v8099_v55 = vadd.f32 %v15218_v21, %v8077_v30 }
0x1c64   :  { %v8124_v35 = vld [vmem:[#allocation2 + $0x31] sm:$0x1] }
0x1c65   :  { %8125 = vst.msk [vmem:[#allocation3] sm:$0x1] %vm570_vm6, %v8124_v35 }
0x1c66   :  { %8115 = vst.msk [vmem:[#allocation2 + $0x38] sm:$0xff] %vm73_vm4, %v8099_v55 }
0x1c67   :  { %v10783_v31 = vpop.eup %10782 }
0x1c68   :  { %v8056_v42 = vmul.f32 %v10783_v31, %v15162_v5  ;;  %v7996_v51 = vpop.xlane.xlu0 %7995 }
0x1c69   :  { %v10785_v45 = vpop.eup %10784  ;;  %v8014_v44 = vmul.f32 0.015625, %v7996_v51 }
0x1c6a   :  { %v8078_v46 = vmul.f32 %v15212_v59, %v8056_v42  ;;  %v8057_v7 = vmul.f32 %v10785_v45, %v15165_v37 }
0x1c6b   :  { %v8030_v47 = vadd.f32 1e-05, %v8014_v44  ;;  %v7993_v52 = vpop.xlane.xlu1 %7992 }
0x1c6c   :  { %v8100_v16 = vadd.f32 %v15218_v21, %v8078_v46  ;;  %v8079_v58 = vmul.f32 %v15212_v59, %v8057_v7  ;;  %v8013_v25 = vmul.f32 0.015625, %v7993_v52  ;;  %v7984_v1 = vpop.xlane.xlu0 %7983 }
0x1c6d   :  { %v10787_v19 = vpop.eup %10786  ;;  %10788 = vrsqrt.f32 %v8030_v47  ;;  %v8010_v18 = vmul.f32 0.015625, %v7984_v1 }
0x1c6e   :  { %8116 = vst.msk [vmem:[#allocation2 + $0x40] sm:$0xff] %vm73_vm4, %v8100_v16  ;;  %v8101_v5 = vadd.f32 %v15218_v21, %v8079_v58  ;;  %v8059_v48 = vmul.f32 %v10787_v19, %v15173_v36  ;;  %v8029_v26 = vadd.f32 1e-05, %v8013_v25 }
0x1c6f   :  { %v8026_v63 = vadd.f32 1e-05, %v8010_v18 }
0x1c70   :  { %8117 = vst.msk [vmem:[#allocation2 + $0x48] sm:$0xff] %vm73_vm4, %v8101_v5  ;;  %v8081_v37 = vmul.f32 %v15212_v59, %v8059_v48  ;;  %10790 = vrsqrt.f32 %v8029_v26  ;;  %v7990_v17 = vpop.xlane.xlu0 %7989 }
0x1c71   :  { %10792 = vrsqrt.f32 %v8026_v63  ;;  %v8012_v34 = vmul.f32 0.015625, %v7990_v17 }
0x1c72   :  { %v8103_v23 = vadd.f32 %v15218_v21, %v8081_v37 }
0x1c73   :  { %v8028_v11 = vadd.f32 1e-05, %v8012_v34 }
0x1c74   :  { %8119 = vst.msk [vmem:[#allocation2 + $0x58] sm:$0xff] %vm73_vm4, %v8103_v23  ;;  %v7999_v43 = vpop.xlane.xlu0 %7998 }
0x1c75   :  { %10794 = vrsqrt.f32 %v8028_v11  ;;  %v8015_v53 = vmul.f32 0.015625, %v7999_v43 }
0x1c77   :  { %v10789_v3 = vpop.eup %10788  ;;  %v8031_v36 = vadd.f32 1e-05, %v8015_v53 }
0x1c78   :  { %v8062_v22 = vmul.f32 %v10789_v3, %v15180_v0 }
0x1c79   :  { %10796 = vrsqrt.f32 %v8031_v36 }
0x1c7a   :  { %v10791_v24 = vpop.eup %10790  ;;  %v8084_v57 = vmul.f32 %v15212_v59, %v8062_v22 }
0x1c7b   :  { %v10793_v4 = vpop.eup %10792  ;;  %v8061_v33 = vmul.f32 %v10791_v24, %v15185_v9 }
0x1c7c   :  { %v8106_v2 = vadd.f32 %v15218_v21, %v8084_v57  ;;  %v8058_v29 = vmul.f32 %v10793_v4, %v15188_v12 }
0x1c7d   :  { %v8083_v20 = vmul.f32 %v15212_v59, %v8061_v33 }
0x1c7e   :  { %8122 = vst.msk [vmem:[#allocation2 + $0x70] sm:$0xff] %vm73_vm4, %v8106_v2  ;;  %v8080_v13 = vmul.f32 %v15212_v59, %v8058_v29 }
0x1c7f   :  { %v10795_v14 = vpop.eup %10794  ;;  %v8105_v0 = vadd.f32 %v15218_v21, %v8083_v20 }
0x1c80   :  { %v8102_v62 = vadd.f32 %v15218_v21, %v8080_v13  ;;  %v8060_v61 = vmul.f32 %v10795_v14, %v15197_v41 }
0x1c81   :  { %8121 = vst.msk [vmem:[#allocation2 + $0x68] sm:$0xff] %vm73_vm4, %v8105_v0 }
0x1c82   :  { %8118 = vst.msk [vmem:[#allocation2 + $0x50] sm:$0xff] %vm73_vm4, %v8102_v62  ;;  %v8082_v9 = vmul.f32 %v15212_v59, %v8060_v61 }
0x1c83   :  { %v10797_v12 = vpop.eup %10796 }
0x1c84   :  { %v8104_v38 = vadd.f32 %v15218_v21, %v8082_v9  ;;  %v8063_v8 = vmul.f32 %v10797_v12, %v15203_v32 }
0x1c85   :  { %v8126_v49 = vld [vmem:[#allocation2 + $0x71] sm:$0x1] }
0x1c86   :  { %8120 = vst.msk [vmem:[#allocation2 + $0x60] sm:$0xff] %vm73_vm4, %v8104_v38  ;;  %v8085_v50 = vmul.f32 %v15212_v59, %v8063_v8 }
0x1c87   :  { %8127 = vst.msk [vmem:[#allocation3 + $0x1] sm:$0x1] %vm570_vm6, %v8126_v49 }
0x1c88   :  { %10873 = shalt.err (!%p10870_p4)
}
0x1c89   :  { %s10874_s0 = scalar_lea.hbm %s15319_s22, 32 }
0x1c8a   :  { %p10875_p5 = scmp.ne.s32.totalorder %s15319_s22, %s10874_s0  ;;  %p10878_p6 = scmp.lt.u32.totalorder %s10874_s0, %s15319_s22 }
0x1c8c   :  { %p10880_p7 = pnand %p10878_p6, %p10875_p5 }
0x1c8e   :  { %10883 = shalt.err (!%p10880_p7)
}
0x1c8f   :  { %8137 = dma.vmem_to_hbm [thread:$0]  %s8135_s21, 32, %s15319_s22, [#allocation4]   ;;  %v8107_v41 = vadd.f32 %v15218_v21, %v8085_v50 }
0x1c91   :  { %8123 = vst.msk [vmem:[#allocation2 + $0x78] sm:$0xff] %vm73_vm4, %v8107_v41 }
0x1c92   :  { %10884 = dma.done.wait [#allocation4], 32  }
0x1c93   :  { %10885 = vsyncadd [#allocation4], 4294967264 }
0x1c94   :  { %8141 = vsyncpa [#allocation4], 1 }

</bundles_post_ra>
